<compile_context>
chip_gen: v5e
topology: v5e:2x2
jax: 0.10.0
libtpu: 0.0.40
codegen_flags: <defaults>
</compile_context>

<pallas_src>
import numpy as np
import jax
import jax.numpy as jnp
from jax import lax
from jax.experimental import pallas as pl
from jax.experimental.pallas import tpu as pltpu


# ----------------------------------------------------------------------------
# VMEM budgeting helpers
# ----------------------------------------------------------------------------
def _ceil_to(n, m):
    return ((n + m - 1) // m) * m


def _vmem_bytes_estimate(bt, cimg, H, W, c1, c2, c3):
    """Rough per-grid-step VMEM footprint including lane/sublane padding."""
    Hh, W2, H4, W4 = H // 2, W // 2, H // 4, W // 4
    M2, M3 = bt * Hh * W2, bt * H4 * W4
    Wl = _ceil_to(W, 128)
    est = 0
    est += 2 * bt * cimg * Hh * 8 * Wl * 4                                 # input block (dbl-buffered, (2,W) minor)
    est += 6 * bt * _ceil_to(Hh + 1, 8) * Wl * 4                           # dx-shifted parity planes
    est += 12 * bt * _ceil_to(Hh, 8) * Wl * 4                              # conv1 tap temporaries
    est += bt * Hh * _ceil_to(c1, 8) * Wl * 4                              # a1h (channel-sublane)
    est += bt * Hh * _ceil_to(W, 8) * _ceil_to(c1, 128) * 4                # NHWC transpose temp
    est += bt * (Hh + 2) * _ceil_to(W2 + 2, 16) * _ceil_to(c1, 128) * 2    # a1p (bf16)
    est += _ceil_to(M2, 16) * _ceil_to(9 * c1, 128) * 2                    # stage2 (bf16)
    est += 2 * _ceil_to(M2, 8) * _ceil_to(c2, 128) * 4                     # conv2 acc + pool temps
    est += bt * (H4 + 2) * _ceil_to(W4 + 2, 16) * _ceil_to(c2, 128) * 2    # a2p (bf16)
    est += _ceil_to(M3, 16) * _ceil_to(9 * c2, 128) * 2                    # stage3 (bf16)
    est += 2 * _ceil_to(M3, 8) * _ceil_to(c3, 128) * 4                     # conv3 acc + pool temps
    est += 2 * 1024 * 1024                                                 # weights + misc headroom
    return est


def _pick_batch_tile(B, cimg, H, W, c1, c2, c3, budget=28 * 1024 * 1024):
    cands = [bt for bt in range(min(B, 8), 0, -1)
             if B % bt == 0 and _vmem_bytes_estimate(bt, cimg, H, W, c1, c2, c3) <= budget]
    if not cands:
        return 1
    for bt in cands:          # prefer an even number of grid steps (>= 2) so both
        g = B // bt           # v7x TensorCores get an equal share of the batch axis
        if g >= 2 and g % 2 == 0:
            return bt
    for bt in cands:
        if B // bt >= 2:
            return bt
    return cands[0]


# ----------------------------------------------------------------------------
# fused kernel: whole AriasModel forward for one batch tile
# ----------------------------------------------------------------------------
def arias_fused_kernel(x_ref, w1_ref, b1_ref, w2_ref, b2_ref, w3_ref, b3_ref,
                       fc1w_ref, fc1b_ref, fc2w_ref, fc2b_ref,
                       o_ref,
                       xp_ref, a1h_ref, a1p_ref, stage2_ref, a2p_ref, stage3_ref):
    BT, Cimg, Hh, _, W = x_ref.shape          # rows pre-split by parity: H = 2*Hh
    C1 = w1_ref.shape[1]                      # 16
    C2 = w2_ref.shape[1]                      # 32
    C3 = w3_ref.shape[1]                      # 64
    H2, W2 = Hh, W // 2
    H4, W4 = H2 // 2, W2 // 2
    H8, W8 = H4 // 2, W4 // 2
    M2 = BT * H2 * W2
    M3 = BT * H4 * W4
    f32 = jnp.float32
    bf16 = jnp.bfloat16

    # ---- optional RGB -> grayscale mean (torch: if x.size(1) == 3) ----------
    x = x_ref[...]
    if Cimg == 3:
        g2 = jnp.mean(x, axis=1)              # (BT, Hh, 2, W)
    else:
        g2 = x[:, 0]
    g_even = g2[:, :, 0, :]                   # original rows 0,2,4,...  (BT, Hh, W)
    g_odd = g2[:, :, 1, :]                    # original rows 1,3,5,...

    # ---- build 3 dx-shifted, zero-framed, parity-split padded planes --------
    # xp[dx, 0, :, i, :] = padded-image row 2i   at column (w + dx - 1)
    # xp[dx, 1, :, i, :] = padded-image row 2i+1 at column (w + dx - 1)
    # Only the 1-element border is zeroed (thin strips), not the whole buffer.
    zrow = jnp.zeros((3, BT, 1, W), f32)
    xp_ref[:, 0, :, 0:1, :] = zrow                       # padded row 0 (top halo)
    xp_ref[:, 1, :, Hh:Hh + 1, :] = zrow                 # padded row H+1 (bottom halo)
    zcol = jnp.zeros((2, BT, Hh + 1, 1), f32)
    xp_ref[0, :, :, :, 0:1] = zcol                       # left halo column (dx = 0)
    xp_ref[2, :, :, :, W - 1:W] = zcol                   # right halo column (dx = 2)
    # dx = 1 (center)
    xp_ref[1, 0, :, 1:Hh + 1, :] = g_odd
    xp_ref[1, 1, :, 0:Hh, :] = g_even
    # dx = 0 (value at w-1): pay the lane shift once per plane, not per tap
    xp_ref[0, 0, :, 1:Hh + 1, 1:W] = g_odd[:, :, 0:W - 1]
    xp_ref[0, 1, :, 0:Hh, 1:W] = g_even[:, :, 0:W - 1]
    # dx = 2 (value at w+1)
    xp_ref[2, 0, :, 1:Hh + 1, 0:W - 1] = g_odd[:, :, 1:W]
    xp_ref[2, 1, :, 0:Hh, 0:W - 1] = g_even[:, :, 1:W]

    # ---- conv1 (1->16): planar per-channel scalar FMAs, fused 2x H-pool -----
    # Even/odd output-row phases read disjoint padded-row slices; their max is
    # exactly the stride-2 H max-pool, so no relayout is needed for H pooling.
    tap = {}
    for dx in range(3):
        tap[(dx, "E0")] = xp_ref[dx, 0, :, 0:Hh, :]      # padded rows 2i
        tap[(dx, "E1")] = xp_ref[dx, 0, :, 1:Hh + 1, :]  # padded rows 2i+2
        tap[(dx, "O0")] = xp_ref[dx, 1, :, 0:Hh, :]      # padded rows 2i+1
        tap[(dx, "O1")] = xp_ref[dx, 1, :, 1:Hh + 1, :]  # padded rows 2i+3
    keyE = ("E0", "O0", "E1")    # output row 2i,   taps dy = 0,1,2
    keyO = ("O0", "E1", "O1")    # output row 2i+1, taps dy = 0,1,2

    for c in range(C1):
        accE = None
        accO = None
        for dy in range(3):
            for dx in range(3):
                w = w1_ref[dy * 3 + dx, c]               # scalar weight from SMEM
                tE = tap[(dx, keyE[dy])] * w
                tO = tap[(dx, keyO[dy])] * w
                accE = tE if accE is None else accE + tE
                accO = tO if accO is None else accO + tO
        hp = jnp.maximum(accE, accO)                     # (BT, H2, W)  H-pooled
        a1h_ref[:, :, c:c + 1, :] = hp[:, :, None, :]

    # One minor-dim transpose of the (already H-pooled) activation to NHWC.
    a1n = jnp.swapaxes(a1h_ref[...], 2, 3)               # (BT, H2, W, C1) f32
    a1w = jnp.max(a1n.reshape(BT, H2, W2, 2, C1), axis=3)   # W-direction 2x max-pool
    # bias + ReLU AFTER the pool (exact; 1/4 of the elements)
    a1 = jnp.maximum(a1w + b1_ref[...].reshape(1, 1, 1, C1), 0.0)

    # ---- conv2 (16->32): one im2col-K bf16 MXU matmul (K = 9*16 = 144) ------
    a1p_ref[:, 0:1, :, :] = jnp.zeros((BT, 1, W2 + 2, C1), bf16)
    a1p_ref[:, H2 + 1:H2 + 2, :, :] = jnp.zeros((BT, 1, W2 + 2, C1), bf16)
    a1p_ref[:, :, 0:1, :] = jnp.zeros((BT, H2 + 2, 1, C1), bf16)
    a1p_ref[:, :, W2 + 1:W2 + 2, :] = jnp.zeros((BT, H2 + 2, 1, C1), bf16)
    a1p_ref[:, 1:H2 + 1, 1:W2 + 1, :] = a1.astype(bf16)  # single bf16 cast
    for t in range(9):
        dy, dx = t // 3, t % 3
        stage2_ref[:, t * C1:(t + 1) * C1] = (
            a1p_ref[:, dy:dy + H2, dx:dx + W2, :].reshape(M2, C1))
    acc2 = jnp.dot(stage2_ref[...], w2_ref[...], preferred_element_type=f32)   # (M2, C2)
    y2 = acc2.reshape(BT, H2, W2, C2)
    y2 = jnp.max(y2.reshape(BT, H4, 2, W2, C2), axis=2)
    y2 = jnp.max(y2.reshape(BT, H4, W4, 2, C2), axis=3)
    a2 = jnp.maximum(y2 + b2_ref[...].reshape(1, 1, 1, C2), 0.0)

    # ---- conv3 (32->64): one im2col-K bf16 MXU matmul (K = 9*32 = 288) ------
    a2p_ref[:, 0:1, :, :] = jnp.zeros((BT, 1, W4 + 2, C2), bf16)
    a2p_ref[:, H4 + 1:H4 + 2, :, :] = jnp.zeros((BT, 1, W4 + 2, C2), bf16)
    a2p_ref[:, :, 0:1, :] = jnp.zeros((BT, H4 + 2, 1, C2), bf16)
    a2p_ref[:, :, W4 + 1:W4 + 2, :] = jnp.zeros((BT, H4 + 2, 1, C2), bf16)
    a2p_ref[:, 1:H4 + 1, 1:W4 + 1, :] = a2.astype(bf16)
    for t in range(9):
        dy, dx = t // 3, t % 3
        stage3_ref[:, t * C2:(t + 1) * C2] = (
            a2p_ref[:, dy:dy + H4, dx:dx + W4, :].reshape(M3, C2))
    acc3 = jnp.dot(stage3_ref[...], w3_ref[...], preferred_element_type=f32)   # (M3, C3)
    y3 = acc3.reshape(BT, H4, W4, C3)
    y3 = jnp.max(y3.reshape(BT, H8, 2, W4, C3), axis=2)
    y3 = jnp.max(y3.reshape(BT, H8, W8, 2, C3), axis=3)
    a3 = jnp.maximum(y3 + b3_ref[...].reshape(1, 1, 1, C3), 0.0)

    # ---- GAP + fc1 + ReLU + (dropout = identity in eval) + fc2 --------------
    gap = jnp.mean(a3.reshape(BT, H8 * W8, C3), axis=1)                        # (BT, C3)
    h = jnp.dot(gap, fc1w_ref[...], preferred_element_type=f32) + fc1b_ref[...]
    h = jnp.maximum(h, 0.0)
    out = jnp.dot(h, fc2w_ref[...], preferred_element_type=f32) + fc2b_ref[...]
    o_ref[...] = out.astype(o_ref.dtype)     # is_multilabel=True -> no softmax


# ----------------------------------------------------------------------------
# wrapper
# ----------------------------------------------------------------------------
def arias_forward(x_nchw, params, *, batch_tile=None):
    x = x_nchw.astype(jnp.float32)
    B, Cimg, H, W = x.shape
    if Cimg not in (1, 3):
        raise ValueError(f"AriasModel expects 1- or 3-channel input (conv1 has in_channels=1; "
                         f"3-channel input is averaged to grayscale), got C={Cimg}")
    if H % 8 != 0 or W % 8 != 0:
        raise ValueError("AriasModel forward requires H and W divisible by 8 "
                         "(three stride-2 2x2 max-pools).")

    c1 = params["w1"].shape[-1]
    c2 = params["w2"].shape[-1]
    c3 = params["w3"].shape[-1]
    nh = params["fc1_w"].shape[-1]
    nc = params["fc2_w"].shape[-1]

    bt = batch_tile if batch_tile is not None else _pick_batch_tile(B, Cimg, H, W, c1, c2, c3)
    if B % bt != 0:
        raise ValueError(f"batch {B} must be divisible by batch tile {bt}")
    G = B // bt
    Hh, W2, H4, W4 = H // 2, W // 2, H // 4, W // 4
    M2, M3 = bt * Hh * W2, bt * H4 * W4

    # Free metadata reshape: split rows by parity so the kernel's fused
    # conv1 + H-pool can read even/odd row phases with plain (unstrided) slices.
    x5 = x.reshape(B, Cimg, Hh, 2, W)

    # Weight prep (tiny tensors; reshapes/casts are free XLA ops).
    w1 = params["w1"].reshape(9, c1).astype(jnp.float32)            # SMEM scalar table
    b1 = params["b1"].reshape(1, c1).astype(jnp.float32)
    w2 = params["w2"].reshape(9 * c1, c2).astype(jnp.bfloat16)      # im2col layout, K=144
    b2 = params["b2"].reshape(1, c2).astype(jnp.float32)
    w3 = params["w3"].reshape(9 * c2, c3).astype(jnp.bfloat16)      # im2col layout, K=288
    b3 = params["b3"].reshape(1, c3).astype(jnp.float32)
    fc1w = params["fc1_w"].astype(jnp.float32)
    fc1b = params["fc1_b"].reshape(1, nh).astype(jnp.float32)
    fc2w = params["fc2_w"].astype(jnp.float32)
    fc2b = params["fc2_b"].reshape(1, nc).astype(jnp.float32)

    out = pl.pallas_call(
        arias_fused_kernel,
        out_shape=jax.ShapeDtypeStruct((G, bt, nc), jnp.float32),
        grid=(G,),
        in_specs=[
            pl.BlockSpec((bt, Cimg, Hh, 2, W), lambda g: (g, 0, 0, 0, 0)),
            pl.BlockSpec(memory_space=pltpu.MemorySpace.SMEM),       # w1 scalar table
            pl.BlockSpec((1, c1), lambda g: (0, 0)),
            pl.BlockSpec((9 * c1, c2), lambda g: (0, 0)),
            pl.BlockSpec((1, c2), lambda g: (0, 0)),
            pl.BlockSpec((9 * c2, c3), lambda g: (0, 0)),
            pl.BlockSpec((1, c3), lambda g: (0, 0)),
            pl.BlockSpec((c3, nh), lambda g: (0, 0)),
            pl.BlockSpec((1, nh), lambda g: (0, 0)),
            pl.BlockSpec((nh, nc), lambda g: (0, 0)),
            pl.BlockSpec((1, nc), lambda g: (0, 0)),
        ],
        out_specs=pl.BlockSpec((None, bt, nc), lambda g: (g, 0, 0)),
        scratch_shapes=[
            pltpu.VMEM((3, 2, bt, Hh + 1, W), jnp.float32),          # dx-shifted padded parity planes
            pltpu.VMEM((bt, Hh, c1, W), jnp.float32),                # H-pooled conv1 (channel-sublane)
            pltpu.VMEM((bt, Hh + 2, W2 + 2, c1), jnp.bfloat16),      # padded pool1 output (NHWC, bf16)
            pltpu.VMEM((M2, 9 * c1), jnp.bfloat16),                  # conv2 im2col staging (K=144)
            pltpu.VMEM((bt, H4 + 2, W4 + 2, c2), jnp.bfloat16),      # padded pool2 output (NHWC, bf16)
            pltpu.VMEM((M3, 9 * c2), jnp.bfloat16),                  # conv3 im2col staging (K=288)
        ],
        compiler_params=pltpu.CompilerParams(
            dimension_semantics=("parallel",),
            vmem_limit_bytes=48 * 1024 * 1024,
        ),
    )(x5, w1, b1, w2, b2, w3, b3, fc1w, fc1b, fc2w, fc2b)
    return out.reshape(B, nc)


# ----------------------------------------------------------------------------
# Pure-JAX reference (for correctness check)
# ----------------------------------------------------------------------------
def arias_forward_ref(x_nchw, params):
    x = x_nchw.astype(jnp.float32)
    if x.shape[1] == 3:
        x = jnp.mean(x, axis=1, keepdims=True)
    x = jnp.transpose(x, (0, 2, 3, 1))
    dn = ("NHWC", "HWIO", "NHWC")
    for w, b in [(params["w1"], params["b1"]),
                 (params["w2"], params["b2"]),
                 (params["w3"], params["b3"])]:
        x = lax.conv_general_dilated(x, w, (1, 1), "SAME", dimension_numbers=dn) + b
        x = jnp.maximum(x, 0.0)
        x = lax.reduce_window(x, -jnp.inf, lax.max, (1, 2, 2, 1), (1, 2, 2, 1), "VALID")
    gap = jnp.mean(x, axis=(1, 2))
    h = jnp.maximum(gap @ params["fc1_w"] + params["fc1_b"], 0.0)
    return h @ params["fc2_w"] + params["fc2_b"]


def init_params(key, num_classes):
    ks = jax.random.split(key, 10)
    def u(k, shape, fan_in):
        bound = 1.0 / np.sqrt(fan_in)
        return jax.random.uniform(k, shape, jnp.float32, -bound, bound)
    return {
        "w1": u(ks[0], (3, 3, 1, 16), 9 * 1),   "b1": u(ks[1], (16,), 9 * 1),
        "w2": u(ks[2], (3, 3, 16, 32), 9 * 16), "b2": u(ks[3], (32,), 9 * 16),
        "w3": u(ks[4], (3, 3, 32, 64), 9 * 32), "b3": u(ks[5], (64,), 9 * 32),
        "fc1_w": u(ks[6], (64, 32), 64),        "fc1_b": u(ks[7], (32,), 64),
        "fc2_w": u(ks[8], (32, num_classes), 32),
        "fc2_b": u(ks[9], (num_classes,), 32),
    }


if __name__ == "__main__":
    num_classes = 5
    key = jax.random.PRNGKey(0)
    kx, kp = jax.random.split(key)
    # small input, RGB so the channel-mean branch is exercised
    x = jax.random.normal(kx, (2, 3, 16, 16), jnp.float32)
    params = init_params(kp, num_classes)

    out = jax.block_until_ready(jax.jit(arias_forward)(x, params))
    ref = jax.block_until_ready(arias_forward_ref(x, params))

    assert out.shape == (2, num_classes)
    # conv1/pool1 are exact f32; conv2/conv3 run as bf16 MXU matmuls with f32
    # accumulation (intentional) -> 2e-2 tolerance vs. the pure-f32 reference.
    np.testing.assert_allclose(np.asarray(out), np.asarray(ref), rtol=2e-2, atol=2e-2)

    print("KERNEL_OK")
</pallas_src>

<mosaic_0001>
module attributes {stable_mosaic.version = 11 : i64} {
  func.func @arias_fused_kernel(%arg0: i32, %arg1: memref<1x3x8x2x16xf32, #tpu.memory_space<vmem>>, %arg2: memref<9x16xf32, #tpu.memory_space<smem>>, %arg3: memref<1x16xf32, #tpu.memory_space<vmem>>, %arg4: memref<144x32xbf16, #tpu.memory_space<vmem>>, %arg5: memref<1x32xf32, #tpu.memory_space<vmem>>, %arg6: memref<288x64xbf16, #tpu.memory_space<vmem>>, %arg7: memref<1x64xf32, #tpu.memory_space<vmem>>, %arg8: memref<64x32xf32, #tpu.memory_space<vmem>>, %arg9: memref<1x32xf32, #tpu.memory_space<vmem>>, %arg10: memref<32x5xf32, #tpu.memory_space<vmem>>, %arg11: memref<1x5xf32, #tpu.memory_space<vmem>>, %arg12: memref<1x1x5xf32, #tpu.memory_space<vmem>>, %arg13: memref<3x2x1x9x16xf32, #tpu.memory_space<vmem>>, %arg14: memref<1x8x16x16xf32, #tpu.memory_space<vmem>>, %arg15: memref<1x10x10x16xbf16, #tpu.memory_space<vmem>>, %arg16: memref<64x144xbf16, #tpu.memory_space<vmem>>, %arg17: memref<1x6x6x32xbf16, #tpu.memory_space<vmem>>, %arg18: memref<16x288xbf16, #tpu.memory_space<vmem>>) attributes {dimension_semantics = [#tpu.dimension_semantics<parallel>], iteration_bounds = array<i64: 2>, scalar_prefetch = 0 : i64, scratch_operands = 6 : i64, tpu.core_type = #tpu.core_type<tc>, window_params = [{transform_indices = @transform_0, window_bounds = array<i64: 1, 3, 8, 2, 16>}, {transform_indices = @transform_1, window_bounds = array<i64: 9, 16>}, {pipeline_mode = #tpu.pipeline_mode<synchronous>, transform_indices = @transform_2, window_bounds = array<i64: 1, 16>}, {pipeline_mode = #tpu.pipeline_mode<synchronous>, transform_indices = @transform_3, window_bounds = array<i64: 144, 32>}, {pipeline_mode = #tpu.pipeline_mode<synchronous>, transform_indices = @transform_4, window_bounds = array<i64: 1, 32>}, {pipeline_mode = #tpu.pipeline_mode<synchronous>, transform_indices = @transform_5, window_bounds = array<i64: 288, 64>}, {pipeline_mode = #tpu.pipeline_mode<synchronous>, transform_indices = @transform_6, window_bounds = array<i64: 1, 64>}, {pipeline_mode = #tpu.pipeline_mode<synchronous>, transform_indices = @transform_7, window_bounds = array<i64: 64, 32>}, {pipeline_mode = #tpu.pipeline_mode<synchronous>, transform_indices = @transform_8, window_bounds = array<i64: 1, 32>}, {pipeline_mode = #tpu.pipeline_mode<synchronous>, transform_indices = @transform_9, window_bounds = array<i64: 32, 5>}, {pipeline_mode = #tpu.pipeline_mode<synchronous>, transform_indices = @transform_10, window_bounds = array<i64: 1, 5>}, {transform_indices = @transform_11, window_bounds = array<i64: 1, 1, 5>}]} {
    %c0 = arith.constant 0 : index
    %c0_0 = arith.constant 0 : index
    %c0_1 = arith.constant 0 : index
    %c0_2 = arith.constant 0 : index
    %c0_3 = arith.constant 0 : index
    %0 = vector.load %arg1[%c0, %c0_0, %c0_1, %c0_2, %c0_3] : memref<1x3x8x2x16xf32, #tpu.memory_space<vmem>>, vector<1x3x8x2x16xf32>
    %cst = arith.constant dense<0.000000e+00> : vector<1x8x2x16xf32>
    %1 = vector.multi_reduction <add>, %0, %cst [1] : vector<1x3x8x2x16xf32> to vector<1x8x2x16xf32>
    %cst_4 = arith.constant 3.000000e+00 : f32
    %2 = vector.broadcast %cst_4 : f32 to vector<1x8x2x16xf32>
    %3 = arith.divf %1, %2 : vector<1x8x2x16xf32>
    %4 = vector.extract_strided_slice %3 {offsets = [0, 0, 0, 0], sizes = [1, 8, 1, 16], strides = [1, 1, 1, 1]} : vector<1x8x2x16xf32> to vector<1x8x1x16xf32>
    %5 = vector.shape_cast %4 : vector<1x8x1x16xf32> to vector<1x8x16xf32>
    %6 = vector.extract_strided_slice %3 {offsets = [0, 0, 1, 0], sizes = [1, 8, 1, 16], strides = [1, 1, 1, 1]} : vector<1x8x2x16xf32> to vector<1x8x1x16xf32>
    %7 = vector.shape_cast %6 : vector<1x8x1x16xf32> to vector<1x8x16xf32>
    %cst_5 = arith.constant 0.000000e+00 : f32
    %8 = vector.broadcast %cst_5 : f32 to vector<3x1x1x16xf32>
    %c0_6 = arith.constant 0 : index
    %c0_7 = arith.constant 0 : index
    %c0_8 = arith.constant 0 : index
    %c0_9 = arith.constant 0 : index
    %c0_10 = arith.constant 0 : index
    %9 = vector.load %arg13[%c0_6, %c0_7, %c0_8, %c0_9, %c0_10] : memref<3x2x1x9x16xf32, #tpu.memory_space<vmem>>, vector<3x1x1x1x16xf32>
    %10 = vector.shape_cast %9 : vector<3x1x1x1x16xf32> to vector<3x1x1x16xf32>
    %11 = vector.shape_cast %8 : vector<3x1x1x16xf32> to vector<3x1x1x1x16xf32>
    tpu.vector_store %arg13[%c0_6, %c0_7, %c0_8, %c0_9, %c0_10], %11 {strides = array<i32>} : memref<3x2x1x9x16xf32, #tpu.memory_space<vmem>>, vector<3x1x1x1x16xf32>,
    %c0_11 = arith.constant 0 : index
    %c1 = arith.constant 1 : index
    %c0_12 = arith.constant 0 : index
    %c8 = arith.constant 8 : index
    %c0_13 = arith.constant 0 : index
    %12 = vector.load %arg13[%c0_11, %c1, %c0_12, %c8, %c0_13] : memref<3x2x1x9x16xf32, #tpu.memory_space<vmem>>, vector<3x1x1x1x16xf32>
    %13 = vector.shape_cast %12 : vector<3x1x1x1x16xf32> to vector<3x1x1x16xf32>
    %14 = vector.shape_cast %8 : vector<3x1x1x16xf32> to vector<3x1x1x1x16xf32>
    tpu.vector_store %arg13[%c0_11, %c1, %c0_12, %c8, %c0_13], %14 {strides = array<i32>} : memref<3x2x1x9x16xf32, #tpu.memory_space<vmem>>, vector<3x1x1x1x16xf32>,
    %cst_14 = arith.constant 0.000000e+00 : f32
    %15 = vector.broadcast %cst_14 : f32 to vector<2x1x9x1xf32>
    %c0_15 = arith.constant 0 : index
    %c0_16 = arith.constant 0 : index
    %c0_17 = arith.constant 0 : index
    %c0_18 = arith.constant 0 : index
    %c0_19 = arith.constant 0 : index
    %16 = vector.load %arg13[%c0_15, %c0_16, %c0_17, %c0_18, %c0_19] : memref<3x2x1x9x16xf32, #tpu.memory_space<vmem>>, vector<1x2x1x9x1xf32>
    %17 = vector.shape_cast %16 : vector<1x2x1x9x1xf32> to vector<2x1x9x1xf32>
    %18 = vector.shape_cast %15 : vector<2x1x9x1xf32> to vector<1x2x1x9x1xf32>
    tpu.vector_store %arg13[%c0_15, %c0_16, %c0_17, %c0_18, %c0_19], %18 {strides = array<i32>} : memref<3x2x1x9x16xf32, #tpu.memory_space<vmem>>, vector<1x2x1x9x1xf32>,
    %c2 = arith.constant 2 : index
    %c0_20 = arith.constant 0 : index
    %c0_21 = arith.constant 0 : index
    %c0_22 = arith.constant 0 : index
    %c15 = arith.constant 15 : index
    %19 = vector.load %arg13[%c2, %c0_20, %c0_21, %c0_22, %c15] : memref<3x2x1x9x16xf32, #tpu.memory_space<vmem>>, vector<1x2x1x9x1xf32>
    %20 = vector.shape_cast %19 : vector<1x2x1x9x1xf32> to vector<2x1x9x1xf32>
    %21 = vector.shape_cast %15 : vector<2x1x9x1xf32> to vector<1x2x1x9x1xf32>
    tpu.vector_store %arg13[%c2, %c0_20, %c0_21, %c0_22, %c15], %21 {strides = array<i32>} : memref<3x2x1x9x16xf32, #tpu.memory_space<vmem>>, vector<1x2x1x9x1xf32>,
    %c1_23 = arith.constant 1 : index
    %c0_24 = arith.constant 0 : index
    %c0_25 = arith.constant 0 : index
    %c1_26 = arith.constant 1 : index
    %c0_27 = arith.constant 0 : index
    %22 = vector.load %arg13[%c1_23, %c0_24, %c0_25, %c1_26, %c0_27] : memref<3x2x1x9x16xf32, #tpu.memory_space<vmem>>, vector<1x1x1x8x16xf32>
    %23 = vector.shape_cast %22 : vector<1x1x1x8x16xf32> to vector<1x8x16xf32>
    %24 = vector.shape_cast %7 : vector<1x8x16xf32> to vector<1x1x1x8x16xf32>
    tpu.vector_store %arg13[%c1_23, %c0_24, %c0_25, %c1_26, %c0_27], %24 {strides = array<i32>} : memref<3x2x1x9x16xf32, #tpu.memory_space<vmem>>, vector<1x1x1x8x16xf32>,
    %c1_28 = arith.constant 1 : index
    %c1_29 = arith.constant 1 : index
    %c0_30 = arith.constant 0 : index
    %c0_31 = arith.constant 0 : index
    %c0_32 = arith.constant 0 : index
    %25 = vector.load %arg13[%c1_28, %c1_29, %c0_30, %c0_31, %c0_32] : memref<3x2x1x9x16xf32, #tpu.memory_space<vmem>>, vector<1x1x1x8x16xf32>
    %26 = vector.shape_cast %25 : vector<1x1x1x8x16xf32> to vector<1x8x16xf32>
    %27 = vector.shape_cast %5 : vector<1x8x16xf32> to vector<1x1x1x8x16xf32>
    tpu.vector_store %arg13[%c1_28, %c1_29, %c0_30, %c0_31, %c0_32], %27 {strides = array<i32>} : memref<3x2x1x9x16xf32, #tpu.memory_space<vmem>>, vector<1x1x1x8x16xf32>,
    %28 = vector.extract_strided_slice %7 {offsets = [0, 0, 0], sizes = [1, 8, 15], strides = [1, 1, 1]} : vector<1x8x16xf32> to vector<1x8x15xf32>
    %c0_33 = arith.constant 0 : index
    %c0_34 = arith.constant 0 : index
    %c0_35 = arith.constant 0 : index
    %c1_36 = arith.constant 1 : index
    %c1_37 = arith.constant 1 : index
    %29 = vector.load %arg13[%c0_33, %c0_34, %c0_35, %c1_36, %c1_37] : memref<3x2x1x9x16xf32, #tpu.memory_space<vmem>>, vector<1x1x1x8x15xf32>
    %30 = vector.shape_cast %29 : vector<1x1x1x8x15xf32> to vector<1x8x15xf32>
    %31 = vector.shape_cast %28 : vector<1x8x15xf32> to vector<1x1x1x8x15xf32>
    tpu.vector_store %arg13[%c0_33, %c0_34, %c0_35, %c1_36, %c1_37], %31 {strides = array<i32>} : memref<3x2x1x9x16xf32, #tpu.memory_space<vmem>>, vector<1x1x1x8x15xf32>,
    %32 = vector.extract_strided_slice %5 {offsets = [0, 0, 0], sizes = [1, 8, 15], strides = [1, 1, 1]} : vector<1x8x16xf32> to vector<1x8x15xf32>
    %c0_38 = arith.constant 0 : index
    %c1_39 = arith.constant 1 : index
    %c0_40 = arith.constant 0 : index
    %c0_41 = arith.constant 0 : index
    %c1_42 = arith.constant 1 : index
    %33 = vector.load %arg13[%c0_38, %c1_39, %c0_40, %c0_41, %c1_42] : memref<3x2x1x9x16xf32, #tpu.memory_space<vmem>>, vector<1x1x1x8x15xf32>
    %34 = vector.shape_cast %33 : vector<1x1x1x8x15xf32> to vector<1x8x15xf32>
    %35 = vector.shape_cast %32 : vector<1x8x15xf32> to vector<1x1x1x8x15xf32>
    tpu.vector_store %arg13[%c0_38, %c1_39, %c0_40, %c0_41, %c1_42], %35 {strides = array<i32>} : memref<3x2x1x9x16xf32, #tpu.memory_space<vmem>>, vector<1x1x1x8x15xf32>,
    %36 = vector.extract_strided_slice %7 {offsets = [0, 0, 1], sizes = [1, 8, 15], strides = [1, 1, 1]} : vector<1x8x16xf32> to vector<1x8x15xf32>
    %c2_43 = arith.constant 2 : index
    %c0_44 = arith.constant 0 : index
    %c0_45 = arith.constant 0 : index
    %c1_46 = arith.constant 1 : index
    %c0_47 = arith.constant 0 : index
    %37 = vector.load %arg13[%c2_43, %c0_44, %c0_45, %c1_46, %c0_47] : memref<3x2x1x9x16xf32, #tpu.memory_space<vmem>>, vector<1x1x1x8x15xf32>
    %38 = vector.shape_cast %37 : vector<1x1x1x8x15xf32> to vector<1x8x15xf32>
    %39 = vector.shape_cast %36 : vector<1x8x15xf32> to vector<1x1x1x8x15xf32>
    tpu.vector_store %arg13[%c2_43, %c0_44, %c0_45, %c1_46, %c0_47], %39 {strides = array<i32>} : memref<3x2x1x9x16xf32, #tpu.memory_space<vmem>>, vector<1x1x1x8x15xf32>,
    %40 = vector.extract_strided_slice %5 {offsets = [0, 0, 1], sizes = [1, 8, 15], strides = [1, 1, 1]} : vector<1x8x16xf32> to vector<1x8x15xf32>
    %c2_48 = arith.constant 2 : index
    %c1_49 = arith.constant 1 : index
    %c0_50 = arith.constant 0 : index
    %c0_51 = arith.constant 0 : index
    %c0_52 = arith.constant 0 : index
    %41 = vector.load %arg13[%c2_48, %c1_49, %c0_50, %c0_51, %c0_52] : memref<3x2x1x9x16xf32, #tpu.memory_space<vmem>>, vector<1x1x1x8x15xf32>
    %42 = vector.shape_cast %41 : vector<1x1x1x8x15xf32> to vector<1x8x15xf32>
    %43 = vector.shape_cast %40 : vector<1x8x15xf32> to vector<1x1x1x8x15xf32>
    tpu.vector_store %arg13[%c2_48, %c1_49, %c0_50, %c0_51, %c0_52], %43 {strides = array<i32>} : memref<3x2x1x9x16xf32, #tpu.memory_space<vmem>>, vector<1x1x1x8x15xf32>,
    %c0_53 = arith.constant 0 : index
    %c0_54 = arith.constant 0 : index
    %c0_55 = arith.constant 0 : index
    %c0_56 = arith.constant 0 : index
    %c0_57 = arith.constant 0 : index
    %44 = vector.load %arg13[%c0_53, %c0_54, %c0_55, %c0_56, %c0_57] : memref<3x2x1x9x16xf32, #tpu.memory_space<vmem>>, vector<1x1x1x8x16xf32>
    %45 = vector.shape_cast %44 : vector<1x1x1x8x16xf32> to vector<1x8x16xf32>
    %c0_58 = arith.constant 0 : index
    %c0_59 = arith.constant 0 : index
    %c0_60 = arith.constant 0 : index
    %c1_61 = arith.constant 1 : index
    %c0_62 = arith.constant 0 : index
    %46 = vector.load %arg13[%c0_58, %c0_59, %c0_60, %c1_61, %c0_62] : memref<3x2x1x9x16xf32, #tpu.memory_space<vmem>>, vector<1x1x1x8x16xf32>
    %47 = vector.shape_cast %46 : vector<1x1x1x8x16xf32> to vector<1x8x16xf32>
    %c0_63 = arith.constant 0 : index
    %c1_64 = arith.constant 1 : index
    %c0_65 = arith.constant 0 : index
    %c0_66 = arith.constant 0 : index
    %c0_67 = arith.constant 0 : index
    %48 = vector.load %arg13[%c0_63, %c1_64, %c0_65, %c0_66, %c0_67] : memref<3x2x1x9x16xf32, #tpu.memory_space<vmem>>, vector<1x1x1x8x16xf32>
    %49 = vector.shape_cast %48 : vector<1x1x1x8x16xf32> to vector<1x8x16xf32>
    %c0_68 = arith.constant 0 : index
    %c1_69 = arith.constant 1 : index
    %c0_70 = arith.constant 0 : index
    %c1_71 = arith.constant 1 : index
    %c0_72 = arith.constant 0 : index
    %50 = vector.load %arg13[%c0_68, %c1_69, %c0_70, %c1_71, %c0_72] : memref<3x2x1x9x16xf32, #tpu.memory_space<vmem>>, vector<1x1x1x8x16xf32>
    %51 = vector.shape_cast %50 : vector<1x1x1x8x16xf32> to vector<1x8x16xf32>
    %c1_73 = arith.constant 1 : index
    %c0_74 = arith.constant 0 : index
    %c0_75 = arith.constant 0 : index
    %c0_76 = arith.constant 0 : index
    %c0_77 = arith.constant 0 : index
    %52 = vector.load %arg13[%c1_73, %c0_74, %c0_75, %c0_76, %c0_77] : memref<3x2x1x9x16xf32, #tpu.memory_space<vmem>>, vector<1x1x1x8x16xf32>
    %53 = vector.shape_cast %52 : vector<1x1x1x8x16xf32> to vector<1x8x16xf32>
    %c1_78 = arith.constant 1 : index
    %c0_79 = arith.constant 0 : index
    %c0_80 = arith.constant 0 : index
    %c1_81 = arith.constant 1 : index
    %c0_82 = arith.constant 0 : index
    %54 = vector.load %arg13[%c1_78, %c0_79, %c0_80, %c1_81, %c0_82] : memref<3x2x1x9x16xf32, #tpu.memory_space<vmem>>, vector<1x1x1x8x16xf32>
    %55 = vector.shape_cast %54 : vector<1x1x1x8x16xf32> to vector<1x8x16xf32>
    %c1_83 = arith.constant 1 : index
    %c1_84 = arith.constant 1 : index
    %c0_85 = arith.constant 0 : index
    %c0_86 = arith.constant 0 : index
    %c0_87 = arith.constant 0 : index
    %56 = vector.load %arg13[%c1_83, %c1_84, %c0_85, %c0_86, %c0_87] : memref<3x2x1x9x16xf32, #tpu.memory_space<vmem>>, vector<1x1x1x8x16xf32>
    %57 = vector.shape_cast %56 : vector<1x1x1x8x16xf32> to vector<1x8x16xf32>
    %c1_88 = arith.constant 1 : index
    %c1_89 = arith.constant 1 : index
    %c0_90 = arith.constant 0 : index
    %c1_91 = arith.constant 1 : index
    %c0_92 = arith.constant 0 : index
    %58 = vector.load %arg13[%c1_88, %c1_89, %c0_90, %c1_91, %c0_92] : memref<3x2x1x9x16xf32, #tpu.memory_space<vmem>>, vector<1x1x1x8x16xf32>
    %59 = vector.shape_cast %58 : vector<1x1x1x8x16xf32> to vector<1x8x16xf32>
    %c2_93 = arith.constant 2 : index
    %c0_94 = arith.constant 0 : index
    %c0_95 = arith.constant 0 : index
    %c0_96 = arith.constant 0 : index
    %c0_97 = arith.constant 0 : index
    %60 = vector.load %arg13[%c2_93, %c0_94, %c0_95, %c0_96, %c0_97] : memref<3x2x1x9x16xf32, #tpu.memory_space<vmem>>, vector<1x1x1x8x16xf32>
    %61 = vector.shape_cast %60 : vector<1x1x1x8x16xf32> to vector<1x8x16xf32>
    %c2_98 = arith.constant 2 : index
    %c0_99 = arith.constant 0 : index
    %c0_100 = arith.constant 0 : index
    %c1_101 = arith.constant 1 : index
    %c0_102 = arith.constant 0 : index
    %62 = vector.load %arg13[%c2_98, %c0_99, %c0_100, %c1_101, %c0_102] : memref<3x2x1x9x16xf32, #tpu.memory_space<vmem>>, vector<1x1x1x8x16xf32>
    %63 = vector.shape_cast %62 : vector<1x1x1x8x16xf32> to vector<1x8x16xf32>
    %c2_103 = arith.constant 2 : index
    %c1_104 = arith.constant 1 : index
    %c0_105 = arith.constant 0 : index
    %c0_106 = arith.constant 0 : index
    %c0_107 = arith.constant 0 : index
    %64 = vector.load %arg13[%c2_103, %c1_104, %c0_105, %c0_106, %c0_107] : memref<3x2x1x9x16xf32, #tpu.memory_space<vmem>>, vector<1x1x1x8x16xf32>
    %65 = vector.shape_cast %64 : vector<1x1x1x8x16xf32> to vector<1x8x16xf32>
    %c2_108 = arith.constant 2 : index
    %c1_109 = arith.constant 1 : index
    %c0_110 = arith.constant 0 : index
    %c1_111 = arith.constant 1 : index
    %c0_112 = arith.constant 0 : index
    %66 = vector.load %arg13[%c2_108, %c1_109, %c0_110, %c1_111, %c0_112] : memref<3x2x1x9x16xf32, #tpu.memory_space<vmem>>, vector<1x1x1x8x16xf32>
    %67 = vector.shape_cast %66 : vector<1x1x1x8x16xf32> to vector<1x8x16xf32>
    %c0_113 = arith.constant 0 : index
    %c0_114 = arith.constant 0 : index
    %68 = memref.load %arg2[%c0_113, %c0_114] : memref<9x16xf32, #tpu.memory_space<smem>>
    %69 = vector.broadcast %68 : f32 to vector<1x8x16xf32>
    %70 = arith.mulf %45, %69 : vector<1x8x16xf32>
    %71 = vector.broadcast %68 : f32 to vector<1x8x16xf32>
    %72 = arith.mulf %49, %71 : vector<1x8x16xf32>
    %c1_115 = arith.constant 1 : index
    %c0_116 = arith.constant 0 : index
    %73 = memref.load %arg2[%c1_115, %c0_116] : memref<9x16xf32, #tpu.memory_space<smem>>
    %74 = vector.broadcast %73 : f32 to vector<1x8x16xf32>
    %75 = arith.mulf %53, %74 : vector<1x8x16xf32>
    %76 = vector.broadcast %73 : f32 to vector<1x8x16xf32>
    %77 = arith.mulf %57, %76 : vector<1x8x16xf32>
    %78 = arith.addf %70, %75 : vector<1x8x16xf32>
    %79 = arith.addf %72, %77 : vector<1x8x16xf32>
    %c2_117 = arith.constant 2 : index
    %c0_118 = arith.constant 0 : index
    %80 = memref.load %arg2[%c2_117, %c0_118] : memref<9x16xf32, #tpu.memory_space<smem>>
    %81 = vector.broadcast %80 : f32 to vector<1x8x16xf32>
    %82 = arith.mulf %61, %81 : vector<1x8x16xf32>
    %83 = vector.broadcast %80 : f32 to vector<1x8x16xf32>
    %84 = arith.mulf %65, %83 : vector<1x8x16xf32>
    %85 = arith.addf %78, %82 : vector<1x8x16xf32>
    %86 = arith.addf %79, %84 : vector<1x8x16xf32>
    %c3 = arith.constant 3 : index
    %c0_119 = arith.constant 0 : index
    %87 = memref.load %arg2[%c3, %c0_119] : memref<9x16xf32, #tpu.memory_space<smem>>
    %88 = vector.broadcast %87 : f32 to vector<1x8x16xf32>
    %89 = arith.mulf %49, %88 : vector<1x8x16xf32>
    %90 = vector.broadcast %87 : f32 to vector<1x8x16xf32>
    %91 = arith.mulf %47, %90 : vector<1x8x16xf32>
    %92 = arith.addf %85, %89 : vector<1x8x16xf32>
    %93 = arith.addf %86, %91 : vector<1x8x16xf32>
    %c4 = arith.constant 4 : index
    %c0_120 = arith.constant 0 : index
    %94 = memref.load %arg2[%c4, %c0_120] : memref<9x16xf32, #tpu.memory_space<smem>>
    %95 = vector.broadcast %94 : f32 to vector<1x8x16xf32>
    %96 = arith.mulf %57, %95 : vector<1x8x16xf32>
    %97 = vector.broadcast %94 : f32 to vector<1x8x16xf32>
    %98 = arith.mulf %55, %97 : vector<1x8x16xf32>
    %99 = arith.addf %92, %96 : vector<1x8x16xf32>
    %100 = arith.addf %93, %98 : vector<1x8x16xf32>
    %c5 = arith.constant 5 : index
    %c0_121 = arith.constant 0 : index
    %101 = memref.load %arg2[%c5, %c0_121] : memref<9x16xf32, #tpu.memory_space<smem>>
    %102 = vector.broadcast %101 : f32 to vector<1x8x16xf32>
    %103 = arith.mulf %65, %102 : vector<1x8x16xf32>
    %104 = vector.broadcast %101 : f32 to vector<1x8x16xf32>
    %105 = arith.mulf %63, %104 : vector<1x8x16xf32>
    %106 = arith.addf %99, %103 : vector<1x8x16xf32>
    %107 = arith.addf %100, %105 : vector<1x8x16xf32>
    %c6 = arith.constant 6 : index
    %c0_122 = arith.constant 0 : index
    %108 = memref.load %arg2[%c6, %c0_122] : memref<9x16xf32, #tpu.memory_space<smem>>
    %109 = vector.broadcast %108 : f32 to vector<1x8x16xf32>
    %110 = arith.mulf %47, %109 : vector<1x8x16xf32>
    %111 = vector.broadcast %108 : f32 to vector<1x8x16xf32>
    %112 = arith.mulf %51, %111 : vector<1x8x16xf32>
    %113 = arith.addf %106, %110 : vector<1x8x16xf32>
    %114 = arith.addf %107, %112 : vector<1x8x16xf32>
    %c7 = arith.constant 7 : index
    %c0_123 = arith.constant 0 : index
    %115 = memref.load %arg2[%c7, %c0_123] : memref<9x16xf32, #tpu.memory_space<smem>>
    %116 = vector.broadcast %115 : f32 to vector<1x8x16xf32>
    %117 = arith.mulf %55, %116 : vector<1x8x16xf32>
    %118 = vector.broadcast %115 : f32 to vector<1x8x16xf32>
    %119 = arith.mulf %59, %118 : vector<1x8x16xf32>
    %120 = arith.addf %113, %117 : vector<1x8x16xf32>
    %121 = arith.addf %114, %119 : vector<1x8x16xf32>
    %c8_124 = arith.constant 8 : index
    %c0_125 = arith.constant 0 : index
    %122 = memref.load %arg2[%c8_124, %c0_125] : memref<9x16xf32, #tpu.memory_space<smem>>
    %123 = vector.broadcast %122 : f32 to vector<1x8x16xf32>
    %124 = arith.mulf %63, %123 : vector<1x8x16xf32>
    %125 = vector.broadcast %122 : f32 to vector<1x8x16xf32>
    %126 = arith.mulf %67, %125 : vector<1x8x16xf32>
    %127 = arith.addf %120, %124 : vector<1x8x16xf32>
    %128 = arith.addf %121, %126 : vector<1x8x16xf32>
    %129 = arith.maximumf %127, %128 : vector<1x8x16xf32>
    %130 = vector.shape_cast %129 : vector<1x8x16xf32> to vector<1x8x1x16xf32>
    %c0_126 = arith.constant 0 : index
    %c0_127 = arith.constant 0 : index
    %c0_128 = arith.constant 0 : index
    %c0_129 = arith.constant 0 : index
    %131 = vector.load %arg14[%c0_126, %c0_127, %c0_128, %c0_129] : memref<1x8x16x16xf32, #tpu.memory_space<vmem>>, vector<1x8x1x16xf32>
    tpu.vector_store %arg14[%c0_126, %c0_127, %c0_128, %c0_129], %130 {strides = array<i32>} : memref<1x8x16x16xf32, #tpu.memory_space<vmem>>, vector<1x8x1x16xf32>,
    %c0_130 = arith.constant 0 : index
    %c1_131 = arith.constant 1 : index
    %132 = memref.load %arg2[%c0_130, %c1_131] : memref<9x16xf32, #tpu.memory_space<smem>>
    %133 = vector.broadcast %132 : f32 to vector<1x8x16xf32>
    %134 = arith.mulf %45, %133 : vector<1x8x16xf32>
    %135 = vector.broadcast %132 : f32 to vector<1x8x16xf32>
    %136 = arith.mulf %49, %135 : vector<1x8x16xf32>
    %c1_132 = arith.constant 1 : index
    %c1_133 = arith.constant 1 : index
    %137 = memref.load %arg2[%c1_132, %c1_133] : memref<9x16xf32, #tpu.memory_space<smem>>
    %138 = vector.broadcast %137 : f32 to vector<1x8x16xf32>
    %139 = arith.mulf %53, %138 : vector<1x8x16xf32>
    %140 = vector.broadcast %137 : f32 to vector<1x8x16xf32>
    %141 = arith.mulf %57, %140 : vector<1x8x16xf32>
    %142 = arith.addf %134, %139 : vector<1x8x16xf32>
    %143 = arith.addf %136, %141 : vector<1x8x16xf32>
    %c2_134 = arith.constant 2 : index
    %c1_135 = arith.constant 1 : index
    %144 = memref.load %arg2[%c2_134, %c1_135] : memref<9x16xf32, #tpu.memory_space<smem>>
    %145 = vector.broadcast %144 : f32 to vector<1x8x16xf32>
    %146 = arith.mulf %61, %145 : vector<1x8x16xf32>
    %147 = vector.broadcast %144 : f32 to vector<1x8x16xf32>
    %148 = arith.mulf %65, %147 : vector<1x8x16xf32>
    %149 = arith.addf %142, %146 : vector<1x8x16xf32>
    %150 = arith.addf %143, %148 : vector<1x8x16xf32>
    %c3_136 = arith.constant 3 : index
    %c1_137 = arith.constant 1 : index
    %151 = memref.load %arg2[%c3_136, %c1_137] : memref<9x16xf32, #tpu.memory_space<smem>>
    %152 = vector.broadcast %151 : f32 to vector<1x8x16xf32>
    %153 = arith.mulf %49, %152 : vector<1x8x16xf32>
    %154 = vector.broadcast %151 : f32 to vector<1x8x16xf32>
    %155 = arith.mulf %47, %154 : vector<1x8x16xf32>
    %156 = arith.addf %149, %153 : vector<1x8x16xf32>
    %157 = arith.addf %150, %155 : vector<1x8x16xf32>
    %c4_138 = arith.constant 4 : index
    %c1_139 = arith.constant 1 : index
    %158 = memref.load %arg2[%c4_138, %c1_139] : memref<9x16xf32, #tpu.memory_space<smem>>
    %159 = vector.broadcast %158 : f32 to vector<1x8x16xf32>
    %160 = arith.mulf %57, %159 : vector<1x8x16xf32>
    %161 = vector.broadcast %158 : f32 to vector<1x8x16xf32>
    %162 = arith.mulf %55, %161 : vector<1x8x16xf32>
    %163 = arith.addf %156, %160 : vector<1x8x16xf32>
    %164 = arith.addf %157, %162 : vector<1x8x16xf32>
    %c5_140 = arith.constant 5 : index
    %c1_141 = arith.constant 1 : index
    %165 = memref.load %arg2[%c5_140, %c1_141] : memref<9x16xf32, #tpu.memory_space<smem>>
    %166 = vector.broadcast %165 : f32 to vector<1x8x16xf32>
    %167 = arith.mulf %65, %166 : vector<1x8x16xf32>
    %168 = vector.broadcast %165 : f32 to vector<1x8x16xf32>
    %169 = arith.mulf %63, %168 : vector<1x8x16xf32>
    %170 = arith.addf %163, %167 : vector<1x8x16xf32>
    %171 = arith.addf %164, %169 : vector<1x8x16xf32>
    %c6_142 = arith.constant 6 : index
    %c1_143 = arith.constant 1 : index
    %172 = memref.load %arg2[%c6_142, %c1_143] : memref<9x16xf32, #tpu.memory_space<smem>>
    %173 = vector.broadcast %172 : f32 to vector<1x8x16xf32>
    %174 = arith.mulf %47, %173 : vector<1x8x16xf32>
    %175 = vector.broadcast %172 : f32 to vector<1x8x16xf32>
    %176 = arith.mulf %51, %175 : vector<1x8x16xf32>
    %177 = arith.addf %170, %174 : vector<1x8x16xf32>
    %178 = arith.addf %171, %176 : vector<1x8x16xf32>
    %c7_144 = arith.constant 7 : index
    %c1_145 = arith.constant 1 : index
    %179 = memref.load %arg2[%c7_144, %c1_145] : memref<9x16xf32, #tpu.memory_space<smem>>
    %180 = vector.broadcast %179 : f32 to vector<1x8x16xf32>
    %181 = arith.mulf %55, %180 : vector<1x8x16xf32>
    %182 = vector.broadcast %179 : f32 to vector<1x8x16xf32>
    %183 = arith.mulf %59, %182 : vector<1x8x16xf32>
    %184 = arith.addf %177, %181 : vector<1x8x16xf32>
    %185 = arith.addf %178, %183 : vector<1x8x16xf32>
    %c8_146 = arith.constant 8 : index
    %c1_147 = arith.constant 1 : index
    %186 = memref.load %arg2[%c8_146, %c1_147] : memref<9x16xf32, #tpu.memory_space<smem>>
    %187 = vector.broadcast %186 : f32 to vector<1x8x16xf32>
    %188 = arith.mulf %63, %187 : vector<1x8x16xf32>
    %189 = vector.broadcast %186 : f32 to vector<1x8x16xf32>
    %190 = arith.mulf %67, %189 : vector<1x8x16xf32>
    %191 = arith.addf %184, %188 : vector<1x8x16xf32>
    %192 = arith.addf %185, %190 : vector<1x8x16xf32>
    %193 = arith.maximumf %191, %192 : vector<1x8x16xf32>
    %194 = vector.shape_cast %193 : vector<1x8x16xf32> to vector<1x8x1x16xf32>
    %c0_148 = arith.constant 0 : index
    %c0_149 = arith.constant 0 : index
    %c1_150 = arith.constant 1 : index
    %c0_151 = arith.constant 0 : index
    %195 = vector.load %arg14[%c0_148, %c0_149, %c1_150, %c0_151] : memref<1x8x16x16xf32, #tpu.memory_space<vmem>>, vector<1x8x1x16xf32>
    tpu.vector_store %arg14[%c0_148, %c0_149, %c1_150, %c0_151], %194 {strides = array<i32>} : memref<1x8x16x16xf32, #tpu.memory_space<vmem>>, vector<1x8x1x16xf32>,
    %c0_152 = arith.constant 0 : index
    %c2_153 = arith.constant 2 : index
    %196 = memref.load %arg2[%c0_152, %c2_153] : memref<9x16xf32, #tpu.memory_space<smem>>
    %197 = vector.broadcast %196 : f32 to vector<1x8x16xf32>
    %198 = arith.mulf %45, %197 : vector<1x8x16xf32>
    %199 = vector.broadcast %196 : f32 to vector<1x8x16xf32>
    %200 = arith.mulf %49, %199 : vector<1x8x16xf32>
    %c1_154 = arith.constant 1 : index
    %c2_155 = arith.constant 2 : index
    %201 = memref.load %arg2[%c1_154, %c2_155] : memref<9x16xf32, #tpu.memory_space<smem>>
    %202 = vector.broadcast %201 : f32 to vector<1x8x16xf32>
    %203 = arith.mulf %53, %202 : vector<1x8x16xf32>
    %204 = vector.broadcast %201 : f32 to vector<1x8x16xf32>
    %205 = arith.mulf %57, %204 : vector<1x8x16xf32>
    %206 = arith.addf %198, %203 : vector<1x8x16xf32>
    %207 = arith.addf %200, %205 : vector<1x8x16xf32>
    %c2_156 = arith.constant 2 : index
    %c2_157 = arith.constant 2 : index
    %208 = memref.load %arg2[%c2_156, %c2_157] : memref<9x16xf32, #tpu.memory_space<smem>>
    %209 = vector.broadcast %208 : f32 to vector<1x8x16xf32>
    %210 = arith.mulf %61, %209 : vector<1x8x16xf32>
    %211 = vector.broadcast %208 : f32 to vector<1x8x16xf32>
    %212 = arith.mulf %65, %211 : vector<1x8x16xf32>
    %213 = arith.addf %206, %210 : vector<1x8x16xf32>
    %214 = arith.addf %207, %212 : vector<1x8x16xf32>
    %c3_158 = arith.constant 3 : index
    %c2_159 = arith.constant 2 : index
    %215 = memref.load %arg2[%c3_158, %c2_159] : memref<9x16xf32, #tpu.memory_space<smem>>
    %216 = vector.broadcast %215 : f32 to vector<1x8x16xf32>
    %217 = arith.mulf %49, %216 : vector<1x8x16xf32>
    %218 = vector.broadcast %215 : f32 to vector<1x8x16xf32>
    %219 = arith.mulf %47, %218 : vector<1x8x16xf32>
    %220 = arith.addf %213, %217 : vector<1x8x16xf32>
    %221 = arith.addf %214, %219 : vector<1x8x16xf32>
    %c4_160 = arith.constant 4 : index
    %c2_161 = arith.constant 2 : index
    %222 = memref.load %arg2[%c4_160, %c2_161] : memref<9x16xf32, #tpu.memory_space<smem>>
    %223 = vector.broadcast %222 : f32 to vector<1x8x16xf32>
    %224 = arith.mulf %57, %223 : vector<1x8x16xf32>
    %225 = vector.broadcast %222 : f32 to vector<1x8x16xf32>
    %226 = arith.mulf %55, %225 : vector<1x8x16xf32>
    %227 = arith.addf %220, %224 : vector<1x8x16xf32>
    %228 = arith.addf %221, %226 : vector<1x8x16xf32>
    %c5_162 = arith.constant 5 : index
    %c2_163 = arith.constant 2 : index
    %229 = memref.load %arg2[%c5_162, %c2_163] : memref<9x16xf32, #tpu.memory_space<smem>>
    %230 = vector.broadcast %229 : f32 to vector<1x8x16xf32>
    %231 = arith.mulf %65, %230 : vector<1x8x16xf32>
    %232 = vector.broadcast %229 : f32 to vector<1x8x16xf32>
    %233 = arith.mulf %63, %232 : vector<1x8x16xf32>
    %234 = arith.addf %227, %231 : vector<1x8x16xf32>
    %235 = arith.addf %228, %233 : vector<1x8x16xf32>
    %c6_164 = arith.constant 6 : index
    %c2_165 = arith.constant 2 : index
    %236 = memref.load %arg2[%c6_164, %c2_165] : memref<9x16xf32, #tpu.memory_space<smem>>
    %237 = vector.broadcast %236 : f32 to vector<1x8x16xf32>
    %238 = arith.mulf %47, %237 : vector<1x8x16xf32>
    %239 = vector.broadcast %236 : f32 to vector<1x8x16xf32>
    %240 = arith.mulf %51, %239 : vector<1x8x16xf32>
    %241 = arith.addf %234, %238 : vector<1x8x16xf32>
    %242 = arith.addf %235, %240 : vector<1x8x16xf32>
    %c7_166 = arith.constant 7 : index
    %c2_167 = arith.constant 2 : index
    %243 = memref.load %arg2[%c7_166, %c2_167] : memref<9x16xf32, #tpu.memory_space<smem>>
    %244 = vector.broadcast %243 : f32 to vector<1x8x16xf32>
    %245 = arith.mulf %55, %244 : vector<1x8x16xf32>
    %246 = vector.broadcast %243 : f32 to vector<1x8x16xf32>
    %247 = arith.mulf %59, %246 : vector<1x8x16xf32>
    %248 = arith.addf %241, %245 : vector<1x8x16xf32>
    %249 = arith.addf %242, %247 : vector<1x8x16xf32>
    %c8_168 = arith.constant 8 : index
    %c2_169 = arith.constant 2 : index
    %250 = memref.load %arg2[%c8_168, %c2_169] : memref<9x16xf32, #tpu.memory_space<smem>>
    %251 = vector.broadcast %250 : f32 to vector<1x8x16xf32>
    %252 = arith.mulf %63, %251 : vector<1x8x16xf32>
    %253 = vector.broadcast %250 : f32 to vector<1x8x16xf32>
    %254 = arith.mulf %67, %253 : vector<1x8x16xf32>
    %255 = arith.addf %248, %252 : vector<1x8x16xf32>
    %256 = arith.addf %249, %254 : vector<1x8x16xf32>
    %257 = arith.maximumf %255, %256 : vector<1x8x16xf32>
    %258 = vector.shape_cast %257 : vector<1x8x16xf32> to vector<1x8x1x16xf32>
    %c0_170 = arith.constant 0 : index
    %c0_171 = arith.constant 0 : index
    %c2_172 = arith.constant 2 : index
    %c0_173 = arith.constant 0 : index
    %259 = vector.load %arg14[%c0_170, %c0_171, %c2_172, %c0_173] : memref<1x8x16x16xf32, #tpu.memory_space<vmem>>, vector<1x8x1x16xf32>
    tpu.vector_store %arg14[%c0_170, %c0_171, %c2_172, %c0_173], %258 {strides = array<i32>} : memref<1x8x16x16xf32, #tpu.memory_space<vmem>>, vector<1x8x1x16xf32>,
    %c0_174 = arith.constant 0 : index
    %c3_175 = arith.constant 3 : index
    %260 = memref.load %arg2[%c0_174, %c3_175] : memref<9x16xf32, #tpu.memory_space<smem>>
    %261 = vector.broadcast %260 : f32 to vector<1x8x16xf32>
    %262 = arith.mulf %45, %261 : vector<1x8x16xf32>
    %263 = vector.broadcast %260 : f32 to vector<1x8x16xf32>
    %264 = arith.mulf %49, %263 : vector<1x8x16xf32>
    %c1_176 = arith.constant 1 : index
    %c3_177 = arith.constant 3 : index
    %265 = memref.load %arg2[%c1_176, %c3_177] : memref<9x16xf32, #tpu.memory_space<smem>>
    %266 = vector.broadcast %265 : f32 to vector<1x8x16xf32>
    %267 = arith.mulf %53, %266 : vector<1x8x16xf32>
    %268 = vector.broadcast %265 : f32 to vector<1x8x16xf32>
    %269 = arith.mulf %57, %268 : vector<1x8x16xf32>
    %270 = arith.addf %262, %267 : vector<1x8x16xf32>
    %271 = arith.addf %264, %269 : vector<1x8x16xf32>
    %c2_178 = arith.constant 2 : index
    %c3_179 = arith.constant 3 : index
    %272 = memref.load %arg2[%c2_178, %c3_179] : memref<9x16xf32, #tpu.memory_space<smem>>
    %273 = vector.broadcast %272 : f32 to vector<1x8x16xf32>
    %274 = arith.mulf %61, %273 : vector<1x8x16xf32>
    %275 = vector.broadcast %272 : f32 to vector<1x8x16xf32>
    %276 = arith.mulf %65, %275 : vector<1x8x16xf32>
    %277 = arith.addf %270, %274 : vector<1x8x16xf32>
    %278 = arith.addf %271, %276 : vector<1x8x16xf32>
    %c3_180 = arith.constant 3 : index
    %c3_181 = arith.constant 3 : index
    %279 = memref.load %arg2[%c3_180, %c3_181] : memref<9x16xf32, #tpu.memory_space<smem>>
    %280 = vector.broadcast %279 : f32 to vector<1x8x16xf32>
    %281 = arith.mulf %49, %280 : vector<1x8x16xf32>
    %282 = vector.broadcast %279 : f32 to vector<1x8x16xf32>
    %283 = arith.mulf %47, %282 : vector<1x8x16xf32>
    %284 = arith.addf %277, %281 : vector<1x8x16xf32>
    %285 = arith.addf %278, %283 : vector<1x8x16xf32>
    %c4_182 = arith.constant 4 : index
    %c3_183 = arith.constant 3 : index
    %286 = memref.load %arg2[%c4_182, %c3_183] : memref<9x16xf32, #tpu.memory_space<smem>>
    %287 = vector.broadcast %286 : f32 to vector<1x8x16xf32>
    %288 = arith.mulf %57, %287 : vector<1x8x16xf32>
    %289 = vector.broadcast %286 : f32 to vector<1x8x16xf32>
    %290 = arith.mulf %55, %289 : vector<1x8x16xf32>
    %291 = arith.addf %284, %288 : vector<1x8x16xf32>
    %292 = arith.addf %285, %290 : vector<1x8x16xf32>
    %c5_184 = arith.constant 5 : index
    %c3_185 = arith.constant 3 : index
    %293 = memref.load %arg2[%c5_184, %c3_185] : memref<9x16xf32, #tpu.memory_space<smem>>
    %294 = vector.broadcast %293 : f32 to vector<1x8x16xf32>
    %295 = arith.mulf %65, %294 : vector<1x8x16xf32>
    %296 = vector.broadcast %293 : f32 to vector<1x8x16xf32>
    %297 = arith.mulf %63, %296 : vector<1x8x16xf32>
    %298 = arith.addf %291, %295 : vector<1x8x16xf32>
    %299 = arith.addf %292, %297 : vector<1x8x16xf32>
    %c6_186 = arith.constant 6 : index
    %c3_187 = arith.constant 3 : index
    %300 = memref.load %arg2[%c6_186, %c3_187] : memref<9x16xf32, #tpu.memory_space<smem>>
    %301 = vector.broadcast %300 : f32 to vector<1x8x16xf32>
    %302 = arith.mulf %47, %301 : vector<1x8x16xf32>
    %303 = vector.broadcast %300 : f32 to vector<1x8x16xf32>
    %304 = arith.mulf %51, %303 : vector<1x8x16xf32>
    %305 = arith.addf %298, %302 : vector<1x8x16xf32>
    %306 = arith.addf %299, %304 : vector<1x8x16xf32>
    %c7_188 = arith.constant 7 : index
    %c3_189 = arith.constant 3 : index
    %307 = memref.load %arg2[%c7_188, %c3_189] : memref<9x16xf32, #tpu.memory_space<smem>>
    %308 = vector.broadcast %307 : f32 to vector<1x8x16xf32>
    %309 = arith.mulf %55, %308 : vector<1x8x16xf32>
    %310 = vector.broadcast %307 : f32 to vector<1x8x16xf32>
    %311 = arith.mulf %59, %310 : vector<1x8x16xf32>
    %312 = arith.addf %305, %309 : vector<1x8x16xf32>
    %313 = arith.addf %306, %311 : vector<1x8x16xf32>
    %c8_190 = arith.constant 8 : index
    %c3_191 = arith.constant 3 : index
    %314 = memref.load %arg2[%c8_190, %c3_191] : memref<9x16xf32, #tpu.memory_space<smem>>
    %315 = vector.broadcast %314 : f32 to vector<1x8x16xf32>
    %316 = arith.mulf %63, %315 : vector<1x8x16xf32>
    %317 = vector.broadcast %314 : f32 to vector<1x8x16xf32>
    %318 = arith.mulf %67, %317 : vector<1x8x16xf32>
    %319 = arith.addf %312, %316 : vector<1x8x16xf32>
    %320 = arith.addf %313, %318 : vector<1x8x16xf32>
    %321 = arith.maximumf %319, %320 : vector<1x8x16xf32>
    %322 = vector.shape_cast %321 : vector<1x8x16xf32> to vector<1x8x1x16xf32>
    %c0_192 = arith.constant 0 : index
    %c0_193 = arith.constant 0 : index
    %c3_194 = arith.constant 3 : index
    %c0_195 = arith.constant 0 : index
    %323 = vector.load %arg14[%c0_192, %c0_193, %c3_194, %c0_195] : memref<1x8x16x16xf32, #tpu.memory_space<vmem>>, vector<1x8x1x16xf32>
    tpu.vector_store %arg14[%c0_192, %c0_193, %c3_194, %c0_195], %322 {strides = array<i32>} : memref<1x8x16x16xf32, #tpu.memory_space<vmem>>, vector<1x8x1x16xf32>,
    %c0_196 = arith.constant 0 : index
    %c4_197 = arith.constant 4 : index
    %324 = memref.load %arg2[%c0_196, %c4_197] : memref<9x16xf32, #tpu.memory_space<smem>>
    %325 = vector.broadcast %324 : f32 to vector<1x8x16xf32>
    %326 = arith.mulf %45, %325 : vector<1x8x16xf32>
    %327 = vector.broadcast %324 : f32 to vector<1x8x16xf32>
    %328 = arith.mulf %49, %327 : vector<1x8x16xf32>
    %c1_198 = arith.constant 1 : index
    %c4_199 = arith.constant 4 : index
    %329 = memref.load %arg2[%c1_198, %c4_199] : memref<9x16xf32, #tpu.memory_space<smem>>
    %330 = vector.broadcast %329 : f32 to vector<1x8x16xf32>
    %331 = arith.mulf %53, %330 : vector<1x8x16xf32>
    %332 = vector.broadcast %329 : f32 to vector<1x8x16xf32>
    %333 = arith.mulf %57, %332 : vector<1x8x16xf32>
    %334 = arith.addf %326, %331 : vector<1x8x16xf32>
    %335 = arith.addf %328, %333 : vector<1x8x16xf32>
    %c2_200 = arith.constant 2 : index
    %c4_201 = arith.constant 4 : index
    %336 = memref.load %arg2[%c2_200, %c4_201] : memref<9x16xf32, #tpu.memory_space<smem>>
    %337 = vector.broadcast %336 : f32 to vector<1x8x16xf32>
    %338 = arith.mulf %61, %337 : vector<1x8x16xf32>
    %339 = vector.broadcast %336 : f32 to vector<1x8x16xf32>
    %340 = arith.mulf %65, %339 : vector<1x8x16xf32>
    %341 = arith.addf %334, %338 : vector<1x8x16xf32>
    %342 = arith.addf %335, %340 : vector<1x8x16xf32>
    %c3_202 = arith.constant 3 : index
    %c4_203 = arith.constant 4 : index
    %343 = memref.load %arg2[%c3_202, %c4_203] : memref<9x16xf32, #tpu.memory_space<smem>>
    %344 = vector.broadcast %343 : f32 to vector<1x8x16xf32>
    %345 = arith.mulf %49, %344 : vector<1x8x16xf32>
    %346 = vector.broadcast %343 : f32 to vector<1x8x16xf32>
    %347 = arith.mulf %47, %346 : vector<1x8x16xf32>
    %348 = arith.addf %341, %345 : vector<1x8x16xf32>
    %349 = arith.addf %342, %347 : vector<1x8x16xf32>
    %c4_204 = arith.constant 4 : index
    %c4_205 = arith.constant 4 : index
    %350 = memref.load %arg2[%c4_204, %c4_205] : memref<9x16xf32, #tpu.memory_space<smem>>
    %351 = vector.broadcast %350 : f32 to vector<1x8x16xf32>
    %352 = arith.mulf %57, %351 : vector<1x8x16xf32>
    %353 = vector.broadcast %350 : f32 to vector<1x8x16xf32>
    %354 = arith.mulf %55, %353 : vector<1x8x16xf32>
    %355 = arith.addf %348, %352 : vector<1x8x16xf32>
    %356 = arith.addf %349, %354 : vector<1x8x16xf32>
    %c5_206 = arith.constant 5 : index
    %c4_207 = arith.constant 4 : index
    %357 = memref.load %arg2[%c5_206, %c4_207] : memref<9x16xf32, #tpu.memory_space<smem>>
    %358 = vector.broadcast %357 : f32 to vector<1x8x16xf32>
    %359 = arith.mulf %65, %358 : vector<1x8x16xf32>
    %360 = vector.broadcast %357 : f32 to vector<1x8x16xf32>
    %361 = arith.mulf %63, %360 : vector<1x8x16xf32>
    %362 = arith.addf %355, %359 : vector<1x8x16xf32>
    %363 = arith.addf %356, %361 : vector<1x8x16xf32>
    %c6_208 = arith.constant 6 : index
    %c4_209 = arith.constant 4 : index
    %364 = memref.load %arg2[%c6_208, %c4_209] : memref<9x16xf32, #tpu.memory_space<smem>>
    %365 = vector.broadcast %364 : f32 to vector<1x8x16xf32>
    %366 = arith.mulf %47, %365 : vector<1x8x16xf32>
    %367 = vector.broadcast %364 : f32 to vector<1x8x16xf32>
    %368 = arith.mulf %51, %367 : vector<1x8x16xf32>
    %369 = arith.addf %362, %366 : vector<1x8x16xf32>
    %370 = arith.addf %363, %368 : vector<1x8x16xf32>
    %c7_210 = arith.constant 7 : index
    %c4_211 = arith.constant 4 : index
    %371 = memref.load %arg2[%c7_210, %c4_211] : memref<9x16xf32, #tpu.memory_space<smem>>
    %372 = vector.broadcast %371 : f32 to vector<1x8x16xf32>
    %373 = arith.mulf %55, %372 : vector<1x8x16xf32>
    %374 = vector.broadcast %371 : f32 to vector<1x8x16xf32>
    %375 = arith.mulf %59, %374 : vector<1x8x16xf32>
    %376 = arith.addf %369, %373 : vector<1x8x16xf32>
    %377 = arith.addf %370, %375 : vector<1x8x16xf32>
    %c8_212 = arith.constant 8 : index
    %c4_213 = arith.constant 4 : index
    %378 = memref.load %arg2[%c8_212, %c4_213] : memref<9x16xf32, #tpu.memory_space<smem>>
    %379 = vector.broadcast %378 : f32 to vector<1x8x16xf32>
    %380 = arith.mulf %63, %379 : vector<1x8x16xf32>
    %381 = vector.broadcast %378 : f32 to vector<1x8x16xf32>
    %382 = arith.mulf %67, %381 : vector<1x8x16xf32>
    %383 = arith.addf %376, %380 : vector<1x8x16xf32>
    %384 = arith.addf %377, %382 : vector<1x8x16xf32>
    %385 = arith.maximumf %383, %384 : vector<1x8x16xf32>
    %386 = vector.shape_cast %385 : vector<1x8x16xf32> to vector<1x8x1x16xf32>
    %c0_214 = arith.constant 0 : index
    %c0_215 = arith.constant 0 : index
    %c4_216 = arith.constant 4 : index
    %c0_217 = arith.constant 0 : index
    %387 = vector.load %arg14[%c0_214, %c0_215, %c4_216, %c0_217] : memref<1x8x16x16xf32, #tpu.memory_space<vmem>>, vector<1x8x1x16xf32>
    tpu.vector_store %arg14[%c0_214, %c0_215, %c4_216, %c0_217], %386 {strides = array<i32>} : memref<1x8x16x16xf32, #tpu.memory_space<vmem>>, vector<1x8x1x16xf32>,
    %c0_218 = arith.constant 0 : index
    %c5_219 = arith.constant 5 : index
    %388 = memref.load %arg2[%c0_218, %c5_219] : memref<9x16xf32, #tpu.memory_space<smem>>
    %389 = vector.broadcast %388 : f32 to vector<1x8x16xf32>
    %390 = arith.mulf %45, %389 : vector<1x8x16xf32>
    %391 = vector.broadcast %388 : f32 to vector<1x8x16xf32>
    %392 = arith.mulf %49, %391 : vector<1x8x16xf32>
    %c1_220 = arith.constant 1 : index
    %c5_221 = arith.constant 5 : index
    %393 = memref.load %arg2[%c1_220, %c5_221] : memref<9x16xf32, #tpu.memory_space<smem>>
    %394 = vector.broadcast %393 : f32 to vector<1x8x16xf32>
    %395 = arith.mulf %53, %394 : vector<1x8x16xf32>
    %396 = vector.broadcast %393 : f32 to vector<1x8x16xf32>
    %397 = arith.mulf %57, %396 : vector<1x8x16xf32>
    %398 = arith.addf %390, %395 : vector<1x8x16xf32>
    %399 = arith.addf %392, %397 : vector<1x8x16xf32>
    %c2_222 = arith.constant 2 : index
    %c5_223 = arith.constant 5 : index
    %400 = memref.load %arg2[%c2_222, %c5_223] : memref<9x16xf32, #tpu.memory_space<smem>>
    %401 = vector.broadcast %400 : f32 to vector<1x8x16xf32>
    %402 = arith.mulf %61, %401 : vector<1x8x16xf32>
    %403 = vector.broadcast %400 : f32 to vector<1x8x16xf32>
    %404 = arith.mulf %65, %403 : vector<1x8x16xf32>
    %405 = arith.addf %398, %402 : vector<1x8x16xf32>
    %406 = arith.addf %399, %404 : vector<1x8x16xf32>
    %c3_224 = arith.constant 3 : index
    %c5_225 = arith.constant 5 : index
    %407 = memref.load %arg2[%c3_224, %c5_225] : memref<9x16xf32, #tpu.memory_space<smem>>
    %408 = vector.broadcast %407 : f32 to vector<1x8x16xf32>
    %409 = arith.mulf %49, %408 : vector<1x8x16xf32>
    %410 = vector.broadcast %407 : f32 to vector<1x8x16xf32>
    %411 = arith.mulf %47, %410 : vector<1x8x16xf32>
    %412 = arith.addf %405, %409 : vector<1x8x16xf32>
    %413 = arith.addf %406, %411 : vector<1x8x16xf32>
    %c4_226 = arith.constant 4 : index
    %c5_227 = arith.constant 5 : index
    %414 = memref.load %arg2[%c4_226, %c5_227] : memref<9x16xf32, #tpu.memory_space<smem>>
    %415 = vector.broadcast %414 : f32 to vector<1x8x16xf32>
    %416 = arith.mulf %57, %415 : vector<1x8x16xf32>
    %417 = vector.broadcast %414 : f32 to vector<1x8x16xf32>
    %418 = arith.mulf %55, %417 : vector<1x8x16xf32>
    %419 = arith.addf %412, %416 : vector<1x8x16xf32>
    %420 = arith.addf %413, %418 : vector<1x8x16xf32>
    %c5_228 = arith.constant 5 : index
    %c5_229 = arith.constant 5 : index
    %421 = memref.load %arg2[%c5_228, %c5_229] : memref<9x16xf32, #tpu.memory_space<smem>>
    %422 = vector.broadcast %421 : f32 to vector<1x8x16xf32>
    %423 = arith.mulf %65, %422 : vector<1x8x16xf32>
    %424 = vector.broadcast %421 : f32 to vector<1x8x16xf32>
    %425 = arith.mulf %63, %424 : vector<1x8x16xf32>
    %426 = arith.addf %419, %423 : vector<1x8x16xf32>
    %427 = arith.addf %420, %425 : vector<1x8x16xf32>
    %c6_230 = arith.constant 6 : index
    %c5_231 = arith.constant 5 : index
    %428 = memref.load %arg2[%c6_230, %c5_231] : memref<9x16xf32, #tpu.memory_space<smem>>
    %429 = vector.broadcast %428 : f32 to vector<1x8x16xf32>
    %430 = arith.mulf %47, %429 : vector<1x8x16xf32>
    %431 = vector.broadcast %428 : f32 to vector<1x8x16xf32>
    %432 = arith.mulf %51, %431 : vector<1x8x16xf32>
    %433 = arith.addf %426, %430 : vector<1x8x16xf32>
    %434 = arith.addf %427, %432 : vector<1x8x16xf32>
    %c7_232 = arith.constant 7 : index
    %c5_233 = arith.constant 5 : index
    %435 = memref.load %arg2[%c7_232, %c5_233] : memref<9x16xf32, #tpu.memory_space<smem>>
    %436 = vector.broadcast %435 : f32 to vector<1x8x16xf32>
    %437 = arith.mulf %55, %436 : vector<1x8x16xf32>
    %438 = vector.broadcast %435 : f32 to vector<1x8x16xf32>
    %439 = arith.mulf %59, %438 : vector<1x8x16xf32>
    %440 = arith.addf %433, %437 : vector<1x8x16xf32>
    %441 = arith.addf %434, %439 : vector<1x8x16xf32>
    %c8_234 = arith.constant 8 : index
    %c5_235 = arith.constant 5 : index
    %442 = memref.load %arg2[%c8_234, %c5_235] : memref<9x16xf32, #tpu.memory_space<smem>>
    %443 = vector.broadcast %442 : f32 to vector<1x8x16xf32>
    %444 = arith.mulf %63, %443 : vector<1x8x16xf32>
    %445 = vector.broadcast %442 : f32 to vector<1x8x16xf32>
    %446 = arith.mulf %67, %445 : vector<1x8x16xf32>
    %447 = arith.addf %440, %444 : vector<1x8x16xf32>
    %448 = arith.addf %441, %446 : vector<1x8x16xf32>
    %449 = arith.maximumf %447, %448 : vector<1x8x16xf32>
    %450 = vector.shape_cast %449 : vector<1x8x16xf32> to vector<1x8x1x16xf32>
    %c0_236 = arith.constant 0 : index
    %c0_237 = arith.constant 0 : index
    %c5_238 = arith.constant 5 : index
    %c0_239 = arith.constant 0 : index
    %451 = vector.load %arg14[%c0_236, %c0_237, %c5_238, %c0_239] : memref<1x8x16x16xf32, #tpu.memory_space<vmem>>, vector<1x8x1x16xf32>
    tpu.vector_store %arg14[%c0_236, %c0_237, %c5_238, %c0_239], %450 {strides = array<i32>} : memref<1x8x16x16xf32, #tpu.memory_space<vmem>>, vector<1x8x1x16xf32>,
    %c0_240 = arith.constant 0 : index
    %c6_241 = arith.constant 6 : index
    %452 = memref.load %arg2[%c0_240, %c6_241] : memref<9x16xf32, #tpu.memory_space<smem>>
    %453 = vector.broadcast %452 : f32 to vector<1x8x16xf32>
    %454 = arith.mulf %45, %453 : vector<1x8x16xf32>
    %455 = vector.broadcast %452 : f32 to vector<1x8x16xf32>
    %456 = arith.mulf %49, %455 : vector<1x8x16xf32>
    %c1_242 = arith.constant 1 : index
    %c6_243 = arith.constant 6 : index
    %457 = memref.load %arg2[%c1_242, %c6_243] : memref<9x16xf32, #tpu.memory_space<smem>>
    %458 = vector.broadcast %457 : f32 to vector<1x8x16xf32>
    %459 = arith.mulf %53, %458 : vector<1x8x16xf32>
    %460 = vector.broadcast %457 : f32 to vector<1x8x16xf32>
    %461 = arith.mulf %57, %460 : vector<1x8x16xf32>
    %462 = arith.addf %454, %459 : vector<1x8x16xf32>
    %463 = arith.addf %456, %461 : vector<1x8x16xf32>
    %c2_244 = arith.constant 2 : index
    %c6_245 = arith.constant 6 : index
    %464 = memref.load %arg2[%c2_244, %c6_245] : memref<9x16xf32, #tpu.memory_space<smem>>
    %465 = vector.broadcast %464 : f32 to vector<1x8x16xf32>
    %466 = arith.mulf %61, %465 : vector<1x8x16xf32>
    %467 = vector.broadcast %464 : f32 to vector<1x8x16xf32>
    %468 = arith.mulf %65, %467 : vector<1x8x16xf32>
    %469 = arith.addf %462, %466 : vector<1x8x16xf32>
    %470 = arith.addf %463, %468 : vector<1x8x16xf32>
    %c3_246 = arith.constant 3 : index
    %c6_247 = arith.constant 6 : index
    %471 = memref.load %arg2[%c3_246, %c6_247] : memref<9x16xf32, #tpu.memory_space<smem>>
    %472 = vector.broadcast %471 : f32 to vector<1x8x16xf32>
    %473 = arith.mulf %49, %472 : vector<1x8x16xf32>
    %474 = vector.broadcast %471 : f32 to vector<1x8x16xf32>
    %475 = arith.mulf %47, %474 : vector<1x8x16xf32>
    %476 = arith.addf %469, %473 : vector<1x8x16xf32>
    %477 = arith.addf %470, %475 : vector<1x8x16xf32>
    %c4_248 = arith.constant 4 : index
    %c6_249 = arith.constant 6 : index
    %478 = memref.load %arg2[%c4_248, %c6_249] : memref<9x16xf32, #tpu.memory_space<smem>>
    %479 = vector.broadcast %478 : f32 to vector<1x8x16xf32>
    %480 = arith.mulf %57, %479 : vector<1x8x16xf32>
    %481 = vector.broadcast %478 : f32 to vector<1x8x16xf32>
    %482 = arith.mulf %55, %481 : vector<1x8x16xf32>
    %483 = arith.addf %476, %480 : vector<1x8x16xf32>
    %484 = arith.addf %477, %482 : vector<1x8x16xf32>
    %c5_250 = arith.constant 5 : index
    %c6_251 = arith.constant 6 : index
    %485 = memref.load %arg2[%c5_250, %c6_251] : memref<9x16xf32, #tpu.memory_space<smem>>
    %486 = vector.broadcast %485 : f32 to vector<1x8x16xf32>
    %487 = arith.mulf %65, %486 : vector<1x8x16xf32>
    %488 = vector.broadcast %485 : f32 to vector<1x8x16xf32>
    %489 = arith.mulf %63, %488 : vector<1x8x16xf32>
    %490 = arith.addf %483, %487 : vector<1x8x16xf32>
    %491 = arith.addf %484, %489 : vector<1x8x16xf32>
    %c6_252 = arith.constant 6 : index
    %c6_253 = arith.constant 6 : index
    %492 = memref.load %arg2[%c6_252, %c6_253] : memref<9x16xf32, #tpu.memory_space<smem>>
    %493 = vector.broadcast %492 : f32 to vector<1x8x16xf32>
    %494 = arith.mulf %47, %493 : vector<1x8x16xf32>
    %495 = vector.broadcast %492 : f32 to vector<1x8x16xf32>
    %496 = arith.mulf %51, %495 : vector<1x8x16xf32>
    %497 = arith.addf %490, %494 : vector<1x8x16xf32>
    %498 = arith.addf %491, %496 : vector<1x8x16xf32>
    %c7_254 = arith.constant 7 : index
    %c6_255 = arith.constant 6 : index
    %499 = memref.load %arg2[%c7_254, %c6_255] : memref<9x16xf32, #tpu.memory_space<smem>>
    %500 = vector.broadcast %499 : f32 to vector<1x8x16xf32>
    %501 = arith.mulf %55, %500 : vector<1x8x16xf32>
    %502 = vector.broadcast %499 : f32 to vector<1x8x16xf32>
    %503 = arith.mulf %59, %502 : vector<1x8x16xf32>
    %504 = arith.addf %497, %501 : vector<1x8x16xf32>
    %505 = arith.addf %498, %503 : vector<1x8x16xf32>
    %c8_256 = arith.constant 8 : index
    %c6_257 = arith.constant 6 : index
    %506 = memref.load %arg2[%c8_256, %c6_257] : memref<9x16xf32, #tpu.memory_space<smem>>
    %507 = vector.broadcast %506 : f32 to vector<1x8x16xf32>
    %508 = arith.mulf %63, %507 : vector<1x8x16xf32>
    %509 = vector.broadcast %506 : f32 to vector<1x8x16xf32>
    %510 = arith.mulf %67, %509 : vector<1x8x16xf32>
    %511 = arith.addf %504, %508 : vector<1x8x16xf32>
    %512 = arith.addf %505, %510 : vector<1x8x16xf32>
    %513 = arith.maximumf %511, %512 : vector<1x8x16xf32>
    %514 = vector.shape_cast %513 : vector<1x8x16xf32> to vector<1x8x1x16xf32>
    %c0_258 = arith.constant 0 : index
    %c0_259 = arith.constant 0 : index
    %c6_260 = arith.constant 6 : index
    %c0_261 = arith.constant 0 : index
    %515 = vector.load %arg14[%c0_258, %c0_259, %c6_260, %c0_261] : memref<1x8x16x16xf32, #tpu.memory_space<vmem>>, vector<1x8x1x16xf32>
    tpu.vector_store %arg14[%c0_258, %c0_259, %c6_260, %c0_261], %514 {strides = array<i32>} : memref<1x8x16x16xf32, #tpu.memory_space<vmem>>, vector<1x8x1x16xf32>,
    %c0_262 = arith.constant 0 : index
    %c7_263 = arith.constant 7 : index
    %516 = memref.load %arg2[%c0_262, %c7_263] : memref<9x16xf32, #tpu.memory_space<smem>>
    %517 = vector.broadcast %516 : f32 to vector<1x8x16xf32>
    %518 = arith.mulf %45, %517 : vector<1x8x16xf32>
    %519 = vector.broadcast %516 : f32 to vector<1x8x16xf32>
    %520 = arith.mulf %49, %519 : vector<1x8x16xf32>
    %c1_264 = arith.constant 1 : index
    %c7_265 = arith.constant 7 : index
    %521 = memref.load %arg2[%c1_264, %c7_265] : memref<9x16xf32, #tpu.memory_space<smem>>
    %522 = vector.broadcast %521 : f32 to vector<1x8x16xf32>
    %523 = arith.mulf %53, %522 : vector<1x8x16xf32>
    %524 = vector.broadcast %521 : f32 to vector<1x8x16xf32>
    %525 = arith.mulf %57, %524 : vector<1x8x16xf32>
    %526 = arith.addf %518, %523 : vector<1x8x16xf32>
    %527 = arith.addf %520, %525 : vector<1x8x16xf32>
    %c2_266 = arith.constant 2 : index
    %c7_267 = arith.constant 7 : index
    %528 = memref.load %arg2[%c2_266, %c7_267] : memref<9x16xf32, #tpu.memory_space<smem>>
    %529 = vector.broadcast %528 : f32 to vector<1x8x16xf32>
    %530 = arith.mulf %61, %529 : vector<1x8x16xf32>
    %531 = vector.broadcast %528 : f32 to vector<1x8x16xf32>
    %532 = arith.mulf %65, %531 : vector<1x8x16xf32>
    %533 = arith.addf %526, %530 : vector<1x8x16xf32>
    %534 = arith.addf %527, %532 : vector<1x8x16xf32>
    %c3_268 = arith.constant 3 : index
    %c7_269 = arith.constant 7 : index
    %535 = memref.load %arg2[%c3_268, %c7_269] : memref<9x16xf32, #tpu.memory_space<smem>>
    %536 = vector.broadcast %535 : f32 to vector<1x8x16xf32>
    %537 = arith.mulf %49, %536 : vector<1x8x16xf32>
    %538 = vector.broadcast %535 : f32 to vector<1x8x16xf32>
    %539 = arith.mulf %47, %538 : vector<1x8x16xf32>
    %540 = arith.addf %533, %537 : vector<1x8x16xf32>
    %541 = arith.addf %534, %539 : vector<1x8x16xf32>
    %c4_270 = arith.constant 4 : index
    %c7_271 = arith.constant 7 : index
    %542 = memref.load %arg2[%c4_270, %c7_271] : memref<9x16xf32, #tpu.memory_space<smem>>
    %543 = vector.broadcast %542 : f32 to vector<1x8x16xf32>
    %544 = arith.mulf %57, %543 : vector<1x8x16xf32>
    %545 = vector.broadcast %542 : f32 to vector<1x8x16xf32>
    %546 = arith.mulf %55, %545 : vector<1x8x16xf32>
    %547 = arith.addf %540, %544 : vector<1x8x16xf32>
    %548 = arith.addf %541, %546 : vector<1x8x16xf32>
    %c5_272 = arith.constant 5 : index
    %c7_273 = arith.constant 7 : index
    %549 = memref.load %arg2[%c5_272, %c7_273] : memref<9x16xf32, #tpu.memory_space<smem>>
    %550 = vector.broadcast %549 : f32 to vector<1x8x16xf32>
    %551 = arith.mulf %65, %550 : vector<1x8x16xf32>
    %552 = vector.broadcast %549 : f32 to vector<1x8x16xf32>
    %553 = arith.mulf %63, %552 : vector<1x8x16xf32>
    %554 = arith.addf %547, %551 : vector<1x8x16xf32>
    %555 = arith.addf %548, %553 : vector<1x8x16xf32>
    %c6_274 = arith.constant 6 : index
    %c7_275 = arith.constant 7 : index
    %556 = memref.load %arg2[%c6_274, %c7_275] : memref<9x16xf32, #tpu.memory_space<smem>>
    %557 = vector.broadcast %556 : f32 to vector<1x8x16xf32>
    %558 = arith.mulf %47, %557 : vector<1x8x16xf32>
    %559 = vector.broadcast %556 : f32 to vector<1x8x16xf32>
    %560 = arith.mulf %51, %559 : vector<1x8x16xf32>
    %561 = arith.addf %554, %558 : vector<1x8x16xf32>
    %562 = arith.addf %555, %560 : vector<1x8x16xf32>
    %c7_276 = arith.constant 7 : index
    %c7_277 = arith.constant 7 : index
    %563 = memref.load %arg2[%c7_276, %c7_277] : memref<9x16xf32, #tpu.memory_space<smem>>
    %564 = vector.broadcast %563 : f32 to vector<1x8x16xf32>
    %565 = arith.mulf %55, %564 : vector<1x8x16xf32>
    %566 = vector.broadcast %563 : f32 to vector<1x8x16xf32>
    %567 = arith.mulf %59, %566 : vector<1x8x16xf32>
    %568 = arith.addf %561, %565 : vector<1x8x16xf32>
    %569 = arith.addf %562, %567 : vector<1x8x16xf32>
    %c8_278 = arith.constant 8 : index
    %c7_279 = arith.constant 7 : index
    %570 = memref.load %arg2[%c8_278, %c7_279] : memref<9x16xf32, #tpu.memory_space<smem>>
    %571 = vector.broadcast %570 : f32 to vector<1x8x16xf32>
    %572 = arith.mulf %63, %571 : vector<1x8x16xf32>
    %573 = vector.broadcast %570 : f32 to vector<1x8x16xf32>
    %574 = arith.mulf %67, %573 : vector<1x8x16xf32>
    %575 = arith.addf %568, %572 : vector<1x8x16xf32>
    %576 = arith.addf %569, %574 : vector<1x8x16xf32>
    %577 = arith.maximumf %575, %576 : vector<1x8x16xf32>
    %578 = vector.shape_cast %577 : vector<1x8x16xf32> to vector<1x8x1x16xf32>
    %c0_280 = arith.constant 0 : index
    %c0_281 = arith.constant 0 : index
    %c7_282 = arith.constant 7 : index
    %c0_283 = arith.constant 0 : index
    %579 = vector.load %arg14[%c0_280, %c0_281, %c7_282, %c0_283] : memref<1x8x16x16xf32, #tpu.memory_space<vmem>>, vector<1x8x1x16xf32>
    tpu.vector_store %arg14[%c0_280, %c0_281, %c7_282, %c0_283], %578 {strides = array<i32>} : memref<1x8x16x16xf32, #tpu.memory_space<vmem>>, vector<1x8x1x16xf32>,
    %c0_284 = arith.constant 0 : index
    %c8_285 = arith.constant 8 : index
    %580 = memref.load %arg2[%c0_284, %c8_285] : memref<9x16xf32, #tpu.memory_space<smem>>
    %581 = vector.broadcast %580 : f32 to vector<1x8x16xf32>
    %582 = arith.mulf %45, %581 : vector<1x8x16xf32>
    %583 = vector.broadcast %580 : f32 to vector<1x8x16xf32>
    %584 = arith.mulf %49, %583 : vector<1x8x16xf32>
    %c1_286 = arith.constant 1 : index
    %c8_287 = arith.constant 8 : index
    %585 = memref.load %arg2[%c1_286, %c8_287] : memref<9x16xf32, #tpu.memory_space<smem>>
    %586 = vector.broadcast %585 : f32 to vector<1x8x16xf32>
    %587 = arith.mulf %53, %586 : vector<1x8x16xf32>
    %588 = vector.broadcast %585 : f32 to vector<1x8x16xf32>
    %589 = arith.mulf %57, %588 : vector<1x8x16xf32>
    %590 = arith.addf %582, %587 : vector<1x8x16xf32>
    %591 = arith.addf %584, %589 : vector<1x8x16xf32>
    %c2_288 = arith.constant 2 : index
    %c8_289 = arith.constant 8 : index
    %592 = memref.load %arg2[%c2_288, %c8_289] : memref<9x16xf32, #tpu.memory_space<smem>>
    %593 = vector.broadcast %592 : f32 to vector<1x8x16xf32>
    %594 = arith.mulf %61, %593 : vector<1x8x16xf32>
    %595 = vector.broadcast %592 : f32 to vector<1x8x16xf32>
    %596 = arith.mulf %65, %595 : vector<1x8x16xf32>
    %597 = arith.addf %590, %594 : vector<1x8x16xf32>
    %598 = arith.addf %591, %596 : vector<1x8x16xf32>
    %c3_290 = arith.constant 3 : index
    %c8_291 = arith.constant 8 : index
    %599 = memref.load %arg2[%c3_290, %c8_291] : memref<9x16xf32, #tpu.memory_space<smem>>
    %600 = vector.broadcast %599 : f32 to vector<1x8x16xf32>
    %601 = arith.mulf %49, %600 : vector<1x8x16xf32>
    %602 = vector.broadcast %599 : f32 to vector<1x8x16xf32>
    %603 = arith.mulf %47, %602 : vector<1x8x16xf32>
    %604 = arith.addf %597, %601 : vector<1x8x16xf32>
    %605 = arith.addf %598, %603 : vector<1x8x16xf32>
    %c4_292 = arith.constant 4 : index
    %c8_293 = arith.constant 8 : index
    %606 = memref.load %arg2[%c4_292, %c8_293] : memref<9x16xf32, #tpu.memory_space<smem>>
    %607 = vector.broadcast %606 : f32 to vector<1x8x16xf32>
    %608 = arith.mulf %57, %607 : vector<1x8x16xf32>
    %609 = vector.broadcast %606 : f32 to vector<1x8x16xf32>
    %610 = arith.mulf %55, %609 : vector<1x8x16xf32>
    %611 = arith.addf %604, %608 : vector<1x8x16xf32>
    %612 = arith.addf %605, %610 : vector<1x8x16xf32>
    %c5_294 = arith.constant 5 : index
    %c8_295 = arith.constant 8 : index
    %613 = memref.load %arg2[%c5_294, %c8_295] : memref<9x16xf32, #tpu.memory_space<smem>>
    %614 = vector.broadcast %613 : f32 to vector<1x8x16xf32>
    %615 = arith.mulf %65, %614 : vector<1x8x16xf32>
    %616 = vector.broadcast %613 : f32 to vector<1x8x16xf32>
    %617 = arith.mulf %63, %616 : vector<1x8x16xf32>
    %618 = arith.addf %611, %615 : vector<1x8x16xf32>
    %619 = arith.addf %612, %617 : vector<1x8x16xf32>
    %c6_296 = arith.constant 6 : index
    %c8_297 = arith.constant 8 : index
    %620 = memref.load %arg2[%c6_296, %c8_297] : memref<9x16xf32, #tpu.memory_space<smem>>
    %621 = vector.broadcast %620 : f32 to vector<1x8x16xf32>
    %622 = arith.mulf %47, %621 : vector<1x8x16xf32>
    %623 = vector.broadcast %620 : f32 to vector<1x8x16xf32>
    %624 = arith.mulf %51, %623 : vector<1x8x16xf32>
    %625 = arith.addf %618, %622 : vector<1x8x16xf32>
    %626 = arith.addf %619, %624 : vector<1x8x16xf32>
    %c7_298 = arith.constant 7 : index
    %c8_299 = arith.constant 8 : index
    %627 = memref.load %arg2[%c7_298, %c8_299] : memref<9x16xf32, #tpu.memory_space<smem>>
    %628 = vector.broadcast %627 : f32 to vector<1x8x16xf32>
    %629 = arith.mulf %55, %628 : vector<1x8x16xf32>
    %630 = vector.broadcast %627 : f32 to vector<1x8x16xf32>
    %631 = arith.mulf %59, %630 : vector<1x8x16xf32>
    %632 = arith.addf %625, %629 : vector<1x8x16xf32>
    %633 = arith.addf %626, %631 : vector<1x8x16xf32>
    %c8_300 = arith.constant 8 : index
    %c8_301 = arith.constant 8 : index
    %634 = memref.load %arg2[%c8_300, %c8_301] : memref<9x16xf32, #tpu.memory_space<smem>>
    %635 = vector.broadcast %634 : f32 to vector<1x8x16xf32>
    %636 = arith.mulf %63, %635 : vector<1x8x16xf32>
    %637 = vector.broadcast %634 : f32 to vector<1x8x16xf32>
    %638 = arith.mulf %67, %637 : vector<1x8x16xf32>
    %639 = arith.addf %632, %636 : vector<1x8x16xf32>
    %640 = arith.addf %633, %638 : vector<1x8x16xf32>
    %641 = arith.maximumf %639, %640 : vector<1x8x16xf32>
    %642 = vector.shape_cast %641 : vector<1x8x16xf32> to vector<1x8x1x16xf32>
    %c0_302 = arith.constant 0 : index
    %c0_303 = arith.constant 0 : index
    %c8_304 = arith.constant 8 : index
    %c0_305 = arith.constant 0 : index
    %643 = vector.load %arg14[%c0_302, %c0_303, %c8_304, %c0_305] : memref<1x8x16x16xf32, #tpu.memory_space<vmem>>, vector<1x8x1x16xf32>
    tpu.vector_store %arg14[%c0_302, %c0_303, %c8_304, %c0_305], %642 {strides = array<i32>} : memref<1x8x16x16xf32, #tpu.memory_space<vmem>>, vector<1x8x1x16xf32>,
    %c0_306 = arith.constant 0 : index
    %c9 = arith.constant 9 : index
    %644 = memref.load %arg2[%c0_306, %c9] : memref<9x16xf32, #tpu.memory_space<smem>>
    %645 = vector.broadcast %644 : f32 to vector<1x8x16xf32>
    %646 = arith.mulf %45, %645 : vector<1x8x16xf32>
    %647 = vector.broadcast %644 : f32 to vector<1x8x16xf32>
    %648 = arith.mulf %49, %647 : vector<1x8x16xf32>
    %c1_307 = arith.constant 1 : index
    %c9_308 = arith.constant 9 : index
    %649 = memref.load %arg2[%c1_307, %c9_308] : memref<9x16xf32, #tpu.memory_space<smem>>
    %650 = vector.broadcast %649 : f32 to vector<1x8x16xf32>
    %651 = arith.mulf %53, %650 : vector<1x8x16xf32>
    %652 = vector.broadcast %649 : f32 to vector<1x8x16xf32>
    %653 = arith.mulf %57, %652 : vector<1x8x16xf32>
    %654 = arith.addf %646, %651 : vector<1x8x16xf32>
    %655 = arith.addf %648, %653 : vector<1x8x16xf32>
    %c2_309 = arith.constant 2 : index
    %c9_310 = arith.constant 9 : index
    %656 = memref.load %arg2[%c2_309, %c9_310] : memref<9x16xf32, #tpu.memory_space<smem>>
    %657 = vector.broadcast %656 : f32 to vector<1x8x16xf32>
    %658 = arith.mulf %61, %657 : vector<1x8x16xf32>
    %659 = vector.broadcast %656 : f32 to vector<1x8x16xf32>
    %660 = arith.mulf %65, %659 : vector<1x8x16xf32>
    %661 = arith.addf %654, %658 : vector<1x8x16xf32>
    %662 = arith.addf %655, %660 : vector<1x8x16xf32>
    %c3_311 = arith.constant 3 : index
    %c9_312 = arith.constant 9 : index
    %663 = memref.load %arg2[%c3_311, %c9_312] : memref<9x16xf32, #tpu.memory_space<smem>>
    %664 = vector.broadcast %663 : f32 to vector<1x8x16xf32>
    %665 = arith.mulf %49, %664 : vector<1x8x16xf32>
    %666 = vector.broadcast %663 : f32 to vector<1x8x16xf32>
    %667 = arith.mulf %47, %666 : vector<1x8x16xf32>
    %668 = arith.addf %661, %665 : vector<1x8x16xf32>
    %669 = arith.addf %662, %667 : vector<1x8x16xf32>
    %c4_313 = arith.constant 4 : index
    %c9_314 = arith.constant 9 : index
    %670 = memref.load %arg2[%c4_313, %c9_314] : memref<9x16xf32, #tpu.memory_space<smem>>
    %671 = vector.broadcast %670 : f32 to vector<1x8x16xf32>
    %672 = arith.mulf %57, %671 : vector<1x8x16xf32>
    %673 = vector.broadcast %670 : f32 to vector<1x8x16xf32>
    %674 = arith.mulf %55, %673 : vector<1x8x16xf32>
    %675 = arith.addf %668, %672 : vector<1x8x16xf32>
    %676 = arith.addf %669, %674 : vector<1x8x16xf32>
    %c5_315 = arith.constant 5 : index
    %c9_316 = arith.constant 9 : index
    %677 = memref.load %arg2[%c5_315, %c9_316] : memref<9x16xf32, #tpu.memory_space<smem>>
    %678 = vector.broadcast %677 : f32 to vector<1x8x16xf32>
    %679 = arith.mulf %65, %678 : vector<1x8x16xf32>
    %680 = vector.broadcast %677 : f32 to vector<1x8x16xf32>
    %681 = arith.mulf %63, %680 : vector<1x8x16xf32>
    %682 = arith.addf %675, %679 : vector<1x8x16xf32>
    %683 = arith.addf %676, %681 : vector<1x8x16xf32>
    %c6_317 = arith.constant 6 : index
    %c9_318 = arith.constant 9 : index
    %684 = memref.load %arg2[%c6_317, %c9_318] : memref<9x16xf32, #tpu.memory_space<smem>>
    %685 = vector.broadcast %684 : f32 to vector<1x8x16xf32>
    %686 = arith.mulf %47, %685 : vector<1x8x16xf32>
    %687 = vector.broadcast %684 : f32 to vector<1x8x16xf32>
    %688 = arith.mulf %51, %687 : vector<1x8x16xf32>
    %689 = arith.addf %682, %686 : vector<1x8x16xf32>
    %690 = arith.addf %683, %688 : vector<1x8x16xf32>
    %c7_319 = arith.constant 7 : index
    %c9_320 = arith.constant 9 : index
    %691 = memref.load %arg2[%c7_319, %c9_320] : memref<9x16xf32, #tpu.memory_space<smem>>
    %692 = vector.broadcast %691 : f32 to vector<1x8x16xf32>
    %693 = arith.mulf %55, %692 : vector<1x8x16xf32>
    %694 = vector.broadcast %691 : f32 to vector<1x8x16xf32>
    %695 = arith.mulf %59, %694 : vector<1x8x16xf32>
    %696 = arith.addf %689, %693 : vector<1x8x16xf32>
    %697 = arith.addf %690, %695 : vector<1x8x16xf32>
    %c8_321 = arith.constant 8 : index
    %c9_322 = arith.constant 9 : index
    %698 = memref.load %arg2[%c8_321, %c9_322] : memref<9x16xf32, #tpu.memory_space<smem>>
    %699 = vector.broadcast %698 : f32 to vector<1x8x16xf32>
    %700 = arith.mulf %63, %699 : vector<1x8x16xf32>
    %701 = vector.broadcast %698 : f32 to vector<1x8x16xf32>
    %702 = arith.mulf %67, %701 : vector<1x8x16xf32>
    %703 = arith.addf %696, %700 : vector<1x8x16xf32>
    %704 = arith.addf %697, %702 : vector<1x8x16xf32>
    %705 = arith.maximumf %703, %704 : vector<1x8x16xf32>
    %706 = vector.shape_cast %705 : vector<1x8x16xf32> to vector<1x8x1x16xf32>
    %c0_323 = arith.constant 0 : index
    %c0_324 = arith.constant 0 : index
    %c9_325 = arith.constant 9 : index
    %c0_326 = arith.constant 0 : index
    %707 = vector.load %arg14[%c0_323, %c0_324, %c9_325, %c0_326] : memref<1x8x16x16xf32, #tpu.memory_space<vmem>>, vector<1x8x1x16xf32>
    tpu.vector_store %arg14[%c0_323, %c0_324, %c9_325, %c0_326], %706 {strides = array<i32>} : memref<1x8x16x16xf32, #tpu.memory_space<vmem>>, vector<1x8x1x16xf32>,
    %c0_327 = arith.constant 0 : index
    %c10 = arith.constant 10 : index
    %708 = memref.load %arg2[%c0_327, %c10] : memref<9x16xf32, #tpu.memory_space<smem>>
    %709 = vector.broadcast %708 : f32 to vector<1x8x16xf32>
    %710 = arith.mulf %45, %709 : vector<1x8x16xf32>
    %711 = vector.broadcast %708 : f32 to vector<1x8x16xf32>
    %712 = arith.mulf %49, %711 : vector<1x8x16xf32>
    %c1_328 = arith.constant 1 : index
    %c10_329 = arith.constant 10 : index
    %713 = memref.load %arg2[%c1_328, %c10_329] : memref<9x16xf32, #tpu.memory_space<smem>>
    %714 = vector.broadcast %713 : f32 to vector<1x8x16xf32>
    %715 = arith.mulf %53, %714 : vector<1x8x16xf32>
    %716 = vector.broadcast %713 : f32 to vector<1x8x16xf32>
    %717 = arith.mulf %57, %716 : vector<1x8x16xf32>
    %718 = arith.addf %710, %715 : vector<1x8x16xf32>
    %719 = arith.addf %712, %717 : vector<1x8x16xf32>
    %c2_330 = arith.constant 2 : index
    %c10_331 = arith.constant 10 : index
    %720 = memref.load %arg2[%c2_330, %c10_331] : memref<9x16xf32, #tpu.memory_space<smem>>
    %721 = vector.broadcast %720 : f32 to vector<1x8x16xf32>
    %722 = arith.mulf %61, %721 : vector<1x8x16xf32>
    %723 = vector.broadcast %720 : f32 to vector<1x8x16xf32>
    %724 = arith.mulf %65, %723 : vector<1x8x16xf32>
    %725 = arith.addf %718, %722 : vector<1x8x16xf32>
    %726 = arith.addf %719, %724 : vector<1x8x16xf32>
    %c3_332 = arith.constant 3 : index
    %c10_333 = arith.constant 10 : index
    %727 = memref.load %arg2[%c3_332, %c10_333] : memref<9x16xf32, #tpu.memory_space<smem>>
    %728 = vector.broadcast %727 : f32 to vector<1x8x16xf32>
    %729 = arith.mulf %49, %728 : vector<1x8x16xf32>
    %730 = vector.broadcast %727 : f32 to vector<1x8x16xf32>
    %731 = arith.mulf %47, %730 : vector<1x8x16xf32>
    %732 = arith.addf %725, %729 : vector<1x8x16xf32>
    %733 = arith.addf %726, %731 : vector<1x8x16xf32>
    %c4_334 = arith.constant 4 : index
    %c10_335 = arith.constant 10 : index
    %734 = memref.load %arg2[%c4_334, %c10_335] : memref<9x16xf32, #tpu.memory_space<smem>>
    %735 = vector.broadcast %734 : f32 to vector<1x8x16xf32>
    %736 = arith.mulf %57, %735 : vector<1x8x16xf32>
    %737 = vector.broadcast %734 : f32 to vector<1x8x16xf32>
    %738 = arith.mulf %55, %737 : vector<1x8x16xf32>
    %739 = arith.addf %732, %736 : vector<1x8x16xf32>
    %740 = arith.addf %733, %738 : vector<1x8x16xf32>
    %c5_336 = arith.constant 5 : index
    %c10_337 = arith.constant 10 : index
    %741 = memref.load %arg2[%c5_336, %c10_337] : memref<9x16xf32, #tpu.memory_space<smem>>
    %742 = vector.broadcast %741 : f32 to vector<1x8x16xf32>
    %743 = arith.mulf %65, %742 : vector<1x8x16xf32>
    %744 = vector.broadcast %741 : f32 to vector<1x8x16xf32>
    %745 = arith.mulf %63, %744 : vector<1x8x16xf32>
    %746 = arith.addf %739, %743 : vector<1x8x16xf32>
    %747 = arith.addf %740, %745 : vector<1x8x16xf32>
    %c6_338 = arith.constant 6 : index
    %c10_339 = arith.constant 10 : index
    %748 = memref.load %arg2[%c6_338, %c10_339] : memref<9x16xf32, #tpu.memory_space<smem>>
    %749 = vector.broadcast %748 : f32 to vector<1x8x16xf32>
    %750 = arith.mulf %47, %749 : vector<1x8x16xf32>
    %751 = vector.broadcast %748 : f32 to vector<1x8x16xf32>
    %752 = arith.mulf %51, %751 : vector<1x8x16xf32>
    %753 = arith.addf %746, %750 : vector<1x8x16xf32>
    %754 = arith.addf %747, %752 : vector<1x8x16xf32>
    %c7_340 = arith.constant 7 : index
    %c10_341 = arith.constant 10 : index
    %755 = memref.load %arg2[%c7_340, %c10_341] : memref<9x16xf32, #tpu.memory_space<smem>>
    %756 = vector.broadcast %755 : f32 to vector<1x8x16xf32>
    %757 = arith.mulf %55, %756 : vector<1x8x16xf32>
    %758 = vector.broadcast %755 : f32 to vector<1x8x16xf32>
    %759 = arith.mulf %59, %758 : vector<1x8x16xf32>
    %760 = arith.addf %753, %757 : vector<1x8x16xf32>
    %761 = arith.addf %754, %759 : vector<1x8x16xf32>
    %c8_342 = arith.constant 8 : index
    %c10_343 = arith.constant 10 : index
    %762 = memref.load %arg2[%c8_342, %c10_343] : memref<9x16xf32, #tpu.memory_space<smem>>
    %763 = vector.broadcast %762 : f32 to vector<1x8x16xf32>
    %764 = arith.mulf %63, %763 : vector<1x8x16xf32>
    %765 = vector.broadcast %762 : f32 to vector<1x8x16xf32>
    %766 = arith.mulf %67, %765 : vector<1x8x16xf32>
    %767 = arith.addf %760, %764 : vector<1x8x16xf32>
    %768 = arith.addf %761, %766 : vector<1x8x16xf32>
    %769 = arith.maximumf %767, %768 : vector<1x8x16xf32>
    %770 = vector.shape_cast %769 : vector<1x8x16xf32> to vector<1x8x1x16xf32>
    %c0_344 = arith.constant 0 : index
    %c0_345 = arith.constant 0 : index
    %c10_346 = arith.constant 10 : index
    %c0_347 = arith.constant 0 : index
    %771 = vector.load %arg14[%c0_344, %c0_345, %c10_346, %c0_347] : memref<1x8x16x16xf32, #tpu.memory_space<vmem>>, vector<1x8x1x16xf32>
    tpu.vector_store %arg14[%c0_344, %c0_345, %c10_346, %c0_347], %770 {strides = array<i32>} : memref<1x8x16x16xf32, #tpu.memory_space<vmem>>, vector<1x8x1x16xf32>,
    %c0_348 = arith.constant 0 : index
    %c11 = arith.constant 11 : index
    %772 = memref.load %arg2[%c0_348, %c11] : memref<9x16xf32, #tpu.memory_space<smem>>
    %773 = vector.broadcast %772 : f32 to vector<1x8x16xf32>
    %774 = arith.mulf %45, %773 : vector<1x8x16xf32>
    %775 = vector.broadcast %772 : f32 to vector<1x8x16xf32>
    %776 = arith.mulf %49, %775 : vector<1x8x16xf32>
    %c1_349 = arith.constant 1 : index
    %c11_350 = arith.constant 11 : index
    %777 = memref.load %arg2[%c1_349, %c11_350] : memref<9x16xf32, #tpu.memory_space<smem>>
    %778 = vector.broadcast %777 : f32 to vector<1x8x16xf32>
    %779 = arith.mulf %53, %778 : vector<1x8x16xf32>
    %780 = vector.broadcast %777 : f32 to vector<1x8x16xf32>
    %781 = arith.mulf %57, %780 : vector<1x8x16xf32>
    %782 = arith.addf %774, %779 : vector<1x8x16xf32>
    %783 = arith.addf %776, %781 : vector<1x8x16xf32>
    %c2_351 = arith.constant 2 : index
    %c11_352 = arith.constant 11 : index
    %784 = memref.load %arg2[%c2_351, %c11_352] : memref<9x16xf32, #tpu.memory_space<smem>>
    %785 = vector.broadcast %784 : f32 to vector<1x8x16xf32>
    %786 = arith.mulf %61, %785 : vector<1x8x16xf32>
    %787 = vector.broadcast %784 : f32 to vector<1x8x16xf32>
    %788 = arith.mulf %65, %787 : vector<1x8x16xf32>
    %789 = arith.addf %782, %786 : vector<1x8x16xf32>
    %790 = arith.addf %783, %788 : vector<1x8x16xf32>
    %c3_353 = arith.constant 3 : index
    %c11_354 = arith.constant 11 : index
    %791 = memref.load %arg2[%c3_353, %c11_354] : memref<9x16xf32, #tpu.memory_space<smem>>
    %792 = vector.broadcast %791 : f32 to vector<1x8x16xf32>
    %793 = arith.mulf %49, %792 : vector<1x8x16xf32>
    %794 = vector.broadcast %791 : f32 to vector<1x8x16xf32>
    %795 = arith.mulf %47, %794 : vector<1x8x16xf32>
    %796 = arith.addf %789, %793 : vector<1x8x16xf32>
    %797 = arith.addf %790, %795 : vector<1x8x16xf32>
    %c4_355 = arith.constant 4 : index
    %c11_356 = arith.constant 11 : index
    %798 = memref.load %arg2[%c4_355, %c11_356] : memref<9x16xf32, #tpu.memory_space<smem>>
    %799 = vector.broadcast %798 : f32 to vector<1x8x16xf32>
    %800 = arith.mulf %57, %799 : vector<1x8x16xf32>
    %801 = vector.broadcast %798 : f32 to vector<1x8x16xf32>
    %802 = arith.mulf %55, %801 : vector<1x8x16xf32>
    %803 = arith.addf %796, %800 : vector<1x8x16xf32>
    %804 = arith.addf %797, %802 : vector<1x8x16xf32>
    %c5_357 = arith.constant 5 : index
    %c11_358 = arith.constant 11 : index
    %805 = memref.load %arg2[%c5_357, %c11_358] : memref<9x16xf32, #tpu.memory_space<smem>>
    %806 = vector.broadcast %805 : f32 to vector<1x8x16xf32>
    %807 = arith.mulf %65, %806 : vector<1x8x16xf32>
    %808 = vector.broadcast %805 : f32 to vector<1x8x16xf32>
    %809 = arith.mulf %63, %808 : vector<1x8x16xf32>
    %810 = arith.addf %803, %807 : vector<1x8x16xf32>
    %811 = arith.addf %804, %809 : vector<1x8x16xf32>
    %c6_359 = arith.constant 6 : index
    %c11_360 = arith.constant 11 : index
    %812 = memref.load %arg2[%c6_359, %c11_360] : memref<9x16xf32, #tpu.memory_space<smem>>
    %813 = vector.broadcast %812 : f32 to vector<1x8x16xf32>
    %814 = arith.mulf %47, %813 : vector<1x8x16xf32>
    %815 = vector.broadcast %812 : f32 to vector<1x8x16xf32>
    %816 = arith.mulf %51, %815 : vector<1x8x16xf32>
    %817 = arith.addf %810, %814 : vector<1x8x16xf32>
    %818 = arith.addf %811, %816 : vector<1x8x16xf32>
    %c7_361 = arith.constant 7 : index
    %c11_362 = arith.constant 11 : index
    %819 = memref.load %arg2[%c7_361, %c11_362] : memref<9x16xf32, #tpu.memory_space<smem>>
    %820 = vector.broadcast %819 : f32 to vector<1x8x16xf32>
    %821 = arith.mulf %55, %820 : vector<1x8x16xf32>
    %822 = vector.broadcast %819 : f32 to vector<1x8x16xf32>
    %823 = arith.mulf %59, %822 : vector<1x8x16xf32>
    %824 = arith.addf %817, %821 : vector<1x8x16xf32>
    %825 = arith.addf %818, %823 : vector<1x8x16xf32>
    %c8_363 = arith.constant 8 : index
    %c11_364 = arith.constant 11 : index
    %826 = memref.load %arg2[%c8_363, %c11_364] : memref<9x16xf32, #tpu.memory_space<smem>>
    %827 = vector.broadcast %826 : f32 to vector<1x8x16xf32>
    %828 = arith.mulf %63, %827 : vector<1x8x16xf32>
    %829 = vector.broadcast %826 : f32 to vector<1x8x16xf32>
    %830 = arith.mulf %67, %829 : vector<1x8x16xf32>
    %831 = arith.addf %824, %828 : vector<1x8x16xf32>
    %832 = arith.addf %825, %830 : vector<1x8x16xf32>
    %833 = arith.maximumf %831, %832 : vector<1x8x16xf32>
    %834 = vector.shape_cast %833 : vector<1x8x16xf32> to vector<1x8x1x16xf32>
    %c0_365 = arith.constant 0 : index
    %c0_366 = arith.constant 0 : index
    %c11_367 = arith.constant 11 : index
    %c0_368 = arith.constant 0 : index
    %835 = vector.load %arg14[%c0_365, %c0_366, %c11_367, %c0_368] : memref<1x8x16x16xf32, #tpu.memory_space<vmem>>, vector<1x8x1x16xf32>
    tpu.vector_store %arg14[%c0_365, %c0_366, %c11_367, %c0_368], %834 {strides = array<i32>} : memref<1x8x16x16xf32, #tpu.memory_space<vmem>>, vector<1x8x1x16xf32>,
    %c0_369 = arith.constant 0 : index
    %c12 = arith.constant 12 : index
    %836 = memref.load %arg2[%c0_369, %c12] : memref<9x16xf32, #tpu.memory_space<smem>>
    %837 = vector.broadcast %836 : f32 to vector<1x8x16xf32>
    %838 = arith.mulf %45, %837 : vector<1x8x16xf32>
    %839 = vector.broadcast %836 : f32 to vector<1x8x16xf32>
    %840 = arith.mulf %49, %839 : vector<1x8x16xf32>
    %c1_370 = arith.constant 1 : index
    %c12_371 = arith.constant 12 : index
    %841 = memref.load %arg2[%c1_370, %c12_371] : memref<9x16xf32, #tpu.memory_space<smem>>
    %842 = vector.broadcast %841 : f32 to vector<1x8x16xf32>
    %843 = arith.mulf %53, %842 : vector<1x8x16xf32>
    %844 = vector.broadcast %841 : f32 to vector<1x8x16xf32>
    %845 = arith.mulf %57, %844 : vector<1x8x16xf32>
    %846 = arith.addf %838, %843 : vector<1x8x16xf32>
    %847 = arith.addf %840, %845 : vector<1x8x16xf32>
    %c2_372 = arith.constant 2 : index
    %c12_373 = arith.constant 12 : index
    %848 = memref.load %arg2[%c2_372, %c12_373] : memref<9x16xf32, #tpu.memory_space<smem>>
    %849 = vector.broadcast %848 : f32 to vector<1x8x16xf32>
    %850 = arith.mulf %61, %849 : vector<1x8x16xf32>
    %851 = vector.broadcast %848 : f32 to vector<1x8x16xf32>
    %852 = arith.mulf %65, %851 : vector<1x8x16xf32>
    %853 = arith.addf %846, %850 : vector<1x8x16xf32>
    %854 = arith.addf %847, %852 : vector<1x8x16xf32>
    %c3_374 = arith.constant 3 : index
    %c12_375 = arith.constant 12 : index
    %855 = memref.load %arg2[%c3_374, %c12_375] : memref<9x16xf32, #tpu.memory_space<smem>>
    %856 = vector.broadcast %855 : f32 to vector<1x8x16xf32>
    %857 = arith.mulf %49, %856 : vector<1x8x16xf32>
    %858 = vector.broadcast %855 : f32 to vector<1x8x16xf32>
    %859 = arith.mulf %47, %858 : vector<1x8x16xf32>
    %860 = arith.addf %853, %857 : vector<1x8x16xf32>
    %861 = arith.addf %854, %859 : vector<1x8x16xf32>
    %c4_376 = arith.constant 4 : index
    %c12_377 = arith.constant 12 : index
    %862 = memref.load %arg2[%c4_376, %c12_377] : memref<9x16xf32, #tpu.memory_space<smem>>
    %863 = vector.broadcast %862 : f32 to vector<1x8x16xf32>
    %864 = arith.mulf %57, %863 : vector<1x8x16xf32>
    %865 = vector.broadcast %862 : f32 to vector<1x8x16xf32>
    %866 = arith.mulf %55, %865 : vector<1x8x16xf32>
    %867 = arith.addf %860, %864 : vector<1x8x16xf32>
    %868 = arith.addf %861, %866 : vector<1x8x16xf32>
    %c5_378 = arith.constant 5 : index
    %c12_379 = arith.constant 12 : index
    %869 = memref.load %arg2[%c5_378, %c12_379] : memref<9x16xf32, #tpu.memory_space<smem>>
    %870 = vector.broadcast %869 : f32 to vector<1x8x16xf32>
    %871 = arith.mulf %65, %870 : vector<1x8x16xf32>
    %872 = vector.broadcast %869 : f32 to vector<1x8x16xf32>
    %873 = arith.mulf %63, %872 : vector<1x8x16xf32>
    %874 = arith.addf %867, %871 : vector<1x8x16xf32>
    %875 = arith.addf %868, %873 : vector<1x8x16xf32>
    %c6_380 = arith.constant 6 : index
    %c12_381 = arith.constant 12 : index
    %876 = memref.load %arg2[%c6_380, %c12_381] : memref<9x16xf32, #tpu.memory_space<smem>>
    %877 = vector.broadcast %876 : f32 to vector<1x8x16xf32>
    %878 = arith.mulf %47, %877 : vector<1x8x16xf32>
    %879 = vector.broadcast %876 : f32 to vector<1x8x16xf32>
    %880 = arith.mulf %51, %879 : vector<1x8x16xf32>
    %881 = arith.addf %874, %878 : vector<1x8x16xf32>
    %882 = arith.addf %875, %880 : vector<1x8x16xf32>
    %c7_382 = arith.constant 7 : index
    %c12_383 = arith.constant 12 : index
    %883 = memref.load %arg2[%c7_382, %c12_383] : memref<9x16xf32, #tpu.memory_space<smem>>
    %884 = vector.broadcast %883 : f32 to vector<1x8x16xf32>
    %885 = arith.mulf %55, %884 : vector<1x8x16xf32>
    %886 = vector.broadcast %883 : f32 to vector<1x8x16xf32>
    %887 = arith.mulf %59, %886 : vector<1x8x16xf32>
    %888 = arith.addf %881, %885 : vector<1x8x16xf32>
    %889 = arith.addf %882, %887 : vector<1x8x16xf32>
    %c8_384 = arith.constant 8 : index
    %c12_385 = arith.constant 12 : index
    %890 = memref.load %arg2[%c8_384, %c12_385] : memref<9x16xf32, #tpu.memory_space<smem>>
    %891 = vector.broadcast %890 : f32 to vector<1x8x16xf32>
    %892 = arith.mulf %63, %891 : vector<1x8x16xf32>
    %893 = vector.broadcast %890 : f32 to vector<1x8x16xf32>
    %894 = arith.mulf %67, %893 : vector<1x8x16xf32>
    %895 = arith.addf %888, %892 : vector<1x8x16xf32>
    %896 = arith.addf %889, %894 : vector<1x8x16xf32>
    %897 = arith.maximumf %895, %896 : vector<1x8x16xf32>
    %898 = vector.shape_cast %897 : vector<1x8x16xf32> to vector<1x8x1x16xf32>
    %c0_386 = arith.constant 0 : index
    %c0_387 = arith.constant 0 : index
    %c12_388 = arith.constant 12 : index
    %c0_389 = arith.constant 0 : index
    %899 = vector.load %arg14[%c0_386, %c0_387, %c12_388, %c0_389] : memref<1x8x16x16xf32, #tpu.memory_space<vmem>>, vector<1x8x1x16xf32>
    tpu.vector_store %arg14[%c0_386, %c0_387, %c12_388, %c0_389], %898 {strides = array<i32>} : memref<1x8x16x16xf32, #tpu.memory_space<vmem>>, vector<1x8x1x16xf32>,
    %c0_390 = arith.constant 0 : index
    %c13 = arith.constant 13 : index
    %900 = memref.load %arg2[%c0_390, %c13] : memref<9x16xf32, #tpu.memory_space<smem>>
    %901 = vector.broadcast %900 : f32 to vector<1x8x16xf32>
    %902 = arith.mulf %45, %901 : vector<1x8x16xf32>
    %903 = vector.broadcast %900 : f32 to vector<1x8x16xf32>
    %904 = arith.mulf %49, %903 : vector<1x8x16xf32>
    %c1_391 = arith.constant 1 : index
    %c13_392 = arith.constant 13 : index
    %905 = memref.load %arg2[%c1_391, %c13_392] : memref<9x16xf32, #tpu.memory_space<smem>>
    %906 = vector.broadcast %905 : f32 to vector<1x8x16xf32>
    %907 = arith.mulf %53, %906 : vector<1x8x16xf32>
    %908 = vector.broadcast %905 : f32 to vector<1x8x16xf32>
    %909 = arith.mulf %57, %908 : vector<1x8x16xf32>
    %910 = arith.addf %902, %907 : vector<1x8x16xf32>
    %911 = arith.addf %904, %909 : vector<1x8x16xf32>
    %c2_393 = arith.constant 2 : index
    %c13_394 = arith.constant 13 : index
    %912 = memref.load %arg2[%c2_393, %c13_394] : memref<9x16xf32, #tpu.memory_space<smem>>
    %913 = vector.broadcast %912 : f32 to vector<1x8x16xf32>
    %914 = arith.mulf %61, %913 : vector<1x8x16xf32>
    %915 = vector.broadcast %912 : f32 to vector<1x8x16xf32>
    %916 = arith.mulf %65, %915 : vector<1x8x16xf32>
    %917 = arith.addf %910, %914 : vector<1x8x16xf32>
    %918 = arith.addf %911, %916 : vector<1x8x16xf32>
    %c3_395 = arith.constant 3 : index
    %c13_396 = arith.constant 13 : index
    %919 = memref.load %arg2[%c3_395, %c13_396] : memref<9x16xf32, #tpu.memory_space<smem>>
    %920 = vector.broadcast %919 : f32 to vector<1x8x16xf32>
    %921 = arith.mulf %49, %920 : vector<1x8x16xf32>
    %922 = vector.broadcast %919 : f32 to vector<1x8x16xf32>
    %923 = arith.mulf %47, %922 : vector<1x8x16xf32>
    %924 = arith.addf %917, %921 : vector<1x8x16xf32>
    %925 = arith.addf %918, %923 : vector<1x8x16xf32>
    %c4_397 = arith.constant 4 : index
    %c13_398 = arith.constant 13 : index
    %926 = memref.load %arg2[%c4_397, %c13_398] : memref<9x16xf32, #tpu.memory_space<smem>>
    %927 = vector.broadcast %926 : f32 to vector<1x8x16xf32>
    %928 = arith.mulf %57, %927 : vector<1x8x16xf32>
    %929 = vector.broadcast %926 : f32 to vector<1x8x16xf32>
    %930 = arith.mulf %55, %929 : vector<1x8x16xf32>
    %931 = arith.addf %924, %928 : vector<1x8x16xf32>
    %932 = arith.addf %925, %930 : vector<1x8x16xf32>
    %c5_399 = arith.constant 5 : index
    %c13_400 = arith.constant 13 : index
    %933 = memref.load %arg2[%c5_399, %c13_400] : memref<9x16xf32, #tpu.memory_space<smem>>
    %934 = vector.broadcast %933 : f32 to vector<1x8x16xf32>
    %935 = arith.mulf %65, %934 : vector<1x8x16xf32>
    %936 = vector.broadcast %933 : f32 to vector<1x8x16xf32>
    %937 = arith.mulf %63, %936 : vector<1x8x16xf32>
    %938 = arith.addf %931, %935 : vector<1x8x16xf32>
    %939 = arith.addf %932, %937 : vector<1x8x16xf32>
    %c6_401 = arith.constant 6 : index
    %c13_402 = arith.constant 13 : index
    %940 = memref.load %arg2[%c6_401, %c13_402] : memref<9x16xf32, #tpu.memory_space<smem>>
    %941 = vector.broadcast %940 : f32 to vector<1x8x16xf32>
    %942 = arith.mulf %47, %941 : vector<1x8x16xf32>
    %943 = vector.broadcast %940 : f32 to vector<1x8x16xf32>
    %944 = arith.mulf %51, %943 : vector<1x8x16xf32>
    %945 = arith.addf %938, %942 : vector<1x8x16xf32>
    %946 = arith.addf %939, %944 : vector<1x8x16xf32>
    %c7_403 = arith.constant 7 : index
    %c13_404 = arith.constant 13 : index
    %947 = memref.load %arg2[%c7_403, %c13_404] : memref<9x16xf32, #tpu.memory_space<smem>>
    %948 = vector.broadcast %947 : f32 to vector<1x8x16xf32>
    %949 = arith.mulf %55, %948 : vector<1x8x16xf32>
    %950 = vector.broadcast %947 : f32 to vector<1x8x16xf32>
    %951 = arith.mulf %59, %950 : vector<1x8x16xf32>
    %952 = arith.addf %945, %949 : vector<1x8x16xf32>
    %953 = arith.addf %946, %951 : vector<1x8x16xf32>
    %c8_405 = arith.constant 8 : index
    %c13_406 = arith.constant 13 : index
    %954 = memref.load %arg2[%c8_405, %c13_406] : memref<9x16xf32, #tpu.memory_space<smem>>
    %955 = vector.broadcast %954 : f32 to vector<1x8x16xf32>
    %956 = arith.mulf %63, %955 : vector<1x8x16xf32>
    %957 = vector.broadcast %954 : f32 to vector<1x8x16xf32>
    %958 = arith.mulf %67, %957 : vector<1x8x16xf32>
    %959 = arith.addf %952, %956 : vector<1x8x16xf32>
    %960 = arith.addf %953, %958 : vector<1x8x16xf32>
    %961 = arith.maximumf %959, %960 : vector<1x8x16xf32>
    %962 = vector.shape_cast %961 : vector<1x8x16xf32> to vector<1x8x1x16xf32>
    %c0_407 = arith.constant 0 : index
    %c0_408 = arith.constant 0 : index
    %c13_409 = arith.constant 13 : index
    %c0_410 = arith.constant 0 : index
    %963 = vector.load %arg14[%c0_407, %c0_408, %c13_409, %c0_410] : memref<1x8x16x16xf32, #tpu.memory_space<vmem>>, vector<1x8x1x16xf32>
    tpu.vector_store %arg14[%c0_407, %c0_408, %c13_409, %c0_410], %962 {strides = array<i32>} : memref<1x8x16x16xf32, #tpu.memory_space<vmem>>, vector<1x8x1x16xf32>,
    %c0_411 = arith.constant 0 : index
    %c14 = arith.constant 14 : index
    %964 = memref.load %arg2[%c0_411, %c14] : memref<9x16xf32, #tpu.memory_space<smem>>
    %965 = vector.broadcast %964 : f32 to vector<1x8x16xf32>
    %966 = arith.mulf %45, %965 : vector<1x8x16xf32>
    %967 = vector.broadcast %964 : f32 to vector<1x8x16xf32>
    %968 = arith.mulf %49, %967 : vector<1x8x16xf32>
    %c1_412 = arith.constant 1 : index
    %c14_413 = arith.constant 14 : index
    %969 = memref.load %arg2[%c1_412, %c14_413] : memref<9x16xf32, #tpu.memory_space<smem>>
    %970 = vector.broadcast %969 : f32 to vector<1x8x16xf32>
    %971 = arith.mulf %53, %970 : vector<1x8x16xf32>
    %972 = vector.broadcast %969 : f32 to vector<1x8x16xf32>
    %973 = arith.mulf %57, %972 : vector<1x8x16xf32>
    %974 = arith.addf %966, %971 : vector<1x8x16xf32>
    %975 = arith.addf %968, %973 : vector<1x8x16xf32>
    %c2_414 = arith.constant 2 : index
    %c14_415 = arith.constant 14 : index
    %976 = memref.load %arg2[%c2_414, %c14_415] : memref<9x16xf32, #tpu.memory_space<smem>>
    %977 = vector.broadcast %976 : f32 to vector<1x8x16xf32>
    %978 = arith.mulf %61, %977 : vector<1x8x16xf32>
    %979 = vector.broadcast %976 : f32 to vector<1x8x16xf32>
    %980 = arith.mulf %65, %979 : vector<1x8x16xf32>
    %981 = arith.addf %974, %978 : vector<1x8x16xf32>
    %982 = arith.addf %975, %980 : vector<1x8x16xf32>
    %c3_416 = arith.constant 3 : index
    %c14_417 = arith.constant 14 : index
    %983 = memref.load %arg2[%c3_416, %c14_417] : memref<9x16xf32, #tpu.memory_space<smem>>
    %984 = vector.broadcast %983 : f32 to vector<1x8x16xf32>
    %985 = arith.mulf %49, %984 : vector<1x8x16xf32>
    %986 = vector.broadcast %983 : f32 to vector<1x8x16xf32>
    %987 = arith.mulf %47, %986 : vector<1x8x16xf32>
    %988 = arith.addf %981, %985 : vector<1x8x16xf32>
    %989 = arith.addf %982, %987 : vector<1x8x16xf32>
    %c4_418 = arith.constant 4 : index
    %c14_419 = arith.constant 14 : index
    %990 = memref.load %arg2[%c4_418, %c14_419] : memref<9x16xf32, #tpu.memory_space<smem>>
    %991 = vector.broadcast %990 : f32 to vector<1x8x16xf32>
    %992 = arith.mulf %57, %991 : vector<1x8x16xf32>
    %993 = vector.broadcast %990 : f32 to vector<1x8x16xf32>
    %994 = arith.mulf %55, %993 : vector<1x8x16xf32>
    %995 = arith.addf %988, %992 : vector<1x8x16xf32>
    %996 = arith.addf %989, %994 : vector<1x8x16xf32>
    %c5_420 = arith.constant 5 : index
    %c14_421 = arith.constant 14 : index
    %997 = memref.load %arg2[%c5_420, %c14_421] : memref<9x16xf32, #tpu.memory_space<smem>>
    %998 = vector.broadcast %997 : f32 to vector<1x8x16xf32>
    %999 = arith.mulf %65, %998 : vector<1x8x16xf32>
    %1000 = vector.broadcast %997 : f32 to vector<1x8x16xf32>
    %1001 = arith.mulf %63, %1000 : vector<1x8x16xf32>
    %1002 = arith.addf %995, %999 : vector<1x8x16xf32>
    %1003 = arith.addf %996, %1001 : vector<1x8x16xf32>
    %c6_422 = arith.constant 6 : index
    %c14_423 = arith.constant 14 : index
    %1004 = memref.load %arg2[%c6_422, %c14_423] : memref<9x16xf32, #tpu.memory_space<smem>>
    %1005 = vector.broadcast %1004 : f32 to vector<1x8x16xf32>
    %1006 = arith.mulf %47, %1005 : vector<1x8x16xf32>
    %1007 = vector.broadcast %1004 : f32 to vector<1x8x16xf32>
    %1008 = arith.mulf %51, %1007 : vector<1x8x16xf32>
    %1009 = arith.addf %1002, %1006 : vector<1x8x16xf32>
    %1010 = arith.addf %1003, %1008 : vector<1x8x16xf32>
    %c7_424 = arith.constant 7 : index
    %c14_425 = arith.constant 14 : index
    %1011 = memref.load %arg2[%c7_424, %c14_425] : memref<9x16xf32, #tpu.memory_space<smem>>
    %1012 = vector.broadcast %1011 : f32 to vector<1x8x16xf32>
    %1013 = arith.mulf %55, %1012 : vector<1x8x16xf32>
    %1014 = vector.broadcast %1011 : f32 to vector<1x8x16xf32>
    %1015 = arith.mulf %59, %1014 : vector<1x8x16xf32>
    %1016 = arith.addf %1009, %1013 : vector<1x8x16xf32>
    %1017 = arith.addf %1010, %1015 : vector<1x8x16xf32>
    %c8_426 = arith.constant 8 : index
    %c14_427 = arith.constant 14 : index
    %1018 = memref.load %arg2[%c8_426, %c14_427] : memref<9x16xf32, #tpu.memory_space<smem>>
    %1019 = vector.broadcast %1018 : f32 to vector<1x8x16xf32>
    %1020 = arith.mulf %63, %1019 : vector<1x8x16xf32>
    %1021 = vector.broadcast %1018 : f32 to vector<1x8x16xf32>
    %1022 = arith.mulf %67, %1021 : vector<1x8x16xf32>
    %1023 = arith.addf %1016, %1020 : vector<1x8x16xf32>
    %1024 = arith.addf %1017, %1022 : vector<1x8x16xf32>
    %1025 = arith.maximumf %1023, %1024 : vector<1x8x16xf32>
    %1026 = vector.shape_cast %1025 : vector<1x8x16xf32> to vector<1x8x1x16xf32>
    %c0_428 = arith.constant 0 : index
    %c0_429 = arith.constant 0 : index
    %c14_430 = arith.constant 14 : index
    %c0_431 = arith.constant 0 : index
    %1027 = vector.load %arg14[%c0_428, %c0_429, %c14_430, %c0_431] : memref<1x8x16x16xf32, #tpu.memory_space<vmem>>, vector<1x8x1x16xf32>
    tpu.vector_store %arg14[%c0_428, %c0_429, %c14_430, %c0_431], %1026 {strides = array<i32>} : memref<1x8x16x16xf32, #tpu.memory_space<vmem>>, vector<1x8x1x16xf32>,
    %c0_432 = arith.constant 0 : index
    %c15_433 = arith.constant 15 : index
    %1028 = memref.load %arg2[%c0_432, %c15_433] : memref<9x16xf32, #tpu.memory_space<smem>>
    %1029 = vector.broadcast %1028 : f32 to vector<1x8x16xf32>
    %1030 = arith.mulf %45, %1029 : vector<1x8x16xf32>
    %1031 = vector.broadcast %1028 : f32 to vector<1x8x16xf32>
    %1032 = arith.mulf %49, %1031 : vector<1x8x16xf32>
    %c1_434 = arith.constant 1 : index
    %c15_435 = arith.constant 15 : index
    %1033 = memref.load %arg2[%c1_434, %c15_435] : memref<9x16xf32, #tpu.memory_space<smem>>
    %1034 = vector.broadcast %1033 : f32 to vector<1x8x16xf32>
    %1035 = arith.mulf %53, %1034 : vector<1x8x16xf32>
    %1036 = vector.broadcast %1033 : f32 to vector<1x8x16xf32>
    %1037 = arith.mulf %57, %1036 : vector<1x8x16xf32>
    %1038 = arith.addf %1030, %1035 : vector<1x8x16xf32>
    %1039 = arith.addf %1032, %1037 : vector<1x8x16xf32>
    %c2_436 = arith.constant 2 : index
    %c15_437 = arith.constant 15 : index
    %1040 = memref.load %arg2[%c2_436, %c15_437] : memref<9x16xf32, #tpu.memory_space<smem>>
    %1041 = vector.broadcast %1040 : f32 to vector<1x8x16xf32>
    %1042 = arith.mulf %61, %1041 : vector<1x8x16xf32>
    %1043 = vector.broadcast %1040 : f32 to vector<1x8x16xf32>
    %1044 = arith.mulf %65, %1043 : vector<1x8x16xf32>
    %1045 = arith.addf %1038, %1042 : vector<1x8x16xf32>
    %1046 = arith.addf %1039, %1044 : vector<1x8x16xf32>
    %c3_438 = arith.constant 3 : index
    %c15_439 = arith.constant 15 : index
    %1047 = memref.load %arg2[%c3_438, %c15_439] : memref<9x16xf32, #tpu.memory_space<smem>>
    %1048 = vector.broadcast %1047 : f32 to vector<1x8x16xf32>
    %1049 = arith.mulf %49, %1048 : vector<1x8x16xf32>
    %1050 = vector.broadcast %1047 : f32 to vector<1x8x16xf32>
    %1051 = arith.mulf %47, %1050 : vector<1x8x16xf32>
    %1052 = arith.addf %1045, %1049 : vector<1x8x16xf32>
    %1053 = arith.addf %1046, %1051 : vector<1x8x16xf32>
    %c4_440 = arith.constant 4 : index
    %c15_441 = arith.constant 15 : index
    %1054 = memref.load %arg2[%c4_440, %c15_441] : memref<9x16xf32, #tpu.memory_space<smem>>
    %1055 = vector.broadcast %1054 : f32 to vector<1x8x16xf32>
    %1056 = arith.mulf %57, %1055 : vector<1x8x16xf32>
    %1057 = vector.broadcast %1054 : f32 to vector<1x8x16xf32>
    %1058 = arith.mulf %55, %1057 : vector<1x8x16xf32>
    %1059 = arith.addf %1052, %1056 : vector<1x8x16xf32>
    %1060 = arith.addf %1053, %1058 : vector<1x8x16xf32>
    %c5_442 = arith.constant 5 : index
    %c15_443 = arith.constant 15 : index
    %1061 = memref.load %arg2[%c5_442, %c15_443] : memref<9x16xf32, #tpu.memory_space<smem>>
    %1062 = vector.broadcast %1061 : f32 to vector<1x8x16xf32>
    %1063 = arith.mulf %65, %1062 : vector<1x8x16xf32>
    %1064 = vector.broadcast %1061 : f32 to vector<1x8x16xf32>
    %1065 = arith.mulf %63, %1064 : vector<1x8x16xf32>
    %1066 = arith.addf %1059, %1063 : vector<1x8x16xf32>
    %1067 = arith.addf %1060, %1065 : vector<1x8x16xf32>
    %c6_444 = arith.constant 6 : index
    %c15_445 = arith.constant 15 : index
    %1068 = memref.load %arg2[%c6_444, %c15_445] : memref<9x16xf32, #tpu.memory_space<smem>>
    %1069 = vector.broadcast %1068 : f32 to vector<1x8x16xf32>
    %1070 = arith.mulf %47, %1069 : vector<1x8x16xf32>
    %1071 = vector.broadcast %1068 : f32 to vector<1x8x16xf32>
    %1072 = arith.mulf %51, %1071 : vector<1x8x16xf32>
    %1073 = arith.addf %1066, %1070 : vector<1x8x16xf32>
    %1074 = arith.addf %1067, %1072 : vector<1x8x16xf32>
    %c7_446 = arith.constant 7 : index
    %c15_447 = arith.constant 15 : index
    %1075 = memref.load %arg2[%c7_446, %c15_447] : memref<9x16xf32, #tpu.memory_space<smem>>
    %1076 = vector.broadcast %1075 : f32 to vector<1x8x16xf32>
    %1077 = arith.mulf %55, %1076 : vector<1x8x16xf32>
    %1078 = vector.broadcast %1075 : f32 to vector<1x8x16xf32>
    %1079 = arith.mulf %59, %1078 : vector<1x8x16xf32>
    %1080 = arith.addf %1073, %1077 : vector<1x8x16xf32>
    %1081 = arith.addf %1074, %1079 : vector<1x8x16xf32>
    %c8_448 = arith.constant 8 : index
    %c15_449 = arith.constant 15 : index
    %1082 = memref.load %arg2[%c8_448, %c15_449] : memref<9x16xf32, #tpu.memory_space<smem>>
    %1083 = vector.broadcast %1082 : f32 to vector<1x8x16xf32>
    %1084 = arith.mulf %63, %1083 : vector<1x8x16xf32>
    %1085 = vector.broadcast %1082 : f32 to vector<1x8x16xf32>
    %1086 = arith.mulf %67, %1085 : vector<1x8x16xf32>
    %1087 = arith.addf %1080, %1084 : vector<1x8x16xf32>
    %1088 = arith.addf %1081, %1086 : vector<1x8x16xf32>
    %1089 = arith.maximumf %1087, %1088 : vector<1x8x16xf32>
    %1090 = vector.shape_cast %1089 : vector<1x8x16xf32> to vector<1x8x1x16xf32>
    %c0_450 = arith.constant 0 : index
    %c0_451 = arith.constant 0 : index
    %c15_452 = arith.constant 15 : index
    %c0_453 = arith.constant 0 : index
    %1091 = vector.load %arg14[%c0_450, %c0_451, %c15_452, %c0_453] : memref<1x8x16x16xf32, #tpu.memory_space<vmem>>, vector<1x8x1x16xf32>
    tpu.vector_store %arg14[%c0_450, %c0_451, %c15_452, %c0_453], %1090 {strides = array<i32>} : memref<1x8x16x16xf32, #tpu.memory_space<vmem>>, vector<1x8x1x16xf32>,
    %c0_454 = arith.constant 0 : index
    %c0_455 = arith.constant 0 : index
    %c0_456 = arith.constant 0 : index
    %c0_457 = arith.constant 0 : index
    %1092 = vector.load %arg14[%c0_454, %c0_455, %c0_456, %c0_457] : memref<1x8x16x16xf32, #tpu.memory_space<vmem>>, vector<1x8x16x16xf32>
    %1093 = tpu.transpose %1092, [0, 1, 3, 2] : vector<1x8x16x16xf32> -> vector<1x8x16x16xf32>
    %1094 = vector.shape_cast %1093 : vector<1x8x16x16xf32> to vector<1x8x8x2x16xf32>
    %cst_458 = arith.constant dense<0xFF800000> : vector<1x8x8x16xf32>
    %1095 = vector.multi_reduction <maximumf>, %1094, %cst_458 [3] : vector<1x8x8x2x16xf32> to vector<1x8x8x16xf32>
    %c0_459 = arith.constant 0 : index
    %c0_460 = arith.constant 0 : index
    %1096 = vector.load %arg3[%c0_459, %c0_460] : memref<1x16xf32, #tpu.memory_space<vmem>>, vector<1x16xf32>
    %1097 = vector.shape_cast %1096 : vector<1x16xf32> to vector<1x1x1x16xf32>
    %1098 = vector.broadcast %1097 : vector<1x1x1x16xf32> to vector<1x8x8x16xf32>
    %1099 = arith.addf %1095, %1098 : vector<1x8x8x16xf32>
    %cst_461 = arith.constant 0.000000e+00 : f32
    %1100 = vector.broadcast %cst_461 : f32 to vector<1x8x8x16xf32>
    %1101 = arith.maximumf %1099, %1100 : vector<1x8x8x16xf32>
    %cst_462 = arith.constant 0.000000e+00 : bf16
    %1102 = vector.broadcast %cst_462 : bf16 to vector<1x1x10x16xbf16>
    %c0_463 = arith.constant 0 : index
    %c0_464 = arith.constant 0 : index
    %c0_465 = arith.constant 0 : index
    %c0_466 = arith.constant 0 : index
    %1103 = vector.load %arg15[%c0_463, %c0_464, %c0_465, %c0_466] : memref<1x10x10x16xbf16, #tpu.memory_space<vmem>>, vector<1x1x10x16xbf16>
    tpu.vector_store %arg15[%c0_463, %c0_464, %c0_465, %c0_466], %1102 {strides = array<i32>} : memref<1x10x10x16xbf16, #tpu.memory_space<vmem>>, vector<1x1x10x16xbf16>,
    %cst_467 = arith.constant 0.000000e+00 : bf16
    %1104 = vector.broadcast %cst_467 : bf16 to vector<1x1x10x16xbf16>
    %c0_468 = arith.constant 0 : index
    %c9_469 = arith.constant 9 : index
    %c0_470 = arith.constant 0 : index
    %c0_471 = arith.constant 0 : index
    %1105 = vector.load %arg15[%c0_468, %c9_469, %c0_470, %c0_471] : memref<1x10x10x16xbf16, #tpu.memory_space<vmem>>, vector<1x1x10x16xbf16>
    tpu.vector_store %arg15[%c0_468, %c9_469, %c0_470, %c0_471], %1104 {strides = array<i32>} : memref<1x10x10x16xbf16, #tpu.memory_space<vmem>>, vector<1x1x10x16xbf16>,
    %cst_472 = arith.constant 0.000000e+00 : bf16
    %1106 = vector.broadcast %cst_472 : bf16 to vector<1x10x1x16xbf16>
    %c0_473 = arith.constant 0 : index
    %c0_474 = arith.constant 0 : index
    %c0_475 = arith.constant 0 : index
    %c0_476 = arith.constant 0 : index
    %1107 = vector.load %arg15[%c0_473, %c0_474, %c0_475, %c0_476] : memref<1x10x10x16xbf16, #tpu.memory_space<vmem>>, vector<1x10x1x16xbf16>
    tpu.vector_store %arg15[%c0_473, %c0_474, %c0_475, %c0_476], %1106 {strides = array<i32>} : memref<1x10x10x16xbf16, #tpu.memory_space<vmem>>, vector<1x10x1x16xbf16>,
    %cst_477 = arith.constant 0.000000e+00 : bf16
    %1108 = vector.broadcast %cst_477 : bf16 to vector<1x10x1x16xbf16>
    %c0_478 = arith.constant 0 : index
    %c0_479 = arith.constant 0 : index
    %c9_480 = arith.constant 9 : index
    %c0_481 = arith.constant 0 : index
    %1109 = vector.load %arg15[%c0_478, %c0_479, %c9_480, %c0_481] : memref<1x10x10x16xbf16, #tpu.memory_space<vmem>>, vector<1x10x1x16xbf16>
    tpu.vector_store %arg15[%c0_478, %c0_479, %c9_480, %c0_481], %1108 {strides = array<i32>} : memref<1x10x10x16xbf16, #tpu.memory_space<vmem>>, vector<1x10x1x16xbf16>,
    %1110 = arith.truncf %1101 : vector<1x8x8x16xf32> to vector<1x8x8x16xbf16>
    %c0_482 = arith.constant 0 : index
    %c1_483 = arith.constant 1 : index
    %c1_484 = arith.constant 1 : index
    %c0_485 = arith.constant 0 : index
    %1111 = vector.load %arg15[%c0_482, %c1_483, %c1_484, %c0_485] : memref<1x10x10x16xbf16, #tpu.memory_space<vmem>>, vector<1x8x8x16xbf16>
    tpu.vector_store %arg15[%c0_482, %c1_483, %c1_484, %c0_485], %1110 {strides = array<i32>} : memref<1x10x10x16xbf16, #tpu.memory_space<vmem>>, vector<1x8x8x16xbf16>,
    %c0_486 = arith.constant 0 : index
    %c0_487 = arith.constant 0 : index
    %c0_488 = arith.constant 0 : index
    %c0_489 = arith.constant 0 : index
    %1112 = vector.load %arg15[%c0_486, %c0_487, %c0_488, %c0_489] : memref<1x10x10x16xbf16, #tpu.memory_space<vmem>>, vector<1x8x8x16xbf16>
    %1113 = vector.shape_cast %1112 : vector<1x8x8x16xbf16> to vector<64x16xbf16>
    %c0_490 = arith.constant 0 : index
    %c0_491 = arith.constant 0 : index
    %1114 = vector.load %arg16[%c0_490, %c0_491] : memref<64x144xbf16, #tpu.memory_space<vmem>>, vector<64x16xbf16>
    tpu.vector_store %arg16[%c0_490, %c0_491], %1113 {strides = array<i32>} : memref<64x144xbf16, #tpu.memory_space<vmem>>, vector<64x16xbf16>,
    %c0_492 = arith.constant 0 : index
    %c0_493 = arith.constant 0 : index
    %c1_494 = arith.constant 1 : index
    %c0_495 = arith.constant 0 : index
    %1115 = vector.load %arg15[%c0_492, %c0_493, %c1_494, %c0_495] : memref<1x10x10x16xbf16, #tpu.memory_space<vmem>>, vector<1x8x8x16xbf16>
    %1116 = vector.shape_cast %1115 : vector<1x8x8x16xbf16> to vector<64x16xbf16>
    %c0_496 = arith.constant 0 : index
    %c16 = arith.constant 16 : index
    %1117 = vector.load %arg16[%c0_496, %c16] : memref<64x144xbf16, #tpu.memory_space<vmem>>, vector<64x16xbf16>
    tpu.vector_store %arg16[%c0_496, %c16], %1116 {strides = array<i32>} : memref<64x144xbf16, #tpu.memory_space<vmem>>, vector<64x16xbf16>,
    %c0_497 = arith.constant 0 : index
    %c0_498 = arith.constant 0 : index
    %c2_499 = arith.constant 2 : index
    %c0_500 = arith.constant 0 : index
    %1118 = vector.load %arg15[%c0_497, %c0_498, %c2_499, %c0_500] : memref<1x10x10x16xbf16, #tpu.memory_space<vmem>>, vector<1x8x8x16xbf16>
    %1119 = vector.shape_cast %1118 : vector<1x8x8x16xbf16> to vector<64x16xbf16>
    %c0_501 = arith.constant 0 : index
    %c32 = arith.constant 32 : index
    %1120 = vector.load %arg16[%c0_501, %c32] : memref<64x144xbf16, #tpu.memory_space<vmem>>, vector<64x16xbf16>
    tpu.vector_store %arg16[%c0_501, %c32], %1119 {strides = array<i32>} : memref<64x144xbf16, #tpu.memory_space<vmem>>, vector<64x16xbf16>,
    %c0_502 = arith.constant 0 : index
    %c1_503 = arith.constant 1 : index
    %c0_504 = arith.constant 0 : index
    %c0_505 = arith.constant 0 : index
    %1121 = vector.load %arg15[%c0_502, %c1_503, %c0_504, %c0_505] : memref<1x10x10x16xbf16, #tpu.memory_space<vmem>>, vector<1x8x8x16xbf16>
    %1122 = vector.shape_cast %1121 : vector<1x8x8x16xbf16> to vector<64x16xbf16>
    %c0_506 = arith.constant 0 : index
    %c48 = arith.constant 48 : index
    %1123 = vector.load %arg16[%c0_506, %c48] : memref<64x144xbf16, #tpu.memory_space<vmem>>, vector<64x16xbf16>
    tpu.vector_store %arg16[%c0_506, %c48], %1122 {strides = array<i32>} : memref<64x144xbf16, #tpu.memory_space<vmem>>, vector<64x16xbf16>,
    %c0_507 = arith.constant 0 : index
    %c1_508 = arith.constant 1 : index
    %c1_509 = arith.constant 1 : index
    %c0_510 = arith.constant 0 : index
    %1124 = vector.load %arg15[%c0_507, %c1_508, %c1_509, %c0_510] : memref<1x10x10x16xbf16, #tpu.memory_space<vmem>>, vector<1x8x8x16xbf16>
    %1125 = vector.shape_cast %1124 : vector<1x8x8x16xbf16> to vector<64x16xbf16>
    %c0_511 = arith.constant 0 : index
    %c64 = arith.constant 64 : index
    %1126 = vector.load %arg16[%c0_511, %c64] : memref<64x144xbf16, #tpu.memory_space<vmem>>, vector<64x16xbf16>
    tpu.vector_store %arg16[%c0_511, %c64], %1125 {strides = array<i32>} : memref<64x144xbf16, #tpu.memory_space<vmem>>, vector<64x16xbf16>,
    %c0_512 = arith.constant 0 : index
    %c1_513 = arith.constant 1 : index
    %c2_514 = arith.constant 2 : index
    %c0_515 = arith.constant 0 : index
    %1127 = vector.load %arg15[%c0_512, %c1_513, %c2_514, %c0_515] : memref<1x10x10x16xbf16, #tpu.memory_space<vmem>>, vector<1x8x8x16xbf16>
    %1128 = vector.shape_cast %1127 : vector<1x8x8x16xbf16> to vector<64x16xbf16>
    %c0_516 = arith.constant 0 : index
    %c80 = arith.constant 80 : index
    %1129 = vector.load %arg16[%c0_516, %c80] : memref<64x144xbf16, #tpu.memory_space<vmem>>, vector<64x16xbf16>
    tpu.vector_store %arg16[%c0_516, %c80], %1128 {strides = array<i32>} : memref<64x144xbf16, #tpu.memory_space<vmem>>, vector<64x16xbf16>,
    %c0_517 = arith.constant 0 : index
    %c2_518 = arith.constant 2 : index
    %c0_519 = arith.constant 0 : index
    %c0_520 = arith.constant 0 : index
    %1130 = vector.load %arg15[%c0_517, %c2_518, %c0_519, %c0_520] : memref<1x10x10x16xbf16, #tpu.memory_space<vmem>>, vector<1x8x8x16xbf16>
    %1131 = vector.shape_cast %1130 : vector<1x8x8x16xbf16> to vector<64x16xbf16>
    %c0_521 = arith.constant 0 : index
    %c96 = arith.constant 96 : index
    %1132 = vector.load %arg16[%c0_521, %c96] : memref<64x144xbf16, #tpu.memory_space<vmem>>, vector<64x16xbf16>
    tpu.vector_store %arg16[%c0_521, %c96], %1131 {strides = array<i32>} : memref<64x144xbf16, #tpu.memory_space<vmem>>, vector<64x16xbf16>,
    %c0_522 = arith.constant 0 : index
    %c2_523 = arith.constant 2 : index
    %c1_524 = arith.constant 1 : index
    %c0_525 = arith.constant 0 : index
    %1133 = vector.load %arg15[%c0_522, %c2_523, %c1_524, %c0_525] : memref<1x10x10x16xbf16, #tpu.memory_space<vmem>>, vector<1x8x8x16xbf16>
    %1134 = vector.shape_cast %1133 : vector<1x8x8x16xbf16> to vector<64x16xbf16>
    %c0_526 = arith.constant 0 : index
    %c112 = arith.constant 112 : index
    %1135 = vector.load %arg16[%c0_526, %c112] : memref<64x144xbf16, #tpu.memory_space<vmem>>, vector<64x16xbf16>
    tpu.vector_store %arg16[%c0_526, %c112], %1134 {strides = array<i32>} : memref<64x144xbf16, #tpu.memory_space<vmem>>, vector<64x16xbf16>,
    %c0_527 = arith.constant 0 : index
    %c2_528 = arith.constant 2 : index
    %c2_529 = arith.constant 2 : index
    %c0_530 = arith.constant 0 : index
    %1136 = vector.load %arg15[%c0_527, %c2_528, %c2_529, %c0_530] : memref<1x10x10x16xbf16, #tpu.memory_space<vmem>>, vector<1x8x8x16xbf16>
    %1137 = vector.shape_cast %1136 : vector<1x8x8x16xbf16> to vector<64x16xbf16>
    %c0_531 = arith.constant 0 : index
    %c128 = arith.constant 128 : index
    %1138 = vector.load %arg16[%c0_531, %c128] : memref<64x144xbf16, #tpu.memory_space<vmem>>, vector<64x16xbf16>
    tpu.vector_store %arg16[%c0_531, %c128], %1137 {strides = array<i32>} : memref<64x144xbf16, #tpu.memory_space<vmem>>, vector<64x16xbf16>,
    %c0_532 = arith.constant 0 : index
    %c0_533 = arith.constant 0 : index
    %1139 = vector.load %arg16[%c0_532, %c0_533] : memref<64x144xbf16, #tpu.memory_space<vmem>>, vector<64x144xbf16>
    %c0_534 = arith.constant 0 : index
    %c0_535 = arith.constant 0 : index
    %1140 = vector.load %arg4[%c0_534, %c0_535] : memref<144x32xbf16, #tpu.memory_space<vmem>>, vector<144x32xbf16>
    %cst_536 = arith.constant dense<0.000000e+00> : vector<64x32xf32>
    %1141 = tpu.matmul %1139, %1140, %cst_536 {dimension_numbers = #tpu.dot_dimension_numbers<[1], [0], [0], [1], [0, 0, 1, 1], [], []>} : vector<64x144xbf16>, vector<144x32xbf16>, vector<64x32xf32> -> vector<64x32xf32>
    %1142 = vector.shape_cast %1141 : vector<64x32xf32> to vector<1x8x8x32xf32>
    %1143 = vector.shape_cast %1142 : vector<1x8x8x32xf32> to vector<1x4x2x8x32xf32>
    %cst_537 = arith.constant dense<0xFF800000> : vector<1x4x8x32xf32>
    %1144 = vector.multi_reduction <maximumf>, %1143, %cst_537 [2] : vector<1x4x2x8x32xf32> to vector<1x4x8x32xf32>
    %1145 = vector.shape_cast %1144 : vector<1x4x8x32xf32> to vector<1x4x4x2x32xf32>
    %cst_538 = arith.constant dense<0xFF800000> : vector<1x4x4x32xf32>
    %1146 = vector.multi_reduction <maximumf>, %1145, %cst_538 [3] : vector<1x4x4x2x32xf32> to vector<1x4x4x32xf32>
    %c0_539 = arith.constant 0 : index
    %c0_540 = arith.constant 0 : index
    %1147 = vector.load %arg5[%c0_539, %c0_540] : memref<1x32xf32, #tpu.memory_space<vmem>>, vector<1x32xf32>
    %1148 = vector.shape_cast %1147 : vector<1x32xf32> to vector<1x1x1x32xf32>
    %1149 = vector.broadcast %1148 : vector<1x1x1x32xf32> to vector<1x4x4x32xf32>
    %1150 = arith.addf %1146, %1149 : vector<1x4x4x32xf32>
    %cst_541 = arith.constant 0.000000e+00 : f32
    %1151 = vector.broadcast %cst_541 : f32 to vector<1x4x4x32xf32>
    %1152 = arith.maximumf %1150, %1151 : vector<1x4x4x32xf32>
    %cst_542 = arith.constant 0.000000e+00 : bf16
    %1153 = vector.broadcast %cst_542 : bf16 to vector<1x1x6x32xbf16>
    %c0_543 = arith.constant 0 : index
    %c0_544 = arith.constant 0 : index
    %c0_545 = arith.constant 0 : index
    %c0_546 = arith.constant 0 : index
    %1154 = vector.load %arg17[%c0_543, %c0_544, %c0_545, %c0_546] : memref<1x6x6x32xbf16, #tpu.memory_space<vmem>>, vector<1x1x6x32xbf16>
    tpu.vector_store %arg17[%c0_543, %c0_544, %c0_545, %c0_546], %1153 {strides = array<i32>} : memref<1x6x6x32xbf16, #tpu.memory_space<vmem>>, vector<1x1x6x32xbf16>,
    %cst_547 = arith.constant 0.000000e+00 : bf16
    %1155 = vector.broadcast %cst_547 : bf16 to vector<1x1x6x32xbf16>
    %c0_548 = arith.constant 0 : index
    %c5_549 = arith.constant 5 : index
    %c0_550 = arith.constant 0 : index
    %c0_551 = arith.constant 0 : index
    %1156 = vector.load %arg17[%c0_548, %c5_549, %c0_550, %c0_551] : memref<1x6x6x32xbf16, #tpu.memory_space<vmem>>, vector<1x1x6x32xbf16>
    tpu.vector_store %arg17[%c0_548, %c5_549, %c0_550, %c0_551], %1155 {strides = array<i32>} : memref<1x6x6x32xbf16, #tpu.memory_space<vmem>>, vector<1x1x6x32xbf16>,
    %cst_552 = arith.constant 0.000000e+00 : bf16
    %1157 = vector.broadcast %cst_552 : bf16 to vector<1x6x1x32xbf16>
    %c0_553 = arith.constant 0 : index
    %c0_554 = arith.constant 0 : index
    %c0_555 = arith.constant 0 : index
    %c0_556 = arith.constant 0 : index
    %1158 = vector.load %arg17[%c0_553, %c0_554, %c0_555, %c0_556] : memref<1x6x6x32xbf16, #tpu.memory_space<vmem>>, vector<1x6x1x32xbf16>
    tpu.vector_store %arg17[%c0_553, %c0_554, %c0_555, %c0_556], %1157 {strides = array<i32>} : memref<1x6x6x32xbf16, #tpu.memory_space<vmem>>, vector<1x6x1x32xbf16>,
    %cst_557 = arith.constant 0.000000e+00 : bf16
    %1159 = vector.broadcast %cst_557 : bf16 to vector<1x6x1x32xbf16>
    %c0_558 = arith.constant 0 : index
    %c0_559 = arith.constant 0 : index
    %c5_560 = arith.constant 5 : index
    %c0_561 = arith.constant 0 : index
    %1160 = vector.load %arg17[%c0_558, %c0_559, %c5_560, %c0_561] : memref<1x6x6x32xbf16, #tpu.memory_space<vmem>>, vector<1x6x1x32xbf16>
    tpu.vector_store %arg17[%c0_558, %c0_559, %c5_560, %c0_561], %1159 {strides = array<i32>} : memref<1x6x6x32xbf16, #tpu.memory_space<vmem>>, vector<1x6x1x32xbf16>,
    %1161 = arith.truncf %1152 : vector<1x4x4x32xf32> to vector<1x4x4x32xbf16>
    %c0_562 = arith.constant 0 : index
    %c1_563 = arith.constant 1 : index
    %c1_564 = arith.constant 1 : index
    %c0_565 = arith.constant 0 : index
    %1162 = vector.load %arg17[%c0_562, %c1_563, %c1_564, %c0_565] : memref<1x6x6x32xbf16, #tpu.memory_space<vmem>>, vector<1x4x4x32xbf16>
    tpu.vector_store %arg17[%c0_562, %c1_563, %c1_564, %c0_565], %1161 {strides = array<i32>} : memref<1x6x6x32xbf16, #tpu.memory_space<vmem>>, vector<1x4x4x32xbf16>,
    %c0_566 = arith.constant 0 : index
    %c0_567 = arith.constant 0 : index
    %c0_568 = arith.constant 0 : index
    %c0_569 = arith.constant 0 : index
    %1163 = vector.load %arg17[%c0_566, %c0_567, %c0_568, %c0_569] : memref<1x6x6x32xbf16, #tpu.memory_space<vmem>>, vector<1x4x4x32xbf16>
    %1164 = vector.shape_cast %1163 : vector<1x4x4x32xbf16> to vector<16x32xbf16>
    %c0_570 = arith.constant 0 : index
    %c0_571 = arith.constant 0 : index
    %1165 = vector.load %arg18[%c0_570, %c0_571] : memref<16x288xbf16, #tpu.memory_space<vmem>>, vector<16x32xbf16>
    tpu.vector_store %arg18[%c0_570, %c0_571], %1164 {strides = array<i32>} : memref<16x288xbf16, #tpu.memory_space<vmem>>, vector<16x32xbf16>,
    %c0_572 = arith.constant 0 : index
    %c0_573 = arith.constant 0 : index
    %c1_574 = arith.constant 1 : index
    %c0_575 = arith.constant 0 : index
    %1166 = vector.load %arg17[%c0_572, %c0_573, %c1_574, %c0_575] : memref<1x6x6x32xbf16, #tpu.memory_space<vmem>>, vector<1x4x4x32xbf16>
    %1167 = vector.shape_cast %1166 : vector<1x4x4x32xbf16> to vector<16x32xbf16>
    %c0_576 = arith.constant 0 : index
    %c32_577 = arith.constant 32 : index
    %1168 = vector.load %arg18[%c0_576, %c32_577] : memref<16x288xbf16, #tpu.memory_space<vmem>>, vector<16x32xbf16>
    tpu.vector_store %arg18[%c0_576, %c32_577], %1167 {strides = array<i32>} : memref<16x288xbf16, #tpu.memory_space<vmem>>, vector<16x32xbf16>,
    %c0_578 = arith.constant 0 : index
    %c0_579 = arith.constant 0 : index
    %c2_580 = arith.constant 2 : index
    %c0_581 = arith.constant 0 : index
    %1169 = vector.load %arg17[%c0_578, %c0_579, %c2_580, %c0_581] : memref<1x6x6x32xbf16, #tpu.memory_space<vmem>>, vector<1x4x4x32xbf16>
    %1170 = vector.shape_cast %1169 : vector<1x4x4x32xbf16> to vector<16x32xbf16>
    %c0_582 = arith.constant 0 : index
    %c64_583 = arith.constant 64 : index
    %1171 = vector.load %arg18[%c0_582, %c64_583] : memref<16x288xbf16, #tpu.memory_space<vmem>>, vector<16x32xbf16>
    tpu.vector_store %arg18[%c0_582, %c64_583], %1170 {strides = array<i32>} : memref<16x288xbf16, #tpu.memory_space<vmem>>, vector<16x32xbf16>,
    %c0_584 = arith.constant 0 : index
    %c1_585 = arith.constant 1 : index
    %c0_586 = arith.constant 0 : index
    %c0_587 = arith.constant 0 : index
    %1172 = vector.load %arg17[%c0_584, %c1_585, %c0_586, %c0_587] : memref<1x6x6x32xbf16, #tpu.memory_space<vmem>>, vector<1x4x4x32xbf16>
    %1173 = vector.shape_cast %1172 : vector<1x4x4x32xbf16> to vector<16x32xbf16>
    %c0_588 = arith.constant 0 : index
    %c96_589 = arith.constant 96 : index
    %1174 = vector.load %arg18[%c0_588, %c96_589] : memref<16x288xbf16, #tpu.memory_space<vmem>>, vector<16x32xbf16>
    tpu.vector_store %arg18[%c0_588, %c96_589], %1173 {strides = array<i32>} : memref<16x288xbf16, #tpu.memory_space<vmem>>, vector<16x32xbf16>,
    %c0_590 = arith.constant 0 : index
    %c1_591 = arith.constant 1 : index
    %c1_592 = arith.constant 1 : index
    %c0_593 = arith.constant 0 : index
    %1175 = vector.load %arg17[%c0_590, %c1_591, %c1_592, %c0_593] : memref<1x6x6x32xbf16, #tpu.memory_space<vmem>>, vector<1x4x4x32xbf16>
    %1176 = vector.shape_cast %1175 : vector<1x4x4x32xbf16> to vector<16x32xbf16>
    %c0_594 = arith.constant 0 : index
    %c128_595 = arith.constant 128 : index
    %1177 = vector.load %arg18[%c0_594, %c128_595] : memref<16x288xbf16, #tpu.memory_space<vmem>>, vector<16x32xbf16>
    tpu.vector_store %arg18[%c0_594, %c128_595], %1176 {strides = array<i32>} : memref<16x288xbf16, #tpu.memory_space<vmem>>, vector<16x32xbf16>,
    %c0_596 = arith.constant 0 : index
    %c1_597 = arith.constant 1 : index
    %c2_598 = arith.constant 2 : index
    %c0_599 = arith.constant 0 : index
    %1178 = vector.load %arg17[%c0_596, %c1_597, %c2_598, %c0_599] : memref<1x6x6x32xbf16, #tpu.memory_space<vmem>>, vector<1x4x4x32xbf16>
    %1179 = vector.shape_cast %1178 : vector<1x4x4x32xbf16> to vector<16x32xbf16>
    %c0_600 = arith.constant 0 : index
    %c160 = arith.constant 160 : index
    %1180 = vector.load %arg18[%c0_600, %c160] : memref<16x288xbf16, #tpu.memory_space<vmem>>, vector<16x32xbf16>
    tpu.vector_store %arg18[%c0_600, %c160], %1179 {strides = array<i32>} : memref<16x288xbf16, #tpu.memory_space<vmem>>, vector<16x32xbf16>,
    %c0_601 = arith.constant 0 : index
    %c2_602 = arith.constant 2 : index
    %c0_603 = arith.constant 0 : index
    %c0_604 = arith.constant 0 : index
    %1181 = vector.load %arg17[%c0_601, %c2_602, %c0_603, %c0_604] : memref<1x6x6x32xbf16, #tpu.memory_space<vmem>>, vector<1x4x4x32xbf16>
    %1182 = vector.shape_cast %1181 : vector<1x4x4x32xbf16> to vector<16x32xbf16>
    %c0_605 = arith.constant 0 : index
    %c192 = arith.constant 192 : index
    %1183 = vector.load %arg18[%c0_605, %c192] : memref<16x288xbf16, #tpu.memory_space<vmem>>, vector<16x32xbf16>
    tpu.vector_store %arg18[%c0_605, %c192], %1182 {strides = array<i32>} : memref<16x288xbf16, #tpu.memory_space<vmem>>, vector<16x32xbf16>,
    %c0_606 = arith.constant 0 : index
    %c2_607 = arith.constant 2 : index
    %c1_608 = arith.constant 1 : index
    %c0_609 = arith.constant 0 : index
    %1184 = vector.load %arg17[%c0_606, %c2_607, %c1_608, %c0_609] : memref<1x6x6x32xbf16, #tpu.memory_space<vmem>>, vector<1x4x4x32xbf16>
    %1185 = vector.shape_cast %1184 : vector<1x4x4x32xbf16> to vector<16x32xbf16>
    %c0_610 = arith.constant 0 : index
    %c224 = arith.constant 224 : index
    %1186 = vector.load %arg18[%c0_610, %c224] : memref<16x288xbf16, #tpu.memory_space<vmem>>, vector<16x32xbf16>
    tpu.vector_store %arg18[%c0_610, %c224], %1185 {strides = array<i32>} : memref<16x288xbf16, #tpu.memory_space<vmem>>, vector<16x32xbf16>,
    %c0_611 = arith.constant 0 : index
    %c2_612 = arith.constant 2 : index
    %c2_613 = arith.constant 2 : index
    %c0_614 = arith.constant 0 : index
    %1187 = vector.load %arg17[%c0_611, %c2_612, %c2_613, %c0_614] : memref<1x6x6x32xbf16, #tpu.memory_space<vmem>>, vector<1x4x4x32xbf16>
    %1188 = vector.shape_cast %1187 : vector<1x4x4x32xbf16> to vector<16x32xbf16>
    %c0_615 = arith.constant 0 : index
    %c256 = arith.constant 256 : index
    %1189 = vector.load %arg18[%c0_615, %c256] : memref<16x288xbf16, #tpu.memory_space<vmem>>, vector<16x32xbf16>
    tpu.vector_store %arg18[%c0_615, %c256], %1188 {strides = array<i32>} : memref<16x288xbf16, #tpu.memory_space<vmem>>, vector<16x32xbf16>,
    %c0_616 = arith.constant 0 : index
    %c0_617 = arith.constant 0 : index
    %1190 = vector.load %arg18[%c0_616, %c0_617] : memref<16x288xbf16, #tpu.memory_space<vmem>>, vector<16x288xbf16>
    %c0_618 = arith.constant 0 : index
    %c0_619 = arith.constant 0 : index
    %1191 = vector.load %arg6[%c0_618, %c0_619] : memref<288x64xbf16, #tpu.memory_space<vmem>>, vector<288x64xbf16>
    %cst_620 = arith.constant dense<0.000000e+00> : vector<16x64xf32>
    %1192 = tpu.matmul %1190, %1191, %cst_620 {dimension_numbers = #tpu.dot_dimension_numbers<[1], [0], [0], [1], [0, 0, 1, 1], [], []>} : vector<16x288xbf16>, vector<288x64xbf16>, vector<16x64xf32> -> vector<16x64xf32>
    %1193 = vector.shape_cast %1192 : vector<16x64xf32> to vector<1x4x4x64xf32>
    %1194 = vector.shape_cast %1193 : vector<1x4x4x64xf32> to vector<1x2x2x4x64xf32>
    %cst_621 = arith.constant dense<0xFF800000> : vector<1x2x4x64xf32>
    %1195 = vector.multi_reduction <maximumf>, %1194, %cst_621 [2] : vector<1x2x2x4x64xf32> to vector<1x2x4x64xf32>
    %1196 = vector.shape_cast %1195 : vector<1x2x4x64xf32> to vector<1x2x2x2x64xf32>
    %cst_622 = arith.constant dense<0xFF800000> : vector<1x2x2x64xf32>
    %1197 = vector.multi_reduction <maximumf>, %1196, %cst_622 [3] : vector<1x2x2x2x64xf32> to vector<1x2x2x64xf32>
    %c0_623 = arith.constant 0 : index
    %c0_624 = arith.constant 0 : index
    %1198 = vector.load %arg7[%c0_623, %c0_624] : memref<1x64xf32, #tpu.memory_space<vmem>>, vector<1x64xf32>
    %1199 = vector.shape_cast %1198 : vector<1x64xf32> to vector<1x1x1x64xf32>
    %1200 = vector.broadcast %1199 : vector<1x1x1x64xf32> to vector<1x2x2x64xf32>
    %1201 = arith.addf %1197, %1200 : vector<1x2x2x64xf32>
    %cst_625 = arith.constant 0.000000e+00 : f32
    %1202 = vector.broadcast %cst_625 : f32 to vector<1x2x2x64xf32>
    %1203 = arith.maximumf %1201, %1202 : vector<1x2x2x64xf32>
    %1204 = vector.shape_cast %1203 : vector<1x2x2x64xf32> to vector<1x4x64xf32>
    %cst_626 = arith.constant dense<0.000000e+00> : vector<1x64xf32>
    %1205 = vector.multi_reduction <add>, %1204, %cst_626 [1] : vector<1x4x64xf32> to vector<1x64xf32>
    %cst_627 = arith.constant 4.000000e+00 : f32
    %1206 = vector.broadcast %cst_627 : f32 to vector<1x64xf32>
    %1207 = arith.divf %1205, %1206 : vector<1x64xf32>
    %c0_628 = arith.constant 0 : index
    %c0_629 = arith.constant 0 : index
    %1208 = vector.load %arg8[%c0_628, %c0_629] : memref<64x32xf32, #tpu.memory_space<vmem>>, vector<64x32xf32>
    %cst_630 = arith.constant dense<0.000000e+00> : vector<1x32xf32>
    %1209 = tpu.matmul %1207, %1208, %cst_630 {dimension_numbers = #tpu.dot_dimension_numbers<[1], [0], [0], [1], [0, 0, 1, 1], [], []>} : vector<1x64xf32>, vector<64x32xf32>, vector<1x32xf32> -> vector<1x32xf32>
    %c0_631 = arith.constant 0 : index
    %c0_632 = arith.constant 0 : index
    %1210 = vector.load %arg9[%c0_631, %c0_632] : memref<1x32xf32, #tpu.memory_space<vmem>>, vector<1x32xf32>
    %1211 = arith.addf %1209, %1210 : vector<1x32xf32>
    %cst_633 = arith.constant 0.000000e+00 : f32
    %1212 = vector.broadcast %cst_633 : f32 to vector<1x32xf32>
    %1213 = arith.maximumf %1211, %1212 : vector<1x32xf32>
    %c0_634 = arith.constant 0 : index
    %c0_635 = arith.constant 0 : index
    %1214 = vector.load %arg10[%c0_634, %c0_635] : memref<32x5xf32, #tpu.memory_space<vmem>>, vector<32x5xf32>
    %cst_636 = arith.constant dense<0.000000e+00> : vector<1x5xf32>
    %1215 = tpu.matmul %1213, %1214, %cst_636 {dimension_numbers = #tpu.dot_dimension_numbers<[1], [0], [0], [1], [0, 0, 1, 1], [], []>} : vector<1x32xf32>, vector<32x5xf32>, vector<1x5xf32> -> vector<1x5xf32>
    %c0_637 = arith.constant 0 : index
    %c0_638 = arith.constant 0 : index
    %1216 = vector.load %arg11[%c0_637, %c0_638] : memref<1x5xf32, #tpu.memory_space<vmem>>, vector<1x5xf32>
    %1217 = arith.addf %1215, %1216 : vector<1x5xf32>
    %c0_639 = arith.constant 0 : index
    %c0_640 = arith.constant 0 : index
    %c0_641 = arith.constant 0 : index
    %1218 = vector.load %arg12[%c0_639, %c0_640, %c0_641] : memref<1x1x5xf32, #tpu.memory_space<vmem>>, vector<1x1x5xf32>
    %1219 = vector.shape_cast %1218 : vector<1x1x5xf32> to vector<1x5xf32>
    %1220 = vector.shape_cast %1217 : vector<1x5xf32> to vector<1x1x5xf32>
    tpu.vector_store %arg12[%c0_639, %c0_640, %c0_641], %1220 {strides = array<i32>} : memref<1x1x5xf32, #tpu.memory_space<vmem>>, vector<1x1x5xf32>,
    return
  }
  func.func @transform_0(%arg0: i32) -> (i32, i32, i32, i32, i32) {
    %c0_i32 = arith.constant 0 : i32
    %c0_i32_0 = arith.constant 0 : i32
    %c0_i32_1 = arith.constant 0 : i32
    %c0_i32_2 = arith.constant 0 : i32
    %c0_i32_3 = arith.constant 0 : i32
    return %arg0, %c0_i32, %c0_i32_0, %c0_i32_1, %c0_i32_2 : i32, i32, i32, i32, i32
  }
  func.func @transform_1(%arg0: i32) -> (i32, i32) {
    %c0_i32 = arith.constant 0 : i32
    %c0_i32_0 = arith.constant 0 : i32
    %c0_i32_1 = arith.constant 0 : i32
    return %c0_i32, %c0_i32_0 : i32, i32
  }
  func.func @transform_2(%arg0: i32) -> (i32, i32) {
    %c0_i32 = arith.constant 0 : i32
    %c0_i32_0 = arith.constant 0 : i32
    %c0_i32_1 = arith.constant 0 : i32
    return %c0_i32, %c0_i32_0 : i32, i32
  }
  func.func @transform_3(%arg0: i32) -> (i32, i32) {
    %c0_i32 = arith.constant 0 : i32
    %c0_i32_0 = arith.constant 0 : i32
    %c0_i32_1 = arith.constant 0 : i32
    return %c0_i32, %c0_i32_0 : i32, i32
  }
  func.func @transform_4(%arg0: i32) -> (i32, i32) {
    %c0_i32 = arith.constant 0 : i32
    %c0_i32_0 = arith.constant 0 : i32
    %c0_i32_1 = arith.constant 0 : i32
    return %c0_i32, %c0_i32_0 : i32, i32
  }
  func.func @transform_5(%arg0: i32) -> (i32, i32) {
    %c0_i32 = arith.constant 0 : i32
    %c0_i32_0 = arith.constant 0 : i32
    %c0_i32_1 = arith.constant 0 : i32
    return %c0_i32, %c0_i32_0 : i32, i32
  }
  func.func @transform_6(%arg0: i32) -> (i32, i32) {
    %c0_i32 = arith.constant 0 : i32
    %c0_i32_0 = arith.constant 0 : i32
    %c0_i32_1 = arith.constant 0 : i32
    return %c0_i32, %c0_i32_0 : i32, i32
  }
  func.func @transform_7(%arg0: i32) -> (i32, i32) {
    %c0_i32 = arith.constant 0 : i32
    %c0_i32_0 = arith.constant 0 : i32
    %c0_i32_1 = arith.constant 0 : i32
    return %c0_i32, %c0_i32_0 : i32, i32
  }
  func.func @transform_8(%arg0: i32) -> (i32, i32) {
    %c0_i32 = arith.constant 0 : i32
    %c0_i32_0 = arith.constant 0 : i32
    %c0_i32_1 = arith.constant 0 : i32
    return %c0_i32, %c0_i32_0 : i32, i32
  }
  func.func @transform_9(%arg0: i32) -> (i32, i32) {
    %c0_i32 = arith.constant 0 : i32
    %c0_i32_0 = arith.constant 0 : i32
    %c0_i32_1 = arith.constant 0 : i32
    return %c0_i32, %c0_i32_0 : i32, i32
  }
  func.func @transform_10(%arg0: i32) -> (i32, i32) {
    %c0_i32 = arith.constant 0 : i32
    %c0_i32_0 = arith.constant 0 : i32
    %c0_i32_1 = arith.constant 0 : i32
    return %c0_i32, %c0_i32_0 : i32, i32
  }
  func.func @transform_11(%arg0: i32) -> (i32, i32, i32) {
    %c0_i32 = arith.constant 0 : i32
    %c0_i32_0 = arith.constant 0 : i32
    %c0_i32_1 = arith.constant 0 : i32
    return %arg0, %c0_i32, %c0_i32_0 : i32, i32, i32
  }
}

</mosaic_0001>

<bundles_post_ra>
// kernel: arias_forward.1
= control target key start
LH: loop header
LB: loop body
LE: loop exit
PB: predicated region body
PF: predicated region fallthrough
CT: control target
= control target key end

     0   :  { %s9015_s0 = inlined_call_operand.vmem [shape: f32[2,3,8,2,16], index: 0, kind: input, shape index: {}]   ;;  %s9016_s1 = inlined_call_operand.vmem [shape: f32[9,16], index: 1, kind: input, shape index: {}]   ;;  %s9017_s2 = inlined_call_operand.vmem [shape: f32[1,16], index: 2, kind: input, shape index: {}]   ;;  %s9018_s3 = inlined_call_operand.vmem [shape: bf16[144,32], index: 3, kind: input, shape index: {}]   ;;  %s9019_s4 = inlined_call_operand.vmem [shape: f32[1,32], index: 4, kind: input, shape index: {}]   ;;  %s9020_s5 = inlined_call_operand.vmem [shape: bf16[288,64], index: 5, kind: input, shape index: {}]   ;;  %s9021_s6 = inlined_call_operand.vmem [shape: f32[1,64], index: 6, kind: input, shape index: {}]   ;;  %s9022_s7 = inlined_call_operand.vmem [shape: f32[64,32], index: 7, kind: input, shape index: {}]   ;;  %s9023_s8 = inlined_call_operand.vmem [shape: f32[1,32], index: 8, kind: input, shape index: {}]   ;;  %s9024_s9 = inlined_call_operand.vmem [shape: f32[32,5], index: 9, kind: input, shape index: {}]   ;;  %s9025_s10 = inlined_call_operand.vmem [shape: f32[1,5], index: 10, kind: input, shape index: {}]   ;;  %s9026_s11 = inlined_call_operand.hbm [shape: f32[2,1,5], index: 11, kind: output, shape index: {}]  }
   0x1   :  { %9092 = sst [smem:[#allocation43_spill]] %s9015_s0 }
   0x2   :  { %9093 = sst [smem:[#allocation44_spill]] %s9016_s1 }
   0x3   :  { %9094 = sst [smem:[#allocation45_spill]] %s9017_s2 }
   0x4   :  { %9095 = sst [smem:[#allocation46_spill]] %s9018_s3 }
   0x5   :  { %9096 = sst [smem:[#allocation47_spill]] %s9019_s4 }
   0x6   :  { %9097 = sst [smem:[#allocation48_spill]] %s9020_s5 }
   0x7   :  { %9098 = sst [smem:[#allocation49_spill]] %s9021_s6 }
   0x8   :  { %9099 = sst [smem:[#allocation50_spill]] %s9022_s7 }
   0x9   :  { %9100 = sst [smem:[#allocation51_spill]] %s9023_s8 }
   0xa   :  { %9101 = sst [smem:[#allocation52_spill]] %s9024_s9 }
   0xb   :  { %9102 = sst [smem:[#allocation53_spill]] %s9025_s10 }
   0xc   :  { %9103 = sst [smem:[#allocation54_spill]] %s9026_s11 }
   0xd   :  { %16 = vsyncpa [#allocation10], 0 }
   0xe   :  { %17 = vsyncpa [#allocation9], 0 }
   0xf   :  { %19 = vsyncpa [#allocation9 + $0x1], 0  ;;  %s6362_s17 = smov 0   ;;  %s6364_s18 = smov 0  }
  0x10   :  { %s6366_s19 = smov 0   ;;  %s6368_s20 = smov 0  }
  0x11 LB: > { %9104 = sst [smem:[#allocation14_spill]] %s6272_s17  ;;  %s6383_s21 = sadd.s32 4294967295, %s6284_s20   ;;  %s6284_s20 = sphi %s6368_s20, %s9230_s20   ;;  %s6280_s19 = sphi %s6366_s19, %s9233_s19   ;;  %s6276_s18 = sphi %s6364_s18, %s9232_s18   ;;  %s6272_s17 = sphi %s6362_s17, %s9231_s17  }
  0x12   : > { %9105 = sst [smem:[#allocation15_spill]] %s6276_s18  ;;  %s5719_s22 = sadd.s32 4294967294, %s6284_s20  }
  0x13   : > { %9106 = sst [smem:[#allocation16_spill]] %s6280_s19  ;;  %s6387_s23 = sadd.s32 1, %s6284_s20  }
  0x14   : > { %9107 = sst [smem:[#allocation17_spill]] %s6284_s20  ;;  %s268_s24 = sadd.s32 1, %s6280_s19 }
  0x15   : > { %9108 = sst [smem:[#allocation18_spill]] %s6383_s21  ;;  %s265_s25 = ssub.s32 %s6284_s20, %s6387_s23 }
  0x16   : > { %9109 = sst [smem:[#allocation19_spill]] %s6387_s23  ;;  %p278_p0 = scmp.ne.s32.totalorder %s6280_s19, %s6276_s18 }
  0x17   : > { %p266_p1 = scmp.eq.s32.totalorder %s265_s25, 0  ;;  %p279_p2 = scmp.eq.s32.totalorder %s6383_s21, 1 }
  0x18   : > { %p284_p3 = scmp.ne.s32.totalorder %s6276_s18, %s6272_s17  ;;  %p285_p4 = scmp.eq.s32.totalorder %s5719_s22, 1 }
  0x19   : > { %s6398_s26 = scalar_select %p266_p1, %s6280_s19, %s268_s24  }
  0x1a   : > { %p6400_p5 = por %p279_p2, %p278_p0  ;;  %p6404_p6 = por %p285_p4, %p284_p3 }
  0x1b   : > { %9110 = sst [smem:[#allocation20_spill]] %s6398_s26  ;;  %p5720_p7 = scmp.ge.s32.totalorder %s6284_s20, 1 }
  0x1c   : > { %s9111_s27 = scalar_select %p6400_p5, 1, 0 }
  0x1d   : > { %s9113_s28 = scalar_select %p6404_p6, 1, 0 }
  0x1e   : > { %9112 = sst [smem:[#allocation21_spill]] %s9111_s27  ;;  %p292_p8 = scmp.lt.s32.totalorder %s6284_s20, 3 }
  0x1f   : > { %9114 = sst [smem:[#allocation22_spill]] %s9113_s28  ;;  %p6131_p9 = scmp.eq.s32.totalorder %s6383_s21, 0 }
  0x20   : > { %p293_p10 = pnand %p5720_p7, %p292_p8  ;;  %s9115_s1 = sld [smem:[#allocation44_spill]] }
  0x21   : > { %s6286_s13 = smov [#allocation8]   ;;  %s6287_s14 = smov 128  }
  0x22   : > { %p6123_p11 = pneg %p293_p10  ;;  %s6288_s15 = smov 8  }
  0x23   : > { %354 = sbr.rel (%p293_p10) target bundleno = 1844 (0x734), region = 64 }
  0x24   : > { %p6124_p12 = pnand %p6131_p9, %p6123_p11 }
  0x26   : > { %s303_s12 = sshll.u32 %s9115_s1, 4  ;;  %s304_s12 = int_to_ptr.vmem [resolvable:$true] %s303_s12 }
  0x27   : > { %6126 = dma.vmem_to_smem (!%p6124_p12), %s304_s12, 256, %s6286_s13, [#allocation10], %s6287_s14, %s6287_s14, %s6288_s15  }
  0x28   : > { %6263 = dma.done.wait (%p6131_p9), [#allocation10], 256  }
  0x29   : > { %6265 = vsyncadd (%p6131_p9), [#allocation10], 4294967040 }
  0x2a   : > { %361 = sfence }
  0x2b   : > { %p395_p13 = scmp.lt.s32.totalorder %s6383_s21, 1  ;;  %vm481_vm0 = vcmask 122880   ;;  %v6289_v0 = vmov 0.0   ;;  %s9116_s0 = sld [smem:[#allocation43_spill]]  ;;  %vm425_vm1 = vcmask 123904   ;;  %v6290_v4 = vmov 3.0  }
  0x2c   : > { %483 = vst.msk [vmem:[#allocation2 + $0x20] sm:$0x1] %vm481_vm0, %v6289_v0  ;;  %6185 = vrcp.f32 %v6290_v4  ;;  %vm491_vm2 = vcmask 0   ;;  %vm511_vm4 = vcmask 1042434   ;;  %vm9089_vm5 = vcmask 1041409   ;;  %s6291_s30 = smov 1  }
  0x2d   : > { %s396_s16 = scalar_select %p395_p13, %s6383_s21, 1  ;;  %482 = vst.msk [vmem:[#allocation2] sm:$0x1] %vm481_vm0, %v6289_v0  ;;  %vm514_vm6 = vcmask 1043459   ;;  %vm517_vm7 = vcmask 1044484   ;;  %vm520_vm8 = vcmask 1045509  }
  0x2e   : > { %484 = vst.msk [vmem:[#allocation2 + $0x40] sm:$0x1] %vm481_vm0, %v6289_v0  ;;  %vm9091_vm9 = vcmask 1046534   ;;  %vm526_vm10 = vcmask 1047559   ;;  %vm532_vm11 = vcmask 130049   ;;  %vm545_vm12 = vcmask 130048  }
  0x2f   : > { %486 = vst.msk [vmem:[#allocation2 + $0x18] sm:$0x1] %vm481_vm0, %v6289_v0  ;;  %s6116_s22 = smul.u32 48, %s396_s16  ;;  %s6292_s12 = smov 127   ;;  %vm489_vm13 = vcmask 7168   ;;  %vm555_vm14 = vcmask 122888  }
  0x30   : > { %487 = vst.msk [vmem:[#allocation2 + $0x38] sm:$0x1] %vm481_vm0, %v6289_v0  ;;  %s6500_s13 = sld [smem:[#allocation8]]  ;;  %vm498_vm15 = vcmask 123000  }
  0x31   : > { %488 = vst.msk [vmem:[#allocation2 + $0x58] sm:$0x1] %vm481_vm0, %v6289_v0  ;;  %s6431_s29 = scalar_lea.vmem %s9116_s0, %s6116_s22  ;;  %s6502_s14 = sld [smem:[#allocation8 + $0x80]] }
  0x32   : > { %v401_v1 = vld [vmem:[%s6431_s29] sm:$0x3]  ;;  %v409_v2 = vld [vmem:[%s6431_s29 + $0x10] sm:$0x3]  ;;  %v402_v3 = vld [vmem:[%s6431_s29 + $0x2] sm:$0x3]  ;;  %v6186_v28 = vpop.eup %6185 }
  0x33   : > { %v403_v5 = vld [vmem:[%s6431_s29 + $0x4] sm:$0x3]  ;;  %v404_v6 = vld [vmem:[%s6431_s29 + $0x6] sm:$0x3]  ;;  %v410_v7 = vld [vmem:[%s6431_s29 + $0x12] sm:$0x3]  ;;  %vm471_vm3 = vweird.f32 %v6186_v28 }
  0x34   : > { %v411_v8 = vld [vmem:[%s6431_s29 + $0x14] sm:$0x3]  ;;  %v405_v9 = vld [vmem:[%s6431_s29 + $0x8] sm:$0x3]  ;;  %v417_v10 = vld [vmem:[%s6431_s29 + $0x20] sm:$0x3] }
  0x35   : > { %v418_v11 = vld [vmem:[%s6431_s29 + $0x22] sm:$0x3]  ;;  %v426_v12 = vsel %vm425_vm1, %v401_v1, 0.0  ;;  %v427_v13 = vsel %vm425_vm1, %v409_v2, 0.0  ;;  %v406_v14 = vld [vmem:[%s6431_s29 + $0xa] sm:$0x3] }
  0x36   : > { %v407_v15 = vld [vmem:[%s6431_s29 + $0xc] sm:$0x3]  ;;  %v412_v16 = vld [vmem:[%s6431_s29 + $0x16] sm:$0x3]  ;;  %v413_v17 = vld [vmem:[%s6431_s29 + $0x18] sm:$0x3]  ;;  %v428_v25 = vadd.f32 %v427_v13, %v426_v12 }
  0x37   : > { %v414_v18 = vld [vmem:[%s6431_s29 + $0x1a] sm:$0x3]  ;;  %v415_v19 = vld [vmem:[%s6431_s29 + $0x1c] sm:$0x3]  ;;  %v419_v20 = vld [vmem:[%s6431_s29 + $0x24] sm:$0x3] }
  0x38   : > { %v431_v21 = vsel %vm425_vm1, %v402_v3, 0.0  ;;  %v432_v22 = vsel %vm425_vm1, %v410_v7, 0.0  ;;  %v420_v23 = vld [vmem:[%s6431_s29 + $0x26] sm:$0x3]  ;;  %v421_v24 = vld [vmem:[%s6431_s29 + $0x28] sm:$0x3] }
  0x39   : > { %v429_v26 = vsel %vm425_vm1, %v417_v10, 0.0  ;;  %v434_v27 = vsel %vm425_vm1, %v418_v11, 0.0  ;;  %v436_v29 = vsel %vm425_vm1, %v403_v5, 0.0  ;;  %v437_v30 = vsel %vm425_vm1, %v411_v8, 0.0  ;;  %v408_v33 = vld [vmem:[%s6431_s29 + $0xe] sm:$0x3] }
  0x3a   : > { %v441_v31 = vsel %vm425_vm1, %v404_v6, 0.0  ;;  %v442_v32 = vsel %vm425_vm1, %v412_v16, 0.0  ;;  %v433_v34 = vadd.f32 %v432_v22, %v431_v21  ;;  %v439_v35 = vsel %vm425_vm1, %v419_v20, 0.0  ;;  %v416_v38 = vld [vmem:[%s6431_s29 + $0x1e] sm:$0x3]  ;;  %490 = vst.msk [vmem:[#allocation2] sm:$0xff] %vm489_vm13, %v6289_v0 }
  0x3b   : > { %v446_v36 = vsel %vm425_vm1, %v405_v9, 0.0  ;;  %v447_v37 = vsel %vm425_vm1, %v413_v17, 0.0  ;;  %v422_v39 = vld [vmem:[%s6431_s29 + $0x2a] sm:$0x3]  ;;  %v451_v40 = vsel %vm425_vm1, %v406_v14, 0.0  ;;  %v452_v41 = vsel %vm425_vm1, %v414_v18, 0.0 }
  0x3c   : > { %v456_v42 = vsel %vm425_vm1, %v407_v15, 0.0  ;;  %v457_v43 = vsel %vm425_vm1, %v415_v19, 0.0  ;;  %v423_v44 = vld [vmem:[%s6431_s29 + $0x2c] sm:$0x3]  ;;  %v438_v45 = vadd.f32 %v437_v30, %v436_v29  ;;  %v443_v46 = vadd.f32 %v442_v32, %v441_v31  ;;  %v424_v49 = vld [vmem:[%s6431_s29 + $0x2e] sm:$0x3] }
  0x3d   : > { %v444_v47 = vsel %vm425_vm1, %v420_v23, 0.0  ;;  %v467_v48 = vmul.f32 3.0, %v6186_v28  ;;  %v448_v50 = vadd.f32 %v447_v37, %v446_v36  ;;  %v449_v51 = vsel %vm425_vm1, %v421_v24, 0.0  ;;  %492 = vst.msk [vmem:[#allocation2 + $0x8] sm:$0x1] %vm491_vm2, %v6289_v0  ;;  %s6504_s15 = sld [smem:[#allocation8 + $0x100]] }
  0x3e   : > { %v461_v52 = vsel %vm425_vm1, %v408_v33, 0.0  ;;  %v462_v53 = vsel %vm425_vm1, %v416_v38, 0.0  ;;  %v453_v54 = vadd.f32 %v452_v41, %v451_v40  ;;  %v458_v55 = vadd.f32 %v457_v43, %v456_v42  ;;  %494 = vst.msk [vmem:[#allocation2 + $0x18] sm:$0x1] %vm491_vm2, %v6289_v0  ;;  %s6506_s16 = sld [smem:[#allocation8 + $0x180]] }
  0x3f   : > { %v468_v56 = vsub.f32 1.0, %v467_v48  ;;  %v463_v57 = vadd.f32 %v462_v53, %v461_v52  ;;  %v454_v58 = vsel %vm425_vm1, %v422_v39, 0.0  ;;  %v459_v59 = vsel %vm425_vm1, %v423_v44, 0.0  ;;  %493 = vst.msk [vmem:[#allocation2 + $0x10] sm:$0xff] %vm489_vm13, %v6289_v0  ;;  %s6508_s22 = sld [smem:[#allocation8 + $0x280]] }
  0x40   : > { %v464_v60 = vsel %vm425_vm1, %v424_v49, 0.0  ;;  %v430_v61 = vadd.f32 %v429_v26, %v428_v25  ;;  %v435_v63 = vadd.f32 %v434_v27, %v433_v34  ;;  %v440_v1 = vadd.f32 %v439_v35, %v438_v45  ;;  %s6510_s24 = sld [smem:[#allocation8 + $0x300]]  ;;  %499 = vst.msk [vmem:[#allocation2 + $0x48] sm:$0x1] %vm498_vm15, %v6289_v0 }
  0x41   : > { %v469_v62 = vmul.f32 %v6186_v28, %v468_v56  ;;  %v445_v2 = vadd.f32 %v444_v47, %v443_v46  ;;  %v450_v3 = vadd.f32 %v449_v51, %v448_v50  ;;  %v455_v4 = vadd.f32 %v454_v58, %v453_v54  ;;  %s6512_s25 = sld [smem:[#allocation8 + $0x400]]  ;;  %501 = vst.msk [vmem:[#allocation2 + $0x58] sm:$0x1] %vm498_vm15, %v6289_v0 }
  0x42   : > { %v460_v5 = vadd.f32 %v459_v59, %v458_v55  ;;  %v465_v7 = vadd.f32 %v464_v60, %v463_v57  ;;  %s6514_s29 = sld [smem:[#allocation8 + $0x1]]  ;;  %vm496_vm2 = vcmask 130168   ;;  %v595_v39 = vstv %s6502_s14 }
  0x43   : > { %v470_v6 = vadd.f32 %v6186_v28, %v469_v62  ;;  %s6520_s0 = sld [smem:[#allocation8 + $0x200]]  ;;  %497 = vst.msk [vmem:[#allocation2 + $0x40] sm:$0xff] %vm496_vm2, %v6289_v0  ;;  %vm568_vm13 = vcmask 121857   ;;  %v591_v41 = vstv %s6500_s13  ;;  %v9057_v44 = vstv %s6504_s15 }
  0x44   : > { %9117 = sst [smem:[#allocation23_spill]] %s6506_s16  ;;  %500 = vst.msk [vmem:[#allocation2 + $0x50] sm:$0xff] %vm496_vm2, %v6289_v0  ;;  %v607_v43 = vstv %s6506_s16  ;;  %vm576_vm15 = vcmask 121856   ;;  %vm9090_vm2 = vsmask.f32 256 }
  0x45   : > { %v472_v8 = vsel %vm471_vm3, %v6186_v28, %v470_v6  ;;  %s6523_s1 = sld [smem:[#allocation8 + $0x181]]  ;;  %vm570_vm3 = vcmask 114688   ;;  %v9056_v48 = vstv %s6508_s22 }
  0x46   : > { %v473_v9 = vmul.f32 %v472_v8, %v430_v61  ;;  %v474_v10 = vmul.f32 %v472_v8, %v435_v63  ;;  %v475_v11 = vmul.f32 %v472_v8, %v440_v1  ;;  %v476_v12 = vmul.f32 %v472_v8, %v445_v2  ;;  %s6526_s26 = sld [smem:[#allocation8 + $0x201]] }
  0x47   : > { %v477_v13 = vmul.f32 %v472_v8, %v450_v3  ;;  %v478_v14 = vmul.f32 %v472_v8, %v455_v4  ;;  %v479_v15 = vmul.f32 %v472_v8, %v460_v5  ;;  %v480_v16 = vmul.f32 %v472_v8, %v465_v7  ;;  %s6528_s19 = sld [smem:[#allocation8 + $0x281]] }
  0x48   : > { %v510_v17 = vrot.slane %v474_v10, 7  ;;  %v513_v18 = vrot.slane %v475_v11, 6  ;;  %v516_v19 = vrot.slane %v476_v12, 5  ;;  %s6531_s23 = sld [smem:[#allocation8 + $0x301]]  ;;  %v625_v45 = vstv %s6510_s24 }
  0x49   : > { %v519_v20 = vrot.slane %v477_v13, 4  ;;  %v528_v21 = vrot.slane %v480_v16, 1  ;;  %v522_v23 = vrot.slane %v478_v14, 3  ;;  %v525_v26 = vrot.slane %v479_v15, 2  ;;  %s6534_s28 = sld [smem:[#allocation8 + $0x401]] }
  0x4a   : > { %v512_v22 = vsel %vm511_vm4, %v510_v17, %v473_v9  ;;  %v536_v24 = vsel %vm9089_vm5, %v510_v17, %v473_v9  ;;  %s6536_s17 = sld [smem:[#allocation8 + $0x380]]  ;;  %v9055_v46 = vstv %s6514_s29  ;;  %v9058_v49 = vstv %s6512_s25 }
  0x4b   : > { %v515_v25 = vsel %vm514_vm6, %v513_v18, %v512_v22  ;;  %534 = vst.msk [vmem:[#allocation2 + $0x28] sm:$0x1] %vm481_vm0, %v528_v21  ;;  %v537_v27 = vsel %vm511_vm4, %v513_v18, %v536_v24  ;;  %549 = vrot.lane.b32.xlu2 %v528_v21, %s6291_s30  ;;  %9119 = sst [smem:[#allocation25_spill]] %s6523_s1  ;;  %v9059_v53 = vstv %s6523_s1  ;;  %v613_v61 = vstv %s6520_s0 }
  0x4c   : > { %v518_v28 = vsel %vm517_vm7, %v516_v19, %v515_v25  ;;  %v538_v29 = vsel %vm514_vm6, %v516_v19, %v537_v27  ;;  %s6538_s20 = sld [smem:[#allocation8 + $0x2]]  ;;  %v689_v62 = vstv %s6526_s26 }
  0x4d   : > { %v521_v30 = vsel %vm520_vm8, %v519_v20, %v518_v28  ;;  %v539_v31 = vsel %vm517_vm7, %v519_v20, %v538_v29  ;;  %s6540_s27 = sld [smem:[#allocation8 + $0x82]]  ;;  %v9060_v54 = vstv %s6528_s19 }
  0x4e   : > { %v524_v32 = vsel %vm9091_vm9, %v522_v23, %v521_v30  ;;  %v540_v33 = vsel %vm520_vm8, %v522_v23, %v539_v31  ;;  %s6542_s10 = sld [smem:[#allocation8 + $0x381]]  ;;  %v9062_v55 = vstv %s6531_s23 }
  0x4f   : > { %v527_v34 = vsel %vm526_vm10, %v525_v26, %v524_v32  ;;  %v541_v35 = vsel %vm9091_vm9, %v525_v26, %v540_v33  ;;  %s6544_s11 = sld [smem:[#allocation8 + $0x102]]  ;;  %v9063_v57 = vstv %s6534_s28 }
  0x50   : > { %547 = vrot.lane.b32.xlu0 %v527_v34, %s6291_s30  ;;  %533 = vst.msk [vmem:[#allocation2 + $0x20] sm:$0xfe] %vm532_vm11, %v527_v34  ;;  %562 = vrot.lane.b32.xlu1 %v527_v34, %s6292_s12  ;;  %v542_v36 = vsel %vm526_vm10, %v528_v21, %v541_v35  ;;  %s6546_s8 = sld [smem:[#allocation8 + $0x182]]  ;;  %vm553_vm11 = vcmask 130057   ;;  %v631_v9 = vstv %s6536_s17 }
  0x51   : > { %546 = vst.msk [vmem:[#allocation2 + $0x30] sm:$0xff] %vm545_vm12, %v542_v36  ;;  %s6548_s21 = sld [smem:[#allocation8 + $0x202]] }
  0x52   : > { %9120 = sst [smem:[#allocation26_spill]] %s6538_s20  ;;  %v9074_v56 = vstv %s6538_s20 }
  0x53   : > { %564 = vrot.lane.b32.xlu2 %v528_v21, %s6292_s12  ;;  %s6550_s18 = sld [smem:[#allocation8 + $0x282]]  ;;  %v747_v47 = vstv %s6540_s27 }
  0x54   : > { %9121 = sst [smem:[#allocation27_spill]] %s6542_s10 }
  0x55   : > { %s6552_s9 = sld [smem:[#allocation8 + $0x302]]  ;;  %v9064_v63 = vstv %s6544_s11 }
  0x56   : > { %s6554_s6 = sld [smem:[#allocation8 + $0x382]]  ;;  %v9073_v59 = vstv %s6546_s8 }
  0x57   : > { %s6556_s7 = sld [smem:[#allocation8 + $0x402]]  ;;  %v6566_v0 = vld [vmem:[#allocation2 + $0x20] sm:$0xff]  ;;  %v765_v10 = vstv %s6548_s21 }
  0x58   : > { %557 = vrot.lane.b32.xlu0 %v542_v36, %s6291_s30  ;;  %572 = vrot.lane.b32.xlu1 %v542_v36, %s6292_s12  ;;  %s6516_s30 = sld [smem:[#allocation8 + $0x81]]  ;;  %9125 = vst [vmem:[#allocation31_spill] sm:$0xff] %v6566_v0  ;;  %v6578_v42 = vmul.f32 %v595_v39, %v6566_v0  ;;  %v6597_v52 = vld [vmem:[#allocation2 + $0x30] sm:$0xff]  ;;  %v6607_v58 = vmul.f32 %v747_v47, %v6566_v0  ;;  %v6619_v2 = vld [vmem:[#allocation2 + $0x21] sm:$0xff] }
  0x59   : > { %s6518_s12 = sld [smem:[#allocation8 + $0x101]]  ;;  %9126 = vst [vmem:[#allocation32_spill] sm:$0xff] %v6597_v52  ;;  %v6622_v3 = vmul.f32 %v595_v39, %v6597_v52  ;;  %v9072_v5 = vstv %s6550_s18  ;;  %v6641_v13 = vmul.f32 %v613_v61, %v6597_v52  ;;  %v6644_v14 = vmul.f32 %v689_v62, %v6597_v52  ;;  %v6650_v17 = vld [vmem:[#allocation2 + $0x31] sm:$0xff] }
  0x5a   : > { %s6558_s5 = sld [smem:[#allocation8 + $0x3]]  ;;  %9128 = vst [vmem:[#allocation33_spill] sm:$0xff] %v6619_v2  ;;  %v6647_v15 = vmul.f32 %v747_v47, %v6597_v52  ;;  %v6654_v18 = vmul.f32 %v613_v61, %v6619_v2  ;;  %v6660_v22 = vmul.f32 %v631_v9, %v6619_v2  ;;  %v6663_v23 = vmul.f32 %v765_v10, %v6597_v52 }
  0x5b   : > { %9122 = sst [smem:[#allocation28_spill]] %s6552_s9  ;;  %v9070_v1 = vstv %s6552_s9  ;;  %9131 = vst [vmem:[#allocation34_spill] sm:$0xff] %v6650_v17  ;;  %v6668_v26 = vmul.f32 %v689_v62, %v6619_v2  ;;  %v6676_v30 = vmul.f32 %v631_v9, %v6650_v17  ;;  %v6682_v32 = vmul.f32 %v765_v10, %v6619_v2 }
  0x5c   : > { %9123 = sst [smem:[#allocation29_spill]] %s6554_s6 }
  0x5d   : > { %9124 = sst [smem:[#allocation30_spill]] %s6556_s7 }
  0x5e   : > { %s6560_s4 = sld [smem:[#allocation8 + $0x83]]  ;;  %v671_v40 = vstv %s6516_s30 }
  0x5f   : > { %9118 = sst [smem:[#allocation24_spill]] %s6518_s12  ;;  %v6592_v50 = vmul.f32 %v671_v40, %v6566_v0  ;;  %v9061_v51 = vstv %s6518_s12  ;;  %v6625_v4 = vmul.f32 %v671_v40, %v6597_v52 }
  0x60   : > { %s6562_s3 = sld [smem:[#allocation8 + $0x103]]  ;;  %v9065_v6 = vstv %s6558_s5 }
  0x61   : > { %s6564_s2 = sld [smem:[#allocation8 + $0x183]] }
  0x62   : > { %s6569_s6 = sld [smem:[#allocation8 + $0x203]] }
  0x63   : > { %s6571_s10 = sld [smem:[#allocation8 + $0x283]] }
  0x64   : > { %s6574_s7 = sld [smem:[#allocation8 + $0x303]]  ;;  %v823_v60 = vstv %s6560_s4 }
  0x65   : > { %s6581_s14 = sld [smem:[#allocation8 + $0x383]]  ;;  %v6635_v12 = vmul.f32 %v823_v60, %v6566_v0  ;;  %v6671_v27 = vmul.f32 %v823_v60, %v6597_v52 }
  0x66   : > { %s6587_s30 = sld [smem:[#allocation8 + $0x403]]  ;;  %v9066_v16 = vstv %s6562_s3 }
  0x67   : > { %s6595_s16 = sld [smem:[#allocation8 + $0x4]]  ;;  %v9068_v20 = vstv %s6564_s2 }
  0x68   : > { %s6603_s27 = sld [smem:[#allocation8 + $0x84]]  ;;  %v841_v25 = vstv %s6569_s6 }
  0x69   : > { %s6611_s12 = sld [smem:[#allocation8 + $0x104]]  ;;  %v9069_v28 = vstv %s6571_s10  ;;  %v6692_v36 = vmul.f32 %v841_v25, %v6597_v52 }
  0x6a   : > { %s9127_s1 = sld [smem:[#allocation30_spill]]  ;;  %v9071_v21 = vstv %s6574_s7 }
  0x6b   : > { %s6617_s20 = sld [smem:[#allocation8 + $0x184]]  ;;  %v859_v9 = vstv %s6581_s14 }
  0x6c   : > { %s6629_s4 = sld [smem:[#allocation8 + $0x284]] }
  0x6d   : > { %s9129_s0 = sld [smem:[#allocation27_spill]] }
  0x6e   : > { %s9130_s26 = sld [smem:[#allocation29_spill]]  ;;  %v9054_v29 = vstv %s6603_s27 }
  0x6f   : > { %s6637_s9 = sld [smem:[#allocation8 + $0x304]]  ;;  %v6701_v39 = vmul.f32 %v9054_v29, %v6566_v0 }
  0x70   : > { %v9067_v11 = vstv %s9127_s1  ;;  %s9136_s17 = sld [smem:[#allocation24_spill]] }
  0x71   : > { %9133 = vst [vmem:[#allocation35_spill] sm:$0xff] %v6701_v39  ;;  %s9137_s21 = sld [smem:[#allocation25_spill]] }
  0x72   : > { %s9140_s14 = sld [smem:[#allocation28_spill]] }
  0x73   : > { %v707_v19 = vstv %s9129_s0  ;;  %s9139_s0 = sld [smem:[#allocation26_spill]] }
  0x74   : > { %v783_v24 = vstv %s9130_s26  ;;  %v6679_v31 = vmul.f32 %v707_v19, %v6619_v2  ;;  %v6686_v34 = vmul.f32 %v707_v19, %v6650_v17  ;;  %s7037_s13 = sld [smem:[#allocation8 + $0x106]] }
  0x75   : > { %v6689_v35 = vmul.f32 %v783_v24, %v6619_v2  ;;  %s7061_s24 = sld [smem:[#allocation8 + $0x306]] }
  0x76   : > { %s7097_s26 = sld [smem:[#allocation8 + $0x287]] }
  0x77   : > { %s7101_s6 = sld [smem:[#allocation8 + $0x207]] }
  0xa5   : > { %v550_v37 = vpop.permute.xlu2 %549 }
  0xa6   : > { %556 = vst.msk [vmem:[#allocation2 + $0x8] sm:$0x1] %vm555_vm14, %v550_v37  ;;  %vm560_vm14 = vcmask 130056  }
  0xad   : > { %v565_v38 = vpop.permute.xlu2 %564 }
  0xae   : > { %571 = vst.msk [vmem:[#allocation2 + $0x48] sm:$0x1] %vm570_vm3, %v565_v38  ;;  %v6696_v38 = vmul.f32 %v783_v24, %v6650_v17  ;;  %vm7805_vm3 = vmand %vm481_vm0, %vm9090_vm2 }
  0xc2   : > { %v548_v7 = vpop.permute.xlu0 %547  ;;  %v563_v8 = vpop.permute.xlu1 %562 }
  0xc3   : > { %554 = vst.msk [vmem:[#allocation2] sm:$0xfe] %vm553_vm11, %v548_v7  ;;  %vm2809_vm11 = vsmask.f32 7938 }
  0xc4   : > { %569 = vst.msk [vmem:[#allocation2 + $0x40] sm:$0xfe] %vm568_vm13, %v563_v8  ;;  %v6710_v8 = vmul.f32 %v841_v25, %v6619_v2  ;;  %vm7830_vm13 = vmand %vm481_vm0, %vm2809_vm11 }
  0xca   : > { %v6705_v60 = vld [vmem:[#allocation2] sm:$0xff]  ;;  %v558_v62 = vpop.permute.xlu0 %557  ;;  %v573_v7 = vpop.permute.xlu1 %572 }
  0xcb   : > { %9134 = vst [vmem:[#allocation36_spill] sm:$0xff] %v6705_v60  ;;  %v6707_v61 = vld [vmem:[#allocation2 + $0x1] sm:$0xff]  ;;  %v592_v40 = vmul.f32 %v591_v41, %v6705_v60  ;;  %v668_v10 = vmul.f32 %v9055_v46, %v6705_v60 }
  0xcc   : > { %9135 = vst [vmem:[#allocation37_spill] sm:$0xff] %v6707_v61  ;;  %v6715_v24 = vld [vmem:[#allocation2 + $0x40] sm:$0xff]  ;;  %v609_v25 = vmul.f32 %v607_v43, %v6707_v61  ;;  %v6729_v19 = vmul.f32 %v625_v45, %v6707_v61 }
  0xcd   : > { %9138 = vst [vmem:[#allocation38_spill] sm:$0xff] %v6715_v24  ;;  %v6717_v47 = vld [vmem:[#allocation2 + $0x41] sm:$0xff]  ;;  %v678_v33 = vmul.f32 %v9061_v51, %v6715_v24  ;;  %v674_v46 = vadd.f32 %v6592_v50, %v668_v10  ;;  %v744_v50 = vmul.f32 %v9074_v56, %v6705_v60  ;;  %v9147_v56 = vstv %s6508_s22  ;;  %s7052_s22 = sld [smem:[#allocation8 + $0x206]] }
  0xce   : > { %561 = vst.msk [vmem:[#allocation2 + $0x10] sm:$0xff] %vm560_vm14, %v558_v62  ;;  %v602_v62 = vmul.f32 %v9057_v44, %v6715_v24  ;;  %v6741_v29 = vmul.f32 %v9056_v48, %v6717_v47  ;;  %v6746_v37 = vmul.f32 %v9058_v49, %v6717_v47  ;;  %v685_v48 = vmul.f32 %v9059_v53, %v6707_v61 }
  0xcf   : > { %577 = vst.msk [vmem:[#allocation2 + $0x50] sm:$0xff] %vm576_vm15, %v573_v7  ;;  %v598_v7 = vadd.f32 %v6578_v42, %v592_v40  ;;  %v6759_v44 = vmul.f32 %v9060_v54, %v6717_v47  ;;  %v6764_v49 = vmul.f32 %v9062_v55, %v6707_v61  ;;  %v6769_v42 = vmul.f32 %v9063_v57, %v6717_v47 }
  0xd0   : > { %v754_v40 = vmul.f32 %v9064_v63, %v6715_v24  ;;  %v680_v53 = vadd.f32 %v678_v33, %v674_v46  ;;  %v761_v54 = vmul.f32 %v9073_v59, %v6707_v61  ;;  %v6783_v51 = vmul.f32 %v9072_v5, %v6717_v47 }
  0xd1   : > { %v604_v10 = vadd.f32 %v602_v62, %v598_v7  ;;  %v750_v55 = vadd.f32 %v6607_v58, %v744_v50  ;;  %v6789_v57 = vmul.f32 %v9070_v1, %v6707_v61  ;;  %v6794_v63 = vmul.f32 %v9067_v11, %v6717_v47 }
  0xd2   : > { %v820_v46 = vmul.f32 %v9065_v6, %v6705_v60  ;;  %v830_v33 = vmul.f32 %v9066_v16, %v6715_v24  ;;  %v6805_v58 = vmul.f32 %v9068_v20, %v6707_v61  ;;  %v6810_v62 = vmul.f32 %v9069_v28, %v6717_v47 }
  0xd3   : > { %v6815_v7 = vmul.f32 %v9071_v21, %v6707_v61  ;;  %v756_v16 = vadd.f32 %v754_v40, %v750_v55  ;;  %v6823_v20 = vmul.f32 %v859_v9, %v6619_v2  ;;  %v6826_v28 = vmul.f32 %v859_v9, %v6650_v17 }
  0xd4   : > { %9141 = vst [vmem:[#allocation39_spill] sm:$0xff] %v6810_v62  ;;  %v826_v11 = vadd.f32 %v6635_v12, %v820_v46  ;;  %v9145_v46 = vstv %s6514_s29  ;;  %v9146_v5 = vstv %s6504_s15  ;;  %v9148_v17 = vstv %s6512_s25  ;;  %s7043_s15 = sld [smem:[#allocation8 + $0x186]] }
  0xd5   : > { %9142 = vst [vmem:[#allocation40_spill] sm:$0xff] %v6815_v7  ;;  %v6817_v50 = vld [vmem:[#allocation2 + $0x10] sm:$0xff]  ;;  %v9151_v61 = vstv %s6528_s19  ;;  %v9152_v7 = vstv %s6531_s23  ;;  %s7006_s19 = sld [smem:[#allocation8 + $0x305]]  ;;  %vm2770_vm14 = vcmask 125952  }
  0xd6   : > { %v6819_v6 = vld [vmem:[#allocation2 + $0x11] sm:$0xff]  ;;  %9143 = vst [vmem:[#allocation41_spill] sm:$0xff] %v6823_v20  ;;  %v593_v55 = vmul.f32 %v591_v41, %v6817_v50  ;;  %v608_v12 = vmul.f32 %v607_v43, %v6817_v50  ;;  %v669_v9 = vmul.f32 %v9145_v46, %v6817_v50  ;;  %v9149_v41 = vstv %s9136_s17  ;;  %s7029_s23 = sld [smem:[#allocation8 + $0x6]]  ;;  %vm7875_vm15 = vmand %vm2770_vm14, %vm2809_vm11 }
  0xd7   : > { %9144 = vst [vmem:[#allocation42_spill] sm:$0xff] %v6826_v28  ;;  %v6828_v1 = vld [vmem:[#allocation2 + $0x50] sm:$0xff]  ;;  %v627_v40 = vmul.f32 %v625_v45, %v6819_v6  ;;  %v9150_v20 = vstv %s9137_s21  ;;  %v703_v24 = vmul.f32 %v9152_v7, %v6819_v6  ;;  %v9156_v7 = vstv %s6546_s8  ;;  %s6976_s8 = sld [smem:[#allocation8 + $0x105]] }
  0xd8   : > { %v6830_v21 = vld [vmem:[#allocation2 + $0x51] sm:$0xff]  ;;  %v603_v59 = vmul.f32 %v9146_v5, %v6828_v1  ;;  %v620_v0 = vmul.f32 %v9147_v56, %v6828_v1  ;;  %v679_v43 = vmul.f32 %v9149_v41, %v6828_v1  ;;  %v599_v45 = vadd.f32 %v6622_v3, %v593_v55  ;;  %s7067_s25 = sld [smem:[#allocation8 + $0x386]] }
  0xd9   : > { %v639_v2 = vmul.f32 %v9148_v17, %v6830_v21  ;;  %v610_v28 = vadd.f32 %v608_v12, %v604_v10  ;;  %v675_v46 = vadd.f32 %v6625_v4, %v669_v9  ;;  %v684_v5 = vmul.f32 %v9150_v20, %v6817_v50  ;;  %s7073_s29 = sld [smem:[#allocation8 + $0x406]] }
  0xda   : > { %v696_v56 = vmul.f32 %v9151_v61, %v6828_v1  ;;  %v9153_v17 = vstv %s6534_s28  ;;  %v9154_v41 = vstv %s9139_s0  ;;  %v605_v3 = vadd.f32 %v603_v59, %v599_v45  ;;  %s7035_s28 = sld [smem:[#allocation8 + $0x86]] }
  0xdb   : > { %v715_v39 = vmul.f32 %v9153_v17, %v6830_v21  ;;  %v745_v52 = vmul.f32 %v9154_v41, %v6817_v50  ;;  %v616_v4 = vadd.f32 %v6641_v13, %v610_v28  ;;  %v681_v10 = vadd.f32 %v679_v43, %v675_v46  ;;  %s7110_s17 = sld [smem:[#allocation8 + $0x307]] }
  0xdc   : > { %v686_v55 = vadd.f32 %v684_v5, %v680_v53  ;;  %v9155_v61 = vstv %s6544_s11  ;;  %v760_v9 = vmul.f32 %v9156_v7, %v6817_v50  ;;  %v9157_v17 = vstv %s6550_s18  ;;  %s6990_s11 = sld [smem:[#allocation8 + $0x205]] }
  0xdd   : > { %v751_v20 = vadd.f32 %v6647_v15, %v745_v52  ;;  %v755_v12 = vmul.f32 %v9155_v61, %v6828_v1  ;;  %v772_v62 = vmul.f32 %v9157_v17, %v6828_v1  ;;  %v611_v41 = vadd.f32 %v609_v25, %v605_v3  ;;  %s6998_s18 = sld [smem:[#allocation8 + $0x285]] }
  0xde   : > { %v622_v60 = vadd.f32 %v620_v0, %v616_v4  ;;  %v687_v59 = vadd.f32 %v685_v48, %v681_v10  ;;  %v692_v13 = vadd.f32 %v6644_v14, %v686_v55  ;;  %v762_v53 = vadd.f32 %v760_v9, %v756_v16  ;;  %s7118_s21 = sld [smem:[#allocation8 + $0x387]] }
  0xdf   : > { %v757_v28 = vadd.f32 %v755_v12, %v751_v20  ;;  %v9158_v52 = vstv %s9140_s14  ;;  %v9159_v43 = vstv %s9127_s1  ;;  %v617_v46 = vadd.f32 %v6654_v18, %v611_v41  ;;  %s6920_s1 = sld [smem:[#allocation8 + $0x204]] }
  0xe0   : > { %v779_v15 = vmul.f32 %v9158_v52, %v6819_v6  ;;  %v791_v45 = vmul.f32 %v9159_v43, %v6830_v21  ;;  %v628_v5 = vadd.f32 %v6729_v19, %v622_v60  ;;  %v693_v61 = vadd.f32 %v6668_v26, %v687_v59  ;;  %s7126_s0 = sld [smem:[#allocation8 + $0x407]] }
  0xe1   : > { %v698_v7 = vadd.f32 %v696_v56, %v692_v13  ;;  %v763_v25 = vadd.f32 %v761_v54, %v757_v28  ;;  %v768_v0 = vadd.f32 %v6663_v23, %v762_v53  ;;  %v9160_v48 = vstv %s6558_s5  ;;  %v9167_v53 = vld [vmem:[#allocation36_spill] sm:$0xff]  ;;  %s6952_s5 = sld [smem:[#allocation8 + $0x5]] }
  0xe2   : > { %v821_v14 = vmul.f32 %v9160_v48, %v6817_v50  ;;  %v9161_v16 = vstv %s6562_s3  ;;  %v623_v4 = vadd.f32 %v6741_v29, %v617_v46  ;;  %v634_v10 = vadd.f32 %v6660_v22, %v628_v5  ;;  %s6946_s3 = sld [smem:[#allocation8 + $0x384]]  ;;  %v9171_v5 = vld [vmem:[#allocation32_spill] sm:$0xff]  ;;  %v9174_v48 = vld [vmem:[#allocation38_spill] sm:$0xff] }
  0xe3   : > { %v831_v3 = vmul.f32 %v9161_v16, %v6828_v1  ;;  %v699_v18 = vadd.f32 %v6759_v44, %v693_v61  ;;  %v704_v60 = vadd.f32 %v6764_v49, %v698_v7  ;;  %v769_v54 = vadd.f32 %v6682_v32, %v763_v25  ;;  %v9173_v25 = vld [vmem:[#allocation35_spill] sm:$0xff]  ;;  %s7136_s14 = sld [smem:[#allocation8 + $0x8]] }
  0xe4   : > { %v774_v26 = vadd.f32 %v772_v62, %v768_v0  ;;  %v827_v23 = vadd.f32 %v6671_v27, %v821_v14  ;;  %v832_v19 = vadd.f32 %v830_v33, %v826_v11  ;;  %v629_v56 = vadd.f32 %v627_v40, %v623_v4 }
  0xe5   : > { %v640_v55 = vadd.f32 %v6746_v37, %v634_v10  ;;  %v705_v20 = vadd.f32 %v703_v24, %v699_v18  ;;  %v710_v12 = vadd.f32 %v6679_v31, %v704_v60  ;;  %v775_v22 = vadd.f32 %v6783_v51, %v769_v54  ;;  %v9177_v10 = vld [vmem:[#allocation40_spill] sm:$0xff] }
  0xe6   : > { %v780_v44 = vadd.f32 %v6789_v57, %v774_v26  ;;  %v833_v49 = vadd.f32 %v831_v3, %v827_v23  ;;  %v9162_v29 = vstv %s6564_s2  ;;  %v635_v62 = vadd.f32 %v6676_v30, %v629_v56  ;;  %s6934_s2 = sld [smem:[#allocation8 + $0x404]]  ;;  %v9179_v56 = vld [vmem:[#allocation37_spill] sm:$0xff] }
  0xe7   : > { %v836_v32 = vmul.f32 %v9162_v29, %v6817_v50  ;;  %v711_v11 = vadd.f32 %v6686_v34, %v705_v20  ;;  %v716_v27 = vadd.f32 %v6769_v42, %v710_v12  ;;  %v9163_v37 = vstv %s6571_s10  ;;  %s6982_s10 = sld [smem:[#allocation8 + $0x185]] }
  0xe8   : > { %v848_v24 = vmul.f32 %v9163_v37, %v6828_v1  ;;  %v781_v51 = vadd.f32 %v779_v15, %v775_v22  ;;  %v786_v57 = vadd.f32 %v6689_v35, %v780_v44  ;;  %v839_v33 = vadd.f32 %v6805_v58, %v833_v49  ;;  %v9169_v15 = vld [vmem:[#allocation39_spill] sm:$0xff]  ;;  %v9181_v22 = vld [vmem:[#allocation41_spill] sm:$0xff]  ;;  %v9182_v49 = vld [vmem:[#allocation42_spill] sm:$0xff] }
  0xe9   : > { %v838_v31 = vadd.f32 %v836_v32, %v832_v19  ;;  %v641_v40 = vadd.f32 %v639_v2, %v635_v62  ;;  %v717_v9 = vadd.f32 %v715_v39, %v711_v11  ;;  %v9164_v30 = vstv %s6574_s7  ;;  %s6966_s7 = sld [smem:[#allocation8 + $0x85]]  ;;  %v9183_v62 = vld [vmem:[#allocation33_spill] sm:$0xff] }
  0xea   : > { %v855_v34 = vmul.f32 %v9164_v30, %v6819_v6  ;;  %v9165_v42 = vstv %s6587_s30  ;;  %v787_v41 = vadd.f32 %v6696_v38, %v781_v51  ;;  %v792_v59 = vadd.f32 %v6794_v63, %v786_v57  ;;  %s7083_s30 = sld [smem:[#allocation8 + $0x87]] }
  0xeb   : > { %v866_v17 = vmul.f32 %v9165_v42, %v6717_v47  ;;  %v844_v13 = vadd.f32 %v6692_v36, %v838_v31  ;;  %v845_v35 = vadd.f32 %v6710_v8, %v839_v33  ;;  %v6936_v2 = vmax.f32 %v640_v55, %v641_v40 }
  0xec   : > { %v6938_v39 = vmax.f32 %v716_v27, %v717_v9  ;;  %v9166_v58 = vmov %v9165_v42  ;;  %v9168_v38 = vstv %s6595_s16  ;;  %v793_v63 = vadd.f32 %v791_v45, %v787_v41  ;;  %s7049_s16 = sld [smem:[#allocation8 + $0x286]] }
  0xed   : > { %v867_v28 = vmul.f32 %v9166_v58, %v6830_v21  ;;  %v896_v52 = vmul.f32 %v9168_v38, %v9167_v53  ;;  %v850_v36 = vadd.f32 %v848_v24, %v844_v13  ;;  %v851_v8 = vadd.f32 %v9169_v15, %v845_v35  ;;  %658 = vst.msk [vmem:[#allocation3] sm:$0x1] %vm481_vm0, %v6936_v2 }
  0xee   : > { %v9170_v43 = vmov %v9168_v38  ;;  %v9172_v61 = vstv %s6603_s27  ;;  %v9175_v45 = vstv %s6611_s12  ;;  %734 = vst.msk [vmem:[#allocation3 + $0x1] sm:$0x1] %vm481_vm0, %v6938_v39  ;;  %v6970_v4 = vmax.f32 %v792_v59, %v793_v63  ;;  %s7079_s12 = sld [smem:[#allocation8 + $0x7]] }
  0xef   : > { %v897_v46 = vmul.f32 %v9170_v43, %v6817_v50  ;;  %v901_v7 = vmul.f32 %v9172_v61, %v9171_v5  ;;  %v902_v0 = vadd.f32 %v9173_v25, %v896_v52  ;;  %v906_v14 = vmul.f32 %v9175_v45, %v9174_v48  ;;  %s7087_s27 = sld [smem:[#allocation8 + $0x107]] }
  0xf0   : > { %v9176_v16 = vmov %v9175_v45  ;;  %v856_v18 = vadd.f32 %v9177_v10, %v850_v36  ;;  %v857_v60 = vadd.f32 %v855_v34, %v851_v8  ;;  %v9178_v54 = vstv %s6617_s20  ;;  %810 = vst.msk [vmem:[#allocation3 + $0x2] sm:$0x1] %vm481_vm0, %v6970_v4  ;;  %s7010_s20 = sld [smem:[#allocation8 + $0x405]]  ;;  %v9189_v45 = vld [vmem:[#allocation31_spill] sm:$0xff] }
  0xf1   : > { %v907_v3 = vmul.f32 %v9176_v16, %v6828_v1  ;;  %v912_v26 = vmul.f32 %v9178_v54, %v6817_v50  ;;  %v903_v23 = vadd.f32 %v901_v7, %v897_v46  ;;  %v908_v19 = vadd.f32 %v906_v14, %v902_v0 }
  0xf2   : > { %v9180_v55 = vmov %v9178_v54  ;;  %v917_v12 = vstv %s6920_s1  ;;  %v862_v44 = vadd.f32 %v9181_v22, %v856_v18  ;;  %v863_v29 = vadd.f32 %v9182_v49, %v857_v60  ;;  %s7140_s1 = sld [smem:[#allocation8 + $0x88]] }
  0xf3   : > { %v913_v20 = vmul.f32 %v9180_v55, %v9179_v56  ;;  %v918_v32 = vmul.f32 %v917_v12, %v9171_v5  ;;  %v919_v11 = vmul.f32 %v917_v12, %v9183_v62  ;;  %v909_v27 = vadd.f32 %v907_v3, %v903_v23 }
  0xf4   : > { %v914_v37 = vadd.f32 %v912_v26, %v908_v19  ;;  %v9184_v24 = vstv %s6629_s4  ;;  %v868_v33 = vadd.f32 %v866_v17, %v862_v44  ;;  %v869_v40 = vadd.f32 %v867_v28, %v863_v29  ;;  %v9188_v28 = vld [vmem:[#allocation34_spill] sm:$0xff]  ;;  %s7091_s4 = sld [smem:[#allocation8 + $0x187]] }
  0xf5   : > { %v924_v51 = vmul.f32 %v9184_v24, %v6828_v1  ;;  %v9185_v57 = vmov %v9184_v24  ;;  %v9186_v9 = vstv %s6637_s9  ;;  %v915_v41 = vadd.f32 %v913_v20, %v909_v27  ;;  %s7017_s9 = sld [smem:[#allocation8 + $0x385]] }
  0xf6   : > { %v925_v31 = vmul.f32 %v9185_v57, %v6717_v47  ;;  %v930_v30 = vmul.f32 %v9186_v9, %v9179_v56  ;;  %v9187_v34 = vmov %v9186_v9  ;;  %v920_v59 = vadd.f32 %v918_v32, %v914_v37 }
  0xf7   : > { %v931_v42 = vmul.f32 %v9187_v34, %v6819_v6  ;;  %v935_v13 = vstv %s6946_s3  ;;  %v941_v35 = vstv %s6934_s2  ;;  %v7012_v58 = vmax.f32 %v868_v33, %v869_v40  ;;  %s7144_s2 = sld [smem:[#allocation8 + $0x188]] }
  0xf8   : > { %v936_v17 = vmul.f32 %v935_v13, %v9183_v62  ;;  %v937_v38 = vmul.f32 %v935_v13, %v9188_v28  ;;  %v942_v52 = vmul.f32 %v941_v35, %v6717_v47  ;;  %v921_v63 = vadd.f32 %v919_v11, %v915_v41  ;;  %s7151_s3 = sld [smem:[#allocation8 + $0x108]] }
  0xf9   : > { %v926_v36 = vadd.f32 %v924_v51, %v920_v59  ;;  %v943_v15 = vmul.f32 %v941_v35, %v6830_v21  ;;  %v971_v8 = vstv %s6952_s5  ;;  %886 = vst.msk [vmem:[#allocation3 + $0x3] sm:$0x1] %vm481_vm0, %v7012_v58  ;;  %v975_v61 = vstv %s6966_s7  ;;  %s7155_s5 = sld [smem:[#allocation8 + $0x288]] }
  0xfa   : > { %v972_v43 = vmul.f32 %v971_v8, %v9167_v53  ;;  %v973_v46 = vmul.f32 %v971_v8, %v6817_v50  ;;  %v981_v7 = vstv %s6976_s8  ;;  %v927_v25 = vadd.f32 %v925_v31, %v921_v63  ;;  %s7163_s7 = sld [smem:[#allocation8 + $0x308]] }
  0xfb   : > { %v932_v0 = vadd.f32 %v930_v30, %v926_v36  ;;  %v976_v14 = vmul.f32 %v975_v61, %v9189_v45  ;;  %v977_v16 = vmul.f32 %v975_v61, %v9171_v5  ;;  %v982_v3 = vmul.f32 %v981_v7, %v9174_v48  ;;  %s7167_s8 = sld [smem:[#allocation8 + $0x208]] }
  0xfc   : > { %v983_v10 = vmul.f32 %v981_v7, %v6828_v1  ;;  %v987_v18 = vstv %s6982_s10  ;;  %v993_v60 = vstv %s6990_s11  ;;  %v933_v54 = vadd.f32 %v931_v42, %v927_v25  ;;  %s7177_s10 = sld [smem:[#allocation8 + $0x408]] }
  0xfd   : > { %v938_v26 = vadd.f32 %v936_v17, %v932_v0  ;;  %v978_v23 = vadd.f32 %v976_v14, %v972_v43  ;;  %v979_v19 = vadd.f32 %v977_v16, %v973_v46  ;;  %v988_v55 = vmul.f32 %v987_v18, %v6817_v50  ;;  %s7187_s11 = sld [smem:[#allocation8 + $0x388]] }
  0xfe   : > { %v989_v20 = vmul.f32 %v987_v18, %v9179_v56  ;;  %v994_v12 = vmul.f32 %v993_v60, %v9171_v5  ;;  %v995_v22 = vmul.f32 %v993_v60, %v9183_v62  ;;  %v939_v44 = vadd.f32 %v937_v38, %v933_v54 }
  0xff   : > { %v944_v49 = vadd.f32 %v942_v52, %v938_v26  ;;  %v984_v29 = vadd.f32 %v982_v3, %v978_v23  ;;  %v985_v32 = vadd.f32 %v983_v10, %v979_v19  ;;  %v999_v11 = vstv %s6998_s18  ;;  %s7194_s18 = sld [smem:[#allocation8 + $0x9]] }
 0x100   : > { %v1005_v27 = vstv %s7006_s19  ;;  %v1011_v37 = vstv %s7017_s9  ;;  %v1017_v24 = vstv %s7010_s20  ;;  %v945_v51 = vadd.f32 %v943_v15, %v939_v44  ;;  %s7199_s19 = sld [smem:[#allocation8 + $0x89]] }
 0x101   : > { %v990_v57 = vadd.f32 %v988_v55, %v984_v29  ;;  %v991_v31 = vadd.f32 %v989_v20, %v985_v32  ;;  %v1000_v33 = vmul.f32 %v999_v11, %v6828_v1  ;;  %v1001_v40 = vmul.f32 %v999_v11, %v6717_v47  ;;  %s7204_s20 = sld [smem:[#allocation8 + $0x189]] }
 0x102   : > { %v1006_v9 = vmul.f32 %v1005_v27, %v9179_v56  ;;  %v1007_v30 = vmul.f32 %v1005_v27, %v6819_v6  ;;  %v1012_v34 = vmul.f32 %v1011_v37, %v9183_v62  ;;  %v7058_v42 = vmax.f32 %v944_v49, %v945_v51  ;;  %s7212_s9 = sld [smem:[#allocation8 + $0x109]] }
 0x103   : > { %v996_v41 = vadd.f32 %v994_v12, %v990_v57  ;;  %v997_v59 = vadd.f32 %v995_v22, %v991_v31  ;;  %v1013_v13 = vmul.f32 %v1011_v37, %v9188_v28  ;;  %v1018_v35 = vmul.f32 %v1017_v24, %v6717_v47 }
 0x104   : > { %v1019_v17 = vmul.f32 %v1017_v24, %v6830_v21  ;;  %v1047_v38 = vstv %s7029_s23  ;;  %v1051_v52 = vstv %s7035_s28  ;;  %962 = vst.msk [vmem:[#allocation3 + $0x4] sm:$0x1] %vm481_vm0, %v7058_v42  ;;  %v1057_v61 = vstv %s7037_s13  ;;  %s7223_s23 = sld [smem:[#allocation8 + $0x289]] }
 0x105   : > { %v1002_v63 = vadd.f32 %v1000_v33, %v996_v41  ;;  %v1003_v36 = vadd.f32 %v1001_v40, %v997_v59  ;;  %v1048_v15 = vmul.f32 %v1047_v38, %v9167_v53  ;;  %v1049_v8 = vmul.f32 %v1047_v38, %v6817_v50  ;;  %s7228_s28 = sld [smem:[#allocation8 + $0x209]] }
 0x106   : > { %v1052_v43 = vmul.f32 %v1051_v52, %v9189_v45  ;;  %v1053_v46 = vmul.f32 %v1051_v52, %v9171_v5  ;;  %v1063_v7 = vstv %s7043_s15  ;;  %v1058_v14 = vmul.f32 %v1057_v61, %v9174_v48  ;;  %s7238_s13 = sld [smem:[#allocation8 + $0x309]] }
 0x107   : > { %v1008_v25 = vadd.f32 %v1006_v9, %v1002_v63  ;;  %v1009_v0 = vadd.f32 %v1007_v30, %v1003_v36  ;;  %v1059_v16 = vmul.f32 %v1057_v61, %v6828_v1  ;;  %v1064_v18 = vmul.f32 %v1063_v7, %v6817_v50  ;;  %s7245_s15 = sld [smem:[#allocation8 + $0x389]] }
 0x108   : > { %v1054_v3 = vadd.f32 %v1052_v43, %v1048_v15  ;;  %v1055_v10 = vadd.f32 %v1053_v46, %v1049_v8  ;;  %v1065_v60 = vmul.f32 %v1063_v7, %v9179_v56  ;;  %v1069_v23 = vstv %s7052_s22  ;;  %s7263_s22 = sld [smem:[#allocation8 + $0x409]] }
 0x109   : > { %v1014_v54 = vadd.f32 %v1012_v34, %v1008_v25  ;;  %v1015_v26 = vadd.f32 %v1013_v13, %v1009_v0  ;;  %v1075_v19 = vstv %s7049_s16  ;;  %v1070_v12 = vmul.f32 %v1069_v23, %v9171_v5  ;;  %s7252_s16 = sld [smem:[#allocation8 + $0xa]] }
 0x10a   : > { %v1060_v55 = vadd.f32 %v1058_v14, %v1054_v3  ;;  %v1061_v20 = vadd.f32 %v1059_v16, %v1055_v10  ;;  %v1071_v22 = vmul.f32 %v1069_v23, %v9183_v62  ;;  %v1076_v29 = vmul.f32 %v1075_v19, %v6828_v1 }
 0x10b   : > { %v1020_v44 = vadd.f32 %v1018_v35, %v1014_v54  ;;  %v1021_v49 = vadd.f32 %v1019_v17, %v1015_v26  ;;  %v1077_v32 = vmul.f32 %v1075_v19, %v6717_v47  ;;  %v1081_v37 = vstv %s7061_s24  ;;  %s7268_s24 = sld [smem:[#allocation8 + $0x8a]] }
 0x10c   : > { %v1066_v11 = vadd.f32 %v1064_v18, %v1060_v55  ;;  %v1067_v27 = vadd.f32 %v1065_v60, %v1061_v20  ;;  %v1087_v24 = vstv %s7067_s25  ;;  %v1082_v57 = vmul.f32 %v1081_v37, %v9179_v56  ;;  %s7272_s25 = sld [smem:[#allocation8 + $0x18a]] }
 0x10d   : > { %v7103_v51 = vmax.f32 %v1020_v44, %v1021_v49  ;;  %v1083_v31 = vmul.f32 %v1081_v37, %v6819_v6  ;;  %v1088_v33 = vmul.f32 %v1087_v24, %v9183_v62  ;;  %v1089_v30 = vmul.f32 %v1087_v24, %v9188_v28 }
 0x10e   : > { %v1072_v40 = vadd.f32 %v1070_v12, %v1066_v11  ;;  %v1073_v9 = vadd.f32 %v1071_v22, %v1067_v27  ;;  %v1093_v34 = vstv %s7073_s29  ;;  %v1123_v13 = vstv %s7079_s12  ;;  %s7276_s29 = sld [smem:[#allocation8 + $0x10a]] }
 0x10f   : > { %1038 = vst.msk [vmem:[#allocation3 + $0x5] sm:$0x1] %vm481_vm0, %v7103_v51  ;;  %v1094_v41 = vmul.f32 %v1093_v34, %v6717_v47  ;;  %v1095_v59 = vmul.f32 %v1093_v34, %v6830_v21  ;;  %v1127_v35 = vstv %s7083_s30  ;;  %v1124_v52 = vmul.f32 %v1123_v13, %v9167_v53  ;;  %s7284_s12 = sld [smem:[#allocation8 + $0x28a]] }
 0x110   : > { %v1078_v17 = vadd.f32 %v1076_v29, %v1072_v40  ;;  %v1079_v38 = vadd.f32 %v1077_v32, %v1073_v9  ;;  %v1125_v63 = vmul.f32 %v1123_v13, %v6817_v50  ;;  %v1128_v36 = vmul.f32 %v1127_v35, %v9189_v45  ;;  %s7288_s30 = sld [smem:[#allocation8 + $0x20a]] }
 0x111   : > { %v1129_v15 = vmul.f32 %v1127_v35, %v9171_v5  ;;  %v1133_v8 = vstv %s7087_s27  ;;  %v1139_v43 = vstv %s7091_s4  ;;  %v1145_v60 = vstv %s7101_s6  ;;  %s7299_s27 = sld [smem:[#allocation8 + $0x30a]] }
 0x112   : > { %v1084_v46 = vadd.f32 %v1082_v57, %v1078_v17  ;;  %v1085_v61 = vadd.f32 %v1083_v31, %v1079_v38  ;;  %v1134_v7 = vmul.f32 %v1133_v8, %v9174_v48  ;;  %v1135_v25 = vmul.f32 %v1133_v8, %v6828_v1  ;;  %s7307_s4 = sld [smem:[#allocation8 + $0x38a]] }
 0x113   : > { %v1130_v0 = vadd.f32 %v1128_v36, %v1124_v52  ;;  %v1131_v14 = vadd.f32 %v1129_v15, %v1125_v63  ;;  %v1140_v16 = vmul.f32 %v1139_v43, %v6817_v50  ;;  %v1141_v3 = vmul.f32 %v1139_v43, %v9179_v56  ;;  %s7317_s6 = sld [smem:[#allocation8 + $0x40a]] }
 0x114   : > { %v1090_v10 = vadd.f32 %v1088_v33, %v1084_v46  ;;  %v1091_v18 = vadd.f32 %v1089_v30, %v1085_v61  ;;  %v1151_v54 = vstv %s7097_s26  ;;  %v1146_v19 = vmul.f32 %v1145_v60, %v9171_v5  ;;  %s7311_s26 = sld [smem:[#allocation8 + $0xb]] }
 0x115   : > { %v1136_v26 = vadd.f32 %v1134_v7, %v1130_v0  ;;  %v1137_v23 = vadd.f32 %v1135_v25, %v1131_v14  ;;  %v1147_v55 = vmul.f32 %v1145_v60, %v9183_v62  ;;  %v1152_v22 = vmul.f32 %v1151_v54, %v6828_v1 }
 0x116   : > { %v1096_v20 = vadd.f32 %v1094_v41, %v1090_v10  ;;  %v1097_v12 = vadd.f32 %v1095_v59, %v1091_v18  ;;  %v1153_v44 = vmul.f32 %v1151_v54, %v6717_v47  ;;  %v1157_v32 = vstv %s7110_s17  ;;  %s7321_s17 = sld [smem:[#allocation8 + $0x8b]] }
 0x117   : > { %v1142_v49 = vadd.f32 %v1140_v16, %v1136_v26  ;;  %v1143_v29 = vadd.f32 %v1141_v3, %v1137_v23  ;;  %v1163_v11 = vstv %s7118_s21  ;;  %v1158_v37 = vmul.f32 %v1157_v32, %v9179_v56  ;;  %s7325_s21 = sld [smem:[#allocation8 + $0x18b]] }
 0x118   : > { %v7146_v27 = vmax.f32 %v1096_v20, %v1097_v12  ;;  %v1159_v24 = vmul.f32 %v1157_v32, %v6819_v6  ;;  %v1164_v57 = vmul.f32 %v1163_v11, %v9183_v62  ;;  %v1165_v40 = vmul.f32 %v1163_v11, %v9188_v28 }
 0x119   : > { %v1148_v31 = vadd.f32 %v1146_v19, %v1142_v49  ;;  %v1149_v33 = vadd.f32 %v1147_v55, %v1143_v29  ;;  %v1169_v9 = vstv %s7126_s0  ;;  %v645_v41 = vrot.slane %v6936_v2, 2  ;;  %s7329_s0 = sld [smem:[#allocation8 + $0x10b]] }
 0x11a   : > { %1114 = vst.msk [vmem:[#allocation3 + $0x6] sm:$0x1] %vm481_vm0, %v7146_v27  ;;  %v1170_v30 = vmul.f32 %v1169_v9, %v6717_v47  ;;  %v1171_v34 = vmul.f32 %v1169_v9, %v6830_v21  ;;  %v721_v59 = vrot.slane %v6938_v39, 2  ;;  %v797_v17 = vrot.slane %v6970_v4, 2 }
 0x11b   : > { %v1154_v13 = vadd.f32 %v1152_v22, %v1148_v31  ;;  %v1155_v35 = vadd.f32 %v1153_v44, %v1149_v33  ;;  %v873_v38 = vrot.slane %v7012_v58, 2  ;;  %660 = vst.msk [vmem:[#allocation3 + $0x20] sm:$0x1] %vm481_vm0, %v645_v41  ;;  %v949_v52 = vrot.slane %v7058_v42, 2 }
 0x11c   : > { %v1025_v63 = vrot.slane %v7103_v51, 2  ;;  %v1101_v36 = vrot.slane %v7146_v27, 2  ;;  %v644_v15 = vrot.slane %v6936_v2, 1  ;;  %736 = vst.msk [vmem:[#allocation3 + $0x21] sm:$0x1] %vm481_vm0, %v721_v59  ;;  %v720_v46 = vrot.slane %v6938_v39, 1 }
 0x11d   : > { %v1160_v8 = vadd.f32 %v1158_v37, %v1154_v13  ;;  %v1161_v43 = vadd.f32 %v1159_v24, %v1155_v35  ;;  %v796_v61 = vrot.slane %v6970_v4, 1  ;;  %812 = vst.msk [vmem:[#allocation3 + $0x22] sm:$0x1] %vm481_vm0, %v797_v17  ;;  %v872_v7 = vrot.slane %v7012_v58, 1 }
 0x11e   : > { %v948_v25 = vrot.slane %v7058_v42, 1  ;;  %v1024_v0 = vrot.slane %v7103_v51, 1  ;;  %v1100_v14 = vrot.slane %v7146_v27, 1  ;;  %888 = vst.msk [vmem:[#allocation3 + $0x23] sm:$0x1] %vm481_vm0, %v873_v38  ;;  %v1199_v10 = vstv %s7136_s14  ;;  %s7335_s14 = sld [smem:[#allocation8 + $0x28b]] }
 0x11f   : > { %v1166_v16 = vadd.f32 %v1164_v57, %v1160_v8  ;;  %v1167_v3 = vadd.f32 %v1165_v40, %v1161_v43  ;;  %v1203_v18 = vstv %s7140_s1  ;;  %964 = vst.msk [vmem:[#allocation3 + $0x24] sm:$0x1] %vm481_vm0, %v949_v52  ;;  %v1200_v60 = vmul.f32 %v1199_v10, %v9167_v53  ;;  %s7339_s1 = sld [smem:[#allocation8 + $0x20b]] }
 0x120   : > { %v1201_v54 = vmul.f32 %v1199_v10, %v6817_v50  ;;  %v1204_v26 = vmul.f32 %v1203_v18, %v9189_v45  ;;  %v1205_v23 = vmul.f32 %v1203_v18, %v9171_v5  ;;  %1040 = vst.msk [vmem:[#allocation3 + $0x25] sm:$0x1] %vm481_vm0, %v1025_v63  ;;  %v1209_v20 = vstv %s7151_s3  ;;  %s7362_s3 = sld [smem:[#allocation8 + $0x38b]] }
 0x121   : > { %v1172_v19 = vadd.f32 %v1170_v30, %v1166_v16  ;;  %v1173_v55 = vadd.f32 %v1171_v34, %v1167_v3  ;;  %v1215_v12 = vstv %s7144_s2  ;;  %1116 = vst.msk [vmem:[#allocation3 + $0x26] sm:$0x1] %vm481_vm0, %v1101_v36  ;;  %v1210_v49 = vmul.f32 %v1209_v20, %v9174_v48  ;;  %s7352_s2 = sld [smem:[#allocation8 + $0x30b]] }
 0x122   : > { %v1206_v22 = vadd.f32 %v1204_v26, %v1200_v60  ;;  %v1207_v44 = vadd.f32 %v1205_v23, %v1201_v54  ;;  %v1211_v45 = vmul.f32 %v1209_v20, %v6828_v1  ;;  %659 = vst.msk [vmem:[#allocation3 + $0x10] sm:$0x1] %vm481_vm0, %v644_v15  ;;  %v1216_v32 = vmul.f32 %v1215_v12, %v6817_v50  ;;  %v7257_v60 = vld [vmem:[#allocation2 + $0x20] sm:$0xff] }
 0x123   : > { %v7206_v29 = vmax.f32 %v1172_v19, %v1173_v55  ;;  %v1217_v11 = vmul.f32 %v1215_v12, %v9179_v56  ;;  %v1221_v37 = vstv %s7167_s8  ;;  %735 = vst.msk [vmem:[#allocation3 + $0x11] sm:$0x1] %vm481_vm0, %v720_v46  ;;  %v1227_v30 = vstv %s7155_s5  ;;  %s7368_s5 = sld [smem:[#allocation8 + $0xc]] }
 0x124   : > { %v1212_v24 = vadd.f32 %v1210_v49, %v1206_v22  ;;  %v1213_v57 = vadd.f32 %v1211_v45, %v1207_v44  ;;  %v1222_v31 = vmul.f32 %v1221_v37, %v9171_v5  ;;  %v1223_v33 = vmul.f32 %v1221_v37, %v9183_v62  ;;  %811 = vst.msk [vmem:[#allocation3 + $0x12] sm:$0x1] %vm481_vm0, %v796_v61  ;;  %s7380_s8 = sld [smem:[#allocation8 + $0x8c]] }
 0x125   : > { %1190 = vst.msk [vmem:[#allocation3 + $0x7] sm:$0x1] %vm481_vm0, %v7206_v29  ;;  %v1177_v40 = vrot.slane %v7206_v29, 2  ;;  %v1176_v9 = vrot.slane %v7206_v29, 1  ;;  %v1233_v34 = vstv %s7163_s7  ;;  %v1228_v13 = vmul.f32 %v1227_v30, %v6828_v1  ;;  %s7374_s7 = sld [smem:[#allocation8 + $0x40b]] }
 0x126   : > { %v1218_v41 = vadd.f32 %v1216_v32, %v1212_v24  ;;  %v1219_v59 = vadd.f32 %v1217_v11, %v1213_v57  ;;  %v1229_v35 = vmul.f32 %v1227_v30, %v6717_v47  ;;  %v1234_v17 = vmul.f32 %v1233_v34, %v9179_v56  ;;  %887 = vst.msk [vmem:[#allocation3 + $0x13] sm:$0x1] %vm481_vm0, %v872_v7 }
 0x127   : > { %1192 = vst.msk [vmem:[#allocation3 + $0x27] sm:$0x1] %vm481_vm0, %v1177_v40  ;;  %v1235_v38 = vmul.f32 %v1233_v34, %v6819_v6  ;;  %v1239_v52 = vstv %s7187_s11  ;;  %v1245_v63 = vstv %s7177_s10  ;;  %v1275_v16 = vstv %s7194_s18  ;;  %s7386_s10 = sld [smem:[#allocation8 + $0x18c]] }
 0x128   : > { %v1224_v36 = vadd.f32 %v1222_v31, %v1218_v41  ;;  %v1225_v15 = vadd.f32 %v1223_v33, %v1219_v59  ;;  %v1240_v8 = vmul.f32 %v1239_v52, %v9183_v62  ;;  %v1241_v43 = vmul.f32 %v1239_v52, %v9188_v28  ;;  %963 = vst.msk [vmem:[#allocation3 + $0x14] sm:$0x1] %vm481_vm0, %v948_v25  ;;  %v7278_v33 = vld [vmem:[#allocation2 + $0x30] sm:$0xff]  ;;  %s7390_s11 = sld [smem:[#allocation8 + $0x10c]] }
 0x129   : > { %v1246_v46 = vmul.f32 %v1245_v63, %v6717_v47  ;;  %v1247_v61 = vmul.f32 %v1245_v63, %v6830_v21  ;;  %v1279_v3 = vstv %s7199_s19  ;;  %1039 = vst.msk [vmem:[#allocation3 + $0x15] sm:$0x1] %vm481_vm0, %v1024_v0  ;;  %v1276_v18 = vmul.f32 %v1275_v16, %v9167_v53  ;;  %s7398_s18 = sld [smem:[#allocation8 + $0x28c]] }
 0x12a   : > { %v1230_v7 = vadd.f32 %v1228_v13, %v1224_v36  ;;  %v1231_v10 = vadd.f32 %v1229_v35, %v1225_v15  ;;  %v1277_v25 = vmul.f32 %v1275_v16, %v6817_v50  ;;  %1115 = vst.msk [vmem:[#allocation3 + $0x16] sm:$0x1] %vm481_vm0, %v1100_v14  ;;  %v1280_v54 = vmul.f32 %v7257_v60, %v1279_v3  ;;  %v7294_v36 = vld [vmem:[#allocation2 + $0x21] sm:$0xff]  ;;  %s7402_s19 = sld [smem:[#allocation8 + $0x20c]] }
 0x12b   : > { %v1281_v26 = vmul.f32 %v1279_v3, %v9171_v5  ;;  %v1285_v23 = vstv %s7212_s9  ;;  %v1291_v0 = vstv %s7204_s20  ;;  %1191 = vst.msk [vmem:[#allocation3 + $0x17] sm:$0x1] %vm481_vm0, %v1176_v9  ;;  %v1297_v37 = vstv %s7228_s28  ;;  %s7413_s20 = sld [smem:[#allocation8 + $0x30c]] }
 0x12c   : > { %v1806_v19 = vld [vmem:[#allocation3] sm:$0xff]  ;;  %v1236_v55 = vadd.f32 %v1234_v17, %v1230_v7  ;;  %v1237_v20 = vadd.f32 %v1235_v38, %v1231_v10  ;;  %v1286_v12 = vmul.f32 %v1285_v23, %v9174_v48  ;;  %v1287_v14 = vmul.f32 %v1285_v23, %v6828_v1  ;;  %s7423_s9 = sld [smem:[#allocation8 + $0x38c]] }
 0x12d   : > { %1822 = vxpose.xlu0.b32.start [1/2] (short) (narrow) %v1806_v19, 16  ;;  %v1282_v22 = vadd.f32 %v1280_v54, %v1276_v18  ;;  %v1283_v5 = vadd.f32 %v1281_v26, %v1277_v25  ;;  %v1292_v44 = vmul.f32 %v1291_v0, %v6817_v50  ;;  %v1293_v49 = vmul.f32 %v1291_v0, %v9179_v56  ;;  %s7433_s28 = sld [smem:[#allocation8 + $0x40c]] }
 0x12e   : > { %v1810_v45 = vld [vmem:[#allocation3 + $0x20] sm:$0xff]  ;;  %v1242_v32 = vadd.f32 %v1240_v8, %v1236_v55  ;;  %v1243_v11 = vadd.f32 %v1241_v43, %v1237_v20  ;;  %v1303_v24 = vstv %s7223_s23  ;;  %v1298_v40 = vmul.f32 %v7278_v33, %v1297_v37  ;;  %s7427_s23 = sld [smem:[#allocation8 + $0xd]] }
 0x12f   : > { %1886 = vxpose.xlu2.b32.start [1/2] (short) (narrow) %v1810_v45, 16  ;;  %v1288_v57 = vadd.f32 %v1286_v12, %v1282_v22  ;;  %v1289_v31 = vadd.f32 %v1287_v14, %v1283_v5  ;;  %v1299_v9 = vmul.f32 %v1297_v37, %v9183_v62  ;;  %v1304_v41 = vmul.f32 %v1303_v24, %v6828_v1 }
 0x130   : > { %v1248_v30 = vadd.f32 %v1246_v46, %v1242_v32  ;;  %v1249_v34 = vadd.f32 %v1247_v61, %v1243_v11  ;;  %v1305_v59 = vmul.f32 %v1303_v24, %v6717_v47  ;;  %v1309_v17 = vstv %s7238_s13  ;;  %s7437_s13 = sld [smem:[#allocation8 + $0x8d]] }
 0x131   : > { %v1294_v13 = vadd.f32 %v1292_v44, %v1288_v57  ;;  %v1295_v35 = vadd.f32 %v1293_v49, %v1289_v31  ;;  %v1315_v38 = vstv %s7245_s15  ;;  %v1310_v62 = vmul.f32 %v1309_v17, %v9179_v56  ;;  %s7441_s15 = sld [smem:[#allocation8 + $0x18d]] }
 0x132   : > { %v7290_v52 = vmax.f32 %v1248_v30, %v1249_v34  ;;  %v1311_v63 = vmul.f32 %v1309_v17, %v6819_v6  ;;  %v1316_v15 = vmul.f32 %v7294_v36, %v1315_v38  ;;  %v1808_v8 = vld [vmem:[#allocation3 + $0x10] sm:$0xff]  ;;  %v1317_v61 = vmul.f32 %v1315_v38, %v9188_v28  ;;  %v7343_v17 = vld [vmem:[#allocation2 + $0x1] sm:$0xff] }
 0x133   : > { %v1300_v43 = vadd.f32 %v1298_v40, %v1294_v13  ;;  %v1301_v46 = vadd.f32 %v1299_v9, %v1295_v35  ;;  %v1321_v16 = vstv %s7263_s22  ;;  %1854 = vxpose.xlu1.b32.start [1/2] (short) (narrow) %v1808_v8, 16  ;;  %v1351_v10 = vstv %s7252_s16  ;;  %v7348_v8 = vld [vmem:[#allocation2 + $0x31] sm:$0xff]  ;;  %s7445_s16 = sld [smem:[#allocation8 + $0x10d]] }
 0x134   : > { %1266 = vst.msk [vmem:[#allocation3 + $0x8] sm:$0x1] %vm481_vm0, %v7290_v52  ;;  %v1322_v3 = vmul.f32 %v1321_v16, %v6717_v47  ;;  %v1323_v7 = vmul.f32 %v1321_v16, %v6830_v21  ;;  %v1355_v18 = vstv %s7268_s24  ;;  %v1352_v28 = vmul.f32 %v1351_v10, %v9167_v53  ;;  %s7451_s22 = sld [smem:[#allocation8 + $0x28d]] }
 0x135   : > { %v1306_v25 = vadd.f32 %v1304_v41, %v1300_v43  ;;  %v1307_v54 = vadd.f32 %v1305_v59, %v1301_v46  ;;  %v1353_v26 = vmul.f32 %v1351_v10, %v6817_v50  ;;  %v1356_v23 = vmul.f32 %v7257_v60, %v1355_v18  ;;  %s7455_s24 = sld [smem:[#allocation8 + $0x20d]] }
 0x136   : > { %v1357_v0 = vmul.f32 %v7278_v33, %v1355_v18  ;;  %v1361_v19 = vstv %s7276_s29  ;;  %v1367_v55 = vstv %s7272_s25  ;;  %v1373_v11 = vstv %s7288_s30  ;;  %s7464_s25 = sld [smem:[#allocation8 + $0x30d]] }
 0x137   : > { %v1312_v20 = vadd.f32 %v1310_v62, %v1306_v25  ;;  %v1313_v12 = vadd.f32 %v1311_v63, %v1307_v54  ;;  %v1362_v14 = vmul.f32 %v1361_v19, %v9174_v48  ;;  %v1363_v53 = vmul.f32 %v1361_v19, %v6828_v1  ;;  %v7364_v25 = vld [vmem:[#allocation2] sm:$0xff]  ;;  %s7472_s29 = sld [smem:[#allocation8 + $0x38d]] }
 0x138   : > { %v1358_v22 = vadd.f32 %v1356_v23, %v1352_v28  ;;  %v1359_v5 = vadd.f32 %v1357_v0, %v1353_v26  ;;  %v1368_v44 = vmul.f32 %v1367_v55, %v6817_v50  ;;  %v1369_v49 = vmul.f32 %v1367_v55, %v9179_v56  ;;  %s7482_s30 = sld [smem:[#allocation8 + $0x40d]] }
 0x139   : > { %v1318_v45 = vadd.f32 %v1316_v15, %v1312_v20  ;;  %v1319_v32 = vadd.f32 %v1317_v61, %v1313_v12  ;;  %v1379_v37 = vstv %s7284_s12  ;;  %v1374_v57 = vmul.f32 %v7278_v33, %v1373_v11  ;;  %v7356_v61 = vld [vmem:[#allocation2 + $0x41] sm:$0xff]  ;;  %s7476_s12 = sld [smem:[#allocation8 + $0xe]] }
 0x13a   : > { %v1364_v48 = vadd.f32 %v1362_v14, %v1358_v22  ;;  %v1365_v24 = vadd.f32 %v1363_v53, %v1359_v5  ;;  %v1375_v31 = vmul.f32 %v7294_v36, %v1373_v11  ;;  %v1380_v56 = vmul.f32 %v1379_v37, %v6828_v1  ;;  %v7376_v20 = vld [vmem:[#allocation2 + $0x40] sm:$0xff]  ;;  %v7382_v22 = vld [vmem:[#allocation2 + $0x10] sm:$0xff] }
 0x13b   : > { %v1324_v40 = vadd.f32 %v1322_v3, %v1318_v45  ;;  %v1325_v9 = vadd.f32 %v1323_v7, %v1319_v32  ;;  %v1381_v30 = vmul.f32 %v1379_v37, %v6717_v47  ;;  %v1385_v59 = vstv %s7299_s27  ;;  %s7486_s27 = sld [smem:[#allocation8 + $0x8e]] }
 0x13c   : > { %v1370_v34 = vadd.f32 %v1368_v44, %v1364_v48  ;;  %v1371_v41 = vadd.f32 %v1369_v49, %v1365_v24  ;;  %v1391_v13 = vstv %s7307_s4  ;;  %v1386_v38 = vmul.f32 %v7343_v17, %v1385_v59  ;;  %s7490_s4 = sld [smem:[#allocation8 + $0x18e]] }
 0x13d   : > { %v7341_v35 = vmax.f32 %v1324_v40, %v1325_v9  ;;  %v1387_v62 = vmul.f32 %v1385_v59, %v6819_v6  ;;  %v1392_v47 = vmul.f32 %v7294_v36, %v1391_v13  ;;  %v1393_v43 = vmul.f32 %v7348_v8, %v1391_v13  ;;  %v7394_v40 = vld [vmem:[#allocation2 + $0x50] sm:$0xff] }
 0x13e   : > { %v1376_v63 = vadd.f32 %v1374_v57, %v1370_v34  ;;  %v1377_v15 = vadd.f32 %v1375_v31, %v1371_v41  ;;  %v1397_v46 = vstv %s7317_s6  ;;  %v1427_v3 = vstv %s7311_s26  ;;  %s7494_s26 = sld [smem:[#allocation8 + $0x10e]] }
 0x13f   : > { %1342 = vst.msk [vmem:[#allocation3 + $0x9] sm:$0x1] %vm481_vm0, %v7341_v35  ;;  %v1398_v6 = vmul.f32 %v7356_v61, %v1397_v46  ;;  %v1399_v16 = vmul.f32 %v1397_v46, %v6830_v21  ;;  %v1431_v7 = vstv %s7321_s17  ;;  %v1428_v54 = vmul.f32 %v7364_v25, %v1427_v3  ;;  %s7500_s6 = sld [smem:[#allocation8 + $0x28e]] }
 0x140   : > { %v1382_v10 = vadd.f32 %v1380_v56, %v1376_v63  ;;  %v1383_v18 = vadd.f32 %v1381_v30, %v1377_v15  ;;  %v1429_v28 = vmul.f32 %v1427_v3, %v6817_v50  ;;  %v1432_v26 = vmul.f32 %v7257_v60, %v1431_v7  ;;  %v7418_v3 = vld [vmem:[#allocation2 + $0x51] sm:$0xff]  ;;  %s7504_s17 = sld [smem:[#allocation8 + $0x20e]] }
 0x141   : > { %v1433_v23 = vmul.f32 %v7278_v33, %v1431_v7  ;;  %v1437_v0 = vstv %s7329_s0  ;;  %v1443_v21 = vstv %s7325_s21  ;;  %v1449_v32 = vstv %s7339_s1  ;;  %s7513_s21 = sld [smem:[#allocation8 + $0x30e]] }
 0x142   : > { %v1388_v19 = vadd.f32 %v1386_v38, %v1382_v10  ;;  %v1389_v55 = vadd.f32 %v1387_v62, %v1383_v18  ;;  %v1438_v12 = vmul.f32 %v7376_v20, %v1437_v0  ;;  %v1439_v50 = vmul.f32 %v1437_v0, %v6828_v1  ;;  %v7407_v62 = vld [vmem:[#allocation2 + $0x11] sm:$0xff]  ;;  %s7521_s0 = sld [smem:[#allocation8 + $0x38e]] }
 0x143   : > { %v1434_v14 = vadd.f32 %v1432_v26, %v1428_v54  ;;  %v1435_v53 = vadd.f32 %v1433_v23, %v1429_v28  ;;  %v1444_v5 = vmul.f32 %v7382_v22, %v1443_v21  ;;  %v1445_v44 = vmul.f32 %v7343_v17, %v1443_v21  ;;  %s7531_s1 = sld [smem:[#allocation8 + $0x40e]] }
 0x144   : > { %v1394_v49 = vadd.f32 %v1392_v47, %v1388_v19  ;;  %v1395_v45 = vadd.f32 %v1393_v43, %v1389_v55  ;;  %v1455_v11 = vstv %s7335_s14  ;;  %v1450_v48 = vmul.f32 %v7278_v33, %v1449_v32  ;;  %s7525_s14 = sld [smem:[#allocation8 + $0xf]] }
 0x145   : > { %v1440_v1 = vadd.f32 %v1438_v12, %v1434_v14  ;;  %v1441_v37 = vadd.f32 %v1439_v50, %v1435_v53  ;;  %v1451_v24 = vmul.f32 %v7294_v36, %v1449_v32  ;;  %v1456_v9 = vmul.f32 %v7394_v40, %v1455_v11 }
 0x146   : > { %v1400_v57 = vadd.f32 %v1398_v6, %v1394_v49  ;;  %v1401_v31 = vadd.f32 %v1399_v16, %v1395_v45  ;;  %v1457_v56 = vmul.f32 %v7356_v61, %v1455_v11  ;;  %v1461_v41 = vstv %s7352_s2  ;;  %s7535_s2 = sld [smem:[#allocation8 + $0x8f]] }
 0x147   : > { %v1446_v30 = vadd.f32 %v1444_v5, %v1440_v1  ;;  %v1447_v34 = vadd.f32 %v1445_v44, %v1441_v37  ;;  %v1467_v59 = vstv %s7362_s3  ;;  %v1462_v38 = vmul.f32 %v7343_v17, %v1461_v41  ;;  %s7539_s3 = sld [smem:[#allocation8 + $0x18f]] }
 0x148   : > { %v7404_v13 = vmax.f32 %v1400_v57, %v1401_v31  ;;  %v1463_v47 = vmul.f32 %v7407_v62, %v1461_v41  ;;  %v1468_v63 = vmul.f32 %v7294_v36, %v1467_v59  ;;  %v1469_v46 = vmul.f32 %v7348_v8, %v1467_v59 }
 0x149   : > { %v1452_v15 = vadd.f32 %v1450_v48, %v1446_v30  ;;  %v1453_v43 = vadd.f32 %v1451_v24, %v1447_v34  ;;  %v1473_v6 = vstv %s7374_s7  ;;  %v1503_v10 = vstv %s7368_s5  ;;  %s7543_s5 = sld [smem:[#allocation8 + $0x10f]] }
 0x14a   : > { %1418 = vst.msk [vmem:[#allocation3 + $0xa] sm:$0x1] %vm481_vm0, %v7404_v13  ;;  %v1474_v16 = vmul.f32 %v7356_v61, %v1473_v6  ;;  %v1475_v7 = vmul.f32 %v7418_v3, %v1473_v6  ;;  %v1507_v18 = vstv %s7380_s8  ;;  %v1504_v26 = vmul.f32 %v7364_v25, %v1503_v10  ;;  %s7549_s7 = sld [smem:[#allocation8 + $0x28f]] }
 0x14b   : > { %v1458_v54 = vadd.f32 %v1456_v9, %v1452_v15  ;;  %v1459_v28 = vadd.f32 %v1457_v56, %v1453_v43  ;;  %v1505_v23 = vmul.f32 %v7382_v22, %v1503_v10  ;;  %v1508_v0 = vmul.f32 %v7257_v60, %v1507_v18  ;;  %s7553_s8 = sld [smem:[#allocation8 + $0x20f]] }
 0x14c   : > { %v1509_v21 = vmul.f32 %v7278_v33, %v1507_v18  ;;  %v1513_v19 = vstv %s7390_s11  ;;  %v1519_v55 = vstv %s7386_s10  ;;  %v1525_v1 = vstv %s7402_s19  ;;  %s7562_s10 = sld [smem:[#allocation8 + $0x30f]] }
 0x14d   : > { %v1464_v12 = vadd.f32 %v1462_v38, %v1458_v54  ;;  %v1465_v50 = vadd.f32 %v1463_v47, %v1459_v28  ;;  %v1514_v14 = vmul.f32 %v7376_v20, %v1513_v19  ;;  %v1515_v53 = vmul.f32 %v7394_v40, %v1513_v19  ;;  %s7570_s11 = sld [smem:[#allocation8 + $0x38f]] }
 0x14e   : > { %v1510_v5 = vadd.f32 %v1508_v0, %v1504_v26  ;;  %v1511_v44 = vadd.f32 %v1509_v21, %v1505_v23  ;;  %v1520_v49 = vmul.f32 %v7382_v22, %v1519_v55  ;;  %v1521_v45 = vmul.f32 %v7343_v17, %v1519_v55  ;;  %s9225_s19 = sld [smem:[#allocation53_spill]] }
 0x14f   : > { %v1470_v32 = vadd.f32 %v1468_v63, %v1464_v12  ;;  %v1471_v11 = vadd.f32 %v1469_v46, %v1465_v50  ;;  %v1531_v37 = vstv %s7398_s18  ;;  %v1526_v57 = vmul.f32 %v7278_v33, %v1525_v1  ;;  %s7580_s18 = sld [smem:[#allocation8 + $0x40f]] }
 0x150   : > { %v1516_v48 = vadd.f32 %v1514_v14, %v1510_v5  ;;  %v1517_v24 = vadd.f32 %v1515_v53, %v1511_v44  ;;  %v1527_v31 = vmul.f32 %v7294_v36, %v1525_v1  ;;  %v1532_v30 = vmul.f32 %v7394_v40, %v1531_v37 }
 0x151   : > { %v1476_v9 = vadd.f32 %v1474_v16, %v1470_v32  ;;  %v1477_v56 = vadd.f32 %v1475_v7, %v1471_v11  ;;  %v1533_v34 = vmul.f32 %v7356_v61, %v1531_v37  ;;  %v1537_v38 = vstv %s7413_s20 }
 0x152   : > { %v1522_v41 = vadd.f32 %v1520_v49, %v1516_v48  ;;  %v1523_v59 = vadd.f32 %v1521_v45, %v1517_v24  ;;  %v1543_v47 = vstv %s7423_s9  ;;  %v1538_v15 = vmul.f32 %v7343_v17, %v1537_v38  ;;  %s9192_s9 = sld [smem:[#allocation45_spill]] }
 0x153   : > { %v7457_v63 = vmax.f32 %v1476_v9, %v1477_v56  ;;  %v1539_v43 = vmul.f32 %v7407_v62, %v1537_v38  ;;  %v1544_v46 = vmul.f32 %v7294_v36, %v1543_v47  ;;  %v1545_v7 = vmul.f32 %v7348_v8, %v1543_v47 }
 0x154   : > { %v1528_v6 = vadd.f32 %v1526_v57, %v1522_v41  ;;  %v1529_v16 = vadd.f32 %v1527_v31, %v1523_v59  ;;  %v1549_v10 = vstv %s7433_s28  ;;  %v1579_v28 = vstv %s7427_s23 }
 0x155   : > { %1494 = vst.msk [vmem:[#allocation3 + $0xb] sm:$0x1] %vm481_vm0, %v7457_v63  ;;  %v1550_v18 = vmul.f32 %v7356_v61, %v1549_v10  ;;  %v1551_v54 = vmul.f32 %v7418_v3, %v1549_v10  ;;  %v1583_v26 = vstv %s7437_s13  ;;  %v1580_v21 = vmul.f32 %v7364_v25, %v1579_v28  ;;  %s6294_s13 = smov 48  }
 0x156   : > { %v1534_v23 = vadd.f32 %v1532_v30, %v1528_v6  ;;  %v1535_v0 = vadd.f32 %v1533_v34, %v1529_v16  ;;  %v1581_v19 = vmul.f32 %v7382_v22, %v1579_v28  ;;  %v1584_v55 = vmul.f32 %v7257_v60, %v1583_v26 }
 0x157   : > { %v1585_v12 = vmul.f32 %v7278_v33, %v1583_v26  ;;  %v1589_v50 = vstv %s7445_s16  ;;  %v1595_v14 = vstv %s7441_s15  ;;  %v1601_v24 = vstv %s7455_s24  ;;  %s6295_s15 = smov 32   ;;  %s9199_s24 = sld [smem:[#allocation46_spill]] }
 0x158   : > { %v1540_v53 = vadd.f32 %v1538_v15, %v1534_v23  ;;  %v1541_v5 = vadd.f32 %v1539_v43, %v1535_v0  ;;  %v1590_v44 = vmul.f32 %v7376_v20, %v1589_v50  ;;  %v1591_v49 = vmul.f32 %v7394_v40, %v1589_v50 }
 0x159   : > { %v1586_v45 = vadd.f32 %v1584_v55, %v1580_v21  ;;  %v1587_v32 = vadd.f32 %v1585_v12, %v1581_v19  ;;  %v1596_v11 = vmul.f32 %v7382_v22, %v1595_v14  ;;  %v1597_v1 = vmul.f32 %v7343_v17, %v1595_v14 }
 0x15a   : > { %v1546_v37 = vadd.f32 %v1544_v46, %v1540_v53  ;;  %v1547_v48 = vadd.f32 %v1545_v7, %v1541_v5  ;;  %v1607_v57 = vstv %s7451_s22  ;;  %v1602_v56 = vmul.f32 %v7278_v33, %v1601_v24  ;;  %s9215_s22 = sld [smem:[#allocation48_spill]] }
 0x15b   : > { %v1592_v31 = vadd.f32 %v1590_v44, %v1586_v45  ;;  %v1593_v9 = vadd.f32 %v1591_v49, %v1587_v32  ;;  %v1603_v30 = vmul.f32 %v7294_v36, %v1601_v24  ;;  %v1608_v59 = vmul.f32 %v7394_v40, %v1607_v57 }
 0x15c   : > { %v1552_v34 = vadd.f32 %v1550_v18, %v1546_v37  ;;  %v1553_v41 = vadd.f32 %v1551_v54, %v1547_v48  ;;  %v1609_v38 = vmul.f32 %v7356_v61, %v1607_v57  ;;  %v1613_v43 = vstv %s7464_s25  ;;  %s6296_s25 = smov 96  }
 0x15d   : > { %v1598_v47 = vadd.f32 %v1596_v11, %v1592_v31  ;;  %v1599_v15 = vadd.f32 %v1597_v1, %v1593_v9  ;;  %v1619_v46 = vstv %s7472_s29  ;;  %v1614_v16 = vmul.f32 %v7343_v17, %v1613_v43  ;;  %s6297_s29 = smov 16  }
 0x15e   : > { %v7506_v6 = vmax.f32 %v1552_v34, %v1553_v41  ;;  %v1615_v7 = vmul.f32 %v7407_v62, %v1613_v43  ;;  %v1620_v10 = vmul.f32 %v7294_v36, %v1619_v46  ;;  %v1621_v28 = vmul.f32 %v7348_v8, %v1619_v46 }
 0x15f   : > { %v1604_v18 = vadd.f32 %v1602_v56, %v1598_v47  ;;  %v1605_v54 = vadd.f32 %v1603_v30, %v1599_v15  ;;  %v1625_v26 = vstv %s7482_s30  ;;  %v1655_v21 = vstv %s7476_s12  ;;  %s6298_s12 = smov 80  }
 0x160   : > { %1570 = vst.msk [vmem:[#allocation3 + $0xc] sm:$0x1] %vm481_vm0, %v7506_v6  ;;  %v1626_v23 = vmul.f32 %v7356_v61, %v1625_v26  ;;  %v1627_v0 = vmul.f32 %v7418_v3, %v1625_v26  ;;  %v1659_v19 = vstv %s7486_s27  ;;  %v1656_v50 = vmul.f32 %v7364_v25, %v1655_v21  ;;  %s9221_s27 = sld [smem:[#allocation15_spill]] }
 0x161   : > { %v1610_v55 = vadd.f32 %v1608_v59, %v1604_v18  ;;  %v1611_v12 = vadd.f32 %v1609_v38, %v1605_v54  ;;  %v1657_v14 = vmul.f32 %v7382_v22, %v1655_v21  ;;  %v1660_v53 = vmul.f32 %v7257_v60, %v1659_v19 }
 0x162   : > { %v1661_v5 = vmul.f32 %v7278_v33, %v1659_v19  ;;  %v1665_v44 = vstv %s7494_s26  ;;  %v1671_v49 = vstv %s7490_s4  ;;  %v1677_v56 = vstv %s7504_s17  ;;  %s6299_s4 = smov 64   ;;  %s6300_s26 = smov 112  }
 0x163   : > { %v1616_v45 = vadd.f32 %v1614_v16, %v1610_v55  ;;  %v1617_v32 = vadd.f32 %v1615_v7, %v1611_v12  ;;  %v1666_v11 = vmul.f32 %v7376_v20, %v1665_v44  ;;  %v1667_v1 = vmul.f32 %v7394_v40, %v1665_v44  ;;  %s9216_s17 = sld [smem:[#allocation50_spill]] }
 0x164   : > { %v1662_v37 = vadd.f32 %v1660_v53, %v1656_v50  ;;  %v1663_v48 = vadd.f32 %v1661_v5, %v1657_v14  ;;  %v1672_v24 = vmul.f32 %v7382_v22, %v1671_v49  ;;  %v1673_v57 = vmul.f32 %v7343_v17, %v1671_v49 }
 0x165   : > { %v1622_v31 = vadd.f32 %v1620_v10, %v1616_v45  ;;  %v1623_v9 = vadd.f32 %v1621_v28, %v1617_v32  ;;  %v1683_v30 = vstv %s7500_s6  ;;  %v1678_v59 = vmul.f32 %v7278_v33, %v1677_v56 }
 0x166   : > { %v1668_v34 = vadd.f32 %v1666_v11, %v1662_v37  ;;  %v1669_v41 = vadd.f32 %v1667_v1, %v1663_v48  ;;  %v1679_v38 = vmul.f32 %v7294_v36, %v1677_v56  ;;  %v1684_v43 = vmul.f32 %v7394_v40, %v1683_v30 }
 0x167   : > { %v1628_v47 = vadd.f32 %v1626_v23, %v1622_v31  ;;  %v1629_v15 = vadd.f32 %v1627_v0, %v1623_v9  ;;  %v1685_v46 = vmul.f32 %v7356_v61, %v1683_v30  ;;  %v1689_v10 = vstv %s7513_s21 }
 0x168   : > { %v1674_v16 = vadd.f32 %v1672_v24, %v1668_v34  ;;  %v1675_v7 = vadd.f32 %v1673_v57, %v1669_v41  ;;  %v1695_v18 = vstv %s7521_s0  ;;  %v1690_v28 = vmul.f32 %v7343_v17, %v1689_v10 }
 0x169   : > { %v7555_v54 = vmax.f32 %v1628_v47, %v1629_v15  ;;  %v1691_v26 = vmul.f32 %v7407_v62, %v1689_v10  ;;  %v1696_v23 = vmul.f32 %v7294_v36, %v1695_v18  ;;  %v1697_v19 = vmul.f32 %v7348_v8, %v1695_v18  ;;  %s9217_s21 = smov %s9216_s17 }
 0x16a   : > { %v1680_v0 = vadd.f32 %v1678_v59, %v1674_v16  ;;  %v1681_v21 = vadd.f32 %v1679_v38, %v1675_v7  ;;  %v1701_v55 = vstv %s7531_s1  ;;  %v1731_v14 = vstv %s7525_s14 }
 0x16b   : > { %1646 = vst.msk [vmem:[#allocation3 + $0xd] sm:$0x1] %vm481_vm0, %v7555_v54  ;;  %v1702_v12 = vmul.f32 %v7356_v61, %v1701_v55  ;;  %v1703_v50 = vmul.f32 %v7418_v3, %v1701_v55  ;;  %v1735_v53 = vstv %s7535_s2  ;;  %v1732_v49 = vmul.f32 %v7364_v25, %v1731_v14  ;;  %s9223_s2 = sld [smem:[#allocation51_spill]] }
 0x16c   : > { %v1686_v5 = vadd.f32 %v1684_v43, %v1680_v0  ;;  %v1687_v44 = vadd.f32 %v1685_v46, %v1681_v21  ;;  %v1733_v45 = vmul.f32 %v7382_v22, %v1731_v14  ;;  %v1736_v32 = vmul.f32 %v7257_v60, %v1735_v53 }
 0x16d   : > { %v1737_v11 = vmul.f32 %v7278_v33, %v1735_v53  ;;  %v1741_v1 = vstv %s7543_s5  ;;  %v1747_v37 = vstv %s7539_s3  ;;  %v1753_v41 = vstv %s7553_s8  ;;  %s393_s3 = sand.u32 1, %s9221_s27   ;;  %s9224_s8 = sld [smem:[#allocation54_spill]] }
 0x16e   : > { %v1692_v48 = vadd.f32 %v1690_v28, %v1686_v5  ;;  %v1693_v24 = vadd.f32 %v1691_v26, %v1687_v44  ;;  %v1742_v57 = vmul.f32 %v7376_v20, %v1741_v1  ;;  %v1743_v31 = vmul.f32 %v7394_v40, %v1741_v1  ;;  %s394_s23 = scalar_lea.vmem [#allocation11], %s393_s3 }
 0x16f   : > { %v1738_v9 = vadd.f32 %v1736_v32, %v1732_v49  ;;  %v1739_v25 = vadd.f32 %v1737_v11, %v1733_v45  ;;  %v1748_v56 = vmul.f32 %v7382_v22, %v1747_v37  ;;  %v1749_v60 = vmul.f32 %v7343_v17, %v1747_v37  ;;  %s5650_s28 = sshll.u32 %s394_s23, 4  ;;  %s5651_s28 = int_to_ptr.vmem [resolvable:$true] %s5650_s28 }
 0x170   : > { %v1698_v30 = vadd.f32 %v1696_v23, %v1692_v48  ;;  %v1699_v34 = vadd.f32 %v1697_v19, %v1693_v24  ;;  %v1759_v59 = vstv %s7549_s7  ;;  %v1754_v20 = vmul.f32 %v7278_v33, %v1753_v41 }
 0x171   : > { %v1744_v38 = vadd.f32 %v1742_v57, %v1738_v9  ;;  %v1745_v47 = vadd.f32 %v1743_v31, %v1739_v25  ;;  %v1755_v15 = vmul.f32 %v7294_v36, %v1753_v41  ;;  %v1765_v10 = vstv %s7562_s10 }
 0x172   : > { %v1704_v43 = vadd.f32 %v1702_v12, %v1698_v30  ;;  %v1705_v46 = vadd.f32 %v1703_v50, %v1699_v34  ;;  %v1771_v18 = vstv %s7570_s11  ;;  %v1760_v28 = vmul.f32 %v7394_v40, %v1759_v59 }
 0x173   : > { %v1750_v16 = vadd.f32 %v1748_v56, %v1744_v38  ;;  %v1751_v7 = vadd.f32 %v1749_v60, %v1745_v47  ;;  %v1761_v26 = vmul.f32 %v7356_v61, %v1759_v59  ;;  %v1766_v23 = vmul.f32 %v7343_v17, %v1765_v10  ;;  %s6238_s27 = scalar_lea.hbm %s9224_s8, 2 }
 0x174   : > { %v7590_v22 = vmax.f32 %v1704_v43, %v1705_v46  ;;  %v1767_v33 = vmul.f32 %v7407_v62, %v1765_v10  ;;  %v1772_v19 = vmul.f32 %v7294_v36, %v1771_v18  ;;  %v1773_v55 = vmul.f32 %v7348_v8, %v1771_v18 }
 0x175   : > { %v1756_v0 = vadd.f32 %v1754_v20, %v1750_v16  ;;  %v1757_v21 = vadd.f32 %v1755_v15, %v1751_v7  ;;  %v1777_v12 = vstv %s7580_s18  ;;  %v1253_v50 = vrot.slane %v7290_v52, 2 }
 0x176   : > { %1722 = vst.msk [vmem:[#allocation3 + $0xe] sm:$0x1] %vm481_vm0, %v7590_v22  ;;  %v1329_v40 = vrot.slane %v7341_v35, 2  ;;  %v1405_v17 = vrot.slane %v7404_v13, 2  ;;  %v1481_v5 = vrot.slane %v7457_v63, 2  ;;  %v1557_v36 = vrot.slane %v7506_v6, 2 }
 0x177   : > { %v1762_v14 = vadd.f32 %v1760_v28, %v1756_v0  ;;  %v1763_v53 = vadd.f32 %v1761_v26, %v1757_v21  ;;  %1268 = vst.msk [vmem:[#allocation3 + $0x28] sm:$0x1] %vm481_vm0, %v1253_v50  ;;  %v1633_v8 = vrot.slane %v7555_v54, 2  ;;  %v1778_v49 = vmul.f32 %v7356_v61, %v1777_v12 }
 0x178   : > { %1344 = vst.msk [vmem:[#allocation3 + $0x29] sm:$0x1] %vm481_vm0, %v1329_v40  ;;  %v1709_v45 = vrot.slane %v7590_v22, 2  ;;  %v1779_v1 = vmul.f32 %v7418_v3, %v1777_v12  ;;  %v1252_v37 = vrot.slane %v7290_v52, 1  ;;  %v1328_v48 = vrot.slane %v7341_v35, 1 }
 0x179   : > { %v1768_v62 = vadd.f32 %v1766_v23, %v1762_v14  ;;  %v1769_v44 = vadd.f32 %v1767_v33, %v1763_v53  ;;  %1420 = vst.msk [vmem:[#allocation3 + $0x2a] sm:$0x1] %vm481_vm0, %v1405_v17  ;;  %v1404_v61 = vrot.slane %v7404_v13, 1  ;;  %v1480_v3 = vrot.slane %v7457_v63, 1 }
 0x17a   : > { %1496 = vst.msk [vmem:[#allocation3 + $0x2b] sm:$0x1] %vm481_vm0, %v1481_v5  ;;  %v1556_v25 = vrot.slane %v7506_v6, 1  ;;  %v1632_v56 = vrot.slane %v7555_v54, 1  ;;  %v1708_v60 = vrot.slane %v7590_v22, 1  ;;  %v646_v34 = vrot.slane %v6936_v2, 3 }
 0x17b   : > { %v1774_v32 = vadd.f32 %v1772_v19, %v1768_v62  ;;  %v1775_v11 = vadd.f32 %v1773_v55, %v1769_v44  ;;  %1572 = vst.msk [vmem:[#allocation3 + $0x2c] sm:$0x1] %vm481_vm0, %v1557_v36  ;;  %v722_v41 = vrot.slane %v6938_v39, 3  ;;  %v798_v59 = vrot.slane %v6970_v4, 3 }
 0x17c   : > { %1648 = vst.msk [vmem:[#allocation3 + $0x2d] sm:$0x1] %vm481_vm0, %v1633_v8  ;;  %v874_v47 = vrot.slane %v7012_v58, 3  ;;  %v950_v20 = vrot.slane %v7058_v42, 3  ;;  %v1026_v43 = vrot.slane %v7103_v51, 3  ;;  %v1102_v46 = vrot.slane %v7146_v27, 3 }
 0x17d   : > { %v1780_v24 = vadd.f32 %v1778_v49, %v1774_v32  ;;  %v1781_v57 = vadd.f32 %v1779_v1, %v1775_v11  ;;  %1724 = vst.msk [vmem:[#allocation3 + $0x2e] sm:$0x1] %vm481_vm0, %v1709_v45  ;;  %v1178_v16 = vrot.slane %v7206_v29, 3  ;;  %v647_v7 = vrot.slane %v6936_v2, 4 }
 0x17e   : > { %1267 = vst.msk [vmem:[#allocation3 + $0x18] sm:$0x1] %vm481_vm0, %v1252_v37  ;;  %v723_v10 = vrot.slane %v6938_v39, 4  ;;  %v799_v28 = vrot.slane %v6970_v4, 4  ;;  %v875_v26 = vrot.slane %v7012_v58, 4  ;;  %v951_v23 = vrot.slane %v7058_v42, 4 }
 0x17f   : > { %v7620_v31 = vmax.f32 %v1780_v24, %v1781_v57  ;;  %1343 = vst.msk [vmem:[#allocation3 + $0x19] sm:$0x1] %vm481_vm0, %v1328_v48  ;;  %v1027_v0 = vrot.slane %v7103_v51, 4  ;;  %v1103_v21 = vrot.slane %v7146_v27, 4  ;;  %v1179_v33 = vrot.slane %v7206_v29, 4 }
 0x180   : > { %1419 = vst.msk [vmem:[#allocation3 + $0x1a] sm:$0x1] %vm481_vm0, %v1404_v61  ;;  %v649_v19 = vrot.slane %v6936_v2, 6  ;;  %v725_v55 = vrot.slane %v6938_v39, 6  ;;  %v801_v50 = vrot.slane %v6970_v4, 6  ;;  %v877_v40 = vrot.slane %v7012_v58, 6 }
 0x181   : > { %1798 = vst.msk [vmem:[#allocation3 + $0xf] sm:$0x1] %vm481_vm0, %v7620_v31  ;;  %v1785_v9 = vrot.slane %v7620_v31, 2  ;;  %v1784_v30 = vrot.slane %v7620_v31, 1  ;;  %v953_v14 = vrot.slane %v7058_v42, 6  ;;  %v1029_v53 = vrot.slane %v7103_v51, 6 }
 0x182   : > { %1495 = vst.msk [vmem:[#allocation3 + $0x1b] sm:$0x1] %vm481_vm0, %v1480_v3  ;;  %v1105_v17 = vrot.slane %v7146_v27, 6  ;;  %v1181_v5 = vrot.slane %v7206_v29, 6  ;;  %v1254_v36 = vrot.slane %v7290_v52, 3  ;;  %v1330_v62 = vrot.slane %v7341_v35, 3 }
 0x183   : > { %1800 = vst.msk [vmem:[#allocation3 + $0x2f] sm:$0x1] %vm481_vm0, %v1785_v9  ;;  %v1406_v8 = vrot.slane %v7404_v13, 3  ;;  %v1482_v49 = vrot.slane %v7457_v63, 3  ;;  %v1558_v45 = vrot.slane %v7506_v6, 3  ;;  %v1634_v32 = vrot.slane %v7555_v54, 3 }
 0x184   : > { %1571 = vst.msk [vmem:[#allocation3 + $0x1c] sm:$0x1] %vm481_vm0, %v1556_v25  ;;  %v1710_v11 = vrot.slane %v7590_v22, 3  ;;  %v1786_v1 = vrot.slane %v7620_v31, 3  ;;  %v1255_v37 = vrot.slane %v7290_v52, 4  ;;  %v1331_v48 = vrot.slane %v7341_v35, 4 }
 0x185   : > { %1647 = vst.msk [vmem:[#allocation3 + $0x1d] sm:$0x1] %vm481_vm0, %v1632_v56  ;;  %v1407_v57 = vrot.slane %v7404_v13, 4  ;;  %v1483_v61 = vrot.slane %v7457_v63, 4  ;;  %v1559_v3 = vrot.slane %v7506_v6, 4  ;;  %v1635_v9 = vrot.slane %v7555_v54, 4 }
 0x186   : > { %1723 = vst.msk [vmem:[#allocation3 + $0x1e] sm:$0x1] %vm481_vm0, %v1708_v60  ;;  %v1711_v25 = vrot.slane %v7590_v22, 4  ;;  %v1787_v56 = vrot.slane %v7620_v31, 4  ;;  %v1257_v60 = vrot.slane %v7290_v52, 6  ;;  %vm3432_vm11 = vcmask 1042432  }
 0x187   : > { %1799 = vst.msk [vmem:[#allocation3 + $0x1f] sm:$0x1] %vm481_vm0, %v1784_v30  ;;  %v1333_v30 = vrot.slane %v7341_v35, 6 }
 0x188   : > { %v1807_v38 = vld [vmem:[#allocation3 + $0x8] sm:$0xff]  ;;  %661 = vst.msk [vmem:[#allocation3 + $0x30] sm:$0x1] %vm481_vm0, %v646_v34 }
 0x189   : > { %1823 = vxpose.xlu0.b32.end [2/2] (short) (narrow) %v1807_v38, 16  ;;  %737 = vst.msk [vmem:[#allocation3 + $0x31] sm:$0x1] %vm481_vm0, %v722_v41  ;;  %v1409_v41 = vrot.slane %v7404_v13, 6  ;;  %v1561_v38 = vrot.slane %v7506_v6, 6 }
 0x18a   : > { %v1811_v15 = vld [vmem:[#allocation3 + $0x28] sm:$0xff]  ;;  %813 = vst.msk [vmem:[#allocation3 + $0x32] sm:$0x1] %vm481_vm0, %v798_v59  ;;  %v1485_v59 = vrot.slane %v7457_v63, 6 }
 0x18b   : > { %1887 = vxpose.xlu2.b32.end [2/2] (short) (narrow) %v1811_v15, 16  ;;  %889 = vst.msk [vmem:[#allocation3 + $0x33] sm:$0x1] %vm481_vm0, %v874_v47  ;;  %v1637_v47 = vrot.slane %v7555_v54, 6  ;;  %v1789_v15 = vrot.slane %v7620_v31, 6 }
 0x18c   : > { %965 = vst.msk [vmem:[#allocation3 + $0x34] sm:$0x1] %vm481_vm0, %v950_v20  ;;  %v1713_v20 = vrot.slane %v7590_v22, 6 }
 0x18d   : > { %1041 = vst.msk [vmem:[#allocation3 + $0x35] sm:$0x1] %vm481_vm0, %v1026_v43  ;;  %v648_v43 = vrot.slane %v6936_v2, 5 }
 0x18e   : > { %v1809_v18 = vld [vmem:[#allocation3 + $0x18] sm:$0xff]  ;;  %1117 = vst.msk [vmem:[#allocation3 + $0x36] sm:$0x1] %vm481_vm0, %v1102_v46  ;;  %v724_v46 = vrot.slane %v6938_v39, 5 }
 0x18f   : > { %1855 = vxpose.xlu1.b32.end [2/2] (short) (narrow) %v1809_v18, 16  ;;  %1193 = vst.msk [vmem:[#allocation3 + $0x37] sm:$0x1] %vm481_vm0, %v1178_v16  ;;  %v952_v18 = vrot.slane %v7058_v42, 5 }
 0x190   : > { %662 = vst.msk [vmem:[#allocation3 + $0x40] sm:$0x1] %vm481_vm0, %v647_v7  ;;  %v800_v7 = vrot.slane %v6970_v4, 5 }
 0x191   : > { %738 = vst.msk [vmem:[#allocation3 + $0x41] sm:$0x1] %vm481_vm0, %v723_v10  ;;  %v876_v10 = vrot.slane %v7012_v58, 5 }
 0x192   : > { %814 = vst.msk [vmem:[#allocation3 + $0x42] sm:$0x1] %vm481_vm0, %v799_v28  ;;  %v1028_v28 = vrot.slane %v7103_v51, 5 }
 0x193   : > { %890 = vst.msk [vmem:[#allocation3 + $0x43] sm:$0x1] %vm481_vm0, %v875_v26  ;;  %v1104_v26 = vrot.slane %v7146_v27, 5 }
 0x194   : > { %966 = vst.msk [vmem:[#allocation3 + $0x44] sm:$0x1] %vm481_vm0, %v951_v23  ;;  %v1180_v23 = vrot.slane %v7206_v29, 5 }
 0x195   : > { %1042 = vst.msk [vmem:[#allocation3 + $0x45] sm:$0x1] %vm481_vm0, %v1027_v0  ;;  %v650_v0 = vrot.slane %v6936_v2, 7  ;;  %v1030_v2 = vrot.slane %v7103_v51, 7  ;;  %v1408_v51 = vrot.slane %v7404_v13, 5 }
 0x196   : > { %v1812_v12 = vld [vmem:[#allocation3 + $0x30] sm:$0xff]  ;;  %1118 = vst.msk [vmem:[#allocation3 + $0x46] sm:$0x1] %vm481_vm0, %v1103_v21  ;;  %v726_v21 = vrot.slane %v6938_v39, 7  ;;  %v1106_v39 = vrot.slane %v7146_v27, 7  ;;  %v1484_v27 = vrot.slane %v7457_v63, 5 }
 0x197   : > { %1918 = vxpose.xlu0.b32.start [1/2] (short) (narrow) %v1812_v12, 16  ;;  %1194 = vst.msk [vmem:[#allocation3 + $0x47] sm:$0x1] %vm481_vm0, %v1179_v33  ;;  %v954_v12 = vrot.slane %v7058_v42, 7  ;;  %v1332_v42 = vrot.slane %v7341_v35, 5 }
 0x198   : > { %664 = vst.msk [vmem:[#allocation3 + $0x60] sm:$0x1] %vm481_vm0, %v649_v19  ;;  %v802_v19 = vrot.slane %v6970_v4, 7  ;;  %v1182_v4 = vrot.slane %v7206_v29, 7  ;;  %v1560_v29 = vrot.slane %v7506_v6, 5 }
 0x199   : > { %740 = vst.msk [vmem:[#allocation3 + $0x61] sm:$0x1] %vm481_vm0, %v725_v55  ;;  %v878_v55 = vrot.slane %v7012_v58, 7  ;;  %v1256_v58 = vrot.slane %v7290_v52, 5 }
 0x19a   : > { %816 = vst.msk [vmem:[#allocation3 + $0x62] sm:$0x1] %vm481_vm0, %v801_v50 }
 0x19b   : > { %892 = vst.msk [vmem:[#allocation3 + $0x63] sm:$0x1] %vm481_vm0, %v877_v40  ;;  %v1636_v40 = vrot.slane %v7555_v54, 5 }
 0x19c   : > { %968 = vst.msk [vmem:[#allocation3 + $0x64] sm:$0x1] %vm481_vm0, %v953_v14  ;;  %v1712_v14 = vrot.slane %v7590_v22, 5 }
 0x19d   : > { %1044 = vst.msk [vmem:[#allocation3 + $0x65] sm:$0x1] %vm481_vm0, %v1029_v53  ;;  %v1788_v53 = vrot.slane %v7620_v31, 5 }
 0x19e   : > { %v1814_v44 = vld [vmem:[#allocation3 + $0x40] sm:$0xff]  ;;  %1120 = vst.msk [vmem:[#allocation3 + $0x66] sm:$0x1] %vm481_vm0, %v1105_v17  ;;  %v1258_v17 = vrot.slane %v7290_v52, 7  ;;  %v1638_v52 = vrot.slane %v7555_v54, 7 }
 0x19f   : > { %1950 = vxpose.xlu2.b32.start [1/2] (short) (narrow) %v1814_v44, 16  ;;  %1196 = vst.msk [vmem:[#allocation3 + $0x67] sm:$0x1] %vm481_vm0, %v1181_v5  ;;  %v1334_v5 = vrot.slane %v7341_v35, 7  ;;  %v1486_v44 = vrot.slane %v7457_v63, 7  ;;  %v1714_v35 = vrot.slane %v7590_v22, 7 }
 0x1a0   : > { %1269 = vst.msk [vmem:[#allocation3 + $0x38] sm:$0x1] %vm481_vm0, %v1254_v36 }
 0x1a1   : > { %1345 = vst.msk [vmem:[#allocation3 + $0x39] sm:$0x1] %vm481_vm0, %v1330_v62  ;;  %v1410_v62 = vrot.slane %v7404_v13, 7  ;;  %v1790_v13 = vrot.slane %v7620_v31, 7 }
 0x1a2   : > { %1421 = vst.msk [vmem:[#allocation3 + $0x3a] sm:$0x1] %vm481_vm0, %v1406_v8  ;;  %v1562_v8 = vrot.slane %v7506_v6, 7 }
 0x1a3   : > { %1497 = vst.msk [vmem:[#allocation3 + $0x3b] sm:$0x1] %vm481_vm0, %v1482_v49 }
 0x1a4   : > { %1573 = vst.msk [vmem:[#allocation3 + $0x3c] sm:$0x1] %vm481_vm0, %v1558_v45 }
 0x1a5   : > { %1649 = vst.msk [vmem:[#allocation3 + $0x3d] sm:$0x1] %vm481_vm0, %v1634_v32 }
 0x1a6   : > { %v1818_v24 = vld [vmem:[#allocation3 + $0x60] sm:$0xff]  ;;  %1725 = vst.msk [vmem:[#allocation3 + $0x3e] sm:$0x1] %vm481_vm0, %v1710_v11 }
 0x1a7   : > { %2014 = vxpose.xlu1.b32.start [1/2] (short) (narrow) %v1818_v24, 16  ;;  %1801 = vst.msk [vmem:[#allocation3 + $0x3f] sm:$0x1] %vm481_vm0, %v1786_v1 }
 0x1a8   : > { %1270 = vst.msk [vmem:[#allocation3 + $0x48] sm:$0x1] %vm481_vm0, %v1255_v37 }
 0x1a9   : > { %1346 = vst.msk [vmem:[#allocation3 + $0x49] sm:$0x1] %vm481_vm0, %v1331_v48 }
 0x1aa   : > { %1422 = vst.msk [vmem:[#allocation3 + $0x4a] sm:$0x1] %vm481_vm0, %v1407_v57 }
 0x1ab   : > { %1498 = vst.msk [vmem:[#allocation3 + $0x4b] sm:$0x1] %vm481_vm0, %v1483_v61 }
 0x1ac   : > { %1574 = vst.msk [vmem:[#allocation3 + $0x4c] sm:$0x1] %vm481_vm0, %v1559_v3 }
 0x1ad   : > { %1650 = vst.msk [vmem:[#allocation3 + $0x4d] sm:$0x1] %vm481_vm0, %v1635_v9 }
 0x1ae   : > { %v1813_v34 = vld [vmem:[#allocation3 + $0x38] sm:$0xff]  ;;  %1726 = vst.msk [vmem:[#allocation3 + $0x4e] sm:$0x1] %vm481_vm0, %v1711_v25 }
 0x1af   : > { %1919 = vxpose.xlu0.b32.end [2/2] (short) (narrow) %v1813_v34, 16  ;;  %1802 = vst.msk [vmem:[#allocation3 + $0x4f] sm:$0x1] %vm481_vm0, %v1787_v56 }
 0x1b0   : > { %1272 = vst.msk [vmem:[#allocation3 + $0x68] sm:$0x1] %vm481_vm0, %v1257_v60  ;;  %v2788_v60 = vld [vmem:[#allocation4 + $0x18] sm:$0x1] }
 0x1b1   : > { %1348 = vst.msk [vmem:[#allocation3 + $0x69] sm:$0x1] %vm481_vm0, %v1333_v30 }
 0x1b2   : > { %1424 = vst.msk [vmem:[#allocation3 + $0x6a] sm:$0x1] %vm481_vm0, %v1409_v41 }
 0x1b3   : > { %1500 = vst.msk [vmem:[#allocation3 + $0x6b] sm:$0x1] %vm481_vm0, %v1485_v59 }
 0x1b4   : > { %1576 = vst.msk [vmem:[#allocation3 + $0x6c] sm:$0x1] %vm481_vm0, %v1561_v38 }
 0x1b5   : > { %1652 = vst.msk [vmem:[#allocation3 + $0x6d] sm:$0x1] %vm481_vm0, %v1637_v47 }
 0x1b6   : > { %v1815_v16 = vld [vmem:[#allocation3 + $0x48] sm:$0xff]  ;;  %1728 = vst.msk [vmem:[#allocation3 + $0x6e] sm:$0x1] %vm481_vm0, %v1713_v20 }
 0x1b7   : > { %1951 = vxpose.xlu2.b32.end [2/2] (short) (narrow) %v1815_v16, 16  ;;  %1804 = vst.msk [vmem:[#allocation3 + $0x6f] sm:$0x1] %vm481_vm0, %v1789_v15  ;;  %v2789_v15 = vsel %vm7805_vm3, 0, %v2788_v60  ;;  %v7818_v16 = vld [vmem:[%s9192_s9] ss:$0 sm:$0xff] }
 0x1b8   : > { %663 = vst.msk [vmem:[#allocation3 + $0x50] sm:$0x1] %vm481_vm0, %v648_v43 }
 0x1b9   : > { %739 = vst.msk [vmem:[#allocation3 + $0x51] sm:$0x1] %vm481_vm0, %v724_v46 }
 0x1ba   : > { %815 = vst.msk [vmem:[#allocation3 + $0x52] sm:$0x1] %vm481_vm0, %v800_v7 }
 0x1bb   : > { %891 = vst.msk [vmem:[#allocation3 + $0x53] sm:$0x1] %vm481_vm0, %v876_v10 }
 0x1bc   : > { %967 = vst.msk [vmem:[#allocation3 + $0x54] sm:$0x1] %vm481_vm0, %v952_v18 }
 0x1bd   : > { %1043 = vst.msk [vmem:[#allocation3 + $0x55] sm:$0x1] %vm481_vm0, %v1028_v28 }
 0x1be   : > { %v1819_v33 = vld [vmem:[#allocation3 + $0x68] sm:$0xff]  ;;  %1119 = vst.msk [vmem:[#allocation3 + $0x56] sm:$0x1] %vm481_vm0, %v1104_v26 }
 0x1bf   : > { %2015 = vxpose.xlu1.b32.end [2/2] (short) (narrow) %v1819_v33, 16  ;;  %1195 = vst.msk [vmem:[#allocation3 + $0x57] sm:$0x1] %vm481_vm0, %v1180_v23 }
 0x1c0   : > { %665 = vst.msk [vmem:[#allocation3 + $0x70] sm:$0x1] %vm481_vm0, %v650_v0 }
 0x1c1   : > { %741 = vst.msk [vmem:[#allocation3 + $0x71] sm:$0x1] %vm481_vm0, %v726_v21 }
 0x1c2   : > { %817 = vst.msk [vmem:[#allocation3 + $0x72] sm:$0x1] %vm481_vm0, %v802_v19 }
 0x1c3   : > { %893 = vst.msk [vmem:[#allocation3 + $0x73] sm:$0x1] %vm481_vm0, %v878_v55 }
 0x1c4   : > { %969 = vst.msk [vmem:[#allocation3 + $0x74] sm:$0x1] %vm481_vm0, %v954_v12 }
 0x1c5   : > { %1045 = vst.msk [vmem:[#allocation3 + $0x75] sm:$0x1] %vm481_vm0, %v1030_v2 }
 0x1c6   : > { %v1816_v50 = vld [vmem:[#allocation3 + $0x50] sm:$0xff]  ;;  %1121 = vst.msk [vmem:[#allocation3 + $0x76] sm:$0x1] %vm481_vm0, %v1106_v39 }
 0x1c7   : > { %1982 = vxpose.xlu0.b32.start [1/2] (short) (narrow) %v1816_v50, 16  ;;  %1197 = vst.msk [vmem:[#allocation3 + $0x77] sm:$0x1] %vm481_vm0, %v1182_v4 }
 0x1c8   : > { %1271 = vst.msk [vmem:[#allocation3 + $0x58] sm:$0x1] %vm481_vm0, %v1256_v58 }
 0x1c9   : > { %1347 = vst.msk [vmem:[#allocation3 + $0x59] sm:$0x1] %vm481_vm0, %v1332_v42 }
 0x1ca   : > { %1423 = vst.msk [vmem:[#allocation3 + $0x5a] sm:$0x1] %vm481_vm0, %v1408_v51 }
 0x1cb   : > { %1499 = vst.msk [vmem:[#allocation3 + $0x5b] sm:$0x1] %vm481_vm0, %v1484_v27 }
 0x1cc   : > { %1575 = vst.msk [vmem:[#allocation3 + $0x5c] sm:$0x1] %vm481_vm0, %v1560_v29 }
 0x1cd   : > { %1651 = vst.msk [vmem:[#allocation3 + $0x5d] sm:$0x1] %vm481_vm0, %v1636_v40 }
 0x1ce   : > { %v1820_v36 = vld [vmem:[#allocation3 + $0x70] sm:$0xff]  ;;  %1727 = vst.msk [vmem:[#allocation3 + $0x5e] sm:$0x1] %vm481_vm0, %v1712_v14 }
 0x1cf   : > { %2046 = vxpose.xlu2.b32.start [1/2] (short) (narrow) %v1820_v36, 16  ;;  %1803 = vst.msk [vmem:[#allocation3 + $0x5f] sm:$0x1] %vm481_vm0, %v1788_v53 }
 0x1d0   : > { %1273 = vst.msk [vmem:[#allocation3 + $0x78] sm:$0x1] %vm481_vm0, %v1258_v17 }
 0x1d1   : > { %1349 = vst.msk [vmem:[#allocation3 + $0x79] sm:$0x1] %vm481_vm0, %v1334_v5 }
 0x1d2   : > { %1425 = vst.msk [vmem:[#allocation3 + $0x7a] sm:$0x1] %vm481_vm0, %v1410_v62 }
 0x1d3   : > { %1501 = vst.msk [vmem:[#allocation3 + $0x7b] sm:$0x1] %vm481_vm0, %v1486_v44 }
 0x1d4   : > { %1577 = vst.msk [vmem:[#allocation3 + $0x7c] sm:$0x1] %vm481_vm0, %v1562_v8 }
 0x1d5   : > { %1653 = vst.msk [vmem:[#allocation3 + $0x7d] sm:$0x1] %vm481_vm0, %v1638_v52 }
 0x1d6   : > { %v1817_v63 = vld [vmem:[#allocation3 + $0x58] sm:$0xff]  ;;  %1729 = vst.msk [vmem:[#allocation3 + $0x7e] sm:$0x1] %vm481_vm0, %v1714_v35 }
 0x1d7   : > { %1983 = vxpose.xlu0.b32.end [2/2] (short) (narrow) %v1817_v63, 16  ;;  %1805 = vst.msk [vmem:[#allocation3 + $0x7f] sm:$0x1] %vm481_vm0, %v1790_v13 }
 0x1d8   : > { %2790 = vst [vmem:[#allocation4 + $0x18] sm:$0x1] %v2789_v15 }
 0x1de   : > { %v1821_v6 = vld [vmem:[#allocation3 + $0x78] sm:$0xff] }
 0x1df   : > { %2047 = vxpose.xlu2.b32.end [2/2] (short) (narrow) %v1821_v6, 16 }
 0x21c   : > { %v1902_v54 = vpop.trf.xlu2 }
 0x21d   : > { %v2106_v49 = vrot.slane %v1902_v54, 2  ;;  %v2107_v45 = vrot.slane %v1902_v54, 4  ;;  %v2108_v22 = vrot.slane %v1902_v54, 6  ;;  %v2302_v32 = vsel %vm425_vm1, %v1902_v54, -inf }
 0x21e   : > { %v2303_v11 = vrot.slane %v2302_v32, 4 }
 0x21f   : > { %v2309_v31 = vsel %vm425_vm1, %v2106_v49, -inf  ;;  %v2316_v1 = vsel %vm425_vm1, %v2107_v45, -inf  ;;  %v2323_v37 = vsel %vm425_vm1, %v2108_v22, -inf }
 0x220   : > { %v2304_v48 = vmax.f32 %v2302_v32, %v2303_v11  ;;  %v2310_v24 = vrot.slane %v2309_v31, 4  ;;  %v2317_v57 = vrot.slane %v2316_v1, 4  ;;  %v2324_v61 = vrot.slane %v2323_v37, 4 }
 0x222   : > { %v2305_v3 = vrot.slane %v2304_v48, 2  ;;  %v2311_v9 = vmax.f32 %v2309_v31, %v2310_v24  ;;  %v2318_v25 = vmax.f32 %v2316_v1, %v2317_v57  ;;  %v2325_v56 = vmax.f32 %v2323_v37, %v2324_v61 }
 0x224   : > { %v2306_v30 = vmax.f32 %v2304_v48, %v2305_v3  ;;  %v2312_v34 = vrot.slane %v2311_v9, 2  ;;  %v2319_v41 = vrot.slane %v2318_v25, 2  ;;  %v2326_v59 = vrot.slane %v2325_v56, 2  ;;  %v7809_v47 = vpop.trf.xlu2  ;;  %v2820_v3 = vld [vmem:[#allocation4 + $0x1c] sm:$0x1] }
 0x225   : > { %v1838_v20 = vpop.trf.xlu0  ;;  %v2109_v43 = vrot.slane %v7809_v47, 2  ;;  %v2110_v46 = vrot.slane %v7809_v47, 4 }
 0x226   : > { %v2307_v7 = vrot.slane %v2306_v30, 1  ;;  %v2313_v10 = vmax.f32 %v2311_v9, %v2312_v34  ;;  %v2320_v18 = vmax.f32 %v2318_v25, %v2319_v41  ;;  %v2327_v28 = vmax.f32 %v2325_v56, %v2326_v59 }
 0x227   : > { %v2094_v26 = vrot.slane %v1838_v20, 2  ;;  %v2095_v23 = vrot.slane %v1838_v20, 4  ;;  %v2096_v0 = vrot.slane %v1838_v20, 6  ;;  %v2190_v21 = vsel %vm425_vm1, %v1838_v20, -inf }
 0x228   : > { %v2308_v33 = vmax.f32 %v2306_v30, %v2307_v7  ;;  %v2314_v19 = vrot.slane %v2313_v10, 1  ;;  %v2321_v55 = vrot.slane %v2320_v18, 1  ;;  %v2328_v12 = vrot.slane %v2327_v28, 1 }
 0x229   : > { %v2191_v2 = vrot.slane %v2190_v21, 4  ;;  %v2197_v39 = vsel %vm425_vm1, %v2094_v26, -inf  ;;  %v2204_v4 = vsel %vm425_vm1, %v2095_v23, -inf  ;;  %v2211_v58 = vsel %vm425_vm1, %v2096_v0, -inf }
 0x22a   : > { %v2315_v42 = vmax.f32 %v2313_v10, %v2314_v19  ;;  %v2322_v50 = vmax.f32 %v2320_v18, %v2321_v55  ;;  %v2329_v51 = vmax.f32 %v2327_v28, %v2328_v12  ;;  %v2658_v27 = vadd.f32 %v7818_v16, %v2308_v33 }
 0x22b   : > { %v2192_v29 = vmax.f32 %v2190_v21, %v2191_v2  ;;  %v2198_v40 = vrot.slane %v2197_v39, 4  ;;  %v2205_v14 = vrot.slane %v2204_v4, 4  ;;  %v2212_v53 = vrot.slane %v2211_v58, 4 }
 0x22c   : > { %v2659_v17 = vadd.f32 %v7818_v16, %v2315_v42  ;;  %v2660_v5 = vadd.f32 %v7818_v16, %v2322_v50  ;;  %v2661_v36 = vadd.f32 %v7818_v16, %v2329_v51  ;;  %v2722_v62 = vmax.f32 %v2658_v27, 0.0 }
 0x22d   : > { %v2193_v44 = vrot.slane %v2192_v29, 2  ;;  %v2199_v8 = vmax.f32 %v2197_v39, %v2198_v40  ;;  %v2206_v52 = vmax.f32 %v2204_v4, %v2205_v14  ;;  %v2213_v35 = vmax.f32 %v2211_v58, %v2212_v53 }
 0x22e   : > { %v2723_v13 = vmax.f32 %v2659_v17, 0.0  ;;  %v2724_v63 = vmax.f32 %v2660_v5, 0.0  ;;  %v2725_v6 = vmax.f32 %v2661_v36, 0.0  ;;  %v2857_v54 = vpack.c.bf16 %v2722_v62, %v2722_v62 }
 0x22f   : > { %v2194_v49 = vmax.f32 %v2192_v29, %v2193_v44  ;;  %v2200_v45 = vrot.slane %v2199_v8, 2  ;;  %v2207_v22 = vrot.slane %v2206_v52, 2  ;;  %v2214_v32 = vrot.slane %v2213_v35, 2 }
 0x230   : > { %v2858_v11 = vpack.c.bf16 %v2723_v13, %v2723_v13  ;;  %v2859_v31 = vpack.c.bf16 %v2724_v63, %v2724_v63  ;;  %v2860_v1 = vpack.c.bf16 %v2725_v6, %v2725_v6  ;;  %v2985_v37 = vunpack.c.l.b16 %v2857_v54 }
 0x231   : > { %v2195_v48 = vrot.slane %v2194_v49, 1  ;;  %v2201_v24 = vmax.f32 %v2199_v8, %v2200_v45  ;;  %v2208_v57 = vmax.f32 %v2206_v52, %v2207_v22  ;;  %v2215_v61 = vmax.f32 %v2213_v35, %v2214_v32 }
 0x232   : > { %v2986_v9 = vunpack.c.l.b16 %v2858_v11  ;;  %v2987_v25 = vunpack.c.l.b16 %v2859_v31  ;;  %v2988_v56 = vunpack.c.l.b16 %v2860_v1  ;;  %v3059_v60 = vrot.slane %v2985_v37, 7 }
 0x233   : > { %v2196_v30 = vmax.f32 %v2194_v49, %v2195_v48  ;;  %v2202_v34 = vrot.slane %v2201_v24, 1  ;;  %v2209_v41 = vrot.slane %v2208_v57, 1  ;;  %v2216_v59 = vrot.slane %v2215_v61, 1 }
 0x234   : > { %v3060_v15 = vrot.slane %v2986_v9, 6  ;;  %v3062_v7 = vrot.slane %v2987_v25, 5  ;;  %v3064_v10 = vrot.slane %v2988_v56, 4  ;;  %v2821_v18 = vsel %vm7830_vm13, 0, %v2820_v3 }
 0x235   : > { %v2203_v28 = vmax.f32 %v2201_v24, %v2202_v34  ;;  %v2210_v26 = vmax.f32 %v2208_v57, %v2209_v41  ;;  %v2217_v23 = vmax.f32 %v2215_v61, %v2216_v59  ;;  %v2642_v0 = vadd.f32 %v7818_v16, %v2196_v30  ;;  %2822 = vst [vmem:[#allocation4 + $0x1c] sm:$0x1] %v2821_v18 }
 0x236   : > { %v3061_v21 = vsel %vm511_vm4, %v3060_v15, %v3059_v60  ;;  %v2111_v33 = vrot.slane %v7809_v47, 6  ;;  %v2330_v19 = vsel %vm425_vm1, %v7809_v47, -inf  ;;  %v2337_v55 = vsel %vm425_vm1, %v2109_v43, -inf  ;;  %v1870_v47 = vpop.trf.xlu1 }
 0x237   : > { %v3063_v12 = vsel %vm514_vm6, %v3062_v7, %v3061_v21  ;;  %v2643_v2 = vadd.f32 %v7818_v16, %v2203_v28  ;;  %v2644_v39 = vadd.f32 %v7818_v16, %v2210_v26  ;;  %v2645_v4 = vadd.f32 %v7818_v16, %v2217_v23 }
 0x238   : > { %v7849_v58 = vsel %vm517_vm7, %v3064_v10, %v3063_v12  ;;  %v2706_v42 = vmax.f32 %v2642_v0, 0.0  ;;  %v2331_v50 = vrot.slane %v2330_v19, 4  ;;  %v2338_v51 = vrot.slane %v2337_v55, 4 }
 0x239   : > { %v2707_v27 = vmax.f32 %v2643_v2, 0.0  ;;  %v2708_v29 = vmax.f32 %v2644_v39, 0.0  ;;  %v2709_v40 = vmax.f32 %v2645_v4, 0.0  ;;  %v2344_v43 = vsel %vm425_vm1, %v2110_v46, -inf }
 0x23a   : > { %v2841_v14 = vpack.c.bf16 %v2706_v42, %v2706_v42  ;;  %v2332_v53 = vmax.f32 %v2330_v19, %v2331_v50  ;;  %v2339_v17 = vmax.f32 %v2337_v55, %v2338_v51  ;;  %v2345_v5 = vrot.slane %v2344_v43, 4 }
 0x23b   : > { %v2842_v36 = vpack.c.bf16 %v2707_v27, %v2707_v27  ;;  %v2843_v62 = vpack.c.bf16 %v2708_v29, %v2708_v29  ;;  %v2844_v44 = vpack.c.bf16 %v2709_v40, %v2709_v40  ;;  %v2351_v8 = vsel %vm425_vm1, %v2111_v33, -inf }
 0x23c   : > { %v2969_v52 = vunpack.c.l.b16 %v2841_v14  ;;  %v2333_v35 = vrot.slane %v2332_v53, 2  ;;  %v2340_v13 = vrot.slane %v2339_v17, 2  ;;  %v2346_v63 = vmax.f32 %v2344_v43, %v2345_v5 }
 0x23d   : > { %v2970_v6 = vunpack.c.l.b16 %v2842_v36  ;;  %v2971_v54 = vunpack.c.l.b16 %v2843_v62  ;;  %v2972_v49 = vunpack.c.l.b16 %v2844_v44  ;;  %v2352_v45 = vrot.slane %v2351_v8, 4 }
 0x23e   : > { %v3033_v22 = vrot.slane %v2969_v52, 7  ;;  %v2334_v46 = vmax.f32 %v2332_v53, %v2333_v35  ;;  %v2341_v32 = vmax.f32 %v2339_v17, %v2340_v13  ;;  %v2347_v11 = vrot.slane %v2346_v63, 2 }
 0x23f   : > { %v3034_v31 = vrot.slane %v2970_v6, 6  ;;  %v3036_v1 = vrot.slane %v2971_v54, 5  ;;  %v3038_v37 = vrot.slane %v2972_v49, 4  ;;  %v2353_v48 = vmax.f32 %v2351_v8, %v2352_v45  ;;  %v2782_v54 = vld [vmem:[#allocation4 + $0x8] sm:$0x1] }
 0x240   : > { %v2335_v24 = vrot.slane %v2334_v46, 1  ;;  %v2342_v57 = vrot.slane %v2341_v32, 1  ;;  %v2348_v61 = vmax.f32 %v2346_v63, %v2347_v11  ;;  %v2100_v3 = vrot.slane %v1870_v47, 2 }
 0x241   : > { %v3035_v9 = vsel %vm511_vm4, %v3034_v31, %v3033_v22  ;;  %v2354_v25 = vrot.slane %v2353_v48, 2  ;;  %v2101_v56 = vrot.slane %v1870_v47, 4  ;;  %v2102_v60 = vrot.slane %v1870_v47, 6 }
 0x242   : > { %v3037_v30 = vsel %vm514_vm6, %v3036_v1, %v3035_v9  ;;  %v2336_v34 = vmax.f32 %v2334_v46, %v2335_v24  ;;  %v2343_v41 = vmax.f32 %v2341_v32, %v2342_v57  ;;  %v2349_v59 = vrot.slane %v2348_v61, 1  ;;  %v2814_v1 = vld [vmem:[#allocation4 + $0xc] sm:$0x1] }
 0x243   : > { %v7858_v15 = vsel %vm517_vm7, %v3038_v37, %v3037_v30  ;;  %v2355_v7 = vmax.f32 %v2353_v48, %v2354_v25  ;;  %v2246_v10 = vsel %vm425_vm1, %v1870_v47, -inf  ;;  %v2253_v18 = vsel %vm425_vm1, %v2100_v3, -inf  ;;  %v3184_v30 = vld [vmem:[#allocation4 + $0x18] sm:$0xf] }
 0x244   : > { %v2350_v28 = vmax.f32 %v2348_v61, %v2349_v59  ;;  %v2662_v26 = vadd.f32 %v7818_v16, %v2336_v34  ;;  %v2663_v23 = vadd.f32 %v7818_v16, %v2343_v41  ;;  %v2247_v0 = vrot.slane %v2246_v10, 4 }
 0x245   : > { %v2356_v21 = vrot.slane %v2355_v7, 1  ;;  %v2254_v33 = vrot.slane %v2253_v18, 4  ;;  %v2260_v19 = vsel %vm425_vm1, %v2101_v56, -inf  ;;  %v2267_v55 = vsel %vm425_vm1, %v2102_v60, -inf  ;;  %v1839_v56 = vpop.trf.xlu0 }
 0x246   : > { %v2664_v12 = vadd.f32 %v7818_v16, %v2350_v28  ;;  %v2726_v2 = vmax.f32 %v2662_v26, 0.0  ;;  %v2727_v39 = vmax.f32 %v2663_v23, 0.0  ;;  %v2248_v4 = vmax.f32 %v2246_v10, %v2247_v0 }
 0x247   : > { %v2357_v42 = vmax.f32 %v2355_v7, %v2356_v21  ;;  %v2255_v50 = vmax.f32 %v2253_v18, %v2254_v33  ;;  %v2261_v51 = vrot.slane %v2260_v19, 4  ;;  %v2268_v27 = vrot.slane %v2267_v55, 4 }
 0x248   : > { %v2728_v29 = vmax.f32 %v2664_v12, 0.0  ;;  %v2861_v40 = vpack.c.bf16 %v2726_v2, %v2726_v2  ;;  %v2862_v43 = vpack.c.bf16 %v2727_v39, %v2727_v39  ;;  %v2249_v14 = vrot.slane %v2248_v4, 2 }
 0x249   : > { %v2665_v53 = vadd.f32 %v7818_v16, %v2357_v42  ;;  %v2256_v17 = vrot.slane %v2255_v50, 2  ;;  %v2262_v5 = vmax.f32 %v2260_v19, %v2261_v51  ;;  %v2269_v36 = vmax.f32 %v2267_v55, %v2268_v27 }
 0x24a   : > { %v2863_v62 = vpack.c.bf16 %v2728_v29, %v2728_v29  ;;  %v2989_v44 = vunpack.c.l.b16 %v2861_v40  ;;  %v2990_v8 = vunpack.c.l.b16 %v2862_v43  ;;  %v2250_v52 = vmax.f32 %v2248_v4, %v2249_v14 }
 0x24b   : > { %v2729_v35 = vmax.f32 %v2665_v53, 0.0  ;;  %v2257_v13 = vmax.f32 %v2255_v50, %v2256_v17  ;;  %v2263_v63 = vrot.slane %v2262_v5, 2  ;;  %v2270_v6 = vrot.slane %v2269_v36, 2 }
 0x24c   : > { %v2991_v49 = vunpack.c.l.b16 %v2863_v62  ;;  %v3066_v45 = vrot.slane %v2989_v44, 3  ;;  %v3068_v47 = vrot.slane %v2990_v8, 2  ;;  %v2251_v22 = vrot.slane %v2250_v52, 1 }
 0x24d   : > { %v2864_v46 = vpack.c.bf16 %v2729_v35, %v2729_v35  ;;  %v2258_v32 = vrot.slane %v2257_v13, 1  ;;  %v2264_v11 = vmax.f32 %v2262_v5, %v2263_v63  ;;  %v2271_v31 = vmax.f32 %v2269_v36, %v2270_v6 }
 0x24e   : > { %v3067_v37 = vsel %vm520_vm8, %v3066_v45, %v7849_v58  ;;  %v3070_v48 = vrot.slane %v2991_v49, 1  ;;  %v2252_v24 = vmax.f32 %v2250_v52, %v2251_v22  ;;  %v2783_v57 = vsel %vm7805_vm3, 0, %v2782_v54  ;;  %v3187_v58 = vld [vmem:[#allocation4 + $0x1c] sm:$0x1]  ;;  %v1966_v45 = vpop.trf.xlu2 }
 0x24f   : > { %v2992_v61 = vunpack.c.l.b16 %v2864_v46  ;;  %v3069_v3 = vsel %vm9091_vm9, %v3068_v47, %v3067_v37  ;;  %v2259_v9 = vmax.f32 %v2257_v13, %v2258_v32  ;;  %v2265_v25 = vrot.slane %v2264_v11, 1  ;;  %2784 = vst [vmem:[#allocation4 + $0x8] sm:$0x1] %v2783_v57 }
 0x250   : > { %v3071_v34 = vsel %vm526_vm10, %v3070_v48, %v3069_v3  ;;  %v2272_v41 = vrot.slane %v2271_v31, 1  ;;  %v2650_v59 = vadd.f32 %v7818_v16, %v2252_v24  ;;  %v2815_v7 = vsel %vm7830_vm13, 0, %v2814_v1 }
 0x251   : > { %v3141_v10 = vpack.c.b16 %v3071_v34, %v3071_v34  ;;  %v3142_v18 = vpack.c.b16 %v2992_v61, %v2992_v61  ;;  %v2266_v28 = vmax.f32 %v2264_v11, %v2265_v25  ;;  %v2651_v26 = vadd.f32 %v7818_v16, %v2259_v9  ;;  %2816 = vst [vmem:[#allocation4 + $0xc] sm:$0x1] %v2815_v7 }
 0x252   : > { %v2273_v23 = vmax.f32 %v2271_v31, %v2272_v41  ;;  %v2714_v0 = vmax.f32 %v2650_v59, 0.0  ;;  %v2097_v21 = vrot.slane %v1839_v56, 2  ;;  %v2098_v33 = vrot.slane %v1839_v56, 4 }
 0x253   : > { %v3185_v19 = vsel %vm7875_vm15, %v3141_v10, %v3184_v30  ;;  %v3188_v55 = vsel %vm7805_vm3, %v3142_v18, %v3187_v58  ;;  %v2652_v12 = vadd.f32 %v7818_v16, %v2266_v28  ;;  %v2715_v2 = vmax.f32 %v2651_v26, 0.0 }
 0x254   : > { %3186 = vst [vmem:[#allocation4 + $0x18] sm:$0xf] %v3185_v19  ;;  %v2653_v39 = vadd.f32 %v7818_v16, %v2273_v23  ;;  %v2849_v4 = vpack.c.bf16 %v2714_v0, %v2714_v0  ;;  %v2099_v42 = vrot.slane %v1839_v56, 6  ;;  %v2218_v50 = vsel %vm425_vm1, %v1839_v56, -inf }
 0x255   : > { %3189 = vst [vmem:[#allocation4 + $0x1c] sm:$0x1] %v3188_v55  ;;  %v2716_v51 = vmax.f32 %v2652_v12, 0.0  ;;  %v2850_v27 = vpack.c.bf16 %v2715_v2, %v2715_v2  ;;  %v2219_v29 = vrot.slane %v2218_v50, 4  ;;  %v2225_v40 = vsel %vm425_vm1, %v2097_v21, -inf }
 0x256   : > { %v2717_v43 = vmax.f32 %v2653_v39, 0.0  ;;  %v2977_v14 = vunpack.c.l.b16 %v2849_v4  ;;  %v2226_v53 = vrot.slane %v2225_v40, 4  ;;  %v2232_v17 = vsel %vm425_vm1, %v2098_v33, -inf }
 0x257   : > { %v2851_v5 = vpack.c.bf16 %v2716_v51, %v2716_v51  ;;  %v2978_v36 = vunpack.c.l.b16 %v2850_v27  ;;  %v2220_v62 = vmax.f32 %v2218_v50, %v2219_v29  ;;  %v2233_v44 = vrot.slane %v2232_v17, 4 }
 0x258   : > { %v2852_v8 = vpack.c.bf16 %v2717_v43, %v2717_v43  ;;  %v3046_v52 = vrot.slane %v2977_v14, 7  ;;  %v2227_v35 = vmax.f32 %v2225_v40, %v2226_v53  ;;  %v2239_v13 = vsel %vm425_vm1, %v2099_v42, -inf }
 0x259   : > { %v2979_v63 = vunpack.c.l.b16 %v2851_v5  ;;  %v3047_v6 = vrot.slane %v2978_v36, 6  ;;  %v2221_v54 = vrot.slane %v2220_v62, 2  ;;  %v2234_v49 = vmax.f32 %v2232_v17, %v2233_v44 }
 0x25a   : > { %v2980_v47 = vunpack.c.l.b16 %v2852_v8  ;;  %v2228_v22 = vrot.slane %v2227_v35, 2  ;;  %v2240_v46 = vrot.slane %v2239_v13, 4  ;;  %v2118_v32 = vrot.slane %v1966_v45, 2 }
 0x25b   : > { %v3048_v11 = vsel %vm511_vm4, %v3047_v6, %v3046_v52  ;;  %v3049_v31 = vrot.slane %v2979_v63, 5  ;;  %v2222_v1 = vmax.f32 %v2220_v62, %v2221_v54  ;;  %v2235_v37 = vrot.slane %v2234_v49, 2 }
 0x25c   : > { %v3051_v48 = vrot.slane %v2980_v47, 4  ;;  %v2229_v24 = vmax.f32 %v2227_v35, %v2228_v22  ;;  %v2241_v57 = vmax.f32 %v2239_v13, %v2240_v46  ;;  %v2119_v61 = vrot.slane %v1966_v45, 4 }
 0x25d   : > { %v3050_v3 = vsel %vm514_vm6, %v3049_v31, %v3048_v11  ;;  %v2223_v9 = vrot.slane %v2222_v1, 1  ;;  %v2236_v25 = vmax.f32 %v2234_v49, %v2235_v37  ;;  %v2120_v56 = vrot.slane %v1966_v45, 6 }
 0x25e   : > { %v7897_v30 = vsel %vm517_vm7, %v3051_v48, %v3050_v3  ;;  %v2230_v58 = vrot.slane %v2229_v24, 1  ;;  %v2242_v34 = vrot.slane %v2241_v57, 2  ;;  %v2414_v41 = vsel %vm425_vm1, %v1966_v45, -inf }
 0x25f   : > { %v2224_v59 = vmax.f32 %v2222_v1, %v2223_v9  ;;  %v2237_v7 = vrot.slane %v2236_v25, 1  ;;  %v2415_v10 = vrot.slane %v2414_v41, 4  ;;  %v2421_v18 = vsel %vm425_vm1, %v2118_v32, -inf }
 0x260   : > { %v2231_v28 = vmax.f32 %v2229_v24, %v2230_v58  ;;  %v2243_v26 = vmax.f32 %v2241_v57, %v2242_v34  ;;  %v2422_v23 = vrot.slane %v2421_v18, 4  ;;  %v2428_v0 = vsel %vm425_vm1, %v2119_v61, -inf  ;;  %v2785_v24 = vld [vmem:[#allocation4 + $0x10] sm:$0x1] }
 0x261   : > { %v2238_v21 = vmax.f32 %v2236_v25, %v2237_v7  ;;  %v2646_v33 = vadd.f32 %v7818_v16, %v2224_v59  ;;  %v2416_v19 = vmax.f32 %v2414_v41, %v2415_v10  ;;  %v2429_v55 = vrot.slane %v2428_v0, 4  ;;  %v2817_v41 = vld [vmem:[#allocation4 + $0x14] sm:$0x1]  ;;  %v1871_v59 = vpop.trf.xlu1  ;;  %v3172_v7 = vld [vmem:[#allocation4 + $0x8] sm:$0xf] }
 0x262   : > { %v2244_v12 = vrot.slane %v2243_v26, 1  ;;  %v2647_v2 = vadd.f32 %v7818_v16, %v2231_v28  ;;  %v2423_v39 = vmax.f32 %v2421_v18, %v2422_v23  ;;  %v2435_v4 = vsel %vm425_vm1, %v2120_v56, -inf  ;;  %v3175_v10 = vld [vmem:[#allocation4 + $0xc] sm:$0x1] }
 0x263   : > { %v2648_v42 = vadd.f32 %v7818_v16, %v2238_v21  ;;  %v2710_v50 = vmax.f32 %v2646_v33, 0.0  ;;  %v2417_v51 = vrot.slane %v2416_v19, 2  ;;  %v2430_v27 = vmax.f32 %v2428_v0, %v2429_v55 }
 0x264   : > { %v2245_v29 = vmax.f32 %v2243_v26, %v2244_v12  ;;  %v2711_v40 = vmax.f32 %v2647_v2, 0.0  ;;  %v2424_v43 = vrot.slane %v2423_v39, 2  ;;  %v2436_v14 = vrot.slane %v2435_v4, 4 }
 0x265   : > { %v2712_v53 = vmax.f32 %v2648_v42, 0.0  ;;  %v2845_v17 = vpack.c.bf16 %v2710_v50, %v2710_v50  ;;  %v2418_v5 = vmax.f32 %v2416_v19, %v2417_v51  ;;  %v2431_v36 = vrot.slane %v2430_v27, 2 }
 0x266   : > { %v2649_v62 = vadd.f32 %v7818_v16, %v2245_v29  ;;  %v2846_v44 = vpack.c.bf16 %v2711_v40, %v2711_v40  ;;  %v2425_v8 = vmax.f32 %v2423_v39, %v2424_v43  ;;  %v2437_v52 = vmax.f32 %v2435_v4, %v2436_v14 }
 0x267   : > { %v2847_v35 = vpack.c.bf16 %v2712_v53, %v2712_v53  ;;  %v2973_v13 = vunpack.c.l.b16 %v2845_v17  ;;  %v2419_v63 = vrot.slane %v2418_v5, 1  ;;  %v2432_v6 = vmax.f32 %v2430_v27, %v2431_v36 }
 0x268   : > { %v2713_v54 = vmax.f32 %v2649_v62, 0.0  ;;  %v2974_v49 = vunpack.c.l.b16 %v2846_v44  ;;  %v2426_v45 = vrot.slane %v2425_v8, 1  ;;  %v2438_v47 = vrot.slane %v2437_v52, 2 }
 0x269   : > { %v2975_v22 = vunpack.c.l.b16 %v2847_v35  ;;  %v3040_v46 = vrot.slane %v2973_v13, 3  ;;  %v2420_v32 = vmax.f32 %v2418_v5, %v2419_v63  ;;  %v2433_v11 = vrot.slane %v2432_v6, 1 }
 0x26a   : > { %v2848_v31 = vpack.c.bf16 %v2713_v54, %v2713_v54  ;;  %v3042_v1 = vrot.slane %v2974_v49, 2  ;;  %v2427_v37 = vmax.f32 %v2425_v8, %v2426_v45  ;;  %v2439_v48 = vmax.f32 %v2437_v52, %v2438_v47  ;;  %v1934_v8 = vpop.trf.xlu0 }
 0x26b   : > { %v3041_v57 = vsel %vm520_vm8, %v3040_v46, %v7858_v15  ;;  %v3044_v61 = vrot.slane %v2975_v22, 1  ;;  %v2434_v3 = vmax.f32 %v2432_v6, %v2433_v11  ;;  %v2674_v9 = vadd.f32 %v7818_v16, %v2420_v32 }
 0x26c   : > { %v2976_v25 = vunpack.c.l.b16 %v2848_v31  ;;  %v3043_v56 = vsel %vm9091_vm9, %v3042_v1, %v3041_v57  ;;  %v2440_v58 = vrot.slane %v2439_v48, 1  ;;  %v2675_v34 = vadd.f32 %v7818_v16, %v2427_v37 }
 0x26d   : > { %v3045_v18 = vsel %vm526_vm10, %v3044_v61, %v3043_v56  ;;  %v2676_v28 = vadd.f32 %v7818_v16, %v2434_v3  ;;  %v2738_v26 = vmax.f32 %v2674_v9, 0.0  ;;  %v2786_v15 = vsel %vm7805_vm3, 0, %v2785_v24 }
 0x26e   : > { %v3137_v23 = vpack.c.b16 %v3045_v18, %v3045_v18  ;;  %v3138_v0 = vpack.c.b16 %v2976_v25, %v2976_v25  ;;  %v2441_v21 = vmax.f32 %v2439_v48, %v2440_v58  ;;  %v2739_v33 = vmax.f32 %v2675_v34, 0.0  ;;  %2787 = vst [vmem:[#allocation4 + $0x10] sm:$0x1] %v2786_v15 }
 0x26f   : > { %v2740_v19 = vmax.f32 %v2676_v28, 0.0  ;;  %v2873_v55 = vpack.c.bf16 %v2738_v26, %v2738_v26  ;;  %v2818_v12 = vsel %vm7830_vm13, 0, %v2817_v41  ;;  %v2103_v2 = vrot.slane %v1871_v59, 2 }
 0x270   : > { %v3173_v39 = vsel %vm7875_vm15, %v3137_v23, %v3172_v7  ;;  %v3176_v4 = vsel %vm7805_vm3, %v3138_v0, %v3175_v10  ;;  %v2677_v42 = vadd.f32 %v7818_v16, %v2441_v21  ;;  %v2874_v50 = vpack.c.bf16 %v2739_v33, %v2739_v33  ;;  %2819 = vst [vmem:[#allocation4 + $0x14] sm:$0x1] %v2818_v12 }
 0x271   : > { %3174 = vst [vmem:[#allocation4 + $0x8] sm:$0xf] %v3173_v39  ;;  %v2875_v51 = vpack.c.bf16 %v2740_v19, %v2740_v19  ;;  %v3001_v27 = vunpack.c.l.b16 %v2873_v55  ;;  %v2104_v29 = vrot.slane %v1871_v59, 4  ;;  %v2105_v40 = vrot.slane %v1871_v59, 6 }
 0x272   : > { %3177 = vst [vmem:[#allocation4 + $0xc] sm:$0x1] %v3176_v4  ;;  %v2741_v43 = vmax.f32 %v2677_v42, 0.0  ;;  %v3002_v14 = vunpack.c.l.b16 %v2874_v50  ;;  %v2274_v53 = vsel %vm425_vm1, %v1871_v59, -inf  ;;  %v2281_v17 = vsel %vm425_vm1, %v2103_v2, -inf }
 0x273   : > { %v3003_v5 = vunpack.c.l.b16 %v2875_v51  ;;  %v3085_v36 = vrot.slane %v3001_v27, 7  ;;  %v2275_v62 = vrot.slane %v2274_v53, 4  ;;  %v2282_v44 = vrot.slane %v2281_v17, 4 }
 0x274   : > { %v2876_v52 = vpack.c.bf16 %v2741_v43, %v2741_v43  ;;  %v3086_v35 = vrot.slane %v3002_v14, 6  ;;  %v2288_v13 = vsel %vm425_vm1, %v2104_v29, -inf  ;;  %v2295_v63 = vsel %vm425_vm1, %v2105_v40, -inf }
 0x275   : > { %v3088_v6 = vrot.slane %v3003_v5, 5  ;;  %v2276_v54 = vmax.f32 %v2274_v53, %v2275_v62  ;;  %v2283_v49 = vmax.f32 %v2281_v17, %v2282_v44  ;;  %v2289_v45 = vrot.slane %v2288_v13, 4 }
 0x276   : > { %v3004_v47 = vunpack.c.l.b16 %v2876_v52  ;;  %v3087_v22 = vsel %vm511_vm4, %v3086_v35, %v3085_v36  ;;  %v2296_v46 = vrot.slane %v2295_v63, 4  ;;  %v2112_v32 = vrot.slane %v1934_v8, 2 }
 0x277   : > { %v3089_v11 = vsel %vm514_vm6, %v3088_v6, %v3087_v22  ;;  %v2277_v31 = vrot.slane %v2276_v54, 2  ;;  %v2284_v1 = vrot.slane %v2283_v49, 2  ;;  %v2290_v37 = vmax.f32 %v2288_v13, %v2289_v45 }
 0x278   : > { %v3090_v48 = vrot.slane %v3004_v47, 4  ;;  %v2297_v24 = vmax.f32 %v2295_v63, %v2296_v46  ;;  %v2113_v57 = vrot.slane %v1934_v8, 4  ;;  %v2114_v61 = vrot.slane %v1934_v8, 6 }
 0x279   : > { %v2278_v3 = vmax.f32 %v2276_v54, %v2277_v31  ;;  %v2285_v9 = vmax.f32 %v2283_v49, %v2284_v1  ;;  %v2291_v25 = vrot.slane %v2290_v37, 2  ;;  %v2358_v56 = vsel %vm425_vm1, %v1934_v8, -inf }
 0x27a   : > { %v7931_v58 = vsel %vm517_vm7, %v3090_v48, %v3089_v11  ;;  %v2298_v34 = vrot.slane %v2297_v24, 2  ;;  %v2359_v41 = vrot.slane %v2358_v56, 4  ;;  %v2365_v59 = vsel %vm425_vm1, %v2112_v32, -inf }
 0x27b   : > { %v2279_v7 = vrot.slane %v2278_v3, 1  ;;  %v2286_v10 = vrot.slane %v2285_v9, 1  ;;  %v2292_v18 = vmax.f32 %v2290_v37, %v2291_v25  ;;  %v2366_v28 = vrot.slane %v2365_v59, 4 }
 0x27c   : > { %v2299_v26 = vmax.f32 %v2297_v24, %v2298_v34  ;;  %v2360_v15 = vmax.f32 %v2358_v56, %v2359_v41  ;;  %v2372_v23 = vsel %vm425_vm1, %v2113_v57, -inf  ;;  %v2379_v0 = vsel %vm425_vm1, %v2114_v61, -inf  ;;  %v2794_v24 = vld [vmem:[#allocation4 + $0x28] sm:$0x1] }
 0x27d   : > { %v2280_v21 = vmax.f32 %v2278_v3, %v2279_v7  ;;  %v2287_v33 = vmax.f32 %v2285_v9, %v2286_v10  ;;  %v2293_v19 = vrot.slane %v2292_v18, 1  ;;  %v2367_v55 = vmax.f32 %v2365_v59, %v2366_v28  ;;  %v2826_v59 = vld [vmem:[#allocation4 + $0x2c] sm:$0x1]  ;;  %v3181_v7 = vld [vmem:[#allocation4 + $0x14] sm:$0x1] }
 0x27e   : > { %v2300_v12 = vrot.slane %v2299_v26, 1  ;;  %v2361_v2 = vrot.slane %v2360_v15, 2  ;;  %v2373_v39 = vrot.slane %v2372_v23, 4  ;;  %v2380_v4 = vrot.slane %v2379_v0, 4 }
 0x27f   : > { %v2294_v42 = vmax.f32 %v2292_v18, %v2293_v19  ;;  %v2654_v50 = vadd.f32 %v7818_v16, %v2280_v21  ;;  %v2655_v51 = vadd.f32 %v7818_v16, %v2287_v33  ;;  %v2368_v27 = vrot.slane %v2367_v55, 2  ;;  %v1967_v33 = vpop.trf.xlu2  ;;  %v3178_v19 = vld [vmem:[#allocation4 + $0x10] sm:$0xf] }
 0x280   : > { %v2301_v29 = vmax.f32 %v2299_v26, %v2300_v12  ;;  %v2362_v40 = vmax.f32 %v2360_v15, %v2361_v2  ;;  %v2374_v43 = vmax.f32 %v2372_v23, %v2373_v39  ;;  %v2381_v14 = vmax.f32 %v2379_v0, %v2380_v4 }
 0x281   : > { %v2656_v53 = vadd.f32 %v7818_v16, %v2294_v42  ;;  %v2718_v17 = vmax.f32 %v2654_v50, 0.0  ;;  %v2719_v5 = vmax.f32 %v2655_v51, 0.0  ;;  %v2369_v36 = vmax.f32 %v2367_v55, %v2368_v27 }
 0x282   : > { %v2657_v62 = vadd.f32 %v7818_v16, %v2301_v29  ;;  %v2363_v44 = vrot.slane %v2362_v40, 1  ;;  %v2375_v8 = vrot.slane %v2374_v43, 2  ;;  %v2382_v52 = vrot.slane %v2381_v14, 2 }
 0x283   : > { %v2720_v35 = vmax.f32 %v2656_v53, 0.0  ;;  %v2853_v13 = vpack.c.bf16 %v2718_v17, %v2718_v17  ;;  %v2854_v63 = vpack.c.bf16 %v2719_v5, %v2719_v5  ;;  %v2370_v6 = vrot.slane %v2369_v36, 1  ;;  %v2791_v17 = vld [vmem:[#allocation4 + $0x20] sm:$0x1] }
 0x284   : > { %v2721_v54 = vmax.f32 %v2657_v62, 0.0  ;;  %v2364_v49 = vmax.f32 %v2362_v40, %v2363_v44  ;;  %v2376_v45 = vmax.f32 %v2374_v43, %v2375_v8  ;;  %v2383_v47 = vmax.f32 %v2381_v14, %v2382_v52 }
 0x285   : > { %v2855_v22 = vpack.c.bf16 %v2720_v35, %v2720_v35  ;;  %v2981_v46 = vunpack.c.l.b16 %v2853_v13  ;;  %v2982_v32 = vunpack.c.l.b16 %v2854_v63  ;;  %v2371_v11 = vmax.f32 %v2369_v36, %v2370_v6  ;;  %v2823_v63 = vld [vmem:[#allocation4 + $0x24] sm:$0x1]  ;;  %v1935_v6 = vpop.trf.xlu0 }
 0x286   : > { %v2856_v31 = vpack.c.bf16 %v2721_v54, %v2721_v54  ;;  %v2377_v1 = vrot.slane %v2376_v45, 1  ;;  %v2384_v37 = vrot.slane %v2383_v47, 1  ;;  %v2666_v48 = vadd.f32 %v7818_v16, %v2364_v49 }
 0x287   : > { %v2983_v57 = vunpack.c.l.b16 %v2855_v22  ;;  %v3053_v61 = vrot.slane %v2981_v46, 3  ;;  %v3055_v3 = vrot.slane %v2982_v32, 2  ;;  %v2667_v9 = vadd.f32 %v7818_v16, %v2371_v11 }
 0x288   : > { %v2984_v25 = vunpack.c.l.b16 %v2856_v31  ;;  %v2378_v56 = vmax.f32 %v2376_v45, %v2377_v1  ;;  %v2385_v34 = vmax.f32 %v2383_v47, %v2384_v37  ;;  %v2730_v41 = vmax.f32 %v2666_v48, 0.0 }
 0x289   : > { %v3054_v10 = vsel %vm520_vm8, %v3053_v61, %v7897_v30  ;;  %v3057_v18 = vrot.slane %v2983_v57, 1  ;;  %v2731_v28 = vmax.f32 %v2667_v9, 0.0  ;;  %v2795_v26 = vsel %vm7805_vm3, 0, %v2794_v24 }
 0x28a   : > { %v3056_v15 = vsel %vm9091_vm9, %v3055_v3, %v3054_v10  ;;  %v3140_v23 = vpack.c.b16 %v2984_v25, %v2984_v25  ;;  %v2668_v0 = vadd.f32 %v7818_v16, %v2378_v56  ;;  %v2669_v21 = vadd.f32 %v7818_v16, %v2385_v34  ;;  %2796 = vst [vmem:[#allocation4 + $0x28] sm:$0x1] %v2795_v26 }
 0x28b   : > { %v3058_v55 = vsel %vm526_vm10, %v3057_v18, %v3056_v15  ;;  %v2865_v12 = vpack.c.bf16 %v2730_v41, %v2730_v41  ;;  %v2866_v2 = vpack.c.bf16 %v2731_v28, %v2731_v28  ;;  %v2827_v30 = vsel %vm7830_vm13, 0, %v2826_v59 }
 0x28c   : > { %v3139_v39 = vpack.c.b16 %v3058_v55, %v3058_v55  ;;  %v3182_v4 = vsel %vm7805_vm3, %v3140_v23, %v3181_v7  ;;  %v2732_v42 = vmax.f32 %v2668_v0, 0.0  ;;  %v2733_v50 = vmax.f32 %v2669_v21, 0.0  ;;  %2828 = vst [vmem:[#allocation4 + $0x2c] sm:$0x1] %v2827_v30 }
 0x28d   : > { %3183 = vst [vmem:[#allocation4 + $0x14] sm:$0x1] %v3182_v4  ;;  %v2993_v51 = vunpack.c.l.b16 %v2865_v12  ;;  %v2994_v16 = vunpack.c.l.b16 %v2866_v2  ;;  %v2121_v27 = vrot.slane %v1967_v33, 2  ;;  %v2122_v29 = vrot.slane %v1967_v33, 4 }
 0x28e   : > { %v3179_v40 = vsel %vm7875_vm15, %v3139_v39, %v3178_v19  ;;  %v2867_v43 = vpack.c.bf16 %v2732_v42, %v2732_v42  ;;  %v2868_v14 = vpack.c.bf16 %v2733_v50, %v2733_v50  ;;  %v2123_v53 = vrot.slane %v1967_v33, 6 }
 0x28f   : > { %3180 = vst [vmem:[#allocation4 + $0x10] sm:$0xf] %v3179_v40  ;;  %v3072_v5 = vrot.slane %v2993_v51, 7  ;;  %v3073_v36 = vrot.slane %v2994_v16, 6  ;;  %v2442_v62 = vsel %vm425_vm1, %v1967_v33, -inf  ;;  %v2449_v44 = vsel %vm425_vm1, %v2121_v27, -inf }
 0x290   : > { %v2995_v8 = vunpack.c.l.b16 %v2867_v43  ;;  %v2996_v52 = vunpack.c.l.b16 %v2868_v14  ;;  %v2443_v35 = vrot.slane %v2442_v62, 4  ;;  %v2450_v13 = vrot.slane %v2449_v44, 4 }
 0x291   : > { %v3074_v54 = vsel %vm511_vm4, %v3073_v36, %v3072_v5  ;;  %v2456_v49 = vsel %vm425_vm1, %v2122_v29, -inf  ;;  %v2463_v45 = vsel %vm425_vm1, %v2123_v53, -inf  ;;  %v2792_v47 = vsel %vm7805_vm3, 0, %v2791_v17  ;;  %v7976_v29 = vld [vmem:[%s9192_s9] ss:$0 sm:$0xff] }
 0x292   : > { %v3075_v22 = vrot.slane %v2995_v8, 5  ;;  %v3077_v46 = vrot.slane %v2996_v52, 4  ;;  %v2444_v32 = vmax.f32 %v2442_v62, %v2443_v35  ;;  %v2451_v11 = vmax.f32 %v2449_v44, %v2450_v13  ;;  %2793 = vst [vmem:[#allocation4 + $0x20] sm:$0x1] %v2792_v47 }
 0x293   : > { %v2457_v31 = vrot.slane %v2456_v49, 4  ;;  %v2464_v1 = vrot.slane %v2463_v45, 4  ;;  %v2824_v37 = vsel %vm7830_vm13, 0, %v2823_v63  ;;  %v2115_v48 = vrot.slane %v1935_v6, 2 }
 0x294   : > { %v3076_v24 = vsel %vm514_vm6, %v3075_v22, %v3074_v54  ;;  %v2445_v57 = vrot.slane %v2444_v32, 2  ;;  %v2452_v61 = vrot.slane %v2451_v11, 2  ;;  %2825 = vst [vmem:[#allocation4 + $0x24] sm:$0x1] %v2824_v37  ;;  %v2116_v3 = vrot.slane %v1935_v6, 4 }
 0x295   : > { %v7967_v9 = vsel %vm517_vm7, %v3077_v46, %v3076_v24  ;;  %v2458_v25 = vmax.f32 %v2456_v49, %v2457_v31  ;;  %v2465_v56 = vmax.f32 %v2463_v45, %v2464_v1  ;;  %v2117_v34 = vrot.slane %v1935_v6, 6 }
 0x296   : > { %v2446_v41 = vmax.f32 %v2444_v32, %v2445_v57  ;;  %v2453_v59 = vmax.f32 %v2451_v11, %v2452_v61  ;;  %v2386_v7 = vsel %vm425_vm1, %v1935_v6, -inf  ;;  %v2393_v10 = vsel %vm425_vm1, %v2115_v48, -inf }
 0x297   : > { %v2459_v18 = vrot.slane %v2458_v25, 2  ;;  %v2466_v28 = vrot.slane %v2465_v56, 2  ;;  %v2387_v26 = vrot.slane %v2386_v7, 4  ;;  %v2394_v15 = vrot.slane %v2393_v10, 4 }
 0x298   : > { %v2447_v23 = vrot.slane %v2446_v41, 1  ;;  %v2454_v0 = vrot.slane %v2453_v59, 1  ;;  %v2400_v21 = vsel %vm425_vm1, %v2116_v3, -inf  ;;  %v2407_v33 = vsel %vm425_vm1, %v2117_v34, -inf }
 0x299   : > { %v2460_v19 = vmax.f32 %v2458_v25, %v2459_v18  ;;  %v2467_v55 = vmax.f32 %v2465_v56, %v2466_v28  ;;  %v2388_v12 = vmax.f32 %v2386_v7, %v2387_v26  ;;  %v2395_v2 = vmax.f32 %v2393_v10, %v2394_v15  ;;  %v1998_v56 = vpop.trf.xlu0  ;;  %v3199_v15 = vld [vmem:[#allocation4 + $0x2c] sm:$0x1] }
 0x29a   : > { %v2448_v30 = vmax.f32 %v2446_v41, %v2447_v23  ;;  %v2455_v39 = vmax.f32 %v2453_v59, %v2454_v0  ;;  %v2401_v4 = vrot.slane %v2400_v21, 4  ;;  %v2408_v42 = vrot.slane %v2407_v33, 4 }
 0x29b   : > { %v2461_v50 = vrot.slane %v2460_v19, 1  ;;  %v2468_v51 = vrot.slane %v2467_v55, 1  ;;  %v2389_v16 = vrot.slane %v2388_v12, 2  ;;  %v2396_v27 = vrot.slane %v2395_v2, 2 }
 0x29c   : > { %v2678_v40 = vadd.f32 %v7976_v29, %v2448_v30  ;;  %v2679_v43 = vadd.f32 %v7976_v29, %v2455_v39  ;;  %v2402_v14 = vmax.f32 %v2400_v21, %v2401_v4  ;;  %v2409_v53 = vmax.f32 %v2407_v33, %v2408_v42 }
 0x29d   : > { %v2462_v17 = vmax.f32 %v2460_v19, %v2461_v50  ;;  %v2469_v5 = vmax.f32 %v2467_v55, %v2468_v51  ;;  %v2390_v36 = vmax.f32 %v2388_v12, %v2389_v16  ;;  %v2397_v62 = vmax.f32 %v2395_v2, %v2396_v27  ;;  %v3196_v50 = vld [vmem:[#allocation4 + $0x28] sm:$0xf] }
 0x29e   : > { %v2742_v44 = vmax.f32 %v2678_v40, 0.0  ;;  %v2743_v8 = vmax.f32 %v2679_v43, 0.0  ;;  %v2403_v52 = vrot.slane %v2402_v14, 2  ;;  %v2410_v35 = vrot.slane %v2409_v53, 2 }
 0x29f   : > { %v2680_v13 = vadd.f32 %v7976_v29, %v2462_v17  ;;  %v2681_v63 = vadd.f32 %v7976_v29, %v2469_v5  ;;  %v2391_v6 = vrot.slane %v2390_v36, 1  ;;  %v2398_v54 = vrot.slane %v2397_v62, 1 }
 0x2a0   : > { %v2877_v49 = vpack.c.bf16 %v2742_v44, %v2742_v44  ;;  %v2878_v45 = vpack.c.bf16 %v2743_v8, %v2743_v8  ;;  %v2404_v47 = vmax.f32 %v2402_v14, %v2403_v52  ;;  %v2411_v22 = vmax.f32 %v2409_v53, %v2410_v35  ;;  %v3193_v8 = vld [vmem:[#allocation4 + $0x24] sm:$0x1] }
 0x2a1   : > { %v2744_v46 = vmax.f32 %v2680_v13, 0.0  ;;  %v2745_v32 = vmax.f32 %v2681_v63, 0.0  ;;  %v2392_v11 = vmax.f32 %v2390_v36, %v2391_v6  ;;  %v2399_v31 = vmax.f32 %v2397_v62, %v2398_v54 }
 0x2a2   : > { %v3005_v1 = vunpack.c.l.b16 %v2877_v49  ;;  %v3006_v37 = vunpack.c.l.b16 %v2878_v45  ;;  %v2405_v48 = vrot.slane %v2404_v47, 1  ;;  %v2412_v24 = vrot.slane %v2411_v22, 1 }
 0x2a3   : > { %v2879_v57 = vpack.c.bf16 %v2744_v46, %v2744_v46  ;;  %v2880_v61 = vpack.c.bf16 %v2745_v32, %v2745_v32  ;;  %v2670_v3 = vadd.f32 %v7976_v29, %v2392_v11  ;;  %v2671_v25 = vadd.f32 %v7976_v29, %v2399_v31 }
 0x2a4   : > { %v3092_v34 = vrot.slane %v3005_v1, 3  ;;  %v3094_v41 = vrot.slane %v3006_v37, 2  ;;  %v2406_v59 = vmax.f32 %v2404_v47, %v2405_v48  ;;  %v2413_v7 = vmax.f32 %v2411_v22, %v2412_v24  ;;  %v2030_v37 = vpop.trf.xlu1  ;;  %v3190_v48 = vld [vmem:[#allocation4 + $0x20] sm:$0xf] }
 0x2a5   : > { %v3007_v10 = vunpack.c.l.b16 %v2879_v57  ;;  %v3008_v18 = vunpack.c.l.b16 %v2880_v61  ;;  %v2734_v28 = vmax.f32 %v2670_v3, 0.0  ;;  %v2735_v26 = vmax.f32 %v2671_v25, 0.0 }
 0x2a6   : > { %v3093_v23 = vsel %vm520_vm8, %v3092_v34, %v7931_v58  ;;  %v2672_v0 = vadd.f32 %v7976_v29, %v2406_v59  ;;  %v2673_v21 = vadd.f32 %v7976_v29, %v2413_v7  ;;  %v2124_v33 = vrot.slane %v1998_v56, 2 }
 0x2a7   : > { %v3095_v19 = vsel %vm9091_vm9, %v3094_v41, %v3093_v23  ;;  %v3096_v55 = vrot.slane %v3007_v10, 1  ;;  %v3146_v12 = vpack.c.b16 %v3008_v18, %v3008_v18  ;;  %v2869_v2 = vpack.c.bf16 %v2734_v28, %v2734_v28 }
 0x2a8   : > { %v2736_v30 = vmax.f32 %v2672_v0, 0.0  ;;  %v2737_v39 = vmax.f32 %v2673_v21, 0.0  ;;  %v2870_v4 = vpack.c.bf16 %v2735_v26, %v2735_v26  ;;  %v2125_v42 = vrot.slane %v1998_v56, 4 }
 0x2a9   : > { %v3097_v51 = vsel %vm526_vm10, %v3096_v55, %v3095_v19  ;;  %v3200_v58 = vsel %vm7805_vm3, %v3146_v12, %v3199_v15  ;;  %v2997_v16 = vunpack.c.l.b16 %v2869_v2  ;;  %v2126_v27 = vrot.slane %v1998_v56, 6 }
 0x2aa   : > { %v3145_v40 = vpack.c.b16 %v3097_v51, %v3097_v51  ;;  %3201 = vst [vmem:[#allocation4 + $0x2c] sm:$0x1] %v3200_v58  ;;  %v2871_v43 = vpack.c.bf16 %v2736_v30, %v2736_v30  ;;  %v2872_v14 = vpack.c.bf16 %v2737_v39, %v2737_v39  ;;  %v2998_v53 = vunpack.c.l.b16 %v2870_v4 }
 0x2ab   : > { %v3079_v17 = vrot.slane %v2997_v16, 3  ;;  %v2470_v5 = vsel %vm425_vm1, %v1998_v56, -inf  ;;  %v2477_v36 = vsel %vm425_vm1, %v2124_v33, -inf  ;;  %v2484_v62 = vsel %vm425_vm1, %v2125_v42, -inf }
 0x2ac   : > { %v3197_v44 = vsel %vm7875_vm15, %v3145_v40, %v3196_v50  ;;  %v2999_v52 = vunpack.c.l.b16 %v2871_v43  ;;  %v3000_v35 = vunpack.c.l.b16 %v2872_v14  ;;  %v3081_v13 = vrot.slane %v2998_v53, 2 }
 0x2ad   : > { %3198 = vst [vmem:[#allocation4 + $0x28] sm:$0xf] %v3197_v44  ;;  %v3080_v63 = vsel %vm520_vm8, %v3079_v17, %v7967_v9  ;;  %v2471_v6 = vrot.slane %v2470_v5, 4  ;;  %v2478_v54 = vrot.slane %v2477_v36, 4  ;;  %v2485_v49 = vrot.slane %v2484_v62, 4 }
 0x2ae   : > { %v3082_v45 = vsel %vm9091_vm9, %v3081_v13, %v3080_v63  ;;  %v3083_v47 = vrot.slane %v2999_v52, 1  ;;  %v3144_v22 = vpack.c.b16 %v3000_v35, %v3000_v35  ;;  %v2491_v46 = vsel %vm425_vm1, %v2126_v27, -inf }
 0x2af   : > { %v2472_v32 = vmax.f32 %v2470_v5, %v2471_v6  ;;  %v2479_v11 = vmax.f32 %v2477_v36, %v2478_v54  ;;  %v2486_v31 = vmax.f32 %v2484_v62, %v2485_v49  ;;  %v2492_v1 = vrot.slane %v2491_v46, 4 }
 0x2b0   : > { %v3084_v24 = vsel %vm526_vm10, %v3083_v47, %v3082_v45  ;;  %v3194_v9 = vsel %vm7805_vm3, %v3144_v22, %v3193_v8  ;;  %v2130_v57 = vrot.slane %v2030_v37, 2  ;;  %v2131_v61 = vrot.slane %v2030_v37, 4 }
 0x2b1   : > { %v3143_v3 = vpack.c.b16 %v3084_v24, %v3084_v24  ;;  %3195 = vst [vmem:[#allocation4 + $0x24] sm:$0x1] %v3194_v9  ;;  %v2473_v25 = vrot.slane %v2472_v32, 2  ;;  %v2480_v56 = vrot.slane %v2479_v11, 2  ;;  %v2487_v34 = vrot.slane %v2486_v31, 2 }
 0x2b2   : > { %v2493_v41 = vmax.f32 %v2491_v46, %v2492_v1  ;;  %v2132_v59 = vrot.slane %v2030_v37, 6  ;;  %v2526_v7 = vsel %vm425_vm1, %v2030_v37, -inf  ;;  %v2533_v10 = vsel %vm425_vm1, %v2130_v57, -inf }
 0x2b3   : > { %v3191_v18 = vsel %vm7875_vm15, %v3143_v3, %v3190_v48  ;;  %v2474_v28 = vmax.f32 %v2472_v32, %v2473_v25  ;;  %v2481_v26 = vmax.f32 %v2479_v11, %v2480_v56  ;;  %v2488_v15 = vmax.f32 %v2486_v31, %v2487_v34 }
 0x2b4   : > { %3192 = vst [vmem:[#allocation4 + $0x20] sm:$0xf] %v3191_v18  ;;  %v2494_v23 = vrot.slane %v2493_v41, 2  ;;  %v2527_v0 = vrot.slane %v2526_v7, 4  ;;  %v2534_v21 = vrot.slane %v2533_v10, 4  ;;  %v2540_v33 = vsel %vm425_vm1, %v2131_v61, -inf }
 0x2b5   : > { %v2475_v19 = vrot.slane %v2474_v28, 1  ;;  %v2482_v55 = vrot.slane %v2481_v26, 1  ;;  %v2489_v12 = vrot.slane %v2488_v15, 1  ;;  %v2541_v2 = vrot.slane %v2540_v33, 4 }
 0x2b6   : > { %v2495_v30 = vmax.f32 %v2493_v41, %v2494_v23  ;;  %v2528_v39 = vmax.f32 %v2526_v7, %v2527_v0  ;;  %v2535_v4 = vmax.f32 %v2533_v10, %v2534_v21  ;;  %v2547_v42 = vsel %vm425_vm1, %v2132_v59, -inf  ;;  %v2829_v21 = vld [vmem:[#allocation4 + $0x34] sm:$0x1] }
 0x2b7   : > { %v2476_v50 = vmax.f32 %v2474_v28, %v2475_v19  ;;  %v2483_v51 = vmax.f32 %v2481_v26, %v2482_v55  ;;  %v2490_v58 = vmax.f32 %v2488_v15, %v2489_v12  ;;  %v2542_v16 = vmax.f32 %v2540_v33, %v2541_v2  ;;  %v2797_v15 = vld [vmem:[#allocation4 + $0x30] sm:$0x1]  ;;  %v1999_v12 = vpop.trf.xlu0 }
 0x2b8   : > { %v2496_v27 = vrot.slane %v2495_v30, 1  ;;  %v2529_v40 = vrot.slane %v2528_v39, 2  ;;  %v2536_v43 = vrot.slane %v2535_v4, 2  ;;  %v2548_v14 = vrot.slane %v2547_v42, 4 }
 0x2b9   : > { %v2682_v53 = vadd.f32 %v7976_v29, %v2476_v50  ;;  %v2683_v17 = vadd.f32 %v7976_v29, %v2483_v51  ;;  %v2684_v5 = vadd.f32 %v7976_v29, %v2490_v58  ;;  %v2543_v36 = vrot.slane %v2542_v16, 2 }
 0x2ba   : > { %v2497_v62 = vmax.f32 %v2495_v30, %v2496_v27  ;;  %v2530_v44 = vmax.f32 %v2528_v39, %v2529_v40  ;;  %v2537_v8 = vmax.f32 %v2535_v4, %v2536_v43  ;;  %v2549_v52 = vmax.f32 %v2547_v42, %v2548_v14 }
 0x2bb   : > { %v2746_v35 = vmax.f32 %v2682_v53, 0.0  ;;  %v2747_v13 = vmax.f32 %v2683_v17, 0.0  ;;  %v2748_v63 = vmax.f32 %v2684_v5, 0.0  ;;  %v2544_v6 = vmax.f32 %v2542_v16, %v2543_v36 }
 0x2bc   : > { %v2685_v54 = vadd.f32 %v7976_v29, %v2497_v62  ;;  %v2531_v49 = vrot.slane %v2530_v44, 1  ;;  %v2538_v45 = vrot.slane %v2537_v8, 1  ;;  %v2550_v47 = vrot.slane %v2549_v52, 2 }
 0x2bd   : > { %v2881_v22 = vpack.c.bf16 %v2746_v35, %v2746_v35  ;;  %v2882_v46 = vpack.c.bf16 %v2747_v13, %v2747_v13  ;;  %v2883_v32 = vpack.c.bf16 %v2748_v63, %v2748_v63  ;;  %v2545_v11 = vrot.slane %v2544_v6, 1 }
 0x2be   : > { %v2749_v31 = vmax.f32 %v2685_v54, 0.0  ;;  %v2532_v1 = vmax.f32 %v2530_v44, %v2531_v49  ;;  %v2539_v37 = vmax.f32 %v2537_v8, %v2538_v45  ;;  %v2551_v48 = vmax.f32 %v2549_v52, %v2550_v47  ;;  %v2800_v47 = vld [vmem:[#allocation4 + $0x38] sm:$0x1] }
 0x2bf   : > { %v3009_v24 = vunpack.c.l.b16 %v2881_v22  ;;  %v3010_v9 = vunpack.c.l.b16 %v2882_v46  ;;  %v3011_v57 = vunpack.c.l.b16 %v2883_v32  ;;  %v2546_v61 = vmax.f32 %v2544_v6, %v2545_v11 }
 0x2c0   : > { %v2552_v3 = vrot.slane %v2551_v48, 1  ;;  %v2690_v25 = vadd.f32 %v7976_v29, %v2532_v1  ;;  %v2691_v56 = vadd.f32 %v7976_v29, %v2539_v37  ;;  %v2884_v34 = vpack.c.bf16 %v2749_v31, %v2749_v31 }
 0x2c1   : > { %v3098_v41 = vrot.slane %v3009_v24, 7  ;;  %v3099_v59 = vrot.slane %v3010_v9, 6  ;;  %v2692_v7 = vadd.f32 %v7976_v29, %v2546_v61  ;;  %v3101_v10 = vrot.slane %v3011_v57, 5  ;;  %v2832_v9 = vld [vmem:[#allocation4 + $0x3c] sm:$0x1]  ;;  %v2031_v57 = vpop.trf.xlu1 }
 0x2c2   : > { %v2553_v18 = vmax.f32 %v2551_v48, %v2552_v3  ;;  %v2754_v28 = vmax.f32 %v2690_v25, 0.0  ;;  %v2755_v26 = vmax.f32 %v2691_v56, 0.0  ;;  %v6293_v55 = vmov 0  }
 0x2c3   : > { %v3100_v23 = vsel %vm511_vm4, %v3099_v59, %v3098_v41  ;;  %v2756_v0 = vmax.f32 %v2692_v7, 0.0  ;;  %2771 = vst.msk [vmem:[#allocation4] sm:$0xf] %vm2770_vm14, %v6293_v55  ;;  %v3012_v2 = vunpack.c.l.b16 %v2884_v34  ;;  %v2798_v4 = vsel %vm7805_vm3, 0, %v2797_v15 }
 0x2c4   : > { %v2693_v33 = vadd.f32 %v7976_v29, %v2553_v18  ;;  %v2889_v19 = vpack.c.bf16 %v2754_v28, %v2754_v28  ;;  %v2890_v30 = vpack.c.bf16 %v2755_v26, %v2755_v26  ;;  %2772 = vst.msk [vmem:[#allocation4 + $0x4] sm:$0x1] %vm481_vm0, %v6293_v55  ;;  %v3102_v42 = vsel %vm514_vm6, %v3101_v10, %v3100_v23 }
 0x2c5   : > { %v2891_v39 = vpack.c.bf16 %v2756_v0, %v2756_v0  ;;  %2774 = vst.msk [vmem:[#allocation4 + $0x48] sm:$0xf] %vm2770_vm14, %v6293_v55  ;;  %v2830_v58 = vsel %vm7830_vm13, 0, %v2829_v21  ;;  %v2127_v40 = vrot.slane %v1999_v12, 2  ;;  %v2128_v43 = vrot.slane %v1999_v12, 4 }
 0x2c6   : > { %v2757_v50 = vmax.f32 %v2693_v33, 0.0  ;;  %v3017_v51 = vunpack.c.l.b16 %v2889_v19  ;;  %v3018_v16 = vunpack.c.l.b16 %v2890_v30  ;;  %2775 = vst.msk [vmem:[#allocation4 + $0x4c] sm:$0x1] %vm481_vm0, %v6293_v55  ;;  %v2129_v17 = vrot.slane %v1999_v12, 6 }
 0x2c7   : > { %v3019_v27 = vunpack.c.l.b16 %v2891_v39  ;;  %2799 = vst [vmem:[#allocation4 + $0x30] sm:$0x1] %v2798_v4  ;;  %v2498_v5 = vsel %vm425_vm1, %v1999_v12, -inf  ;;  %v2505_v8 = vsel %vm425_vm1, %v2127_v40, -inf  ;;  %v2512_v13 = vsel %vm425_vm1, %v2128_v43, -inf }
 0x2c8   : > { %v2892_v14 = vpack.c.bf16 %v2757_v50, %v2757_v50  ;;  %v3111_v53 = vrot.slane %v3017_v51, 7  ;;  %v3112_v36 = vrot.slane %v3018_v16, 6  ;;  %2831 = vst [vmem:[#allocation4 + $0x34] sm:$0x1] %v2830_v58  ;;  %v2499_v44 = vrot.slane %v2498_v5, 4 }
 0x2c9   : > { %v3114_v62 = vrot.slane %v3019_v27, 5  ;;  %v2506_v35 = vrot.slane %v2505_v8, 4  ;;  %v2519_v63 = vsel %vm425_vm1, %v2129_v17, -inf  ;;  %v2513_v49 = vrot.slane %v2512_v13, 4 }
 0x2ca   : > { %v3020_v52 = vunpack.c.l.b16 %v2892_v14  ;;  %v3113_v6 = vsel %vm511_vm4, %v3112_v36, %v3111_v53  ;;  %v2500_v54 = vmax.f32 %v2498_v5, %v2499_v44  ;;  %v2520_v45 = vrot.slane %v2519_v63, 4  ;;  %v3400_v1 = vld [vmem:[#allocation4] sm:$0xe]  ;;  %v3500_v36 = vld [vmem:[#allocation4 + $0x8] sm:$0xf] }
 0x2cb   : > { %v3103_v22 = vrot.slane %v3012_v2, 4  ;;  %v2811_v32 = vld [vmem:[#allocation4 + $0x4] sm:$0x1]  ;;  %vm3433_vm0 = vcmask 1046532   ;;  %v2507_v11 = vmax.f32 %v2505_v8, %v2506_v35  ;;  %v2514_v48 = vmax.f32 %v2512_v13, %v2513_v49  ;;  %3516 = vrot.lane.b32.xlu1 %v3500_v36, %s6294_s13 }
 0x2cc   : > { %v8037_v46 = vrot.slane %v3020_v52, 4  ;;  %v2812_v31 = vsel %vm7830_vm13, 0, %v2811_v32  ;;  %v2501_v37 = vrot.slane %v2500_v54, 2  ;;  %v2521_v24 = vmax.f32 %v2519_v63, %v2520_v45  ;;  %vm8059_vm5 = vmor %vm3432_vm11, %vm3433_vm0 }
 0x2cd   : > { %v8042_v61 = vsel %vm517_vm7, %v3103_v22, %v3102_v42  ;;  %v8045_v3 = vsel %vm514_vm6, %v3114_v62, %v3113_v6  ;;  %2813 = vst [vmem:[#allocation4 + $0x4] sm:$0x1] %v2812_v31  ;;  %v2838_v25 = vld [vmem:[#allocation4 + $0x4c] sm:$0x1]  ;;  %v2508_v56 = vrot.slane %v2507_v11, 2  ;;  %v2801_v34 = vsel %vm7805_vm3, 0, %v2800_v47 }
 0x2ce   : > { %v2839_v41 = vsel %vm7830_vm13, 0, %v2838_v25  ;;  %v2502_v59 = vmax.f32 %v2500_v54, %v2501_v37  ;;  %v2515_v7 = vrot.slane %v2514_v48, 2  ;;  %v2522_v10 = vrot.slane %v2521_v24, 2  ;;  %2802 = vst [vmem:[#allocation4 + $0x38] sm:$0x1] %v2801_v34 }
 0x2cf   : > { %2840 = vst [vmem:[#allocation4 + $0x4c] sm:$0x1] %v2839_v41  ;;  %v5869_v18 = vrot.slane %v3400_v1, 9  ;;  %v2509_v28 = vmax.f32 %v2507_v11, %v2508_v56  ;;  %v2833_v26 = vsel %vm7830_vm13, 0, %v2832_v9  ;;  %v2133_v15 = vrot.slane %v2031_v57, 2 }
 0x2d0   : > { %v2503_v23 = vrot.slane %v2502_v59, 1  ;;  %v2516_v0 = vmax.f32 %v2514_v48, %v2515_v7  ;;  %v2523_v21 = vmax.f32 %v2521_v24, %v2522_v10  ;;  %v2134_v33 = vrot.slane %v2031_v57, 4  ;;  %2834 = vst [vmem:[#allocation4 + $0x3c] sm:$0x1] %v2833_v26  ;;  %v2779_v10 = vld [vmem:[#allocation4] sm:$0x1] }
 0x2d1   : > { %v2510_v19 = vrot.slane %v2509_v28, 1  ;;  %v2135_v12 = vrot.slane %v2031_v57, 6  ;;  %v2554_v2 = vsel %vm425_vm1, %v2031_v57, -inf  ;;  %v2561_v30 = vsel %vm425_vm1, %v2133_v15, -inf }
 0x2d2   : > { %v2504_v39 = vmax.f32 %v2502_v59, %v2503_v23  ;;  %v2517_v4 = vrot.slane %v2516_v0, 1  ;;  %v2524_v42 = vrot.slane %v2523_v21, 1  ;;  %v2555_v50 = vrot.slane %v2554_v2, 4 }
 0x2d3   : > { %v2511_v51 = vmax.f32 %v2509_v28, %v2510_v19  ;;  %v2562_v58 = vrot.slane %v2561_v30, 4  ;;  %v2568_v16 = vsel %vm425_vm1, %v2134_v33, -inf  ;;  %v2575_v27 = vsel %vm425_vm1, %v2135_v12, -inf  ;;  %v3205_v28 = vld [vmem:[#allocation4 + $0x34] sm:$0x1] }
 0x2d4   : > { %v3401_v40 = vld [vmem:[#allocation4 + $0x4] sm:$0x1]  ;;  %v2518_v14 = vmax.f32 %v2516_v0, %v2517_v4  ;;  %v2525_v53 = vmax.f32 %v2523_v21, %v2524_v42  ;;  %v2686_v17 = vadd.f32 %v7976_v29, %v2504_v39  ;;  %v2556_v5 = vmax.f32 %v2554_v2, %v2555_v50  ;;  %v3501_v21 = vld [vmem:[#allocation4 + $0x10] sm:$0xf] }
 0x2d5   : > { %v3437_v62 = vrot.slane %v3401_v40, 5  ;;  %v2687_v44 = vadd.f32 %v7976_v29, %v2511_v51  ;;  %v2563_v8 = vmax.f32 %v2561_v30, %v2562_v58  ;;  %v2569_v52 = vrot.slane %v2568_v16, 4  ;;  %v3502_v30 = vld [vmem:[#allocation4 + $0x18] sm:$0xf]  ;;  %3518 = vrot.lane.b32.xlu1 %v3501_v21, %s6294_s13  ;;  %v3202_v40 = vld [vmem:[#allocation4 + $0x30] sm:$0xf] }
 0x2d6   : > { %v2688_v35 = vadd.f32 %v7976_v29, %v2518_v14  ;;  %v2689_v13 = vadd.f32 %v7976_v29, %v2525_v53  ;;  %v2750_v63 = vmax.f32 %v2686_v17, 0.0  ;;  %v2557_v6 = vrot.slane %v2556_v5, 2 }
 0x2d7   : > { %v3438_v54 = vsel %vm8059_vm5, %v5869_v18, %v3437_v62  ;;  %v2751_v49 = vmax.f32 %v2687_v44, 0.0  ;;  %v2564_v45 = vrot.slane %v2563_v8, 2  ;;  %v2570_v47 = vmax.f32 %v2568_v16, %v2569_v52  ;;  %v6094_v18 = vld [vmem:[%s9199_s24 + $0x40] sm:$0xff]  ;;  %v4018_v52 = vld [vmem:[#allocation4 + $0x10] sm:$0xe] }
 0x2d8   : > { %3467 = vrot.lane.b32.xlu2 %v3438_v54, %s6295_s15  ;;  %v2752_v22 = vmax.f32 %v2688_v35, 0.0  ;;  %v2753_v32 = vmax.f32 %v2689_v13, 0.0  ;;  %v2885_v11 = vpack.c.bf16 %v2750_v63, %v2750_v63  ;;  %v2558_v31 = vmax.f32 %v2556_v5, %v2557_v6  ;;  %4262 = vmatpush.bf16.msra.mxu1 %v6094_v18  ;;  %v4019_v5 = vld [vmem:[#allocation4 + $0x14] sm:$0x1]  ;;  %v4020_v13 = vld [vmem:[#allocation4 + $0x18] sm:$0xe] }
 0x2d9   : > { %v2886_v1 = vpack.c.bf16 %v2751_v49, %v2751_v49  ;;  %v2565_v37 = vmax.f32 %v2563_v8, %v2564_v45  ;;  %v2571_v48 = vrot.slane %v2570_v47, 2  ;;  %v2576_v24 = vrot.slane %v2575_v27, 4  ;;  %v4021_v45 = vld [vmem:[#allocation4 + $0x1c] sm:$0x1] }
 0x2da   : > { %v2887_v9 = vpack.c.bf16 %v2752_v22, %v2752_v22  ;;  %v2888_v57 = vpack.c.bf16 %v2753_v32, %v2753_v32  ;;  %v3013_v25 = vunpack.c.l.b16 %v2885_v11  ;;  %v2559_v56 = vrot.slane %v2558_v31, 1 }
 0x2db   : > { %v3014_v34 = vunpack.c.l.b16 %v2886_v1  ;;  %v2566_v41 = vrot.slane %v2565_v37, 1  ;;  %v2572_v59 = vmax.f32 %v2570_v47, %v2571_v48  ;;  %v2577_v7 = vmax.f32 %v2575_v27, %v2576_v24  ;;  %v3237_v24 = vld [vmem:[#allocation4 + $0x4] sm:$0x1] }
 0x2dc   : > { %v3015_v26 = vunpack.c.l.b16 %v2887_v9  ;;  %v3016_v15 = vunpack.c.l.b16 %v2888_v57  ;;  %v3105_v23 = vrot.slane %v3013_v25, 3  ;;  %v2560_v0 = vmax.f32 %v2558_v31, %v2559_v56  ;;  %v3809_v31 = vld [vmem:[#allocation4 + $0x18] sm:$0xf]  ;;  %v3810_v57 = vld [vmem:[#allocation4 + $0x20] sm:$0xf] }
 0x2dd   : > { %v3107_v33 = vrot.slane %v3014_v34, 2  ;;  %v2567_v19 = vmax.f32 %v2565_v37, %v2566_v41  ;;  %v2573_v12 = vrot.slane %v2572_v59, 1  ;;  %v2578_v2 = vrot.slane %v2577_v7, 2  ;;  %3826 = vrot.lane.b32.xlu1 %v3809_v31, %s6296_s25  ;;  %v4023_v25 = vld [vmem:[#allocation4 + $0x24] sm:$0x1] }
 0x2de   : > { %v3106_v39 = vsel %vm520_vm8, %v3105_v23, %v8042_v61  ;;  %v3109_v4 = vrot.slane %v3015_v26, 1  ;;  %v3148_v42 = vpack.c.b16 %v3016_v15, %v3016_v15  ;;  %v2694_v50 = vadd.f32 %v7976_v29, %v2560_v0  ;;  %v4024_v34 = vld [vmem:[#allocation4 + $0x28] sm:$0xe] }
 0x2df   : > { %v3108_v51 = vsel %vm9091_vm9, %v3107_v33, %v3106_v39  ;;  %v2574_v58 = vmax.f32 %v2572_v59, %v2573_v12  ;;  %v2579_v16 = vmax.f32 %v2577_v7, %v2578_v2  ;;  %v2695_v27 = vadd.f32 %v7976_v29, %v2567_v19  ;;  %v3710_v31 = vld [vmem:[#allocation4 + $0x8] sm:$0xe] }
 0x2e0   : > { %v3110_v14 = vsel %vm526_vm10, %v3109_v4, %v3108_v51  ;;  %v3206_v53 = vsel %vm7805_vm3, %v3148_v42, %v3205_v28  ;;  %v2758_v17 = vmax.f32 %v2694_v50, 0.0  ;;  %v2780_v61 = vsel %vm7805_vm3, 0, %v2779_v10  ;;  %3520 = vrot.lane.b32.xlu2 %v3502_v30, %s6294_s13  ;;  %v4022_v28 = vld [vmem:[#allocation4 + $0x20] sm:$0xe]  ;;  %v3208_v4 = vld [vmem:[#allocation4 + $0x38] sm:$0xf] }
 0x2e1   : > { %v3147_v36 = vpack.c.b16 %v3110_v14, %v3110_v14  ;;  %3207 = vst [vmem:[#allocation4 + $0x34] sm:$0x1] %v3206_v53  ;;  %v2580_v62 = vrot.slane %v2579_v16, 1  ;;  %v2696_v44 = vadd.f32 %v7976_v29, %v2574_v58  ;;  %v2759_v8 = vmax.f32 %v2695_v27, 0.0  ;;  %v3211_v42 = vld [vmem:[#allocation4 + $0x3c] sm:$0x1] }
 0x2e2   : > { %v2893_v35 = vpack.c.bf16 %v2758_v17, %v2758_v17  ;;  %2781 = vst [vmem:[#allocation4] sm:$0x1] %v2780_v61  ;;  %v3117_v47 = vsel %vm517_vm7, %v8037_v46, %v8045_v3  ;;  %v5885_v32 = vrot.slane %v4018_v52, 9  ;;  %v4052_v11 = vrot.slane %v4019_v5, 5  ;;  %v3504_v14 = vld [vmem:[#allocation4 + $0x28] sm:$0xf] }
 0x2e3   : > { %v3203_v63 = vsel %vm7875_vm15, %v3147_v36, %v3202_v40  ;;  %v2581_v6 = vmax.f32 %v2579_v16, %v2580_v62  ;;  %v2760_v54 = vmax.f32 %v2696_v44, 0.0  ;;  %v2894_v49 = vpack.c.bf16 %v2759_v8, %v2759_v8  ;;  %v6092_v52 = vld [vmem:[%s9199_s24 + $0x30] sm:$0xff] }
 0x2e4   : > { %3204 = vst [vmem:[#allocation4 + $0x30] sm:$0xf] %v3203_v63  ;;  %v3021_v22 = vunpack.c.l.b16 %v2893_v35  ;;  %v5886_v9 = vrot.slane %v4020_v13, 9  ;;  %vm3252_vm11 = vsmask.f32 3328  ;;  %v4053_v46 = vsel %vm8059_vm5, %v5885_v32, %v4052_v11 }
 0x2e5   : > { %v2697_v1 = vadd.f32 %v7976_v29, %v2581_v6  ;;  %v2895_v37 = vpack.c.bf16 %v2760_v54, %v2760_v54  ;;  %v3022_v48 = vunpack.c.l.b16 %v2894_v49  ;;  %v4056_v3 = vrot.slane %v4021_v45, 5  ;;  %4090 = vst.msk [vmem:[#allocation5 + $0x4] sm:$0xf] %vm2770_vm14, %v4053_v46  ;;  %v4025_v29 = vld [vmem:[#allocation4 + $0x2c] sm:$0x1]  ;;  %3524 = vrot.lane.b32.xlu1 %v3504_v14, %s6294_s13 }
 0x2e6   : > { %v3118_v56 = vrot.slane %v3021_v22, 3  ;;  %v4060_v26 = vrot.slane %v4023_v25, 5  ;;  %v5888_v15 = vrot.slane %v4024_v34, 9  ;;  %v5887_v19 = vrot.slane %v4022_v28, 9  ;;  %v3405_v6 = vld [vmem:[#allocation4 + $0x14] sm:$0x1] }
 0x2e7   : > { %v2761_v41 = vmax.f32 %v2697_v1, 0.0  ;;  %v3023_v59 = vunpack.c.l.b16 %v2895_v37  ;;  %v3120_v7 = vrot.slane %v3022_v48, 2  ;;  %v4057_v18 = vsel %vm8059_vm5, %v5886_v9, %v4056_v3  ;;  %v3402_v54 = vld [vmem:[#allocation4 + $0x8] sm:$0xe]  ;;  %v3403_v49 = vld [vmem:[#allocation4 + $0xc] sm:$0x1] }
 0x2e8   : > { %v3119_v10 = vsel %vm520_vm8, %v3118_v56, %v3117_v47  ;;  %3828 = vrot.lane.b32.xlu2 %v3810_v57, %s6296_s25  ;;  %4091 = vst.msk [vmem:[#allocation5 + $0xc] sm:$0xf] %vm2770_vm14, %v4057_v18  ;;  %v3265_v30 = vshll.u32 %v3237_v24, 16  ;;  %v4064_v39 = vrot.slane %v4025_v29, 5  ;;  %vm3253_vm0 = vsmask.f32 7440 }
 0x2e9   : > { %v2896_v23 = vpack.c.bf16 %v2761_v41, %v2761_v41  ;;  %v3121_v0 = vsel %vm9091_vm9, %v3120_v7, %v3119_v10  ;;  %v3122_v21 = vrot.slane %v3023_v59, 1  ;;  %v3236_v33 = vld [vmem:[#allocation4] sm:$0xf]  ;;  %v4061_v58 = vsel %vm8059_vm5, %v5887_v19, %v4060_v26  ;;  %vm8117_vm2 = vmor %vm3252_vm11, %vm3253_vm0  ;;  %v3404_v22 = vld [vmem:[#allocation4 + $0x10] sm:$0xe] }
 0x2ea   : > { %v3256_v12 = vshrl.u32 %v3236_v33, 16  ;;  %v3259_v2 = vshll.u32 %v3236_v33, 16  ;;  %v4065_v53 = vsel %vm8059_vm5, %v5888_v15, %v4064_v39  ;;  %4092 = vst.msk [vmem:[#allocation5 + $0x14] sm:$0xf] %vm2770_vm14, %v4061_v58  ;;  %v3267_v62 = vrot.slane %v3265_v30, 5 }
 0x2eb   : > { %v3024_v50 = vunpack.c.l.b16 %v2896_v23  ;;  %v3123_v51 = vsel %vm526_vm10, %v3122_v21, %v3121_v0  ;;  %4093 = vst.msk [vmem:[#allocation5 + $0x1c] sm:$0xf] %vm2770_vm14, %v4065_v53  ;;  %v3505_v61 = vld [vmem:[#allocation4 + $0x30] sm:$0xf]  ;;  %v8124_v32 = vld [vmem:[#allocation4 + $0x18] sm:$0xe] }
 0x2ec   : > { %v3149_v16 = vpack.c.b16 %v3123_v51, %v3123_v51  ;;  %v3258_v27 = vrot.slane %v3256_v12, 4  ;;  %v3261_v40 = vrot.slane %v3259_v2, 5  ;;  %v6078_v44 = vld [vmem:[#allocation5 + $0x4] sm:$0xf]  ;;  %v3812_v47 = vld [vmem:[#allocation4 + $0x30] sm:$0xf] }
 0x2ed   : > { %v3150_v17 = vpack.c.b16 %v3024_v50, %v3024_v50  ;;  %v3715_v11 = vld [vmem:[#allocation4 + $0x1c] sm:$0x1]  ;;  %v3711_v1 = vld [vmem:[#allocation4 + $0xc] sm:$0x1]  ;;  %v4027_v37 = vld [vmem:[#allocation4 + $0x34] sm:$0x1]  ;;  %3832 = vrot.lane.b32.xlu1 %v3812_v47, %s6296_s25 }
 0x2ee   : > { %v3209_v5 = vsel %vm7875_vm15, %v3149_v16, %v3208_v4  ;;  %v3262_v36 = vor.u32 %v3261_v40, %v3258_v27  ;;  %v3551_v48 = vld [vmem:[#allocation4 + $0x10] sm:$0xf]  ;;  %v3238_v24 = vld [vmem:[#allocation4 + $0x8] sm:$0xf]  ;;  %v5871_v9 = vrot.slane %v3404_v22, 9  ;;  %v3445_v57 = vrot.slane %v3405_v6, 5 }
 0x2ef   : > { %3210 = vst [vmem:[#allocation4 + $0x38] sm:$0xf] %v3209_v5  ;;  %v3212_v8 = vsel %vm7805_vm3, %v3150_v17, %v3211_v42  ;;  %v5897_v13 = vld [vmem:[#allocation5 + $0x8] sm:$0xf0]  ;;  %v5870_v25 = vrot.slane %v3402_v54, 9  ;;  %v3441_v56 = vrot.slane %v3403_v49, 5 }
 0x2f0   : > { %3213 = vst [vmem:[#allocation4 + $0x3c] sm:$0x1] %v3212_v8  ;;  %v3263_v35 = vrot.slane %v3262_v36, 4  ;;  %3526 = vrot.lane.b32.xlu2 %v3505_v61, %s6294_s13  ;;  %v5900_v63 = vor.u32 %v6078_v44, %v5897_v13  ;;  %v8129_v46 = vld [vmem:[#allocation4 + $0x10] sm:$0xe]  ;;  %v5879_v41 = vrot.slane %v8124_v32, 9 }
 0x2f1   : > { %v8131_v3 = vld [vmem:[#allocation4 + $0x14] sm:$0x1]  ;;  %v3808_v34 = vld [vmem:[#allocation4 + $0x10] sm:$0xf]  ;;  %v3752_v59 = vrot.slane %v3715_v11, 5  ;;  %v5877_v7 = vrot.slane %v3710_v31, 9  ;;  %v3442_v13 = vsel %vm8059_vm5, %v5870_v25, %v3441_v56 }
 0x2f2   : > { %v3268_v45 = vsel %vm8117_vm2, %v3263_v35, %v3267_v62  ;;  %5961 = vmatmul.msk.bf16.vlgmr.msra.gmra.mxu1 %vm545_vm12, %v5900_v63  ;;  %v3744_v29 = vrot.slane %v3711_v1, 5  ;;  %v3410_v10 = vld [vmem:[#allocation4 + $0x28] sm:$0xe]  ;;  %v8134_v18 = vld [vmem:[#allocation4 + $0x18] sm:$0xe]  ;;  %v4068_v26 = vrot.slane %v4027_v37, 5  ;;  %v8157_v35 = vsel %vm8059_vm5, %v5871_v9, %v3445_v57 }
 0x2f3   : > { %3367 = vrot.lane.b32.xlu0 %v3268_v45, %s6297_s29  ;;  %v8136_v28 = vld [vmem:[#allocation4 + $0x1c] sm:$0x1]  ;;  %v3411_v15 = vld [vmem:[#allocation4 + $0x2c] sm:$0x1]  ;;  %v3580_v23 = vshrl.u32 %v3551_v48, 16  ;;  %v3583_v0 = vshll.u32 %v3551_v48, 16  ;;  %v8168_v45 = vsel %vm8059_vm5, %v5879_v41, %v3752_v59 }
 0x2f4   : > { %v3270_v21 = vshrl.u32 %v3238_v24, 16  ;;  %v4026_v33 = vld [vmem:[#allocation4 + $0x30] sm:$0xe]  ;;  %v8138_v4 = vld [vmem:[#allocation4 + $0x20] sm:$0xe]  ;;  %v3273_v50 = vshll.u32 %v3238_v24, 16  ;;  %v3745_v47 = vsel %vm8059_vm5, %v5877_v7, %v3744_v29 }
 0x2f5   : > { %v5889_v2 = vrot.slane %v4026_v33, 9  ;;  %v8140_v42 = vld [vmem:[#allocation4 + $0x24] sm:$0x1]  ;;  %v5874_v51 = vrot.slane %v3410_v10, 9  ;;  %v3457_v58 = vrot.slane %v3411_v15, 5  ;;  %v5878_v16 = vrot.slane %v8129_v46, 9  ;;  %3469 = vrot.lane.b32.xlu1 %v3442_v13, %s6295_s15 }
 0x2f6   : > { %v4028_v19 = vld [vmem:[#allocation4 + $0x38] sm:$0xe]  ;;  %v3748_v27 = vrot.slane %v8131_v3, 5  ;;  %v8144_v40 = vld [vmem:[#allocation4 + $0x20] sm:$0xe]  ;;  %v5872_v5 = vrot.slane %v8134_v18, 9 }
 0x2f7   : > { %v4029_v12 = vld [vmem:[#allocation4 + $0x3c] sm:$0x1]  ;;  %v5890_v30 = vrot.slane %v4028_v19, 9  ;;  %v3552_v14 = vld [vmem:[#allocation4 + $0x14] sm:$0x1]  ;;  %v4069_v17 = vsel %vm8059_vm5, %v5889_v2, %v4068_v26  ;;  %v3449_v36 = vrot.slane %v8136_v28, 5  ;;  %v8181_v56 = vsel %vm8059_vm5, %v5874_v51, %v3457_v58 }
 0x2f8   : > { %v4072_v39 = vrot.slane %v4029_v12, 5  ;;  %v3813_v53 = vld [vmem:[#allocation4 + $0x38] sm:$0xf]  ;;  %v8153_v62 = vld [vmem:[#allocation4 + $0x24] sm:$0x1]  ;;  %v3582_v63 = vrot.slane %v3580_v23, 4  ;;  %v3749_v46 = vsel %vm8059_vm5, %v5878_v16, %v3748_v27 }
 0x2f9   : > { %v3549_v44 = vld [vmem:[#allocation4 + $0x8] sm:$0xf]  ;;  %v6080_v8 = vld [vmem:[#allocation5 + $0x14] sm:$0xf]  ;;  %3834 = vrot.lane.b32.xlu2 %v3813_v53, %s6296_s25  ;;  %4094 = vst.msk [vmem:[#allocation5 + $0x24] sm:$0xf] %vm2770_vm14, %v4069_v17 }
 0x2fa   : > { %v4073_v61 = vsel %vm8059_vm5, %v5890_v30, %v4072_v39  ;;  %v3585_v6 = vrot.slane %v3583_v0, 5  ;;  %v8163_v54 = vld [vmem:[#allocation4 + $0x28] sm:$0xe]  ;;  %v3239_v49 = vld [vmem:[#allocation4 + $0xc] sm:$0x1]  ;;  %v3272_v11 = vrot.slane %v3270_v21, 4 }
 0x2fb   : > { %3824 = vrot.lane.b32.xlu0 %v3808_v34, %s6296_s25  ;;  %4095 = vst.msk [vmem:[#allocation5 + $0x2c] sm:$0xf] %vm2770_vm14, %v4073_v61  ;;  %v8173_v22 = vld [vmem:[#allocation4 + $0x34] sm:$0x1]  ;;  %v8175_v32 = vld [vmem:[#allocation4 + $0x2c] sm:$0x1] }
 0x2fc   : > { %v3275_v31 = vrot.slane %v3273_v50, 5  ;;  %v3503_v1 = vld [vmem:[#allocation4 + $0x20] sm:$0xf]  ;;  %v5873_v37 = vrot.slane %v8138_v4, 9  ;;  %v3453_v48 = vrot.slane %v8140_v42, 5  ;;  %v3566_v9 = vshrl.u32 %v3549_v44, 16 }
 0x2fd   : > { %v3859_v24 = vld [vmem:[#allocation4 + $0x18] sm:$0xf]  ;;  %v3569_v57 = vshll.u32 %v3549_v44, 16  ;;  %v5905_v25 = vld [vmem:[#allocation5 + $0x18] sm:$0xf0]  ;;  %v5880_v3 = vrot.slane %v8144_v40, 9  ;;  %v3586_v26 = vor.u32 %v3585_v6, %v3582_v63  ;;  %3774 = vrot.lane.b32.xlu1 %v3745_v47, %s6298_s12  ;;  %v3450_v47 = vsel %vm8059_vm5, %v5872_v5, %v3449_v36 }
 0x2fe   : > { %v3589_v34 = vshll.u32 %v3552_v14, 16  ;;  %v3240_v41 = vld [vmem:[#allocation4 + $0x10] sm:$0xf]  ;;  %v5908_v59 = vor.u32 %v6080_v8, %v5905_v25  ;;  %v3764_v29 = vrot.slane %v8173_v22, 5  ;;  %v3756_v10 = vrot.slane %v8153_v62, 5 }
 0x2ff   : > { %v3720_v7 = vld [vmem:[#allocation4 + $0x30] sm:$0xe]  ;;  %v3860_v15 = vld [vmem:[#allocation4 + $0x1c] sm:$0x1]  ;;  %v5881_v23 = vrot.slane %v8163_v54, 9  ;;  %v3276_v0 = vor.u32 %v3275_v31, %v3272_v11  ;;  %v3279_v21 = vshll.u32 %v3239_v49, 16  ;;  %v3454_v22 = vsel %vm8059_vm5, %v5873_v37, %v3453_v48 }
 0x300   : > { %v3888_v33 = vshrl.u32 %v3859_v24, 16  ;;  %v3857_v19 = vld [vmem:[#allocation4 + $0x10] sm:$0xf]  ;;  %v3760_v12 = vrot.slane %v8175_v32, 5  ;;  %v3568_v2 = vrot.slane %v3566_v9, 4  ;;  %v3571_v30 = vrot.slane %v3569_v57, 5 }
 0x301   : > { %v3284_v39 = vshrl.u32 %v3240_v41, 16  ;;  %v5882_v4 = vrot.slane %v3720_v7, 9  ;;  %v8192_v42 = vrot.slane %v3589_v34, 5  ;;  %v3891_v50 = vshll.u32 %v3859_v24, 16  ;;  %v3550_v51 = vld [vmem:[#allocation4 + $0xc] sm:$0x1]  ;;  %3776 = vrot.lane.b32.xlu2 %v3749_v46, %s6298_s12 }
 0x302   : > { %5962 = vmatmul.msk.bf16.gmra.mxu1 %vm545_vm12, %v5908_v59  ;;  %v3287_v58 = vshll.u32 %v3240_v41, 16  ;;  %v8195_v16 = vrot.slane %v3586_v26, 4  ;;  %v3897_v27 = vshll.u32 %v3860_v15, 16  ;;  %v3874_v14 = vshrl.u32 %v3857_v19, 16  ;;  %v3241_v62 = vld [vmem:[#allocation4 + $0x14] sm:$0x1] }
 0x303   : > { %3522 = vrot.lane.b32.xlu0 %v3503_v1, %s6294_s13  ;;  %v3286_v40 = vrot.slane %v3284_v39, 4  ;;  %v8198_v53 = vrot.slane %v3276_v0, 4  ;;  %v8200_v17 = vrot.slane %v3279_v21, 5  ;;  %v8202_v61 = vrot.slane %v3888_v33, 4  ;;  %v3553_v54 = vld [vmem:[#allocation4 + $0x18] sm:$0xf] }
 0x304   : > { %v3289_v44 = vrot.slane %v3287_v58, 5  ;;  %v3572_v8 = vor.u32 %v3571_v30, %v3568_v2  ;;  %v3575_v13 = vshll.u32 %v3550_v51, 16  ;;  %v3876_v63 = vrot.slane %v3874_v14, 4  ;;  %v8204_v49 = vld [vmem:[#allocation5 + $0x24] sm:$0xf] }
 0x305   : > { %v3877_v6 = vshll.u32 %v3857_v19, 16  ;;  %v8216_v32 = vsel %vm8059_vm5, %v5880_v3, %v3756_v10  ;;  %v3858_v31 = vld [vmem:[#allocation4 + $0x14] sm:$0x1]  ;;  %v3223_v1 = vld [vmem:[#allocation4 + $0x18] sm:$0xf]  ;;  %v8220_v9 = vsel %vm8059_vm5, %v5882_v4, %v3764_v29  ;;  %v3761_v18 = vsel %vm8059_vm5, %v5881_v23, %v3760_v12  ;;  %v2062_v29 = vpop.trf.xlu2  ;;  %3473 = vrot.lane.b32.xlu1 %v3450_v47, %s6295_s15 }
 0x306   : > { %v3290_v11 = vor.u32 %v3289_v44, %v3286_v40  ;;  %v5913_v24 = vld [vmem:[#allocation5 + $0x28] sm:$0xf0]  ;;  %v8224_v28 = vrot.slane %v3891_v50, 5  ;;  %3231 = vst.msk [vmem:[#allocation5 + $0x18] sm:$0xf] %vm2770_vm14, %v3223_v1  ;;  %v3592_v36 = vsel %vm8117_vm2, %v8195_v16, %v8192_v42  ;;  %v8231_v37 = vrot.slane %v3897_v27, 5 }
 0x307   : > { %v3879_v5 = vrot.slane %v3877_v6, 5  ;;  %v3293_v48 = vshll.u32 %v3241_v62, 16  ;;  %v3594_v57 = vshrl.u32 %v3553_v54, 16  ;;  %v3811_v25 = vld [vmem:[#allocation4 + $0x28] sm:$0xf]  ;;  %v3282_v46 = vsel %vm8117_vm2, %v8198_v53, %v8200_v17 }
 0x308   : > { %v8237_v3 = vrot.slane %v3572_v8, 4  ;;  %v8239_v34 = vrot.slane %v3575_v13, 5  ;;  %v3221_v59 = vld [vmem:[#allocation4 + $0x8] sm:$0xf]  ;;  %v5916_v7 = vor.u32 %v8204_v49, %v5913_v24  ;;  %v8243_v10 = vrot.slane %v3290_v11, 4 }
 0x309   : > { %v3880_v41 = vor.u32 %v3879_v5, %v3876_v63  ;;  %v3883_v26 = vshll.u32 %v3858_v31, 16  ;;  %v8245_v15 = vld [vmem:[#allocation4 + $0x1c] sm:$0x1]  ;;  %v3597_v23 = vshll.u32 %v3553_v54, 16  ;;  %3229 = vst.msk [vmem:[#allocation5 + $0x8] sm:$0xf] %vm2770_vm14, %v3221_v59  ;;  %3475 = vrot.lane.b32.xlu2 %v3454_v22, %s6295_s15 }
 0x30a   : > { %v2136_v0 = vrot.slane %v2062_v29, 2  ;;  %v2137_v21 = vrot.slane %v2062_v29, 4  ;;  %v2138_v33 = vrot.slane %v2062_v29, 6  ;;  %v2582_v19 = vsel %vm425_vm1, %v2062_v29, -inf  ;;  %v3222_v12 = vld [vmem:[#allocation4 + $0x10] sm:$0xf] }
 0x30b   : > { %3830 = vrot.lane.b32.xlu0 %v3811_v25, %s6296_s25  ;;  %v2583_v2 = vrot.slane %v2582_v19, 4  ;;  %v8251_v30 = vrot.slane %v3293_v48, 5  ;;  %v8253_v39 = vrot.slane %v3880_v41, 4  ;;  %v8255_v4 = vrot.slane %v3594_v57, 4  ;;  %3230 = vst.msk [vmem:[#allocation5 + $0x10] sm:$0xf] %vm2770_vm14, %v3222_v12 }
 0x30c   : > { %v2589_v50 = vsel %vm425_vm1, %v2136_v0, -inf  ;;  %v2596_v51 = vsel %vm425_vm1, %v2137_v21, -inf  ;;  %v2603_v58 = vsel %vm425_vm1, %v2138_v33, -inf  ;;  %v8261_v27 = vrot.slane %v3597_v23, 5  ;;  %v8263_v8 = vld [vmem:[#allocation4 + $0x18] sm:$0xf] }
 0x30d   : > { %v2584_v40 = vmax.f32 %v2582_v19, %v2583_v2  ;;  %v2590_v14 = vrot.slane %v2589_v50, 4  ;;  %v2597_v62 = vrot.slane %v2596_v51, 4  ;;  %v2604_v44 = vrot.slane %v2603_v58, 4  ;;  %v2803_v59 = vld [vmem:[#allocation4 + $0x40] sm:$0x1]  ;;  %v2063_v29 = vpop.trf.xlu2  ;;  %3780 = vrot.lane.b32.xlu1 %v8216_v32, %s6298_s12 }
 0x30e   : > { %v3578_v13 = vsel %vm8117_vm2, %v8237_v3, %v8239_v34  ;;  %v3296_v63 = vsel %vm8117_vm2, %v8243_v10, %v8251_v30  ;;  %v8273_v6 = vrot.slane %v3883_v26, 5  ;;  %v3603_v54 = vshll.u32 %v8245_v15, 16  ;;  %v2835_v23 = vld [vmem:[#allocation4 + $0x44] sm:$0x1] }
 0x30f   : > { %v2585_v49 = vrot.slane %v2584_v40, 2  ;;  %v2591_v47 = vmax.f32 %v2589_v50, %v2590_v14  ;;  %v2598_v22 = vmax.f32 %v2596_v51, %v2597_v62  ;;  %v2605_v11 = vmax.f32 %v2603_v58, %v2604_v44 }
 0x310   : > { %v3886_v31 = vsel %vm8117_vm2, %v8253_v39, %v8273_v6  ;;  %v3600_v1 = vor.u32 %v8261_v27, %v8255_v4  ;;  %v3298_v24 = vshrl.u32 %v8263_v8, 16  ;;  %v3301_v5 = vshll.u32 %v8263_v8, 16  ;;  %v3861_v6 = vld [vmem:[#allocation4 + $0x20] sm:$0xf] }
 0x311   : > { %v2586_v48 = vmax.f32 %v2584_v40, %v2585_v49  ;;  %v2592_v57 = vrot.slane %v2591_v47, 2  ;;  %v2599_v25 = vrot.slane %v2598_v22, 2  ;;  %v2606_v41 = vrot.slane %v2605_v11, 2  ;;  %3782 = vrot.lane.b32.xlu2 %v3761_v18, %s6298_s12 }
 0x312   : > { %5963 = vmatmul.msk.bf16.gmra.mxu1 %vm545_vm12, %v5916_v7  ;;  %v2804_v26 = vsel %vm7805_vm3, 0, %v2803_v59  ;;  %v2139_v0 = vrot.slane %v2063_v29, 2  ;;  %v2140_v21 = vrot.slane %v2063_v29, 4  ;;  %v2141_v33 = vrot.slane %v2063_v29, 6 }
 0x313   : > { %3471 = vrot.lane.b32.xlu0 %v8157_v35, %s6295_s15  ;;  %v2587_v19 = vrot.slane %v2586_v48, 1  ;;  %v2593_v12 = vmax.f32 %v2591_v47, %v2592_v57  ;;  %v2600_v35 = vmax.f32 %v2598_v22, %v2599_v25  ;;  %v2607_v2 = vmax.f32 %v2605_v11, %v2606_v41  ;;  %2805 = vst [vmem:[#allocation4 + $0x40] sm:$0x1] %v2804_v26  ;;  %v8301_v57 = vld [vmem:[%s9192_s9] ss:$0 sm:$0xff] }
 0x314   : > { %v2836_v7 = vsel %vm7830_vm13, 0, %v2835_v23  ;;  %v2610_v18 = vsel %vm425_vm1, %v2063_v29, -inf  ;;  %v2617_v50 = vsel %vm425_vm1, %v2139_v0, -inf  ;;  %v2624_v51 = vsel %vm425_vm1, %v2140_v21, -inf  ;;  %v3224_v26 = vld [vmem:[#allocation4 + $0x20] sm:$0xf] }
 0x315   : > { %v2588_v58 = vmax.f32 %v2586_v48, %v2587_v19  ;;  %v2594_v40 = vrot.slane %v2593_v12, 1  ;;  %v2601_v14 = vrot.slane %v2600_v35, 1  ;;  %v2608_v62 = vrot.slane %v2607_v2, 1  ;;  %2837 = vst [vmem:[#allocation4 + $0x44] sm:$0x1] %v2836_v7  ;;  %3369 = vrot.lane.b32.xlu1 %v3282_v46, %s6297_s29 }
 0x316   : > { %v2611_v44 = vrot.slane %v2610_v18, 4  ;;  %v2618_v49 = vrot.slane %v2617_v50, 4  ;;  %v2625_v47 = vrot.slane %v2624_v51, 4  ;;  %v2631_v32 = vsel %vm425_vm1, %v2141_v33, -inf  ;;  %3232 = vst.msk [vmem:[#allocation5 + $0x20] sm:$0xf] %vm2770_vm14, %v3224_v26 }
 0x317   : > { %v2595_v22 = vmax.f32 %v2593_v12, %v2594_v40  ;;  %v2602_v11 = vmax.f32 %v2600_v35, %v2601_v14  ;;  %v2609_v20 = vmax.f32 %v2607_v2, %v2608_v62  ;;  %v2698_v25 = vadd.f32 %v8301_v57, %v2588_v58  ;;  %v3225_v19 = vld [vmem:[#allocation4 + $0x28] sm:$0xf] }
 0x318   : > { %v2612_v48 = vmax.f32 %v2610_v18, %v2611_v44  ;;  %v2619_v41 = vmax.f32 %v2617_v50, %v2618_v49  ;;  %v2626_v59 = vmax.f32 %v2624_v51, %v2625_v47  ;;  %v2632_v29 = vrot.slane %v2631_v32, 4  ;;  %3233 = vst.msk [vmem:[#allocation5 + $0x28] sm:$0xf] %vm2770_vm14, %v3225_v19 }
 0x319   : > { %v2699_v23 = vadd.f32 %v8301_v57, %v2595_v22  ;;  %v2700_v0 = vadd.f32 %v8301_v57, %v2602_v11  ;;  %v2701_v21 = vadd.f32 %v8301_v57, %v2609_v20  ;;  %v2762_v33 = vmax.f32 %v2698_v25, 0.0  ;;  %3677 = vrot.lane.b32.xlu2 %v3578_v13, %s6299_s4  ;;  %v3243_v11 = vld [vmem:[#allocation4 + $0x1c] sm:$0x1] }
 0x31a   : > { %v2613_v12 = vrot.slane %v2612_v48, 2  ;;  %v2620_v35 = vrot.slane %v2619_v41, 2  ;;  %v2627_v2 = vrot.slane %v2626_v59, 2  ;;  %v2633_v7 = vmax.f32 %v2631_v32, %v2632_v29 }
 0x31b   : > { %3778 = vrot.lane.b32.xlu0 %v8168_v45, %s6298_s12  ;;  %v2763_v45 = vmax.f32 %v2699_v23, 0.0  ;;  %v2764_v18 = vmax.f32 %v2700_v0, 0.0  ;;  %v2765_v50 = vmax.f32 %v2701_v21, 0.0  ;;  %v2897_v51 = vpack.c.bf16 %v2762_v33, %v2762_v33 }
 0x31c   : > { %v2614_v58 = vmax.f32 %v2612_v48, %v2613_v12  ;;  %v2621_v40 = vmax.f32 %v2619_v41, %v2620_v35  ;;  %v2628_v14 = vmax.f32 %v2626_v59, %v2627_v2  ;;  %v2634_v62 = vrot.slane %v2633_v7, 2 }
 0x31d   : > { %v2898_v44 = vpack.c.bf16 %v2763_v45, %v2763_v45  ;;  %v2899_v3 = vpack.c.bf16 %v2764_v18, %v2764_v18  ;;  %v2900_v34 = vpack.c.bf16 %v2765_v50, %v2765_v50  ;;  %v3025_v13 = vunpack.c.l.b16 %v2897_v51  ;;  %3371 = vrot.lane.b32.xlu1 %v3296_v63, %s6297_s29  ;;  %v3244_v18 = vld [vmem:[#allocation4 + $0x20] sm:$0xf] }
 0x31e   : > { %v2615_v49 = vrot.slane %v2614_v58, 1  ;;  %v2622_v47 = vrot.slane %v2621_v40, 1  ;;  %v2629_v32 = vrot.slane %v2628_v14, 1  ;;  %v2635_v22 = vmax.f32 %v2633_v7, %v2634_v62  ;;  %v3862_v62 = vld [vmem:[#allocation4 + $0x24] sm:$0x1] }
 0x31f   : > { %v3026_v20 = vunpack.c.l.b16 %v2898_v44  ;;  %v3027_v25 = vunpack.c.l.b16 %v2899_v3  ;;  %v3028_v29 = vunpack.c.l.b16 %v2900_v34  ;;  %v3124_v53 = vrot.slane %v3025_v13, 7  ;;  %v3555_v44 = vld [vmem:[#allocation4 + $0x20] sm:$0xf] }
 0x320   : > { %v2616_v17 = vmax.f32 %v2614_v58, %v2615_v49  ;;  %v2623_v46 = vmax.f32 %v2621_v40, %v2622_v47  ;;  %v2630_v26 = vmax.f32 %v2628_v14, %v2629_v32  ;;  %v2636_v48 = vrot.slane %v2635_v22, 1 }
 0x321   : > { %v3125_v41 = vrot.slane %v3026_v20, 6  ;;  %v3127_v59 = vrot.slane %v3027_v25, 5  ;;  %v3300_v23 = vrot.slane %v3298_v24, 4  ;;  %v3307_v0 = vshll.u32 %v3243_v11, 16  ;;  %3985 = vrot.lane.b32.xlu2 %v3886_v31, %s6300_s26  ;;  %v3217_v11 = vld [vmem:[#allocation4 + $0x44] sm:$0x1] }
 0x322   : > { %v2637_v21 = vmax.f32 %v2635_v22, %v2636_v48  ;;  %v2702_v33 = vadd.f32 %v8301_v57, %v2616_v17  ;;  %v2703_v19 = vadd.f32 %v8301_v57, %v2623_v46  ;;  %v2704_v12 = vadd.f32 %v8301_v57, %v2630_v26  ;;  %v3556_v26 = vld [vmem:[#allocation4 + $0x24] sm:$0x1] }
 0x323   : > { %3477 = vrot.lane.b32.xlu0 %v8181_v56, %s6295_s15  ;;  %v3126_v56 = vsel %vm511_vm4, %v3125_v41, %v3124_v53  ;;  %v3601_v24 = vrot.slane %v3600_v1, 4  ;;  %v3605_v35 = vrot.slane %v3603_v54, 5  ;;  %v3303_v39 = vrot.slane %v3301_v5, 5  ;;  %v3246_v41 = vld [vmem:[#allocation4 + $0x28] sm:$0xf] }
 0x324   : > { %v3129_v31 = vrot.slane %v3028_v29, 4  ;;  %v2705_v2 = vadd.f32 %v8301_v57, %v2637_v21  ;;  %v2766_v7 = vmax.f32 %v2702_v33, 0.0  ;;  %v2767_v45 = vmax.f32 %v2703_v19, 0.0  ;;  %v3247_v33 = vld [vmem:[#allocation4 + $0x2c] sm:$0x1] }
 0x325   : > { %v3128_v10 = vsel %vm514_vm6, %v3127_v59, %v3126_v56  ;;  %v2768_v30 = vmax.f32 %v2704_v12, 0.0  ;;  %v3304_v63 = vor.u32 %v3303_v39, %v3300_v23  ;;  %v3309_v50 = vrot.slane %v3307_v0, 5  ;;  %v3214_v19 = vld [vmem:[#allocation4 + $0x40] sm:$0xf] }
 0x326   : > { %v2769_v4 = vmax.f32 %v2705_v2, 0.0  ;;  %v2901_v27 = vpack.c.bf16 %v2766_v7, %v2766_v7  ;;  %v2902_v1 = vpack.c.bf16 %v2767_v45, %v2767_v45  ;;  %v3902_v15 = vshrl.u32 %v3861_v6, 16 }
 0x327   : > { %v2903_v54 = vpack.c.bf16 %v2768_v30, %v2768_v30  ;;  %v3894_v8 = vor.u32 %v8224_v28, %v8202_v61  ;;  %v3312_v5 = vshrl.u32 %v3244_v18, 16  ;;  %v3305_v51 = vrot.slane %v3304_v63, 4  ;;  %v3226_v28 = vld [vmem:[#allocation4 + $0x30] sm:$0xf] }
 0x328   : > { %v2904_v58 = vpack.c.bf16 %v2769_v4, %v2769_v4  ;;  %v3029_v57 = vunpack.c.l.b16 %v2901_v27  ;;  %v3030_v40 = vunpack.c.l.b16 %v2902_v1  ;;  %v3606_v14 = vsel %vm8117_vm2, %v3601_v24, %v3605_v35  ;;  %3234 = vst.msk [vmem:[#allocation5 + $0x30] sm:$0xf] %vm2770_vm14, %v3226_v28  ;;  %v3557_v24 = vld [vmem:[#allocation4 + $0x28] sm:$0xf]  ;;  %v3864_v4 = vld [vmem:[#allocation4 + $0x2c] sm:$0x1] }
 0x329   : > { %v3130_v3 = vsel %vm517_vm7, %v3129_v31, %v3128_v10  ;;  %v3031_v34 = vunpack.c.l.b16 %v2903_v54  ;;  %v3310_v13 = vsel %vm8117_vm2, %v3305_v51, %v3309_v50  ;;  %v3904_v61 = vrot.slane %v3902_v15, 4  ;;  %3681 = vrot.lane.b32.xlu1 %v3606_v14, %s6299_s4 }
 0x32a   : > { %v3032_v49 = vunpack.c.l.b16 %v2904_v58  ;;  %v3131_v47 = vrot.slane %v3029_v57, 3  ;;  %v3133_v32 = vrot.slane %v3030_v40, 2  ;;  %3373 = vrot.lane.b32.xlu2 %v3310_v13, %s6297_s29  ;;  %v3905_v22 = vshll.u32 %v3861_v6, 16  ;;  %v3863_v6 = vld [vmem:[#allocation4 + $0x28] sm:$0xf] }
 0x32b   : > { %3784 = vrot.lane.b32.xlu0 %v8220_v9, %s6298_s12  ;;  %v3135_v20 = vrot.slane %v3031_v34, 1  ;;  %v3315_v25 = vshll.u32 %v3244_v18, 16  ;;  %v3911_v9 = vshll.u32 %v3862_v62, 16  ;;  %v3608_v29 = vshrl.u32 %v3555_v44, 16  ;;  %v3245_v18 = vld [vmem:[#allocation4 + $0x24] sm:$0x1] }
 0x32c   : > { %v3132_v53 = vsel %vm520_vm8, %v3131_v47, %v3130_v3  ;;  %v3152_v17 = vpack.c.b16 %v3032_v49, %v3032_v49  ;;  %v3907_v46 = vrot.slane %v3905_v22, 5  ;;  %v3611_v48 = vshll.u32 %v3555_v44, 16  ;;  %v3248_v3 = vld [vmem:[#allocation4 + $0x30] sm:$0xf] }
 0x32d   : > { %v3134_v59 = vsel %vm9091_vm9, %v3133_v32, %v3132_v53  ;;  %v3895_v23 = vrot.slane %v3894_v8, 4  ;;  %v8366_v0 = vrot.slane %v3312_v5, 4  ;;  %v3610_v21 = vrot.slane %v3608_v29, 4  ;;  %v3559_v5 = vld [vmem:[#allocation4 + $0x30] sm:$0xf] }
 0x32e   : > { %v3136_v12 = vsel %vm526_vm10, %v3135_v20, %v3134_v59  ;;  %v3218_v56 = vsel %vm7805_vm3, %v3152_v17, %v3217_v11  ;;  %v3908_v35 = vor.u32 %v3907_v46, %v3904_v61  ;;  %v3613_v39 = vrot.slane %v3611_v48, 5  ;;  %v3560_v48 = vld [vmem:[#allocation4 + $0x34] sm:$0x1]  ;;  %v3558_v59 = vld [vmem:[#allocation4 + $0x2c] sm:$0x1] }
 0x32f   : > { %v3151_v31 = vpack.c.b16 %v3136_v12, %v3136_v12  ;;  %3219 = vst [vmem:[#allocation4 + $0x44] sm:$0x1] %v3218_v56  ;;  %v3317_v2 = vrot.slane %v3315_v25, 5  ;;  %v3617_v7 = vshll.u32 %v3556_v26, 16  ;;  %v3326_v45 = vshrl.u32 %v3246_v41, 16 }
 0x330   : > { %v3909_v10 = vrot.slane %v3908_v35, 4  ;;  %v3913_v30 = vrot.slane %v3911_v9, 5  ;;  %v3614_v63 = vor.u32 %v3613_v39, %v3610_v21  ;;  %v3329_v50 = vshll.u32 %v3246_v41, 16  ;;  %v3220_v26 = vld [vmem:[#allocation4] sm:$0xf] }
 0x331   : > { %v3215_v27 = vsel %vm7875_vm15, %v3151_v31, %v3214_v19  ;;  %v3328_v15 = vrot.slane %v3326_v45, 4  ;;  %v3335_v54 = vshll.u32 %v3247_v33, 16  ;;  %v3916_v8 = vshrl.u32 %v3863_v6, 16  ;;  %3228 = vst.msk [vmem:[#allocation5] sm:$0xf] %vm2770_vm14, %v3220_v26 }
 0x332   : > { %v8379_v1 = vpop.permute.xlu2 %3467  ;;  %3216 = vst [vmem:[#allocation4 + $0x40] sm:$0xf] %v3215_v27  ;;  %v3914_v51 = vsel %vm8117_vm2, %v3909_v10, %v3913_v30  ;;  %v3615_v58 = vrot.slane %v3614_v63, 4  ;;  %v3619_v57 = vrot.slane %v3617_v7, 5  ;;  %v3331_v40 = vrot.slane %v3329_v50, 5 }
 0x333   : > { %3679 = vrot.lane.b32.xlu0 %v3592_v36, %s6299_s4  ;;  %v3622_v14 = vshrl.u32 %v3557_v24, 16  ;;  %3989 = vrot.lane.b32.xlu1 %v3914_v51, %s6300_s26  ;;  %v3918_v42 = vrot.slane %v3916_v8, 4  ;;  %v3919_v16 = vshll.u32 %v3863_v6, 16  ;;  %v3625_v60 = vshll.u32 %v3557_v24, 16  ;;  %v3865_v19 = vld [vmem:[#allocation4 + $0x30] sm:$0xf] }
 0x334   : > { %v3620_v36 = vsel %vm8117_vm2, %v3615_v58, %v3619_v57  ;;  %v3332_v62 = vor.u32 %v3331_v40, %v3328_v15  ;;  %v3925_v44 = vshll.u32 %v3864_v4, 16  ;;  %v3900_v34 = vsel %vm8117_vm2, %v3895_v23, %v8231_v37  ;;  %v3249_v12 = vld [vmem:[#allocation4 + $0x34] sm:$0x1]  ;;  %v3867_v57 = vld [vmem:[#allocation4 + $0x38] sm:$0xf] }
 0x335   : > { %v3321_v13 = vshll.u32 %v3245_v18, 16  ;;  %3683 = vrot.lane.b32.xlu2 %v3620_v36, %s6299_s4  ;;  %v3921_v61 = vrot.slane %v3919_v16, 5  ;;  %v3636_v28 = vshrl.u32 %v3559_v5, 16  ;;  %v3318_v49 = vor.u32 %v3317_v2, %v8366_v0  ;;  %v3866_v51 = vld [vmem:[#allocation4 + $0x34] sm:$0x1] }
 0x336   : > { %v3333_v47 = vrot.slane %v3332_v62, 4  ;;  %v3337_v32 = vrot.slane %v3335_v54, 5  ;;  %v3639_v22 = vshll.u32 %v3559_v5, 16  ;;  %v3624_v11 = vrot.slane %v3622_v14, 4  ;;  %v3561_v40 = vld [vmem:[#allocation4 + $0x38] sm:$0xf] }
 0x337   : > { %v3922_v20 = vor.u32 %v3921_v61, %v3918_v42  ;;  %v3638_v25 = vrot.slane %v3636_v28, 4  ;;  %v3340_v9 = vshrl.u32 %v3248_v3, 16  ;;  %v3627_v29 = vrot.slane %v3625_v60, 5  ;;  %v3250_v14 = vld [vmem:[#allocation4 + $0x38] sm:$0xf] }
 0x338   : > { %v3927_v53 = vrot.slane %v3925_v44, 5  ;;  %v3641_v17 = vrot.slane %v3639_v22, 5  ;;  %v3343_v46 = vshll.u32 %v3248_v3, 16  ;;  %v3338_v23 = vsel %vm8117_vm2, %v3333_v47, %v3337_v32  ;;  %v3414_v3 = vld [vmem:[#allocation4 + $0x38] sm:$0xe] }
 0x339   : > { %v3923_v37 = vrot.slane %v3922_v20, 4  ;;  %v3342_v41 = vrot.slane %v3340_v9, 4  ;;  %v3319_v56 = vrot.slane %v3318_v49, 4  ;;  %v3645_v35 = vshll.u32 %v3560_v48, 16 }
 0x33a   : > { %v3642_v0 = vor.u32 %v3641_v17, %v3638_v25  ;;  %v3345_v21 = vrot.slane %v3343_v46, 5  ;;  %v8395_v33 = vpop.permute.xlu2 %3520  ;;  %v3323_v6 = vrot.slane %v3321_v13, 5  ;;  %v3628_v31 = vor.u32 %v3627_v29, %v3624_v11  ;;  %v3868_v11 = vld [vmem:[#allocation4 + $0x3c] sm:$0x1]  ;;  %v3227_v46 = vld [vmem:[#allocation4 + $0x38] sm:$0xf] }
 0x33b   : > { %3987 = vrot.lane.b32.xlu0 %v3900_v34, %s6300_s26  ;;  %3377 = vrot.lane.b32.xlu1 %v3338_v23, %s6297_s29  ;;  %v3928_v24 = vsel %vm8117_vm2, %v3923_v37, %v3927_v53  ;;  %v3631_v2 = vshll.u32 %v3558_v59, 16  ;;  %v3930_v7 = vshrl.u32 %v3865_v19, 16  ;;  %v3933_v45 = vshll.u32 %v3865_v19, 16  ;;  %v3415_v34 = vld [vmem:[#allocation4 + $0x3c] sm:$0x1] }
 0x33c   : > { %v3346_v39 = vor.u32 %v3345_v21, %v3342_v41  ;;  %v3643_v18 = vrot.slane %v3642_v0, 4  ;;  %v3349_v10 = vshll.u32 %v3249_v12, 16  ;;  %v3324_v30 = vsel %vm8117_vm2, %v3319_v56, %v3323_v6  ;;  %v3562_v37 = vld [vmem:[#allocation4 + $0x3c] sm:$0x1]  ;;  %3235 = vst.msk [vmem:[#allocation5 + $0x38] sm:$0xf] %vm2770_vm14, %v3227_v46 }
 0x33d   : > { %3991 = vrot.lane.b32.xlu2 %v3928_v24, %s6300_s26  ;;  %v3647_v63 = vrot.slane %v3645_v35, 5  ;;  %v3629_v4 = vrot.slane %v3628_v31, 4  ;;  %v3633_v27 = vrot.slane %v3631_v2, 5  ;;  %v3932_v15 = vrot.slane %v3930_v7, 4  ;;  %v8414_v44 = vpop.permute.xlu1 %3516  ;;  %v4030_v21 = vld [vmem:[#allocation4 + $0x40] sm:$0xe] }
 0x33e   : > { %v3347_v50 = vrot.slane %v3346_v39, 4  ;;  %v3935_v54 = vrot.slane %v3933_v45, 5  ;;  %v3351_v5 = vrot.slane %v3349_v10, 5  ;;  %v3944_v16 = vshrl.u32 %v3867_v57, 16  ;;  %v3412_v12 = vld [vmem:[#allocation4 + $0x30] sm:$0xe] }
 0x33f   : > { %v3648_v8 = vsel %vm8117_vm2, %v3643_v18, %v3647_v63  ;;  %v3947_v60 = vshll.u32 %v3867_v57, 16  ;;  %v3650_v36 = vshrl.u32 %v3561_v40, 16  ;;  %v3634_v62 = vsel %vm8117_vm2, %v3629_v4, %v3633_v27  ;;  %v3251_v56 = vld [vmem:[#allocation4 + $0x3c] sm:$0x1]  ;;  %v4031_v39 = vld [vmem:[#allocation4 + $0x44] sm:$0x1] }
 0x340   : > { %v3352_v42 = vsel %vm8117_vm2, %v3347_v50, %v3351_v5  ;;  %v3653_v13 = vshll.u32 %v3561_v40, 16  ;;  %v3936_v61 = vor.u32 %v3935_v54, %v3932_v15  ;;  %v3939_v28 = vshll.u32 %v3866_v51, 16  ;;  %v4032_v2 = vld [vmem:[#allocation4 + $0x48] sm:$0xe]  ;;  %v4033_v7 = vld [vmem:[#allocation4 + $0x4c] sm:$0x1] }
 0x341   : > { %v3946_v49 = vrot.slane %v3944_v16, 4  ;;  %v3949_v47 = vrot.slane %v3947_v60, 5  ;;  %v3354_v32 = vshrl.u32 %v3250_v14, 16  ;;  %v3357_v22 = vshll.u32 %v3250_v14, 16  ;;  %v3413_v15 = vld [vmem:[#allocation4 + $0x34] sm:$0x1] }
 0x342   : > { %v8406_v58 = vpop.permute.xlu2 %3828  ;;  %v5876_v20 = vrot.slane %v3414_v3, 9  ;;  %v3465_v25 = vrot.slane %v3415_v34, 5  ;;  %v3953_v29 = vshll.u32 %v3868_v11, 16  ;;  %v3652_v53 = vrot.slane %v3650_v36, 4  ;;  %v3563_v14 = vld [vmem:[#allocation4 + $0x40] sm:$0xf] }
 0x343   : > { %3375 = vrot.lane.b32.xlu0 %v3324_v30, %s6297_s29  ;;  %3687 = vrot.lane.b32.xlu1 %v3648_v8, %s6299_s4  ;;  %v3950_v9 = vor.u32 %v3949_v47, %v3946_v49  ;;  %v3655_v17 = vrot.slane %v3653_v13, 5  ;;  %v3937_v41 = vrot.slane %v3936_v61, 4  ;;  %v3941_v59 = vrot.slane %v3939_v28, 5  ;;  %v3724_v34 = vld [vmem:[#allocation4 + $0x40] sm:$0xe] }
 0x344   : > { %v3955_v48 = vrot.slane %v3953_v29, 5  ;;  %v3356_v23 = vrot.slane %v3354_v32, 4  ;;  %v3359_v0 = vrot.slane %v3357_v22, 5  ;;  %v3466_v35 = vsel %vm8059_vm5, %v5876_v20, %v3465_v25  ;;  %v3725_v13 = vld [vmem:[#allocation4 + $0x44] sm:$0x1] }
 0x345   : > { %3379 = vrot.lane.b32.xlu2 %v3352_v42, %s6297_s29  ;;  %v3951_v26 = vrot.slane %v3950_v9, 4  ;;  %v3656_v6 = vor.u32 %v3655_v17, %v3652_v53  ;;  %v3659_v31 = vshll.u32 %v3562_v37, 16  ;;  %v5891_v45 = vrot.slane %v4030_v21, 9  ;;  %v3564_v29 = vld [vmem:[#allocation4 + $0x44] sm:$0x1] }
 0x346   : > { %v4076_v18 = vrot.slane %v4031_v39, 5  ;;  %v5892_v30 = vrot.slane %v4032_v2, 9  ;;  %v3942_v63 = vsel %vm8117_vm2, %v3937_v41, %v3941_v59  ;;  %v3363_v50 = vshll.u32 %v3251_v56, 16  ;;  %v3869_v53 = vld [vmem:[#allocation4 + $0x40] sm:$0xf] }
 0x347   : > { %v3956_v24 = vsel %vm8117_vm2, %v3951_v26, %v3955_v48  ;;  %v8426_v10 = vpop.permute.xlu1 %3518  ;;  %v4080_v27 = vrot.slane %v4033_v7, 5  ;;  %v3360_v54 = vor.u32 %v3359_v0, %v3356_v23  ;;  %v5875_v8 = vrot.slane %v3412_v12, 9  ;;  %v3870_v17 = vld [vmem:[#allocation4 + $0x44] sm:$0x1]  ;;  %v3507_v46 = vld [vmem:[#allocation4 + $0x40] sm:$0xf] }
 0x348   : > { %v4077_v4 = vsel %vm8059_vm5, %v5891_v45, %v4076_v18  ;;  %v3657_v5 = vrot.slane %v3656_v6, 4  ;;  %v3661_v51 = vrot.slane %v3659_v31, 5  ;;  %v3461_v40 = vrot.slane %v3413_v15, 5  ;;  %v3722_v0 = vld [vmem:[#allocation4 + $0x38] sm:$0xe] }
 0x349   : > { %4096 = vst.msk [vmem:[#allocation5 + $0x34] sm:$0xf] %vm2770_vm14, %v4077_v4  ;;  %v4081_v57 = vsel %vm8059_vm5, %v5892_v30, %v4080_v27  ;;  %v3361_v42 = vrot.slane %v3360_v54, 4  ;;  %v3365_v16 = vrot.slane %v3363_v50, 5  ;;  %v3664_v61 = vshrl.u32 %v3563_v14, 16 }
 0x34a   : > { %v8418_v19 = vpop.permute.xlu2 %3526  ;;  %4097 = vst.msk [vmem:[#allocation5 + $0x3c] sm:$0xf] %vm2770_vm14, %v4081_v57  ;;  %v3462_v60 = vsel %vm8059_vm5, %v5875_v8, %v3461_v40  ;;  %v3662_v36 = vsel %vm8117_vm2, %v3657_v5, %v3661_v51  ;;  %v3667_v28 = vshll.u32 %v3563_v14, 16  ;;  %v5884_v32 = vrot.slane %v3724_v34, 9  ;;  %v3723_v21 = vld [vmem:[#allocation4 + $0x3c] sm:$0x1] }
 0x34b   : > { %3685 = vrot.lane.b32.xlu0 %v3634_v62, %s6299_s4  ;;  %3995 = vrot.lane.b32.xlu1 %v3956_v24, %s6300_s26  ;;  %v3366_v47 = vsel %vm8117_vm2, %v3361_v42, %v3365_v16  ;;  %v3772_v22 = vrot.slane %v3725_v13, 5  ;;  %v3666_v20 = vrot.slane %v3664_v61, 4  ;;  %v3958_v48 = vshrl.u32 %v3869_v53, 16  ;;  %v3506_v39 = vld [vmem:[#allocation4 + $0x38] sm:$0xf] }
 0x34c   : > { %v3669_v25 = vrot.slane %v3667_v28, 5  ;;  %v3961_v41 = vshll.u32 %v3869_v53, 16  ;;  %v3967_v59 = vshll.u32 %v3870_v17, 16  ;;  %v3673_v56 = vshll.u32 %v3564_v29, 16  ;;  %v2806_v50 = vld [vmem:[#allocation4 + $0x48] sm:$0x1] }
 0x34d   : > { %3481 = vrot.lane.b32.xlu2 %v3466_v35, %s6295_s15  ;;  %v3773_v37 = vsel %vm8059_vm5, %v5884_v32, %v3772_v22  ;;  %v3960_v24 = vrot.slane %v3958_v48, 4  ;;  %v5883_v6 = vrot.slane %v3722_v0, 9  ;;  %v3768_v31 = vrot.slane %v3723_v21, 5  ;;  %v3872_v5 = vld [vmem:[#allocation4 + $0x4c] sm:$0x1]  ;;  %v6091_v29 = vld [vmem:[%s9199_s24 + $0x28] sm:$0xff] }
 0x34e   : > { %v3670_v12 = vor.u32 %v3669_v25, %v3666_v20  ;;  %v3963_v35 = vrot.slane %v3961_v41, 5  ;;  %v3969_v7 = vrot.slane %v3967_v59, 5  ;;  %vm3391_vm1 = vcmask 257152   ;;  %v6089_v48 = vld [vmem:[%s9199_s24 + $0x18] sm:$0xff]  ;;  %v6088_v59 = vld [vmem:[%s9199_s24 + $0x10] sm:$0xff] }
 0x34f   : > { %v8445_v3 = vpop.permute.xlu1 %3826  ;;  %vm3491_vm8 = vcmask 388352   ;;  %v3675_v18 = vrot.slane %v3673_v56, 5  ;;  %vm3540_vm10 = vcmask 519552   ;;  %v3769_v4 = vsel %vm8059_vm5, %v5883_v6, %v3768_v31  ;;  %v6087_v56 = vld [vmem:[%s9199_s24 + $0x8] sm:$0xff] }
 0x350   : > { %v6084_v49 = vld [vmem:[#allocation5 + $0x34] sm:$0xf]  ;;  %v3964_v2 = vor.u32 %v3963_v35, %v3960_v24  ;;  %v3671_v45 = vrot.slane %v3670_v12, 4  ;;  %v2807_v54 = vsel %vm7805_vm3, 0, %v2806_v50  ;;  %v3981_v16 = vshll.u32 %v3872_v5, 16  ;;  %v6086_v35 = vld [vmem:[%s9199_s24] sm:$0xff] }
 0x351   : > { %v5921_v11 = vld [vmem:[#allocation5 + $0x38] sm:$0xf0]  ;;  %2808 = vst [vmem:[#allocation4 + $0x48] sm:$0x1] %v2807_v54  ;;  %vm3701_vm5 = vcmask 650752   ;;  %vm3848_vm3 = vcmask 913152  }
 0x352   : > { %v5924_v9 = vor.u32 %v6084_v49, %v5921_v11  ;;  %v3965_v30 = vrot.slane %v3964_v2, 4  ;;  %v3676_v43 = vsel %vm8117_vm2, %v3671_v45, %v3675_v18  ;;  %v3983_v61 = vrot.slane %v3981_v16, 5  ;;  %v6093_v11 = vld [vmem:[%s9199_s24 + $0x38] sm:$0xff] }
 0x353   : > { %3993 = vrot.lane.b32.xlu0 %v3942_v63, %s6300_s26  ;;  %v8441_v62 = vpop.permute.xlu2 %3834  ;;  %3479 = vrot.lane.b32.xlu1 %v3462_v60, %s6295_s15  ;;  %v3814_v60 = vld [vmem:[#allocation4 + $0x40] sm:$0xf]  ;;  %vm4009_vm13 = vcmask 1044352   ;;  %vm4478_vm14 = vcmask 253952   ;;  %vm4498_vm15 = vcmask 256002  }
 0x354   : > { %5964 = vmatmul.msk.bf16.gmra.mxu1 %vm545_vm12, %v5924_v9  ;;  %v3970_v27 = vsel %vm8117_vm2, %v3965_v30, %v3969_v7  ;;  %vm3798_vm12 = vcmask 781952   ;;  %4226 = vmatpush.bf16.msra.mxu0 %v6093_v11  ;;  %vm9202_vm11 = vsmask.f32 256  ;;  %vm4684_vm9 = vsmask.f32 7448 }
 0x355   : > { %3689 = vrot.lane.b32.xlu2 %v3662_v36, %s6299_s4  ;;  %vm8578_vm0 = vmand %vm4478_vm14, %vm9202_vm11 }
 0x357   : > { %v8457_v23 = vpop.permute.xlu1 %3524 }
 0x358   : > { %v3815_v57 = vld [vmem:[#allocation4 + $0x48] sm:$0xf]  ;;  %4227 = vmatpush.bf16.msra.mxu0 %v6092_v52 }
 0x359   : > { %v3871_v40 = vld [vmem:[#allocation4 + $0x48] sm:$0xf] }
 0x35a   : > { %v3972_v14 = vshrl.u32 %v3871_v40, 16  ;;  %v3975_v42 = vshll.u32 %v3871_v40, 16 }
 0x35b   : > { %3381 = vrot.lane.b32.xlu0 %v3366_v47, %s6297_s29  ;;  %v8453_v26 = vpop.permute.xlu2 %3776  ;;  %3530 = vrot.lane.b32.xlu1 %v3507_v46, %s6294_s13  ;;  %v6090_v46 = vld [vmem:[%s9199_s24 + $0x20] sm:$0xff] }
 0x35c   : > { %v3977_v36 = vrot.slane %v3975_v42, 5  ;;  %4228 = vmatpush.bf16.msra.mxu0 %v6091_v29 }
 0x35d   : > { %3788 = vrot.lane.b32.xlu2 %v3773_v37, %s6298_s12 }
 0x35f   : > { %v8473_v8 = vpop.permute.xlu1 %3832 }
 0x360   : > { %4229 = vmatpush.bf16.msra.mxu0 %v6090_v46 }
 0x363   : > { %3528 = vrot.lane.b32.xlu0 %v3506_v39, %s6294_s13  ;;  %v8465_v15 = vpop.permute.xlu2 %3475  ;;  %3786 = vrot.lane.b32.xlu1 %v3769_v4, %s6298_s12  ;;  %s9207_s13 = sld [smem:[#allocation47_spill]] }
 0x364   : > { %4230 = vmatpush.bf16.msra.mxu0 %v6089_v48  ;;  %s9219_s12 = sld [smem:[#allocation52_spill]] }
 0x365   : > { %v3368_v63 = vpop.permute.xlu0 %3367  ;;  %3997 = vrot.lane.b32.xlu2 %v3970_v27, %s6300_s26 }
 0x366   : > { %3392 = vst.msk [vmem:[#allocation5] sm:$0xf] %vm3391_vm1, %v3368_v63 }
 0x367   : > { %3492 = vst.msk [vmem:[#allocation5] sm:$0xf] %vm3491_vm8, %v8379_v1  ;;  %v3470_v1 = vpop.permute.xlu1 %3469 }
 0x368   : > { %3541 = vst.msk [vmem:[#allocation5] sm:$0xf] %vm3540_vm10, %v8414_v44  ;;  %v3974_v44 = vrot.slane %v3972_v14, 4  ;;  %4231 = vmatpush.bf16.msra.mxu0 %v6088_v59 }
 0x36a   : > { %v3978_v13 = vor.u32 %v3977_v36, %v3974_v44 }
 0x36b   : > { %3691 = vrot.lane.b32.xlu0 %v3676_v43, %s6299_s4  ;;  %v8480_v51 = vpop.permute.xlu2 %3782  ;;  %3838 = vrot.lane.b32.xlu1 %v3815_v57, %s6296_s25 }
 0x36c   : > { %v3979_v49 = vrot.slane %v3978_v13, 4  ;;  %4232 = vmatpush.bf16.msra.mxu0 %v6087_v56 }
 0x36d   : > { %v3825_v38 = vpop.permute.xlu0 %3824 }
 0x36e   : > { %v3984_v32 = vsel %vm8117_vm2, %v3979_v49, %v3983_v61  ;;  %vm4474_vm2 = vcmask 256000   ;;  %v4483_v61 = vld [vmem:[#allocation6 + $0x4] sm:$0x1] }
 0x36f   : > { %v3775_v47 = vpop.permute.xlu1 %3774  ;;  %v4264_v13 = vpop.f32.mrf.mxu1  ;;  %4475 = vst.msk [vmem:[#allocation6] sm:$0x7] %vm4474_vm2, %v6293_v55 }
 0x370   : > { %4233 = vmatpush.bf16.msra.mxu0 %v6086_v35  ;;  %4477 = vst.msk [vmem:[#allocation6 + $0x14] sm:$0x7] %vm4474_vm2, %v6293_v55 }
 0x373   : > { %3836 = vrot.lane.b32.xlu0 %v3814_v60, %s6296_s25  ;;  %v3678_v28 = vpop.permute.xlu2 %3677 }
 0x374   : > { %3702 = vst.msk [vmem:[#allocation5] sm:$0xf] %vm3701_vm5, %v3678_v28 }
 0x375   : > { %v3523_v34 = vpop.permute.xlu0 %3522  ;;  %3799 = vst.msk [vmem:[#allocation5] sm:$0xf] %vm3798_vm12, %v3775_v47  ;;  %v4504_v47 = vld [vmem:[#allocation6 + $0x4] sm:$0x4] }
 0x376   : > { %3849 = vst.msk [vmem:[#allocation5] sm:$0xf] %vm3848_vm3, %v3825_v38  ;;  %v4501_v52 = vld [vmem:[#allocation6] sm:$0x4] }
 0x377   : > { %v3474_v25 = vpop.permute.xlu1 %3473  ;;  %v4516_v46 = vld [vmem:[#allocation6 + $0x14] sm:$0x4] }
 0x37b   : > { %3999 = vrot.lane.b32.xlu0 %v3984_v32, %s6300_s26  ;;  %v3986_v20 = vpop.permute.xlu2 %3985  ;;  %v4484_v32 = vsel %vm8578_vm0, 0, %v4483_v61 }
 0x37c   : > { %4010 = vst.msk [vmem:[#allocation5] sm:$0xf] %vm4009_vm13, %v3986_v20 }
 0x37d   : > { %v3831_v22 = vpop.permute.xlu0 %3830  ;;  %4485 = vst [vmem:[#allocation6 + $0x4] sm:$0x1] %v4484_v32 }
 0x37f   : > { %v3781_v17 = vpop.permute.xlu1 %3780 }
 0x383   : > { %v5895_v45 = vld [vmem:[#allocation5] sm:$0xf] }
 0x384   : > { %v3374_v53 = vpop.permute.xlu2 %3373 }
 0x385   : > { %v3472_v9 = vpop.permute.xlu0 %3471  ;;  %3395 = vst.msk [vmem:[#allocation5 + $0x18] sm:$0xf] %vm3391_vm1, %v3374_v53  ;;  %v4495_v53 = vld [vmem:[#allocation6 + $0x14] sm:$0x1] }
 0x386   : > { %3495 = vst.msk [vmem:[#allocation5 + $0x18] sm:$0xf] %vm3491_vm8, %v3474_v25  ;;  %v4480_v25 = vld [vmem:[#allocation6] sm:$0x1]  ;;  %v4496_v48 = vsel %vm8578_vm0, 0, %v4495_v53 }
 0x387   : > { %3544 = vst.msk [vmem:[#allocation5 + $0x18] sm:$0xf] %vm3540_vm10, %v3523_v34  ;;  %v3370_v41 = vpop.permute.xlu1 %3369  ;;  %v4481_v55 = vsel %vm8578_vm0, 0, %v4480_v25  ;;  %v4486_v53 = vld [vmem:[#allocation6 + $0x8] sm:$0x1] }
 0x388   : > { %3393 = vst.msk [vmem:[#allocation5 + $0x8] sm:$0xf] %vm3391_vm1, %v3370_v41 }
 0x389   : > { %3493 = vst.msk [vmem:[#allocation5 + $0x8] sm:$0xf] %vm3491_vm8, %v3470_v1 }
 0x38a   : > { %3542 = vst.msk [vmem:[#allocation5 + $0x8] sm:$0xf] %vm3540_vm10, %v8426_v10 }
 0x38b   : > { %4482 = vst [vmem:[#allocation6] sm:$0x1] %v4481_v55 }
 0x38c   : > { %4497 = vst [vmem:[#allocation6 + $0x14] sm:$0x1] %v4496_v48  ;;  %v4507_v48 = vld [vmem:[#allocation6 + $0x8] sm:$0x4] }
 0x38d   : > { %v3779_v37 = vpop.permute.xlu0 %3778 }
 0x38f   : > { %v3684_v0 = vpop.permute.xlu2 %3683  ;;  %v3372_v12 = vpop.permute.xlu1 %3371 }
 0x390   : > { %3705 = vst.msk [vmem:[#allocation5 + $0x18] sm:$0xf] %vm3701_vm5, %v3684_v0 }
 0x391   : > { %3802 = vst.msk [vmem:[#allocation5 + $0x18] sm:$0xf] %vm3798_vm12, %v3781_v17 }
 0x392   : > { %3852 = vst.msk [vmem:[#allocation5 + $0x18] sm:$0xf] %vm3848_vm3, %v3831_v22 }
 0x393   : > { %3394 = vst.msk [vmem:[#allocation5 + $0x10] sm:$0xf] %vm3391_vm1, %v3372_v12 }
 0x394   : > { %3494 = vst.msk [vmem:[#allocation5 + $0x10] sm:$0xf] %vm3491_vm8, %v3472_v9  ;;  %v4266_v9 = vpop.f32.mrf.mxu1 }
 0x395   : > { %v3478_v21 = vpop.permute.xlu0 %3477  ;;  %3543 = vst.msk [vmem:[#allocation5 + $0x10] sm:$0xf] %vm3540_vm10, %v8395_v33 }
 0x397   : > { %v3992_v24 = vpop.permute.xlu2 %3991 }
 0x398   : > { %4013 = vst.msk [vmem:[#allocation5 + $0x18] sm:$0xf] %vm4009_vm13, %v3992_v24 }
 0x39b   : > { %v3682_v39 = vpop.permute.xlu1 %3681 }
 0x39c   : > { %3704 = vst.msk [vmem:[#allocation5 + $0x10] sm:$0xf] %vm3701_vm5, %v3682_v39 }
 0x39d   : > { %v3785_v10 = vpop.permute.xlu0 %3784  ;;  %3801 = vst.msk [vmem:[#allocation5 + $0x10] sm:$0xf] %vm3798_vm12, %v3779_v37 }
 0x39e   : > { %3851 = vst.msk [vmem:[#allocation5 + $0x10] sm:$0xf] %vm3848_vm3, %v8406_v58 }
 0x39f   : > { %v3380_v6 = vpop.permute.xlu2 %3379  ;;  %v6081_v63 = vld [vmem:[#allocation5 + $0x14] sm:$0xf0] }
 0x3a0   : > { %3398 = vst.msk [vmem:[#allocation5 + $0x30] sm:$0xf] %vm3391_vm1, %v3380_v6 }
 0x3a5   : > { %v3680_v31 = vpop.permute.xlu0 %3679  ;;  %v3990_v33 = vpop.permute.xlu1 %3989 }
 0x3a6   : > { %3703 = vst.msk [vmem:[#allocation5 + $0x8] sm:$0xf] %vm3701_vm5, %v3680_v31 }
 0x3a7   : > { %3800 = vst.msk [vmem:[#allocation5 + $0x8] sm:$0xf] %vm3798_vm12, %v8453_v26  ;;  %v3482_v27 = vpop.permute.xlu2 %3481 }
 0x3a8   : > { %3850 = vst.msk [vmem:[#allocation5 + $0x8] sm:$0xf] %vm3848_vm3, %v8445_v3 }
 0x3a9   : > { %4012 = vst.msk [vmem:[#allocation5 + $0x10] sm:$0xf] %vm4009_vm13, %v3990_v33  ;;  %v4619_v33 = vld [vmem:[#allocation6] sm:$0x3] }
 0x3aa   : > { %4624 = vst [vmem:[#allocation1] ss:$2 sm:$0xff] %v4619_v33 }
 0x3ad   : > { %v3988_v2 = vpop.permute.xlu0 %3987  ;;  %v3378_v7 = vpop.permute.xlu1 %3377 }
 0x3ae   : > { %4011 = vst.msk [vmem:[#allocation5 + $0x8] sm:$0xf] %vm4009_vm13, %v3988_v2 }
 0x3af   : > { %3397 = vst.msk [vmem:[#allocation5 + $0x28] sm:$0xf] %vm3391_vm1, %v3378_v7  ;;  %v3690_v43 = vpop.permute.xlu2 %3689 }
 0x3b0   : > { %3497 = vst.msk [vmem:[#allocation5 + $0x28] sm:$0xf] %vm3491_vm8, %v3478_v21  ;;  %v5903_v30 = vld [vmem:[#allocation5 + $0x10] sm:$0xf] }
 0x3b1   : > { %3546 = vst.msk [vmem:[#allocation5 + $0x28] sm:$0xf] %vm3540_vm10, %v8418_v19  ;;  %v5904_v50 = vor.u32 %v6081_v63, %v5903_v30 }
 0x3b5   : > { %v3376_v58 = vpop.permute.xlu0 %3375  ;;  %v6079_v26 = vld [vmem:[#allocation5 + $0x4] sm:$0xf0]  ;;  %v3688_v18 = vpop.permute.xlu1 %3687 }
 0x3b6   : > { %3396 = vst.msk [vmem:[#allocation5 + $0x20] sm:$0xf] %vm3391_vm1, %v3376_v58  ;;  %v5896_v3 = vor.u32 %v6079_v26, %v5895_v45 }
 0x3b7   : > { %3496 = vst.msk [vmem:[#allocation5 + $0x20] sm:$0xf] %vm3491_vm8, %v8465_v15  ;;  %v3789_v57 = vpop.permute.xlu2 %3788 }
 0x3b8   : > { %3545 = vst.msk [vmem:[#allocation5 + $0x20] sm:$0xf] %vm3540_vm10, %v8457_v23  ;;  %4234 = vmatmul.bf16.vlgmr.msra.gmra.mxu0 %v5896_v3 }
 0x3b9   : > { %3707 = vst.msk [vmem:[#allocation5 + $0x28] sm:$0xf] %vm3701_vm5, %v3688_v18 }
 0x3ba   : > { %3804 = vst.msk [vmem:[#allocation5 + $0x28] sm:$0xf] %vm3798_vm12, %v3785_v10 }
 0x3bb   : > { %3854 = vst.msk [vmem:[#allocation5 + $0x28] sm:$0xf] %vm3848_vm3, %v8441_v62 }
 0x3bd   : > { %v3686_v19 = vpop.permute.xlu0 %3685  ;;  %v3996_v23 = vpop.permute.xlu1 %3995 }
 0x3be   : > { %3706 = vst.msk [vmem:[#allocation5 + $0x20] sm:$0xf] %vm3701_vm5, %v3686_v19 }
 0x3bf   : > { %3803 = vst.msk [vmem:[#allocation5 + $0x20] sm:$0xf] %vm3798_vm12, %v8480_v51  ;;  %v3998_v16 = vpop.permute.xlu2 %3997 }
 0x3c0   : > { %3853 = vst.msk [vmem:[#allocation5 + $0x20] sm:$0xf] %vm3848_vm3, %v8473_v8 }
 0x3c1   : > { %4015 = vst.msk [vmem:[#allocation5 + $0x28] sm:$0xf] %vm4009_vm13, %v3996_v23 }
 0x3c5   : > { %v3994_v4 = vpop.permute.xlu0 %3993  ;;  %v3480_v62 = vpop.permute.xlu1 %3479 }
 0x3c6   : > { %4014 = vst.msk [vmem:[#allocation5 + $0x20] sm:$0xf] %vm4009_vm13, %v3994_v4 }
 0x3c7   : > { %3498 = vst.msk [vmem:[#allocation5 + $0x30] sm:$0xf] %vm3491_vm8, %v3480_v62 }
 0x3c8   : > { %4239 = vmatmul.bf16.gmra.mxu0 %v5904_v50  ;;  %v6083_v54 = vld [vmem:[#allocation5 + $0x24] sm:$0xf0] }
 0x3cd   : > { %v3382_v15 = vpop.permute.xlu0 %3381  ;;  %v3531_v8 = vpop.permute.xlu1 %3530  ;;  %v5911_v38 = vld [vmem:[#allocation5 + $0x20] sm:$0xf] }
 0x3ce   : > { %3399 = vst.msk [vmem:[#allocation5 + $0x38] sm:$0xf] %vm3391_vm1, %v3382_v15  ;;  %v5912_v5 = vor.u32 %v6083_v54, %v5911_v38  ;;  %vm4499_vm1 = vsmask.f32 7946  ;;  %v8609_v54 = vld [vmem:[%s9207_s13] ss:$0 sm:$0xff] }
 0x3cf   : > { %3499 = vst.msk [vmem:[#allocation5 + $0x38] sm:$0xf] %vm3491_vm8, %v3482_v27  ;;  %vm8586_vm8 = vmand %vm4498_vm15, %vm4499_vm1  ;;  %vm4679_vm15 = vsmask.f32 1280  ;;  %vm4682_vm1 = vsmask.f32 5392 }
 0x3d0   : > { %3548 = vst.msk [vmem:[#allocation5 + $0x38] sm:$0xf] %vm3540_vm10, %v3531_v8  ;;  %v4505_v11 = vsel %vm8586_vm8, 0, %v4504_v47  ;;  %v4502_v17 = vsel %vm8586_vm8, 0, %v4501_v52  ;;  %v4517_v41 = vsel %vm8586_vm8, 0, %v4516_v46 }
 0x3d1   : > { %4506 = vst [vmem:[#allocation6 + $0x4] sm:$0x4] %v4505_v11 }
 0x3d2   : > { %4503 = vst [vmem:[#allocation6] sm:$0x4] %v4502_v17 }
 0x3d3   : > { %4518 = vst [vmem:[#allocation6 + $0x14] sm:$0x4] %v4517_v41 }
 0x3d5   : > { %v3529_v51 = vpop.permute.xlu0 %3528  ;;  %v3787_v1 = vpop.permute.xlu1 %3786 }
 0x3d6   : > { %3547 = vst.msk [vmem:[#allocation5 + $0x30] sm:$0xf] %vm3540_vm10, %v3529_v51  ;;  %vm4284_vm10 = vcmask 261120  }
 0x3d7   : > { %3708 = vst.msk [vmem:[#allocation5 + $0x30] sm:$0xf] %vm3701_vm5, %v3690_v43 }
 0x3d8   : > { %4244 = vmatmul.bf16.gmra.mxu0 %v5912_v5  ;;  %3805 = vst.msk [vmem:[#allocation5 + $0x30] sm:$0xf] %vm3798_vm12, %v3787_v1 }
 0x3dd   : > { %v3692_v40 = vpop.permute.xlu0 %3691  ;;  %v3839_v14 = vpop.permute.xlu1 %3838 }
 0x3de   : > { %3709 = vst.msk [vmem:[#allocation5 + $0x38] sm:$0xf] %vm3701_vm5, %v3692_v40  ;;  %vm4325_vm5 = vcmask 254976  }
 0x3df   : > { %3806 = vst.msk [vmem:[#allocation5 + $0x38] sm:$0xf] %vm3798_vm12, %v3789_v57  ;;  %vm4653_vm12 = vcmask 1041408  }
 0x3e0   : > { %3856 = vst.msk [vmem:[#allocation5 + $0x38] sm:$0xf] %vm3848_vm3, %v3839_v14 }
 0x3e5   : > { %v3837_v42 = vpop.permute.xlu0 %3836 }
 0x3e6   : > { %3855 = vst.msk [vmem:[#allocation5 + $0x30] sm:$0xf] %vm3848_vm3, %v3837_v42  ;;  %vm4605_vm3 = vsmask.f32 2306 }
 0x3e7   : > { %4016 = vst.msk [vmem:[#allocation5 + $0x30] sm:$0xf] %vm4009_vm13, %v3998_v16  ;;  %vm8624_vm14 = vmand %vm4474_vm2, %vm4605_vm3  ;;  %vm4680_vm2 = vsmask.f32 3336 }
 0x3e8   : > { %vm4681_vm11 = vmor %vm4679_vm15, %vm4680_vm2 }
 0x3e9   : > { %vm4683_vm3 = vmor %vm4681_vm11, %vm4682_vm1  ;;  %vm9212_vm1 = vcmask 1046534  }
 0x3ea   : > { %vm8637_vm15 = vmor %vm4683_vm3, %vm4684_vm9  ;;  %vm4802_vm9 = vcmask 1040384  }
 0x3eb   : > { %vm4804_vm2 = vmor %vm4802_vm9, %vm511_vm4  ;;  %vm4638_vm9 = vcmask 257024  }
 0x3ec   : > { %vm4806_vm11 = vmor %vm4804_vm2, %vm517_vm7 }
 0x3ed   : > { %v4000_v60 = vpop.permute.xlu0 %3999  ;;  %vm8680_vm3 = vmor %vm4806_vm11, %vm9212_vm1 }
 0x3ee   : > { %4017 = vst.msk [vmem:[#allocation5 + $0x38] sm:$0xf] %vm4009_vm13, %v4000_v60  ;;  %v5919_v44 = vld [vmem:[#allocation5 + $0x30] sm:$0xf]  ;;  %vm4657_vm13 = vcmask 1043458  }
 0x3f5   : > { %v6085_v36 = vld [vmem:[#allocation5 + $0x34] sm:$0xf0] }
 0x3f6   : > { %v5920_v34 = vor.u32 %v6085_v36, %v5919_v44  ;;  %v4269_v44 = vpop.f32.mrf.mxu1 }
 0x3f8   : > { %4249 = vmatmul.bf16.gmra.mxu0 %v5920_v34 }
 0x435   : > { %v4235_v28 = vpop.f32.mrf.mxu0 }
 0x436   : > { %v4265_v20 = vadd.f32 %v4264_v13, %v4235_v28  ;;  %v4641_v28 = vld [vmem:[#allocation6] sm:$0x7] }
 0x437   : > { %v4649_v52 = vrot.slane %v4641_v28, 2 }
 0x438   : > { %v4285_v59 = vsel %vm4284_vm10, %v4265_v20, -inf }
 0x439   : > { %v4656_v41 = vsel %vm4653_vm12, %v4641_v28, %v4649_v52 }
 0x43a   : > { %v4686_v33 = vshrl.u32 %v4656_v41, 16 }
 0x43d   : > { %v4237_v29 = vpop.f32.mrf.mxu0 }
 0x43e   : > { %v4267_v37 = vadd.f32 %v4266_v9, %v4237_v29 }
 0x440   : > { %v4286_v0 = vsel %vm4284_vm10, %v4267_v37, -inf }
 0x441   : > { %v4287_v21 = vmax.f32 %v4285_v59, %v4286_v0 }
 0x443   : > { %v4301_v12 = vrot.slane %v4287_v21, 2  ;;  %v4302_v56 = vrot.slane %v4287_v21, 4  ;;  %v4303_v24 = vrot.slane %v4287_v21, 6  ;;  %v4326_v35 = vsel %vm4325_vm5, %v4287_v21, -inf }
 0x444   : > { %v4327_v10 = vrot.slane %v4326_v35, 4  ;;  %v4487_v21 = vsel %vm8578_vm0, 0, %v4486_v53 }
 0x445   : > { %v4333_v39 = vsel %vm4325_vm5, %v4301_v12, -inf  ;;  %v4340_v6 = vsel %vm4325_vm5, %v4302_v56, -inf  ;;  %v4347_v31 = vsel %vm4325_vm5, %v4303_v24, -inf  ;;  %v4240_v25 = vpop.f32.mrf.mxu0  ;;  %v4508_v12 = vsel %vm8586_vm8, 0, %v4507_v48  ;;  %4488 = vst [vmem:[#allocation6 + $0x8] sm:$0x1] %v4487_v21 }
 0x446   : > { %v4328_v2 = vmax.f32 %v4326_v35, %v4327_v10  ;;  %v4334_v7 = vrot.slane %v4333_v39, 4  ;;  %v4341_v58 = vrot.slane %v4340_v6, 4  ;;  %v4348_v45 = vrot.slane %v4347_v31, 4  ;;  %v4271_v35 = vpop.f32.mrf.mxu1  ;;  %4509 = vst [vmem:[#allocation6 + $0x8] sm:$0x4] %v4508_v12 }
 0x447   : > { %v4270_v24 = vadd.f32 %v4269_v44, %v4240_v25 }
 0x448   : > { %v4329_v26 = vrot.slane %v4328_v2, 2  ;;  %v4335_v3 = vmax.f32 %v4333_v39, %v4334_v7  ;;  %v4342_v18 = vmax.f32 %v4340_v6, %v4341_v58  ;;  %v4349_v19 = vmax.f32 %v4347_v31, %v4348_v45  ;;  %v4607_v6 = vld [vmem:[#allocation6 + $0x4] sm:$0x7] }
 0x449   : > { %v4658_v31 = vsel %vm4657_vm13, %v4641_v28, %v4649_v52 }
 0x44a   : > { %v4330_v30 = vmax.f32 %v4328_v2, %v4329_v26  ;;  %v4336_v23 = vrot.slane %v4335_v3, 2  ;;  %v4343_v63 = vrot.slane %v4342_v18, 2  ;;  %v4350_v50 = vrot.slane %v4349_v19, 2 }
 0x44b   : > { %v4689_v2 = vshll.u32 %v4656_v41, 16 }
 0x44c   : > { %v4331_v4 = vrot.slane %v4330_v30, 1  ;;  %v4337_v27 = vmax.f32 %v4335_v3, %v4336_v23  ;;  %v4344_v62 = vmax.f32 %v4342_v18, %v4343_v63  ;;  %v4351_v15 = vmax.f32 %v4349_v19, %v4350_v50 }
 0x44d   : > { %v4242_v7 = vpop.f32.mrf.mxu0  ;;  %v4660_v3 = vrot.slane %v4658_v31, 2  ;;  %v4288_v18 = vsel %vm4284_vm10, %v4270_v24, -inf  ;;  %v4691_v23 = vrot.slane %v4689_v2, 7 }
 0x44e   : > { %v4332_v8 = vmax.f32 %v4330_v30, %v4331_v4  ;;  %v4338_v43 = vrot.slane %v4337_v27, 1  ;;  %v4345_v38 = vrot.slane %v4344_v62, 1  ;;  %v4352_v5 = vrot.slane %v4351_v15, 1 }
 0x44f   : > { %v4272_v45 = vadd.f32 %v4271_v35, %v4242_v7  ;;  %v4688_v30 = vrot.slane %v4686_v33, 6 }
 0x450   : > { %v4339_v51 = vmax.f32 %v4337_v27, %v4338_v43  ;;  %v4346_v1 = vmax.f32 %v4344_v62, %v4345_v38  ;;  %v4353_v57 = vmax.f32 %v4351_v15, %v4352_v5  ;;  %v4442_v40 = vadd.f32 %v8609_v54, %v4332_v8 }
 0x451   : > { %v4289_v19 = vsel %vm4284_vm10, %v4272_v45, -inf  ;;  %v4695_v15 = vshll.u32 %v4660_v3, 16  ;;  %v4692_v43 = vor.u32 %v4691_v23, %v4688_v30 }
 0x452   : > { %v4443_v14 = vadd.f32 %v8609_v54, %v4339_v51  ;;  %v4444_v42 = vadd.f32 %v8609_v54, %v4346_v1  ;;  %v4445_v16 = vadd.f32 %v8609_v54, %v4353_v57  ;;  %v4458_v60 = vmax.f32 %v4442_v40, 0.0 }
 0x453   : > { %v4290_v63 = vmax.f32 %v4288_v18, %v4289_v19  ;;  %v4274_v19 = vpop.f32.mrf.mxu1 }
 0x454   : > { %v4459_v36 = vmax.f32 %v4443_v14, 0.0  ;;  %v4460_v34 = vmax.f32 %v4444_v42, 0.0  ;;  %v4461_v13 = vmax.f32 %v4445_v16, 0.0  ;;  %v4519_v61 = vpack.c.bf16 %v4458_v60, %v4458_v60 }
 0x455   : > { %v4304_v50 = vrot.slane %v4290_v63, 2  ;;  %v4305_v4 = vrot.slane %v4290_v63, 4  ;;  %v4306_v27 = vrot.slane %v4290_v63, 6  ;;  %v4354_v62 = vsel %vm4325_vm5, %v4290_v63, -inf }
 0x456   : > { %v4520_v47 = vpack.c.bf16 %v4459_v36, %v4459_v36  ;;  %v4521_v32 = vpack.c.bf16 %v4460_v34, %v4460_v34  ;;  %v4522_v11 = vpack.c.bf16 %v4461_v13, %v4461_v13  ;;  %v4551_v20 = vunpack.c.l.b16 %v4519_v61  ;;  %v6105_v61 = vld [vmem:[%s9215_s22 + $0x38] sm:$0xff] }
 0x457   : > { %v4355_v8 = vrot.slane %v4354_v62, 4  ;;  %v4361_v38 = vsel %vm4325_vm5, %v4304_v50, -inf  ;;  %v4368_v5 = vsel %vm4325_vm5, %v4305_v4, -inf  ;;  %v4375_v51 = vsel %vm4325_vm5, %v4306_v27, -inf  ;;  %5439 = vmatpush.bf16.msra.mxu2 %v6105_v61  ;;  %v5578_v61 = vld [vmem:[%s9217_s21 + $0x18] sm:$0xff] }
 0x458   : > { %v4552_v9 = vunpack.c.l.b16 %v4520_v47  ;;  %v4553_v29 = vunpack.c.l.b16 %v4521_v32  ;;  %v4554_v55 = vunpack.c.l.b16 %v4522_v11  ;;  %v4567_v17 = vrot.slane %v4551_v20, 7 }
 0x459   : > { %v4356_v1 = vmax.f32 %v4354_v62, %v4355_v8  ;;  %v4362_v57 = vrot.slane %v4361_v38, 4  ;;  %v4369_v40 = vrot.slane %v4368_v5, 4  ;;  %v4376_v14 = vrot.slane %v4375_v51, 4 }
 0x45a   : > { %v4568_v46 = vrot.slane %v4552_v9, 6  ;;  %v4570_v37 = vrot.slane %v4553_v29, 5  ;;  %v4572_v0 = vrot.slane %v4554_v55, 4  ;;  %v4693_v34 = vrot.slane %v4692_v43, 2 }
 0x45b   : > { %v4363_v60 = vmax.f32 %v4361_v38, %v4362_v57  ;;  %v4370_v44 = vmax.f32 %v4368_v5, %v4369_v40  ;;  %v4697_v13 = vrot.slane %v4695_v15, 7  ;;  %v4357_v28 = vrot.slane %v4356_v1, 2  ;;  %v4245_v15 = vpop.f32.mrf.mxu0 }
 0x45c   : > { %v4569_v59 = vsel %vm511_vm4, %v4568_v46, %v4567_v17  ;;  %v4377_v11 = vmax.f32 %v4375_v51, %v4376_v14  ;;  %v4489_v51 = vld [vmem:[#allocation6 + $0xc] sm:$0x1] }
 0x45d   : > { %v4571_v56 = vsel %vm514_vm6, %v4570_v37, %v4569_v59  ;;  %v4364_v47 = vrot.slane %v4363_v60, 2  ;;  %v4371_v32 = vrot.slane %v4370_v44, 2  ;;  %v4698_v55 = vsel %vm8637_vm15, %v4693_v34, %v4697_v13 }
 0x45e   : > { %v4573_v10 = vsel %vm517_vm7, %v4572_v0, %v4571_v56  ;;  %v4358_v53 = vmax.f32 %v4356_v1, %v4357_v28  ;;  %v4378_v59 = vrot.slane %v4377_v11, 2  ;;  %v4510_v1 = vld [vmem:[#allocation6 + $0xc] sm:$0x4]  ;;  %v4490_v40 = vsel %vm8578_vm0, 0, %v4489_v51 }
 0x45f   : > { %v4595_v58 = vpack.c.b16 %v4573_v10, %v4573_v10  ;;  %v4365_v17 = vmax.f32 %v4363_v60, %v4364_v47  ;;  %v4372_v46 = vmax.f32 %v4370_v44, %v4371_v32  ;;  %v4511_v14 = vsel %vm8586_vm8, 0, %v4510_v1  ;;  %4491 = vst [vmem:[#allocation6 + $0xc] sm:$0x1] %v4490_v40  ;;  %v4276_v47 = vpop.f32.mrf.mxu1 }
 0x460   : > { %v4359_v0 = vrot.slane %v4358_v53, 1  ;;  %v4379_v35 = vmax.f32 %v4377_v11, %v4378_v59  ;;  %4512 = vst [vmem:[#allocation6 + $0xc] sm:$0x4] %v4511_v14  ;;  %v4275_v28 = vadd.f32 %v4274_v19, %v4245_v15 }
 0x461   : > { %v4608_v26 = vsel %vm8624_vm14, %v4595_v58, %v4607_v6  ;;  %v4366_v21 = vrot.slane %v4365_v17, 1  ;;  %v4373_v12 = vrot.slane %v4372_v46, 1 }
 0x462   : > { %4609 = vst [vmem:[#allocation6 + $0x4] sm:$0x7] %v4608_v26  ;;  %v4360_v10 = vmax.f32 %v4358_v53, %v4359_v0  ;;  %v4380_v7 = vrot.slane %v4379_v35, 1 }
 0x463   : > { %v4367_v6 = vmax.f32 %v4365_v17, %v4366_v21  ;;  %v4374_v31 = vmax.f32 %v4372_v46, %v4373_v12  ;;  %v4247_v32 = vpop.f32.mrf.mxu0 }
 0x464   : > { %v4446_v58 = vadd.f32 %v8609_v54, %v4360_v10  ;;  %v4381_v18 = vmax.f32 %v4379_v35, %v4380_v7 }
 0x465   : > { %v4447_v45 = vadd.f32 %v8609_v54, %v4367_v6  ;;  %v4448_v26 = vadd.f32 %v8609_v54, %v4374_v31  ;;  %v4762_v6 = vld [vmem:[#allocation6] sm:$0x6] }
 0x466   : > { %v4462_v30 = vmax.f32 %v4446_v58, 0.0  ;;  %v4449_v50 = vadd.f32 %v8609_v54, %v4381_v18 }
 0x467   : > { %v4463_v23 = vmax.f32 %v4447_v45, 0.0  ;;  %v4464_v63 = vmax.f32 %v4448_v26, 0.0  ;;  %v4770_v26 = vrot.slane %v4762_v6, 2 }
 0x468   : > { %v4523_v4 = vpack.c.bf16 %v4462_v30, %v4462_v30  ;;  %v4465_v8 = vmax.f32 %v4449_v50, 0.0 }
 0x469   : > { %v4620_v42 = vld [vmem:[#allocation6 + $0x4] sm:$0x3]  ;;  %v4524_v27 = vpack.c.bf16 %v4463_v23, %v4463_v23  ;;  %v4525_v62 = vpack.c.bf16 %v4464_v63, %v4464_v63  ;;  %v4776_v63 = vsel %vm4653_vm12, %v4762_v6, %v4770_v26  ;;  %v4778_v15 = vsel %vm4657_vm13, %v4762_v6, %v4770_v26 }
 0x46a   : > { %v4642_v16 = vld [vmem:[#allocation6 + $0x4] sm:$0x7]  ;;  %4627 = vst [vmem:[#allocation1 + $0x1] ss:$2 sm:$0xff] %v4620_v42  ;;  %v4555_v43 = vunpack.c.l.b16 %v4523_v4  ;;  %v4526_v57 = vpack.c.bf16 %v4465_v8, %v4465_v8  ;;  %v5965_v40 = vrot.slane %v4776_v63, 9 }
 0x46b   : > { %v4650_v36 = vrot.slane %v4642_v16, 2  ;;  %v4556_v38 = vunpack.c.l.b16 %v4524_v27  ;;  %v4557_v5 = vunpack.c.l.b16 %v4525_v62  ;;  %v4763_v31 = vld [vmem:[#allocation6 + $0x4] sm:$0x6] }
 0x46c   : > { %v4574_v42 = vrot.slane %v4555_v43, 7  ;;  %v4558_v44 = vunpack.c.l.b16 %v4526_v57  ;;  %v4771_v18 = vrot.slane %v4763_v31, 2  ;;  %v4877_v50 = vld [vmem:[#allocation6 + $0x4] sm:$0x7] }
 0x46d   : > { %v4663_v20 = vsel %vm4653_vm12, %v4642_v16, %v4650_v36  ;;  %v4664_v25 = vsel %vm4657_vm13, %v4642_v16, %v4650_v36  ;;  %v4575_v16 = vrot.slane %v4556_v38, 6  ;;  %v4577_v60 = vrot.slane %v4557_v5, 5 }
 0x46e   : > { %v4666_v52 = vrot.slane %v4664_v25, 2  ;;  %v4699_v9 = vshrl.u32 %v4663_v20, 16  ;;  %v4702_v29 = vshll.u32 %v4663_v20, 16  ;;  %v4579_v13 = vrot.slane %v4558_v44, 4  ;;  %v4610_v20 = vld [vmem:[#allocation6 + $0x8] sm:$0x7] }
 0x46f   : > { %v4576_v36 = vsel %vm511_vm4, %v4575_v16, %v4574_v42  ;;  %v4277_v25 = vadd.f32 %v4276_v47, %v4247_v32  ;;  %v4783_v8 = vsel %vm4653_vm12, %v4763_v31, %v4771_v18  ;;  %v4785_v5 = vsel %vm4657_vm13, %v4763_v31, %v4771_v18  ;;  %v8674_v16 = vld [vmem:[#allocation6 + $0x4] sm:$0x6] }
 0x470   : > { %v4701_v37 = vrot.slane %v4699_v9, 6  ;;  %v4704_v48 = vrot.slane %v4702_v29, 7  ;;  %v4708_v41 = vshll.u32 %v4666_v52, 16  ;;  %v4578_v34 = vsel %vm514_vm6, %v4577_v60, %v4576_v36 }
 0x471   : > { %v8645_v56 = vld.sshfl [vmem:[#allocation1] sm:$0xff pattern:$0x75643120]  ;;  %v4580_v11 = vsel %vm517_vm7, %v4579_v13, %v4578_v34  ;;  %v4291_v9 = vsel %vm4284_vm10, %v4275_v28, -inf  ;;  %v4292_v29 = vsel %vm4284_vm10, %v4277_v25, -inf  ;;  %v4885_v14 = vrot.slane %v4877_v50, 2 }
 0x472   : > { %v4705_v24 = vor.u32 %v4704_v48, %v4701_v37  ;;  %4739 = vst [vmem:[#allocation1] ss:$2 sm:$0xff] %v4698_v55  ;;  %v4710_v2 = vrot.slane %v4708_v41, 7  ;;  %v4596_v52 = vpack.c.b16 %v4580_v11, %v4580_v11  ;;  %v4293_v53 = vmax.f32 %v4291_v9, %v4292_v29 }
 0x473   : > { %v5966_v28 = vrot.slane %v4778_v15, 9  ;;  %v5967_v47 = vrot.slane %v4783_v8, 9  ;;  %v5968_v32 = vrot.slane %v4785_v5, 9  ;;  %4639 = vst.msk [vmem:[#allocation7] sm:$0xf] %vm4638_vm9, %v8645_v56 }
 0x474   : > { %v4706_v33 = vrot.slane %v4705_v24, 2  ;;  %v4611_v55 = vsel %vm8624_vm14, %v4596_v52, %v4610_v20  ;;  %v4307_v17 = vrot.slane %v4293_v53, 2  ;;  %v4308_v46 = vrot.slane %v4293_v53, 4 }
 0x475   : > { %4612 = vst [vmem:[#allocation6 + $0x8] sm:$0x7] %v4611_v55  ;;  %v4309_v37 = vrot.slane %v4293_v53, 6  ;;  %v4382_v48 = vsel %vm4325_vm5, %v4293_v53, -inf  ;;  %v4990_v55 = vrot.slane %v8674_v16, 2 }
 0x476   : > { %v4711_v3 = vsel %vm8637_vm15, %v4706_v33, %v4710_v2  ;;  %v4383_v41 = vrot.slane %v4382_v48, 4  ;;  %v4389_v59 = vsel %vm4325_vm5, %v4307_v17, -inf  ;;  %v4396_v0 = vsel %vm4325_vm5, %v4308_v46, -inf }
 0x477   : > { %4742 = vst [vmem:[#allocation1 + $0x1] ss:$2 sm:$0xff] %v4711_v3  ;;  %v4403_v21 = vsel %vm4325_vm5, %v4309_v37, -inf  ;;  %v4390_v24 = vrot.slane %v4389_v59, 4  ;;  %v4397_v35 = vrot.slane %v4396_v0, 4  ;;  %v4891_v46 = vsel %vm4653_vm12, %v4877_v50, %v4885_v14 }
 0x478   : > { %v4384_v12 = vmax.f32 %v4382_v48, %v4383_v41  ;;  %v4404_v10 = vrot.slane %v4403_v21, 4  ;;  %v8693_v37 = vsel %vm4657_vm13, %v4877_v50, %v4885_v14  ;;  %v4279_v48 = vpop.f32.mrf.mxu1  ;;  %v4916_v15 = vshll.u32 %v4891_v46, 16 }
 0x479   : > { %v4391_v2 = vmax.f32 %v4389_v59, %v4390_v24  ;;  %v4398_v7 = vmax.f32 %v4396_v0, %v4397_v35 }
 0x47a   : > { %v4385_v33 = vrot.slane %v4384_v12, 2  ;;  %v4405_v58 = vmax.f32 %v4403_v21, %v4404_v10  ;;  %v4816_v10 = vsel %vm8680_vm3, %v5967_v47, %v5968_v32  ;;  %v4613_v47 = vld [vmem:[#allocation6 + $0xc] sm:$0x7] }
 0x47b   : > { %v4392_v19 = vrot.slane %v4391_v2, 2  ;;  %v4399_v30 = vrot.slane %v4398_v7, 2 }
 0x47c   : > { %v4621_v45 = vld [vmem:[#allocation6 + $0x8] sm:$0x3]  ;;  %v4386_v3 = vmax.f32 %v4384_v12, %v4385_v33  ;;  %v4406_v23 = vrot.slane %v4405_v58, 2 }
 0x47d   : > { %4630 = vst [vmem:[#allocation1 + $0x10] ss:$2 sm:$0xff] %v4621_v45  ;;  %v4393_v27 = vmax.f32 %v4391_v2, %v4392_v19  ;;  %v4400_v62 = vmax.f32 %v4398_v7, %v4399_v30  ;;  %v4643_v43 = vld [vmem:[#allocation6 + $0x8] sm:$0x7]  ;;  %v4250_v7 = vpop.f32.mrf.mxu0 }
 0x47e   : > { %v4387_v4 = vrot.slane %v4386_v3, 1  ;;  %v4407_v38 = vmax.f32 %v4405_v58, %v4406_v23  ;;  %v4651_v60 = vrot.slane %v4643_v43, 2  ;;  %v8676_v44 = vld [vmem:[#allocation6 + $0x8] sm:$0x7]  ;;  %v4812_v58 = vsel %vm8680_vm3, %v5965_v40, %v5966_v28 }
 0x47f   : > { %v4394_v1 = vrot.slane %v4393_v27, 1  ;;  %v4401_v57 = vrot.slane %v4400_v62, 1  ;;  %v8684_v25 = vld [vmem:[#allocation6 + $0x8] sm:$0x6]  ;;  %v4886_v53 = vrot.slane %v8676_v44, 2  ;;  %v4913_v23 = vshrl.u32 %v4891_v46, 16 }
 0x480   : > { %v4388_v51 = vmax.f32 %v4386_v3, %v4387_v4  ;;  %v4408_v42 = vrot.slane %v4407_v38, 1  ;;  %v4669_v41 = vsel %vm4653_vm12, %v4643_v43, %v4651_v60  ;;  %v4670_v12 = vsel %vm4657_vm13, %v4643_v43, %v4651_v60  ;;  %v4749_v2 = vld.sshfl [vmem:[#allocation1] sm:$0xff pattern:$0x75643120]  ;;  %v4281_v28 = vpop.f32.mrf.mxu1 }
 0x481   : > { %v4395_v36 = vmax.f32 %v4393_v27, %v4394_v1  ;;  %v4402_v34 = vmax.f32 %v4400_v62, %v4401_v57  ;;  %v4772_v24 = vrot.slane %v8684_v25, 2  ;;  %v4712_v45 = vshrl.u32 %v4669_v41, 16  ;;  %4753 = vrot.lane.b32.xlu1 %v4749_v2, %s6295_s15  ;;  %4826 = vst [vmem:[#allocation1] ss:$2 sm:$0xff] %v4812_v58  ;;  %v4492_v27 = vld [vmem:[#allocation6 + $0x10] sm:$0x1] }
 0x482   : > { %v4450_v13 = vadd.f32 %v8609_v54, %v4388_v51  ;;  %v4409_v11 = vmax.f32 %v4407_v38, %v4408_v42  ;;  %v4715_v26 = vshll.u32 %v4669_v41, 16  ;;  %4829 = vst [vmem:[#allocation1 + $0x1] ss:$2 sm:$0xff] %v4816_v10  ;;  %v4897_v30 = vsel %vm4653_vm12, %v8676_v44, %v4886_v53  ;;  %v4513_v62 = vld [vmem:[#allocation6 + $0x10] sm:$0x4] }
 0x483   : > { %v4451_v52 = vadd.f32 %v8609_v54, %v4395_v36  ;;  %v4452_v9 = vadd.f32 %v8609_v54, %v4402_v34  ;;  %v8707_v63 = vsel %vm4653_vm12, %v8684_v25, %v4772_v24  ;;  %v4493_v38 = vsel %vm8578_vm0, 0, %v4492_v27 }
 0x484   : > { %v4466_v29 = vmax.f32 %v4450_v13, 0.0  ;;  %v4453_v17 = vadd.f32 %v8609_v54, %v4409_v11  ;;  %v4514_v5 = vsel %vm8586_vm8, 0, %v4513_v62  ;;  %v4714_v51 = vrot.slane %v4712_v45, 6  ;;  %4494 = vst [vmem:[#allocation6 + $0x10] sm:$0x1] %v4493_v38 }
 0x485   : > { %v4467_v59 = vmax.f32 %v4451_v52, 0.0  ;;  %v4468_v0 = vmax.f32 %v4452_v9, 0.0  ;;  %v4717_v1 = vrot.slane %v4715_v26, 7  ;;  %v4926_v57 = vshrl.u32 %v4897_v30, 16  ;;  %4515 = vst [vmem:[#allocation6 + $0x10] sm:$0x4] %v4514_v5  ;;  %v4252_v32 = vpop.f32.mrf.mxu0 }
 0x486   : > { %v4527_v21 = vpack.c.bf16 %v4466_v29, %v4466_v29  ;;  %v4469_v35 = vmax.f32 %v4453_v17, 0.0  ;;  %v4929_v40 = vshll.u32 %v4897_v30, 16  ;;  %v4672_v14 = vrot.slane %v4670_v12, 2 }
 0x487   : > { %v4528_v6 = vpack.c.bf16 %v4467_v59, %v4467_v59  ;;  %v4529_v31 = vpack.c.bf16 %v4468_v0, %v4468_v0  ;;  %v4898_v49 = vsel %vm4657_vm13, %v8676_v44, %v4886_v53  ;;  %v4280_v22 = vadd.f32 %v4279_v48, %v4250_v7  ;;  %v4849_v59 = vld [vmem:[#allocation6 + $0x4] sm:$0x3]  ;;  %v4850_v0 = vld [vmem:[#allocation6 + $0x8] sm:$0x3] }
 0x488   : > { %v4559_v33 = vunpack.c.l.b16 %v4527_v21  ;;  %v4530_v3 = vpack.c.bf16 %v4469_v35, %v4469_v35  ;;  %v4915_v34 = vrot.slane %v4913_v23, 6  ;;  %v4918_v13 = vrot.slane %v4916_v15, 7 }
 0x489   : > { %v4560_v18 = vunpack.c.l.b16 %v4528_v6  ;;  %v4561_v19 = vunpack.c.l.b16 %v4529_v31  ;;  %v4894_v11 = vrot.slane %v8693_v37, 2  ;;  %v4928_v52 = vrot.slane %v4926_v57, 6  ;;  %v4836_v46 = vld.sshfl [vmem:[#allocation1] sm:$0xff pattern:$0x75643120] }
 0x48a   : > { %v4562_v50 = vunpack.c.l.b16 %v4530_v3  ;;  %v4581_v4 = vrot.slane %v4559_v33, 7  ;;  %v4931_v9 = vrot.slane %v4929_v40, 7  ;;  %v4718_v29 = vor.u32 %v4717_v1, %v4714_v51  ;;  %4840 = vrot.lane.b32.xlu0 %v4836_v46, %s6299_s4  ;;  %4854 = vst [vmem:[#allocation1] ss:$2 sm:$0xff] %v4849_v59  ;;  %v4983_v31 = vld [vmem:[#allocation6 + $0x8] sm:$0x6] }
 0x48b   : > { %v4582_v8 = vrot.slane %v4560_v18, 6  ;;  %v4584_v43 = vrot.slane %v4561_v19, 5  ;;  %v4282_v41 = vadd.f32 %v4281_v28, %v4252_v32  ;;  %v4900_v44 = vrot.slane %v4898_v49, 2  ;;  %4857 = vst [vmem:[#allocation1 + $0x1] ss:$2 sm:$0xff] %v4850_v0 }
 0x48c   : > { %v4586_v60 = vrot.slane %v4562_v50, 4  ;;  %v4721_v53 = vshll.u32 %v4672_v14, 16  ;;  %v8723_v48 = vsel %vm4657_vm13, %v8684_v25, %v4772_v24  ;;  %v8730_v37 = vsel %vm4653_vm12, %v8674_v16, %v4990_v55 }
 0x48d   : > { %v4583_v42 = vsel %vm511_vm4, %v4582_v8, %v4581_v4  ;;  %v4294_v12 = vsel %vm4284_vm10, %v4280_v22, -inf  ;;  %v4295_v35 = vsel %vm4284_vm10, %v4282_v41, -inf  ;;  %v4919_v25 = vor.u32 %v4918_v13, %v4915_v34 }
 0x48e   : > { %v4585_v36 = vsel %vm514_vm6, %v4584_v43, %v4583_v42  ;;  %v5969_v24 = vrot.slane %v8707_v63, 9  ;;  %v4296_v10 = vmax.f32 %v4294_v12, %v4295_v35  ;;  %v4932_v6 = vor.u32 %v4931_v9, %v4928_v52 }
 0x48f   : > { %v4587_v56 = vsel %vm517_vm7, %v4586_v60, %v4585_v36  ;;  %v4998_v33 = vsel %vm4657_vm13, %v8674_v16, %v4990_v55  ;;  %v4719_v2 = vrot.slane %v4718_v29, 2  ;;  %v5970_v7 = vrot.slane %v8723_v48, 9 }
 0x490   : > { %v4597_v17 = vpack.c.b16 %v4587_v56, %v4587_v56  ;;  %v4922_v58 = vshll.u32 %v4894_v11, 16  ;;  %v4935_v45 = vshll.u32 %v4900_v44, 16  ;;  %v4310_v26 = vrot.slane %v4296_v10, 2 }
 0x491   : > { %v4311_v3 = vrot.slane %v4296_v10, 4  ;;  %v4312_v18 = vrot.slane %v4296_v10, 6  ;;  %v4410_v19 = vsel %vm4325_vm5, %v4296_v10, -inf  ;;  %v4723_v30 = vrot.slane %v4721_v53, 7 }
 0x492   : > { %v4614_v21 = vsel %vm8624_vm14, %v4597_v17, %v4613_v47  ;;  %v4411_v23 = vrot.slane %v4410_v19, 4  ;;  %v4920_v50 = vrot.slane %v4919_v25, 2  ;;  %v4991_v4 = vrot.slane %v4983_v31, 2  ;;  %v4864_v51 = vld.sshfl [vmem:[#allocation1] sm:$0xff pattern:$0x75643120] }
 0x493   : > { %4615 = vst [vmem:[#allocation6 + $0xc] sm:$0x7] %v4614_v21  ;;  %v4417_v27 = vsel %vm4325_vm5, %v4310_v26, -inf  ;;  %v4424_v62 = vsel %vm4325_vm5, %v4311_v3, -inf  ;;  %v4431_v16 = vsel %vm4325_vm5, %v4312_v18, -inf  ;;  %v4933_v55 = vrot.slane %v4932_v6, 2  ;;  %4868 = vrot.lane.b32.xlu2 %v4864_v51, %s6296_s25 }
 0x494   : > { %v4412_v15 = vmax.f32 %v4410_v19, %v4411_v23  ;;  %v4418_v8 = vrot.slane %v4417_v27, 4  ;;  %v4425_v43 = vrot.slane %v4424_v62, 4  ;;  %v4432_v38 = vrot.slane %v4431_v16, 4  ;;  %v5089_v47 = vld [vmem:[#allocation6 + $0x8] sm:$0x7] }
 0x495   : > { %v4724_v5 = vsel %vm8637_vm15, %v4719_v2, %v4723_v30  ;;  %v4924_v1 = vrot.slane %v4922_v58, 7  ;;  %v4937_v57 = vrot.slane %v4935_v45, 7  ;;  %v5973_v40 = vrot.slane %v8730_v37, 9 }
 0x496   : > { %v4419_v60 = vmax.f32 %v4417_v27, %v4418_v8  ;;  %v4426_v49 = vmax.f32 %v4424_v62, %v4425_v43  ;;  %v5003_v36 = vsel %vm4653_vm12, %v4983_v31, %v4991_v4  ;;  %v5005_v22 = vsel %vm4657_vm13, %v4983_v31, %v4991_v4 }
 0x497   : > { %v4925_v13 = vsel %vm8637_vm15, %v4920_v50, %v4924_v1  ;;  %v4938_v28 = vsel %vm8637_vm15, %v4933_v55, %v4937_v57  ;;  %v5974_v56 = vrot.slane %v4998_v33, 9  ;;  %v4413_v32 = vrot.slane %v4412_v15, 2 }
 0x498   : > { %v4420_v11 = vrot.slane %v4419_v60, 2  ;;  %v4427_v52 = vrot.slane %v4426_v49, 2  ;;  %v4433_v9 = vmax.f32 %v4431_v16, %v4432_v38  ;;  %4966 = vst [vmem:[#allocation1] ss:$2 sm:$0xff] %v4925_v13  ;;  %v5975_v46 = vrot.slane %v5003_v36, 9 }
 0x499   : > { %4969 = vst [vmem:[#allocation1 + $0x1] ss:$2 sm:$0xff] %v4938_v28  ;;  %v5976_v41 = vrot.slane %v5005_v22, 9  ;;  %v5097_v0 = vrot.slane %v5089_v47, 2  ;;  %v4414_v37 = vmax.f32 %v4412_v15, %v4413_v32  ;;  %v5025_v35 = vsel %vm8680_vm3, %v5973_v40, %v5974_v56 }
 0x49a   : > { %v4622_v14 = vld [vmem:[#allocation6 + $0xc] sm:$0x3]  ;;  %v4421_v21 = vmax.f32 %v4419_v60, %v4420_v11  ;;  %v4428_v12 = vmax.f32 %v4426_v49, %v4427_v52  ;;  %v4434_v2 = vrot.slane %v4433_v9, 2  ;;  %vm4846_vm0 = vcmask 781824  }
 0x49b   : > { %v4644_v42 = vld [vmem:[#allocation6 + $0xc] sm:$0x7]  ;;  %4633 = vst [vmem:[#allocation1 + $0x11] ss:$2 sm:$0xff] %v4622_v14  ;;  %v4415_v58 = vrot.slane %v4414_v37, 1  ;;  %v5029_v3 = vsel %vm8680_vm3, %v5975_v46, %v5976_v41  ;;  %v5103_v50 = vsel %vm4653_vm12, %v5089_v47, %v5097_v0  ;;  %v8764_v38 = vsel %vm4657_vm13, %v5089_v47, %v5097_v0 }
 0x49c   : > { %v4652_v34 = vrot.slane %v4644_v42, 2  ;;  %v5090_v25 = vld [vmem:[#allocation6 + $0xc] sm:$0x7]  ;;  %v4422_v45 = vrot.slane %v4421_v21, 1  ;;  %v4429_v26 = vrot.slane %v4428_v12, 1  ;;  %v4435_v30 = vmax.f32 %v4433_v9, %v4434_v2 }
 0x49d   : > { %v4765_v33 = vld [vmem:[#allocation6 + $0xc] sm:$0x6]  ;;  %v5098_v23 = vrot.slane %v5090_v25, 2  ;;  %v4416_v27 = vmax.f32 %v4414_v37, %v4415_v58  ;;  %v5128_v60 = vshll.u32 %v5103_v50, 16  ;;  %v5106_v9 = vrot.slane %v8764_v38, 2 }
 0x49e   : > { %v4675_v29 = vsel %vm4653_vm12, %v4644_v42, %v4652_v34  ;;  %v4676_v17 = vsel %vm4657_vm13, %v4644_v42, %v4652_v34  ;;  %v4773_v4 = vrot.slane %v4765_v33, 2  ;;  %v4423_v62 = vmax.f32 %v4421_v21, %v4422_v45  ;;  %v5062_v21 = vld [vmem:[#allocation6 + $0x8] sm:$0x3]  ;;  %v5063_v48 = vld [vmem:[#allocation6 + $0xc] sm:$0x3] }
 0x49f   : > { %v4678_v59 = vrot.slane %v4676_v17, 2  ;;  %v4725_v44 = vshrl.u32 %v4675_v29, 16  ;;  %v4728_v53 = vshll.u32 %v4675_v29, 16  ;;  %v4430_v16 = vmax.f32 %v4428_v12, %v4429_v26 }
 0x4a0   : > { %v4436_v8 = vrot.slane %v4435_v30, 1  ;;  %v4976_v43 = vld.sshfl [vmem:[#allocation1] sm:$0xff pattern:$0x75643120]  ;;  %v4454_v51 = vadd.f32 %v8609_v54, %v4416_v27  ;;  %v4455_v1 = vadd.f32 %v8609_v54, %v4423_v62  ;;  %v5109_v40 = vsel %vm4653_vm12, %v5090_v25, %v5098_v23 }
 0x4a1   : > { %v4727_v10 = vrot.slane %v4725_v44, 6  ;;  %v4730_v6 = vrot.slane %v4728_v53, 7  ;;  %v4734_v31 = vshll.u32 %v4678_v59, 16  ;;  %v4456_v57 = vadd.f32 %v8609_v54, %v4430_v16  ;;  %5039 = vst [vmem:[#allocation1] ss:$2 sm:$0xff] %v5025_v35 }
 0x4a2   : > { %v4635_v18 = vld.sshfl [vmem:[#allocation1 + $0x10] sm:$0xff pattern:$0x75643120]  ;;  %v4437_v14 = vmax.f32 %v4435_v30, %v4436_v8  ;;  %5042 = vst [vmem:[#allocation1 + $0x1] ss:$2 sm:$0xff] %v5029_v3  ;;  %v5125_v42 = vshrl.u32 %v5103_v50, 16  ;;  %v4797_v49 = vsel %vm4653_vm12, %v4765_v33, %v4773_v4  ;;  %v4799_v13 = vsel %vm4657_vm13, %v4765_v33, %v4773_v4 }
 0x4a3   : > { %v4731_v19 = vor.u32 %v4730_v6, %v4727_v10  ;;  %4745 = vst [vmem:[#allocation1 + $0x10] ss:$2 sm:$0xff] %v4724_v5  ;;  %v4736_v15 = vrot.slane %v4734_v31, 7  ;;  %v4470_v36 = vmax.f32 %v4454_v51, 0.0  ;;  %v4471_v22 = vmax.f32 %v4455_v1, 0.0 }
 0x4a4   : > { %v4472_v34 = vmax.f32 %v4456_v57, 0.0  ;;  %v4457_v28 = vadd.f32 %v8609_v54, %v4437_v14  ;;  %v5138_v56 = vshrl.u32 %v5109_v40, 16  ;;  %v5141_v47 = vshll.u32 %v5109_v40, 16  ;;  %4640 = vst.msk [vmem:[#allocation7 + $0xc] sm:$0xf] %vm4638_vm9, %v4635_v18 }
 0x4a5   : > { %v4732_v55 = vrot.slane %v4731_v19, 2  ;;  %v4531_v32 = vpack.c.bf16 %v4470_v36, %v4470_v36  ;;  %v4532_v11 = vpack.c.bf16 %v4471_v22, %v4471_v22  ;;  %4980 = vst.msk [vmem:[#allocation7 + $0x4] sm:$0xf] %vm4638_vm9, %v4976_v43  ;;  %v5971_v29 = vrot.slane %v4797_v49, 9  ;;  %v4879_v44 = vld [vmem:[#allocation6 + $0xc] sm:$0x7] }
 0x4a6   : > { %v4533_v52 = vpack.c.bf16 %v4472_v34, %v4472_v34  ;;  %v4473_v17 = vmax.f32 %v4457_v28, 0.0  ;;  %v5127_v46 = vrot.slane %v5125_v42, 6  ;;  %v5130_v41 = vrot.slane %v5128_v60, 7  ;;  %v5201_v1 = vld [vmem:[#allocation6 + $0xc] sm:$0x6] }
 0x4a7   : > { %v4737_v5 = vsel %vm8637_vm15, %v4732_v55, %v4736_v15  ;;  %v5972_v59 = vrot.slane %v4799_v13, 9  ;;  %v4563_v53 = vunpack.c.l.b16 %v4531_v32  ;;  %v4564_v0 = vunpack.c.l.b16 %v4532_v11  ;;  %v5200_v55 = vld [vmem:[#allocation6 + $0x8] sm:$0x6]  ;;  %v4851_v14 = vld [vmem:[#allocation6 + $0xc] sm:$0x3] }
 0x4a8   : > { %4748 = vst [vmem:[#allocation1 + $0x11] ss:$2 sm:$0xff] %v4737_v5  ;;  %v4565_v54 = vunpack.c.l.b16 %v4533_v52  ;;  %v4534_v37 = vpack.c.bf16 %v4473_v17, %v4473_v17  ;;  %v5110_v12 = vsel %vm4657_vm13, %v5090_v25, %v5098_v23  ;;  %v5140_v35 = vrot.slane %v5138_v56, 6 }
 0x4a9   : > { %v5143_v10 = vrot.slane %v5141_v47, 7  ;;  %v4588_v6 = vrot.slane %v4563_v53, 7  ;;  %v4589_v31 = vrot.slane %v4564_v0, 6  ;;  %v5049_v2 = vld.sshfl [vmem:[#allocation1] sm:$0xff pattern:$0x75643120]  ;;  %v4820_v3 = vsel %vm8680_vm3, %v5969_v24, %v5970_v7 }
 0x4aa   : > { %v4591_v33 = vrot.slane %v4565_v54, 5  ;;  %v4887_v58 = vrot.slane %v4879_v44, 2  ;;  %v4566_v45 = vunpack.c.l.b16 %v4534_v37  ;;  %5067 = vst [vmem:[#allocation1] ss:$2 sm:$0xff] %v5062_v21  ;;  %v4824_v25 = vsel %vm8680_vm3, %v5971_v29, %v5972_v59  ;;  %v4616_v7 = vld [vmem:[#allocation6 + $0x10] sm:$0x7] }
 0x4ab   : > { %v4590_v18 = vsel %vm511_vm4, %v4589_v31, %v4588_v6  ;;  %v5112_v19 = vrot.slane %v5110_v12, 2  ;;  %v5131_v50 = vor.u32 %v5130_v41, %v5127_v46  ;;  %5070 = vst [vmem:[#allocation1 + $0x1] ss:$2 sm:$0xff] %v5063_v48  ;;  %v5144_v63 = vor.u32 %v5143_v10, %v5140_v35  ;;  %v4984_v6 = vld [vmem:[#allocation6 + $0xc] sm:$0x6] }
 0x4ac   : > { %v4592_v30 = vsel %vm514_vm6, %v4591_v33, %v4590_v18  ;;  %v4593_v23 = vrot.slane %v4566_v45, 4  ;;  %v5134_v4 = vshll.u32 %v5106_v9, 16  ;;  %v4903_v27 = vsel %vm4653_vm12, %v4879_v44, %v4887_v58 }
 0x4ad   : > { %v5147_v16 = vshll.u32 %v5112_v19, 16  ;;  %v5132_v15 = vrot.slane %v5131_v50, 2  ;;  %v5145_v43 = vrot.slane %v5144_v63, 2  ;;  %v4939_v38 = vshrl.u32 %v4903_v27, 16  ;;  %v5092_v63 = vld [vmem:[#allocation6 + $0x14] sm:$0x7] }
 0x4ae   : > { %v4594_v24 = vsel %vm517_vm7, %v4593_v23, %v4592_v30  ;;  %v4942_v51 = vshll.u32 %v4903_v27, 16  ;;  %v5136_v57 = vrot.slane %v5134_v4, 7  ;;  %v5208_v40 = vrot.slane %v5200_v55, 2 }
 0x4af   : > { %v4751_v26 = vld.sshfl [vmem:[#allocation1 + $0x10] sm:$0xff pattern:$0x75643120]  ;;  %v4598_v62 = vpack.c.b16 %v4594_v24, %v4594_v24  ;;  %v5149_v42 = vrot.slane %v5147_v16, 7  ;;  %v4904_v60 = vsel %vm4657_vm13, %v4879_v44, %v4887_v58  ;;  %v5209_v36 = vrot.slane %v5201_v1, 2 }
 0x4b0   : > { %4755 = vrot.lane.b32.xlu2 %v4751_v26, %s6295_s15  ;;  %4832 = vst [vmem:[#allocation1 + $0x10] ss:$2 sm:$0xff] %v4820_v3  ;;  %v5137_v39 = vsel %vm8637_vm15, %v5132_v15, %v5136_v57  ;;  %v4941_v34 = vrot.slane %v4939_v38, 6  ;;  %v4944_v13 = vrot.slane %v4942_v51, 7  ;;  %v4906_v28 = vrot.slane %v4904_v60, 2 }
 0x4b1   : > { %4835 = vst [vmem:[#allocation1 + $0x11] ss:$2 sm:$0xff] %v4824_v25  ;;  %v4617_v8 = vsel %vm8624_vm14, %v4598_v62, %v4616_v7  ;;  %v5150_v22 = vsel %vm8637_vm15, %v5145_v43, %v5149_v42  ;;  %v5214_v56 = vsel %vm4653_vm12, %v5200_v55, %v5208_v40  ;;  %v5216_v47 = vsel %vm4657_vm13, %v5200_v55, %v5208_v40 }
 0x4b2   : > { %4618 = vst [vmem:[#allocation6 + $0x10] sm:$0x7] %v4617_v8  ;;  %v8796_v49 = vld.sshfl [vmem:[#allocation1] sm:$0xff pattern:$0x75643120]  ;;  %v5221_v32 = vsel %vm4653_vm12, %v5201_v1, %v5209_v36  ;;  %v5223_v11 = vsel %vm4657_vm13, %v5201_v1, %v5209_v36  ;;  %v4945_v29 = vor.u32 %v4944_v13, %v4941_v34  ;;  %v4948_v46 = vshll.u32 %v4906_v28, 16 }
 0x4b3   : > { %5178 = vst [vmem:[#allocation1] ss:$2 sm:$0xff] %v5137_v39  ;;  %v5981_v41 = vrot.slane %v5214_v56, 9  ;;  %v5982_v59 = vrot.slane %v5216_v47, 9  ;;  %v5983_v44 = vrot.slane %v5221_v32, 9  ;;  %v5984_v53 = vrot.slane %v5223_v11, 9 }
 0x4b4   : > { %5181 = vst [vmem:[#allocation1 + $0x1] ss:$2 sm:$0xff] %v5150_v22  ;;  %v4946_v21 = vrot.slane %v4945_v29, 2  ;;  %v4950_v10 = vrot.slane %v4948_v46, 7  ;;  %v4992_v30 = vrot.slane %v4984_v6, 2  ;;  %v5100_v55 = vrot.slane %v5092_v63, 2 }
 0x4b5   : > { %v5243_v33 = vsel %vm8680_vm3, %v5981_v41, %v5982_v59  ;;  %v5065_v11 = vld [vmem:[#allocation6 + $0x14] sm:$0x3]  ;;  %vm4759_vm7 = vcmask 519424   ;;  %vm4874_vm8 = vcmask 1044224   ;;  %vm5487_vm5 = vcmask 519168  }
 0x4b6   : > { %v4951_v25 = vsel %vm8637_vm15, %v4946_v21, %v4950_v10  ;;  %v5010_v4 = vsel %vm4653_vm12, %v4984_v6, %v4992_v30  ;;  %v5012_v27 = vsel %vm4657_vm13, %v4984_v6, %v4992_v30  ;;  %v5121_v57 = vsel %vm4653_vm12, %v5092_v63, %v5100_v55 }
 0x4b7   : > { %v5977_v43 = vrot.slane %v5010_v4, 9  ;;  %v5978_v38 = vrot.slane %v5012_v27, 9  ;;  %v5164_v60 = vshrl.u32 %v5121_v57, 16  ;;  %v5167_v39 = vshll.u32 %v5121_v57, 16  ;;  %v6103_v4 = vld [vmem:[%s9215_s22 + $0x28] sm:$0xff]  ;;  %v6102_v27 = vld [vmem:[%s9215_s22 + $0x20] sm:$0xff] }
 0x4b8   : > { %v4838_v5 = vld.sshfl [vmem:[#allocation1 + $0x10] sm:$0xff pattern:$0x75643120]  ;;  %v5122_v36 = vsel %vm4657_vm13, %v5092_v63, %v5100_v55  ;;  %v6099_v55 = vld [vmem:[%s9215_s22 + $0x8] sm:$0xff]  ;;  %vm5508_vm14 = vcmask 517120  }
 0x4b9   : > { %4842 = vrot.lane.b32.xlu1 %v4838_v5, %s6299_s4  ;;  %4860 = vst [vmem:[#allocation1 + $0x10] ss:$2 sm:$0xff] %v4851_v14  ;;  %v4880_v52 = vld [vmem:[#allocation6 + $0x10] sm:$0x7]  ;;  %v5033_v14 = vsel %vm8680_vm3, %v5977_v43, %v5978_v38  ;;  %v5124_v13 = vrot.slane %v5122_v36, 2  ;;  %v5166_v28 = vrot.slane %v5164_v60, 6 }
 0x4ba   : > { %v4852_v9 = vld [vmem:[#allocation6 + $0x10] sm:$0x3]  ;;  %v4888_v17 = vrot.slane %v4880_v52, 2  ;;  %v5169_v56 = vrot.slane %v5167_v39, 7  ;;  %v6112_v38 = vld [vmem:[%s9215_s22 + $0x70] sm:$0xff] }
 0x4bb   : > { %4863 = vst [vmem:[#allocation1 + $0x11] ss:$2 sm:$0xff] %v4852_v9  ;;  %v8809_v31 = vld.sshfl [vmem:[#allocation1] sm:$0xff pattern:$0x75643120]  ;;  %v5173_v46 = vshll.u32 %v5124_v13, 16 }
 0x4bc   : > { %v4909_v0 = vsel %vm4653_vm12, %v4880_v52, %v4888_v17  ;;  %v4910_v54 = vsel %vm4657_vm13, %v4880_v52, %v4888_v17  ;;  %5257 = vst [vmem:[#allocation1] ss:$2 sm:$0xff] %v5243_v33  ;;  %v4985_v3 = vld [vmem:[#allocation6 + $0x10] sm:$0x6]  ;;  %v5170_v17 = vor.u32 %v5169_v56, %v5166_v28  ;;  %v6108_v39 = vld [vmem:[%s9215_s22 + $0x50] sm:$0xff]  ;;  %v6106_v56 = vld [vmem:[%s9215_s22 + $0x40] sm:$0xff] }
 0x4bd   : > { %v4912_v37 = vrot.slane %v4910_v54, 2  ;;  %v4952_v12 = vshrl.u32 %v4909_v0, 16  ;;  %v4955_v35 = vshll.u32 %v4909_v0, 16  ;;  %v4993_v50 = vrot.slane %v4985_v3, 2  ;;  %v5091_v7 = vld [vmem:[#allocation6 + $0x10] sm:$0x7] }
 0x4be   : > { %v5099_v8 = vrot.slane %v5091_v7, 2  ;;  %v5064_v29 = vld [vmem:[#allocation6 + $0x10] sm:$0x3]  ;;  %v5175_v0 = vrot.slane %v5173_v46, 7 }
 0x4bf   : > { %v4954_v58 = vrot.slane %v4952_v12, 6  ;;  %v4957_v45 = vrot.slane %v4955_v35, 7  ;;  %v4961_v26 = vshll.u32 %v4912_v37, 16  ;;  %v5017_v62 = vsel %vm4653_vm12, %v4985_v3, %v4993_v50  ;;  %v5202_v54 = vld [vmem:[#allocation6 + $0x10] sm:$0x6] }
 0x4c0   : > { %v5019_v16 = vsel %vm4657_vm13, %v4985_v3, %v4993_v50  ;;  %v5979_v51 = vrot.slane %v5017_v62, 9  ;;  %v5115_v40 = vsel %vm4653_vm12, %v5091_v7, %v5099_v8  ;;  %v5116_v34 = vsel %vm4657_vm13, %v5091_v7, %v5099_v8  ;;  %v6101_v62 = vld [vmem:[%s9215_s22 + $0x18] sm:$0xff]  ;;  %v6115_v43 = vld [vmem:[%s9215_s22 + $0x88] sm:$0xff] }
 0x4c1   : > { %5053 = vrot.lane.b32.xlu1 %v5049_v2, %s6295_s15  ;;  %v5247_v2 = vsel %vm8680_vm3, %v5983_v44, %v5984_v53  ;;  %v4958_v19 = vor.u32 %v4957_v45, %v4954_v58  ;;  %v4963_v48 = vrot.slane %v4961_v26, 7  ;;  %v5980_v1 = vrot.slane %v5019_v16, 9  ;;  %v5203_v44 = vld [vmem:[#allocation6 + $0x14] sm:$0x6]  ;;  %v6100_v16 = vld [vmem:[%s9215_s22 + $0x10] sm:$0xff]  ;;  %v6113_v8 = vld [vmem:[%s9215_s22 + $0x78] sm:$0xff] }
 0x4c2   : > { %5260 = vst [vmem:[#allocation1 + $0x1] ss:$2 sm:$0xff] %v5247_v2  ;;  %v4866_v18 = vld.sshfl [vmem:[#allocation1 + $0x10] sm:$0xff pattern:$0x75643120]  ;;  %v5154_v22 = vshll.u32 %v5115_v40, 16  ;;  %5453 = vmatpush.bf16.msra.mxu3 %v6113_v8 }
 0x4c3   : > { %4870 = vrot.lane.b32.xlu0 %v4866_v18, %s6296_s25  ;;  %4972 = vst [vmem:[#allocation1 + $0x10] ss:$2 sm:$0xff] %v4951_v25  ;;  %v4959_v23 = vrot.slane %v4958_v19, 2  ;;  %v5037_v42 = vsel %vm8680_vm3, %v5979_v51, %v5980_v1  ;;  %v5118_v52 = vrot.slane %v5116_v34, 2  ;;  %v5171_v53 = vrot.slane %v5170_v17, 2  ;;  %v6114_v51 = vld [vmem:[%s9215_s22 + $0x80] sm:$0xff] }
 0x4c4   : > { %v5156_v32 = vrot.slane %v5154_v22, 7  ;;  %v5211_v21 = vrot.slane %v5203_v44, 2  ;;  %v5210_v35 = vrot.slane %v5202_v54, 2  ;;  %v6111_v1 = vld [vmem:[%s9215_s22 + $0x68] sm:$0xff]  ;;  %v5575_v8 = vld [vmem:[%s9217_s21] sm:$0xff] }
 0x4c5   : > { %v4964_v24 = vsel %vm8637_vm15, %v4959_v23, %v4963_v48  ;;  %v5160_v59 = vshll.u32 %v5118_v52, 16  ;;  %v5176_v10 = vsel %vm8637_vm15, %v5171_v53, %v5175_v0  ;;  %v6104_v48 = vld [vmem:[%s9215_s22 + $0x30] sm:$0xff]  ;;  %v6107_v34 = vld [vmem:[%s9215_s22 + $0x48] sm:$0xff] }
 0x4c6   : > { %4975 = vst [vmem:[#allocation1 + $0x11] ss:$2 sm:$0xff] %v4964_v24  ;;  %v5235_v58 = vsel %vm4653_vm12, %v5203_v44, %v5211_v21  ;;  %v5237_v45 = vsel %vm4657_vm13, %v5203_v44, %v5211_v21  ;;  %v5228_v26 = vsel %vm4653_vm12, %v5202_v54, %v5210_v35  ;;  %v5230_v2 = vsel %vm4657_vm13, %v5202_v54, %v5210_v35  ;;  %v5582_v21 = vld [vmem:[%s9216_s17 + $0x38] sm:$0xff] }
 0x4c7   : > { %v5162_v12 = vrot.slane %v5160_v59, 7  ;;  %v5987_v3 = vrot.slane %v5235_v58, 9  ;;  %v5988_v18 = vrot.slane %v5237_v45, 9  ;;  %v5985_v25 = vrot.slane %v5228_v26, 9  ;;  %5440 = vmatpush.bf16.msra.mxu2 %v6104_v48  ;;  %5454 = vmatpush.bf16.msra.mxu3 %v6112_v38  ;;  %v5580_v58 = vld [vmem:[%s9217_s21 + $0x28] sm:$0xff] }
 0x4c9   : > { %v5267_v15 = vld.sshfl [vmem:[#allocation1] sm:$0xff pattern:$0x75643120]  ;;  %v5255_v19 = vsel %vm8680_vm3, %v5987_v3, %v5988_v18 }
 0x4ca   : > { %5271 = vst.msk [vmem:[#allocation7 + $0x8] sm:$0xf] %vm4638_vm9, %v5267_v15  ;;  %v6098_v15 = vld [vmem:[%s9215_s22] sm:$0xff] }
 0x4cb   : > { %5081 = vrot.lane.b32.xlu0 %v8796_v49, %s6299_s4  ;;  %v5151_v49 = vshrl.u32 %v5115_v40, 16  ;;  %5441 = vmatpush.bf16.msra.mxu2 %v6103_v4  ;;  %v5579_v3 = vld [vmem:[%s9217_s21 + $0x20] sm:$0xff] }
 0x4cc   : > { %5455 = vmatpush.bf16.msra.mxu3 %v6111_v1 }
 0x4cd   : > { %v4977_v5 = vld.sshfl [vmem:[#allocation1 + $0x10] sm:$0xff pattern:$0x75643120]  ;;  %v5153_v47 = vrot.slane %v5151_v49, 6 }
 0x4ce   : > { %5045 = vst [vmem:[#allocation1 + $0x10] ss:$2 sm:$0xff] %v5033_v14 }
 0x4cf   : > { %5048 = vst [vmem:[#allocation1 + $0x11] ss:$2 sm:$0xff] %v5037_v42  ;;  %v5157_v41 = vor.u32 %v5156_v32, %v5153_v47  ;;  %5442 = vmatpush.bf16.msra.mxu2 %v6102_v27  ;;  %v6109_v42 = vld [vmem:[%s9215_s22 + $0x58] sm:$0xff] }
 0x4d0   : > { %4981 = vst.msk [vmem:[#allocation7 + $0x10] sm:$0xf] %vm4638_vm9, %v4977_v5  ;;  %v6110_v5 = vld [vmem:[%s9215_s22 + $0x60] sm:$0xff] }
 0x4d1   : > { %v5158_v37 = vrot.slane %v5157_v41, 2  ;;  %5456 = vmatpush.bf16.msra.mxu3 %v6110_v5  ;;  %v5999_v32 = vld [vmem:[#allocation7 + $0x8] sm:$0xf] }
 0x4d3   : > { %v5163_v33 = vsel %vm8637_vm15, %v5158_v37, %v5162_v12  ;;  %5443 = vmatpush.bf16.msra.mxu2 %v6101_v62  ;;  %v5581_v12 = vld [vmem:[%s9217_s21 + $0x30] sm:$0xff]  ;;  %v5576_v62 = vld [vmem:[%s9217_s21 + $0x8] sm:$0xff]  ;;  %vm5584_vm15 = vcmask 523264  }
 0x4d5   : > { %5457 = vmatpush.bf16.msra.mxu3 %v6109_v42 }
 0x4d6   : > { %v5051_v9 = vld.sshfl [vmem:[#allocation1 + $0x10] sm:$0xff pattern:$0x75643120] }
 0x4d7   : > { %5055 = vrot.lane.b32.xlu2 %v5051_v9, %s6295_s15  ;;  %5073 = vst [vmem:[#allocation1 + $0x10] ss:$2 sm:$0xff] %v5064_v29  ;;  %5444 = vmatpush.bf16.msra.mxu2 %v6100_v16  ;;  %s9218_s15 = sld [smem:[#allocation49_spill]] }
 0x4d8   : > { %5076 = vst [vmem:[#allocation1 + $0x11] ss:$2 sm:$0xff] %v5065_v11 }
 0x4d9   : > { %5458 = vmatpush.bf16.msra.mxu3 %v6108_v39 }
 0x4db   : > { %5445 = vmatpush.bf16.msra.mxu2 %v6099_v55 }
 0x4dd   : > { %5459 = vmatpush.bf16.msra.mxu3 %v6107_v34  ;;  %v6184_v34 = vld [vmem:[%s9218_s15] ss:$0 sm:$0xff]  ;;  %s5640_s15 = scalar_lea.sflag [#allocation9], %s393_s3 }
 0x4df   : > { %5192 = vrot.lane.b32.xlu2 %v8809_v31, %s6296_s25  ;;  %v5079_v6 = vld.sshfl [vmem:[#allocation1 + $0x10] sm:$0xff pattern:$0x75643120]  ;;  %v5986_v31 = vrot.slane %v5230_v2, 9  ;;  %5446 = vmatpush.bf16.msra.mxu2 %v6098_v15 }
 0x4e0   : > { %5083 = vrot.lane.b32.xlu1 %v5079_v6, %s6299_s4  ;;  %5184 = vst [vmem:[#allocation1 + $0x10] ss:$2 sm:$0xff] %v5163_v33  ;;  %s9222_s4 = sld [smem:[#allocation18_spill]] }
 0x4e1   : > { %5187 = vst [vmem:[#allocation1 + $0x11] ss:$2 sm:$0xff] %v5176_v10  ;;  %v5251_v23 = vsel %vm8680_vm3, %v5985_v25, %v5986_v31  ;;  %5460 = vmatpush.bf16.msra.mxu3 %v6106_v56  ;;  %v5612_v56 = vld [vmem:[%s9219_s12 + $0x18] sm:$0xff] }
 0x4e3   : > { %5473 = vmatpush.bf16.msrb.mxu2 %v6115_v43 }
 0x4e5   : > { %5596 = vmatpush.msrb.mxu3 %v5582_v21 }
 0x4e6   : > { %s5648_s10 = scalar_lea.hbm %s9224_s8, %s9222_s4 }
 0x4e7   : > { %5474 = vmatpush.bf16.msrb.mxu2 %v6114_v51  ;;  %5597 = vmatpush.msrb.mxu3 %v5581_v12  ;;  %s5652_s13 = sshll.u32 %s5648_s10, 4  ;;  %s5653_s13 = int_to_ptr.hbm [resolvable:$true] %s5652_s13 }
 0x4e8   : > { %v5190_v30 = vld.sshfl [vmem:[#allocation1 + $0x10] sm:$0xff pattern:$0x75643120]  ;;  %s6232_s16 = sshra.s32 %s5653_s13, 4  ;;  %s6233_s16 = int_to_ptr.hbm [resolvable:$true] %s6232_s16 }
 0x4e9   : > { %5194 = vrot.lane.b32.xlu0 %v5190_v30, %s6296_s25  ;;  %5263 = vst [vmem:[#allocation1 + $0x10] ss:$2 sm:$0xff] %v5251_v23  ;;  %5598 = vmatpush.msrb.mxu3 %v5580_v58  ;;  %s6234_s29 = scalar_lea.hbm %s6233_s16, 1  ;;  %p6239_p3 = scmp.lt.s32.totalorder %s6233_s16, %s9224_s8 }
 0x4ea   : > { %5266 = vst [vmem:[#allocation1 + $0x11] ss:$2 sm:$0xff] %v5255_v19  ;;  %p6235_p0 = scmp.ne.s32.totalorder %s6233_s16, %s6234_s29  ;;  %p6240_p4 = scmp.lt.s32.totalorder %s6238_s27, %s6234_s29 }
 0x4eb   : > { %5599 = vmatpush.msrb.mxu3 %v5579_v3 }
 0x4ec   : > { %p6236_p1 = pnand %p6235_p0, %p6400_p5  ;;  %p6241_p7 = por %p6240_p4, %p6239_p3 }
 0x4ed   : > { %v4869_v24 = vpop.permute.xlu2 %4868  ;;  %5600 = vmatpush.msrb.mxu3 %v5578_v61 }
 0x4ee   : > { %p6237_p2 = pneg %p6236_p1 }
 0x4f0   : > { %p6242_p8 = pnand %p6241_p7, %p6237_p2 }
 0x4f1   : > { %v5268_v50 = vld.sshfl [vmem:[#allocation1 + $0x10] sm:$0xff pattern:$0x75643120] }
 0x4f2   : > { %5272 = vst.msk [vmem:[#allocation7 + $0x14] sm:$0xf] %vm4638_vm9, %v5268_v50  ;;  %v5577_v50 = vld [vmem:[%s9217_s21 + $0x10] sm:$0xff] }
 0x4f3   : > { %v4754_v63 = vpop.permute.xlu1 %4753  ;;  %5601 = vmatpush.msrb.mxu3 %v5577_v50 }
 0x4f4   : > { %4760 = vst.msk [vmem:[#allocation7] sm:$0xf] %vm4759_vm7, %v4754_v63 }
 0x4f5   : > { %5602 = vmatpush.msrb.mxu3 %v5576_v62 }
 0x4f7   : > { %5603 = vmatpush.msrb.mxu3 %v5575_v8 }
 0x4f9   : > { %v6097_v47 = vld [vmem:[#allocation7 + $0x10] sm:$0xf0] }
 0x4fa   : > { %v6000_v11 = vor.u32 %v6097_v47, %v5999_v32  ;;  %v5611_v47 = vld [vmem:[%s9219_s12 + $0x10] sm:$0xff] }
 0x4fc   : > { %v4841_v20 = vpop.permute.xlu0 %4840 }
 0x4fd   : > { %4847 = vst.msk [vmem:[#allocation7] sm:$0xf] %vm4846_vm0, %v4841_v20 }
 0x4fe   : > { %4875 = vst.msk [vmem:[#allocation7] sm:$0xf] %vm4874_vm8, %v4869_v24 }
 0x505   : > { %v5991_v49 = vld [vmem:[#allocation7] sm:$0xf] }
 0x50a   : > { %v4756_v7 = vpop.permute.xlu2 %4755 }
 0x50b   : > { %4761 = vst.msk [vmem:[#allocation7 + $0xc] sm:$0xf] %vm4759_vm7, %v4756_v7 }
 0x52b   : > { %v4843_v57 = vpop.permute.xlu1 %4842 }
 0x52c   : > { %4848 = vst.msk [vmem:[#allocation7 + $0xc] sm:$0xf] %vm4846_vm0, %v4843_v57 }
 0x531   : > { %v5056_v14 = vpop.permute.xlu2 %5055 }
 0x532   : > { %5060 = vst.msk [vmem:[#allocation7 + $0x10] sm:$0xf] %vm4759_vm7, %v5056_v14 }
 0x533   : > { %v5054_v40 = vpop.permute.xlu1 %5053 }
 0x534   : > { %5059 = vst.msk [vmem:[#allocation7 + $0x4] sm:$0xf] %vm4759_vm7, %v5054_v40 }
 0x535   : > { %v4871_v60 = vpop.permute.xlu0 %4870 }
 0x536   : > { %4876 = vst.msk [vmem:[#allocation7 + $0xc] sm:$0xf] %vm4874_vm8, %v4871_v60 }
 0x539   : > { %v5193_v13 = vpop.permute.xlu2 %5192 }
 0x53d   : > { %v5082_v36 = vpop.permute.xlu0 %5081  ;;  %v6096_v22 = vld [vmem:[#allocation7 + $0x8] sm:$0xf0] }
 0x53e   : > { %5087 = vst.msk [vmem:[#allocation7 + $0x4] sm:$0xf] %vm4846_vm0, %v5082_v36  ;;  %v5992_v28 = vor.u32 %v6096_v22, %v5991_v49 }
 0x53f   : > { %5198 = vst.msk [vmem:[#allocation7 + $0x4] sm:$0xf] %vm4874_vm8, %v5193_v13 }
 0x540   : > { %5447 = vmatmul.bf16.vlgmr.msra.gmra.mxu2 %v5992_v28 }
 0x546   : > { %v6095_v29 = vld [vmem:[#allocation7 + $0x4] sm:$0xf] }
 0x550   : > { %6073 = vmatmul.msk.bf16.vlgmr.msrb.gmra.mxu2 %vm4284_vm10, %v6000_v11 }
 0x552   : > { %v5084_v52 = vpop.permute.xlu1 %5083 }
 0x553   : > { %5088 = vst.msk [vmem:[#allocation7 + $0x10] sm:$0xf] %vm4846_vm0, %v5084_v52 }
 0x55b   : > { %v5195_v9 = vpop.permute.xlu0 %5194 }
 0x55c   : > { %5199 = vst.msk [vmem:[#allocation7 + $0x10] sm:$0xf] %vm4874_vm8, %v5195_v9  ;;  %v6301_v9 = vmov 4.0  }
 0x55d   : > { %6187 = vrcp.f32 %v6301_v9 }
 0x563   : > { %v5993_v17 = vld [vmem:[#allocation7 + $0xc] sm:$0xf0] }
 0x564   : > { %v5996_v46 = vor.u32 %v6095_v29, %v5993_v17 }
 0x566   : > { %5461 = vmatmul.bf16.vlgmr.msra.gmra.mxu3 %v5996_v46 }
 0x567   : > { %5629 = vmatpush.msra.mxu3 %v5612_v56 }
 0x569   : > { %5630 = vmatpush.msra.mxu3 %v5611_v47 }
 0x5c3   : > { %v5448_v41 = vpop.f32.mrf.mxu2 }
 0x5cb   : > { %v5450_v59 = vpop.f32.mrf.mxu2 }
 0x5d3   : > { %v5476_v44 = vpop.f32.mrf.mxu2 }
 0x5db   : > { %v5478_v26 = vpop.f32.mrf.mxu2 }
 0x5e9   : > { %v5462_v53 = vpop.f32.mrf.mxu3 }
 0x5ea   : > { %v5463_v0 = vadd.f32 %v5462_v53, %v5448_v41 }
 0x5ec   : > { %v5477_v54 = vadd.f32 %v5476_v44, %v5463_v0  ;;  %v6188_v0 = vpop.eup %6187 }
 0x5ee   : > { %v5483_v37 = vrot.slane %v5477_v54, 4  ;;  %v5488_v35 = vsel %vm5487_vm5, %v5477_v54, -inf }
 0x5f0   : > { %v5489_v10 = vsel %vm5487_vm5, %v5483_v37, -inf }
 0x5f1   : > { %v5490_v6 = vmax.f32 %v5488_v35, %v5489_v10  ;;  %v5464_v33 = vpop.f32.mrf.mxu3 }
 0x5f2   : > { %v5465_v45 = vadd.f32 %v5464_v33, %v5450_v59 }
 0x5f3   : > { %v5496_v2 = vrot.slane %v5490_v6, 2 }
 0x5f4   : > { %v5479_v18 = vadd.f32 %v5478_v26, %v5465_v45 }
 0x5f5   : > { %v5498_v25 = vsel %vm4653_vm12, %v5490_v6, %v5496_v2  ;;  %v5499_v31 = vsel %vm4657_vm13, %v5490_v6, %v5496_v2  ;;  %v5568_v6 = vmul.f32 4.0, %v6188_v0 }
 0x5f6   : > { %v5500_v19 = vrot.slane %v5499_v31, 2  ;;  %v5509_v30 = vsel %vm5508_vm14, %v5498_v25, -inf  ;;  %v5484_v23 = vrot.slane %v5479_v18, 4  ;;  %v5491_v24 = vsel %vm5487_vm5, %v5479_v18, -inf }
 0x5f7   : > { %v5510_v48 = vrot.slane %v5509_v30, 4  ;;  %v5569_v3 = vsub.f32 1.0, %v5568_v6 }
 0x5f8   : > { %v5516_v63 = vsel %vm5508_vm14, %v5500_v19, -inf  ;;  %v5492_v20 = vsel %vm5487_vm5, %v5484_v23, -inf }
 0x5f9   : > { %v5511_v7 = vmax.f32 %v5509_v30, %v5510_v48  ;;  %v5517_v4 = vrot.slane %v5516_v63, 4  ;;  %v5493_v27 = vmax.f32 %v5491_v24, %v5492_v20  ;;  %v5570_v61 = vmul.f32 %v6188_v0, %v5569_v3 }
 0x5fb   : > { %v5512_v16 = vrot.slane %v5511_v7, 2  ;;  %v5518_v55 = vmax.f32 %v5516_v63, %v5517_v4  ;;  %v5497_v15 = vrot.slane %v5493_v27, 2  ;;  %v5571_v23 = vadd.f32 %v6188_v0, %v5570_v61  ;;  %v5609_v4 = vld [vmem:[%s9219_s12] sm:$0xff] }
 0x5fd   : > { %v5519_v43 = vrot.slane %v5518_v55, 2  ;;  %v5501_v38 = vsel %vm4653_vm12, %v5493_v27, %v5497_v15  ;;  %v5502_v51 = vsel %vm4657_vm13, %v5493_v27, %v5497_v15  ;;  %v5513_v1 = vmax.f32 %v5511_v7, %v5512_v16  ;;  %v5610_v7 = vld [vmem:[%s9219_s12 + $0x8] sm:$0xff]  ;;  %v5583_v27 = vld [vmem:[%s9223_s2] sm:$0x1] }
 0x5fe   : > { %v5503_v57 = vrot.slane %v5502_v51, 2  ;;  %v5523_v40 = vsel %vm5508_vm14, %v5501_v38, -inf  ;;  %vm9220_vm12 = vcmask 1041409   ;;  %vm5572_vm13 = vweird.f32 %v6188_v0  ;;  %5631 = vmatpush.msra.mxu3 %v5610_v7  ;;  %v5613_v15 = vld [vmem:[%s9225_s19] sm:$0x1] }
 0x5ff   : > { %v5520_v5 = vmax.f32 %v5518_v55, %v5519_v43  ;;  %v5524_v14 = vrot.slane %v5523_v40, 4  ;;  %v5514_v49 = vrot.slane %v5513_v1, 1  ;;  %v5573_v63 = vsel %vm5572_vm13, %v6188_v0, %v5571_v23 }
 0x600   : > { %v5530_v42 = vsel %vm5508_vm14, %v5503_v57, -inf  ;;  %5632 = vmatpush.msra.mxu3 %v5609_v4 }
 0x601   : > { %v5521_v60 = vrot.slane %v5520_v5, 1  ;;  %v5525_v39 = vmax.f32 %v5523_v40, %v5524_v14  ;;  %v5531_v36 = vrot.slane %v5530_v42, 4  ;;  %v5515_v29 = vmax.f32 %v5513_v1, %v5514_v49 }
 0x603   : > { %v5522_v22 = vmax.f32 %v5520_v5, %v5521_v60  ;;  %v5526_v13 = vrot.slane %v5525_v39, 2  ;;  %v5532_v28 = vmax.f32 %v5530_v42, %v5531_v36  ;;  %v5541_v53 = vadd.f32 %v6184_v34, %v5515_v29 }
 0x605   : > { %v5542_v32 = vadd.f32 %v6184_v34, %v5522_v22  ;;  %v5527_v11 = vmax.f32 %v5525_v39, %v5526_v13  ;;  %v5533_v52 = vrot.slane %v5532_v28, 2  ;;  %v5545_v10 = vmax.f32 %v5541_v53, 0.0 }
 0x607   : > { %v5528_v17 = vrot.slane %v5527_v11, 1  ;;  %v5534_v46 = vmax.f32 %v5532_v28, %v5533_v52  ;;  %v5546_v41 = vmax.f32 %v5542_v32, 0.0 }
 0x609   : > { %v5529_v59 = vmax.f32 %v5527_v11, %v5528_v17  ;;  %v5535_v44 = vrot.slane %v5534_v46, 1  ;;  %v5553_v21 = vrot.slane %v5546_v41, 7 }
 0x60b   : > { %v5536_v54 = vmax.f32 %v5534_v46, %v5535_v44  ;;  %v5543_v37 = vadd.f32 %v6184_v34, %v5529_v59  ;;  %v5554_v45 = vsel %vm9220_vm12, %v5553_v21, %v5545_v10 }
 0x60d   : > { %v5544_v12 = vadd.f32 %v6184_v34, %v5536_v54  ;;  %v5547_v35 = vmax.f32 %v5543_v37, 0.0 }
 0x60f   : > { %v5548_v33 = vmax.f32 %v5544_v12, 0.0  ;;  %v5555_v58 = vrot.slane %v5547_v35, 6 }
 0x611   : > { %v5556_v26 = vsel %vm511_vm4, %v5555_v58, %v5554_v45  ;;  %v5557_v2 = vrot.slane %v5548_v33, 5  ;;  %vm5637_vm4 = vcmask 32768  }
 0x613   : > { %v5558_v18 = vsel %vm514_vm6, %v5557_v2, %v5556_v26 }
 0x614   : > { %v5560_v25 = vsel %vm5487_vm5, %v5558_v18, 0.0 }
 0x615   : > { %v5561_v31 = vrot.slane %v5560_v25, 4 }
 0x617   : > { %v5562_v19 = vadd.f32 %v5561_v31, %v5560_v25 }
 0x619   : > { %v5563_v30 = vrot.slane %v5562_v19, 2 }
 0x61b   : > { %v5564_v48 = vadd.f32 %v5563_v30, %v5562_v19 }
 0x61d   : > { %v5565_v50 = vrot.slane %v5564_v48, 1 }
 0x61f   : > { %v5566_v24 = vadd.f32 %v5565_v50, %v5564_v48 }
 0x621   : > { %v5574_v20 = vmul.f32 %v5573_v63, %v5566_v24 }
 0x623   : > { %6074 = vmatmul.msk.f32.vlgmr.msrb.gmra.mxu3 %vm5584_vm15, %v5574_v20 }
 0x6a6   : > { %v5605_v62 = vpop.f32.mrf.mxu3 }
 0x6a7   : > { %v5606_v16 = vadd.f32 %v5605_v62, %v5583_v27 }
 0x6a9   : > { %v5608_v55 = vmax.f32 %v5606_v16, 0.0 }
 0x6ab   : > { %6075 = vmatmul.msk.f32.vlgmr.msra.gmra.mxu3 %vm4284_vm10, %v5608_v55 }
 0x72e   : > { %v5634_v8 = vpop.f32.mrf.mxu3 }
 0x72f   : > { %v5635_v43 = vadd.f32 %v5634_v8, %v5613_v15 }
 0x731   : > { %5638 = vst.msk [vmem:[%s394_s23] sm:$0x1] %vm5637_vm4, %v5635_v43 }
 0x732   : > { %6245 = shalt.err (!%p6242_p8)
}
 0x733   : > { %6121 = dma.vmem_to_hbm [thread:$0]  (%p6400_p5), %s5651_s28, 16, %s5653_s13, %s5640_s15  }
 0x734 PF: > { %s9227_s6 = sld [smem:[#allocation17_spill]] }
 0x735   : > { %s9228_s17 = sld [smem:[#allocation14_spill]] }
 0x73a   : > { %p6133_p9 = scmp.ge.s32.totalorder %s9227_s6, 2 }
 0x73b   : > { %s5664_s14 = sand.u32 1, %s9228_s17  }
 0x73c   : > { %p6128_p10 = pnand %p6133_p9, %p6404_p6  ;;  %s5665_s1 = scalar_lea.sflag [#allocation9], %s5664_s14 }
 0x73e   : > { %p6129_p11 = pneg %p6128_p10 }
 0x740   : > { %6267 = dma.done.wait (%p6129_p11), %s5665_s1, 16  }
 0x741   : > { %6269 = vsyncadd (%p6129_p11), %s5665_s1, 4294967280  ;;  %s9230_s20 = sld [smem:[#allocation19_spill]] }
 0x742   : > { %s9231_s17 = sld [smem:[#allocation15_spill]] }
 0x743   : > { %s9232_s18 = sld [smem:[#allocation16_spill]] }
 0x744   : > { %s9233_s19 = sld [smem:[#allocation20_spill]] }
 0x747   : > { %p22_p12 = scmp.ge.s32.totalorder %s9230_s20, 4  }
 0x749   :  { %24 = sbr.rel (!%p22_p12) target bundleno = 17 (0x11), region = 142 }
 0x74e   :  { %5670 = vsyncpa [#allocation9], 1 }
 0x74f   :  { %5672 = vsyncpa [#allocation9 + $0x1], 1 }
 0x750   :  { %5673 = vsyncpa [#allocation10], 1 }
 0x751   :  { %5675 = vsyncpa [#allocation10 + $0x1], 1 }

</bundles_post_ra>
